<compile_context>
chip_gen: v7x
topology: tpu7x:2x2x1
jax: 0.10.0
libtpu: 0.0.40
codegen_flags: <defaults>
</compile_context>

<pallas_src>
import jax
import jax.numpy as jnp
from jax.experimental import pallas as pl
from jax.experimental.pallas import tpu as pltpu

IN_FEATURES = 145 * 260 * 3   # 113100
H1 = 100
H2 = 25
OUT = 1

TK = 14336                          # K tile (112 * 128)
N_K = pl.cdiv(IN_FEATURES, TK)      # 8
NUM_SPLITS = 2                      # K-splits (one per TensorCore on v7x)
assert N_K % NUM_SPLITS == 0
N_PER_SPLIT = N_K // NUM_SPLITS     # 4
K_PAD = N_K * TK                    # 114688


def prepare_w1(w1):
    """Zero-pad W1 along K once at init/load time (NOT in the jitted forward)."""
    return jnp.pad(w1.astype(jnp.float32), ((0, K_PAD - IN_FEATURES), (0, 0)))


def _fc1_partial_kernel(x_ref, w1_ref, part_ref, acc_ref):
    p = pl.program_id(0)          # K-split index (parallel across TCs on v7x)
    j = pl.program_id(1)          # K-tile within the split (reduction axis)

    @pl.when(j == 0)
    def _():
        acc_ref[...] = jnp.zeros_like(acc_ref)

    # Mask the ragged tail of K: the last x block extends past IN_FEATURES and
    # its out-of-bounds contents are unspecified.  W1 is zero-padded there,
    # but 0 * NaN would still poison the accumulator, so zero invalid x
    # columns.  This is cheap VPU work fully hidden under the W1 DMA.
    k_start = (p * N_PER_SPLIT + j) * TK
    col = jax.lax.broadcasted_iota(jnp.int32, x_ref.shape, 1)
    x_tile = jnp.where(col < IN_FEATURES - k_start, x_ref[...], 0.0)

    acc_ref[...] += jnp.dot(x_tile, w1_ref[...],
                            preferred_element_type=jnp.float32)

    @pl.when(j == N_PER_SPLIT - 1)
    def _():
        part_ref[0] = acc_ref[...]


def _epilogue_kernel(part_ref, b1_ref, w2_ref, b2_ref, w3_ref, b3_ref, out_ref):
    # Sum the per-split partial fc1 pre-activations, then run the tiny MLP tail.
    h1 = part_ref[0]
    for s in range(1, NUM_SPLITS):
        h1 = h1 + part_ref[s]
    h1 = jnp.maximum(h1 + b1_ref[...], 0.0)                            # ReLU(fc1)
    h2 = jnp.dot(h1, w2_ref[...], preferred_element_type=jnp.float32)
    h2 = jnp.maximum(h2 + b2_ref[...], 0.0)                            # ReLU(fc2)
    h3 = jnp.dot(h2, w3_ref[...], preferred_element_type=jnp.float32)
    out_ref[...] = jax.nn.sigmoid(h3 + b3_ref[...])                    # sigmoid(fc3)


@jax.jit
def baseline_forward(x, w1_padded, b1, w2, b2, w3, b3):
    """x: (B, 3, 145, 260); w1_padded: prepare_w1(w1) of shape (K_PAD, 100)."""
    B = x.shape[0]
    xf = x.reshape(B, -1).astype(jnp.float32)   # (B, 113100), torch .view order

    # Stage 1: partial fc1 reductions, streaming W1 from HBM (the hot path).
    partials = pl.pallas_call(
        _fc1_partial_kernel,
        out_shape=jax.ShapeDtypeStruct((NUM_SPLITS, B, H1), jnp.float32),
        grid_spec=pltpu.PrefetchScalarGridSpec(
            num_scalar_prefetch=0,
            grid=(NUM_SPLITS, N_PER_SPLIT),
            in_specs=[
                pl.BlockSpec((B, TK), lambda p, j: (0, p * N_PER_SPLIT + j)),
                pl.BlockSpec((TK, H1), lambda p, j: (p * N_PER_SPLIT + j, 0)),
            ],
            out_specs=pl.BlockSpec((1, B, H1), lambda p, j: (p, 0, 0)),
            scratch_shapes=[pltpu.VMEM((B, H1), jnp.float32)],   # fc1 accumulator
        ),
        compiler_params=pltpu.CompilerParams(
            dimension_semantics=("parallel", "arbitrary"),
            vmem_limit_bytes=32 * 1024 * 1024,
        ),
        cost_estimate=pl.CostEstimate(
            flops=2 * B * IN_FEATURES * H1,
            transcendentals=0,
            bytes_accessed=K_PAD * H1 * 4 + B * IN_FEATURES * 4
                           + NUM_SPLITS * B * H1 * 4,
        ),
    )(xf, w1_padded)

    # Stage 2: tiny fused epilogue (runs once; everything resident in VMEM).
    out = pl.pallas_call(
        _epilogue_kernel,
        out_shape=jax.ShapeDtypeStruct((B, OUT), jnp.float32),
    )(partials, b1.reshape(1, H1), w2, b2.reshape(1, H2), w3, b3.reshape(1, OUT))

    return jnp.squeeze(out)   # matches torch .squeeze(): (B,) for B > 1


def _init_params(key):
    """Deterministic init mimicking nn.Linear default (uniform +/- 1/sqrt(fan_in))."""
    ks = jax.random.split(key, 6)

    def lin(kw, kb, fan_in, fan_out):
        bound = 1.0 / (fan_in ** 0.5)
        w = jax.random.uniform(kw, (fan_in, fan_out), jnp.float32, -bound, bound)
        b = jax.random.uniform(kb, (fan_out,), jnp.float32, -bound, bound)
        return w, b

    w1, b1 = lin(ks[0], ks[1], IN_FEATURES, H1)
    w2, b2 = lin(ks[2], ks[3], H1, H2)
    w3, b3 = lin(ks[4], ks[5], H2, OUT)
    return w1, b1, w2, b2, w3, b3


def _reference(x, w1, b1, w2, b2, w3, b3):
    B = x.shape[0]
    xf = x.reshape(B, -1).astype(jnp.float32)
    h1 = jnp.maximum(xf @ w1 + b1, 0.0)
    h2 = jnp.maximum(h1 @ w2 + b2, 0.0)
    return jnp.squeeze(jax.nn.sigmoid(h2 @ w3 + b3))


if __name__ == "__main__":
    key = jax.random.PRNGKey(0)
    k_in, k_param = jax.random.split(key)

    # small batch; feature dims are fixed by the module (145*260*3)
    x = jax.random.normal(k_in, (2, 3, 145, 260), dtype=jnp.float32)
    w1, b1, w2, b2, w3, b3 = _init_params(k_param)

    # One-time weight layout prep (outside the per-call hot path).
    w1_padded = jax.block_until_ready(prepare_w1(w1))

    out = baseline_forward(x, w1_padded, b1, w2, b2, w3, b3)
    out = jax.block_until_ready(out)

    ref = _reference(x, w1, b1, w2, b2, w3, b3)
    assert out.shape == ref.shape == (2,)
    assert jnp.allclose(out, ref, atol=1e-4, rtol=1e-4), (out, ref)

    print("KERNEL_OK")
</pallas_src>

<mosaic_0001>
module attributes {stable_mosaic.version = 11 : i64} {
  func.func @_fc1_partial_kernel(%arg0: i32, %arg1: i32, %arg2: memref<2x14336xf32, #tpu.memory_space<vmem>>, %arg3: memref<14336x100xf32, #tpu.memory_space<vmem>>, %arg4: memref<1x2x100xf32, #tpu.memory_space<vmem>>, %arg5: memref<2x100xf32, #tpu.memory_space<vmem>>) attributes {dimension_semantics = [#tpu.dimension_semantics<parallel>, #tpu.dimension_semantics<arbitrary>], iteration_bounds = array<i64: 2, 4>, scalar_prefetch = 0 : i64, scratch_operands = 1 : i64, tpu.core_type = #tpu.core_type<tc>, window_params = [{transform_indices = @transform_0, window_bounds = array<i64: 2, 14336>}, {transform_indices = @transform_1, window_bounds = array<i64: 14336, 100>}, {transform_indices = @transform_2, window_bounds = array<i64: 1, 2, 100>}]} {
    %c0_i32 = arith.constant 0 : i32
    %0 = arith.cmpi eq, %arg1, %c0_i32 : i32
    %1 = arith.extui %0 : i1 to i32
    %c0_i32_0 = arith.constant 0 : i32
    %2 = arith.cmpi ne, %1, %c0_i32_0 : i32
    scf.if %2 {
      %cst_10 = arith.constant 0.000000e+00 : f32
      %21 = vector.broadcast %cst_10 : f32 to vector<2x100xf32>
      %c0_11 = arith.constant 0 : index
      %c0_12 = arith.constant 0 : index
      %22 = vector.load %arg5[%c0_11, %c0_12] : memref<2x100xf32, #tpu.memory_space<vmem>>, vector<2x100xf32>
      tpu.vector_store %arg5[%c0_11, %c0_12], %21 {strides = array<i32>} : memref<2x100xf32, #tpu.memory_space<vmem>>, vector<2x100xf32>,
    } else {
    }
    %c4_i32 = arith.constant 4 : i32
    %3 = arith.muli %arg0, %c4_i32 : i32
    %4 = arith.addi %3, %arg1 : i32
    %c14336_i32 = arith.constant 14336 : i32
    %5 = arith.muli %4, %c14336_i32 : i32
    %6 = tpu.iota {dimensions = array<i32: 1>} : vector<2x14336xi32>
    %c113100_i32 = arith.constant 113100 : i32
    %7 = arith.subi %c113100_i32, %5 : i32
    %8 = vector.broadcast %7 : i32 to vector<2x14336xi32>
    %9 = arith.cmpi slt, %6, %8 : vector<2x14336xi32>
    %c0 = arith.constant 0 : index
    %c0_1 = arith.constant 0 : index
    %10 = vector.load %arg2[%c0, %c0_1] : memref<2x14336xf32, #tpu.memory_space<vmem>>, vector<2x14336xf32>
    %cst = arith.constant 0.000000e+00 : f32
    %11 = vector.broadcast %cst : f32 to vector<2x14336xf32>
    %12 = arith.select %9, %10, %11 : vector<2x14336xi1>, vector<2x14336xf32>
    %c0_2 = arith.constant 0 : index
    %c0_3 = arith.constant 0 : index
    %13 = vector.load %arg5[%c0_2, %c0_3] : memref<2x100xf32, #tpu.memory_space<vmem>>, vector<2x100xf32>
    %c0_4 = arith.constant 0 : index
    %c0_5 = arith.constant 0 : index
    %14 = vector.load %arg3[%c0_4, %c0_5] : memref<14336x100xf32, #tpu.memory_space<vmem>>, vector<14336x100xf32>
    %cst_6 = arith.constant dense<0.000000e+00> : vector<2x100xf32>
    %15 = tpu.matmul %12, %14, %cst_6 {dimension_numbers = #tpu.dot_dimension_numbers<[1], [0], [0], [1], [0, 0, 1, 1], [], []>} : vector<2x14336xf32>, vector<14336x100xf32>, vector<2x100xf32> -> vector<2x100xf32>
    %16 = arith.addf %13, %15 : vector<2x100xf32>
    %c0_7 = arith.constant 0 : index
    %c0_8 = arith.constant 0 : index
    %17 = vector.load %arg5[%c0_7, %c0_8] : memref<2x100xf32, #tpu.memory_space<vmem>>, vector<2x100xf32>
    tpu.vector_store %arg5[%c0_7, %c0_8], %16 {strides = array<i32>} : memref<2x100xf32, #tpu.memory_space<vmem>>, vector<2x100xf32>,
    %c3_i32 = arith.constant 3 : i32
    %18 = arith.cmpi eq, %arg1, %c3_i32 : i32
    %19 = arith.extui %18 : i1 to i32
    %c0_i32_9 = arith.constant 0 : i32
    %20 = arith.cmpi ne, %19, %c0_i32_9 : i32
    scf.if %20 {
      %c0_10 = arith.constant 0 : index
      %c0_11 = arith.constant 0 : index
      %21 = vector.load %arg5[%c0_10, %c0_11] : memref<2x100xf32, #tpu.memory_space<vmem>>, vector<2x100xf32>
      %c0_12 = arith.constant 0 : index
      %c0_13 = arith.constant 0 : index
      %c0_14 = arith.constant 0 : index
      %22 = vector.load %arg4[%c0_12, %c0_13, %c0_14] : memref<1x2x100xf32, #tpu.memory_space<vmem>>, vector<1x2x100xf32>
      %23 = vector.shape_cast %22 : vector<1x2x100xf32> to vector<2x100xf32>
      %24 = vector.shape_cast %21 : vector<2x100xf32> to vector<1x2x100xf32>
      tpu.vector_store %arg4[%c0_12, %c0_13, %c0_14], %24 {strides = array<i32>} : memref<1x2x100xf32, #tpu.memory_space<vmem>>, vector<1x2x100xf32>,
    } else {
    }
    return
  }
  func.func @transform_0(%arg0: i32, %arg1: i32) -> (i32, i32) {
    %c4_i32 = arith.constant 4 : i32
    %0 = arith.muli %arg0, %c4_i32 : i32
    %1 = arith.addi %0, %arg1 : i32
    %c0_i32 = arith.constant 0 : i32
    %c0_i32_0 = arith.constant 0 : i32
    return %c0_i32, %1 : i32, i32
  }
  func.func @transform_1(%arg0: i32, %arg1: i32) -> (i32, i32) {
    %c4_i32 = arith.constant 4 : i32
    %0 = arith.muli %arg0, %c4_i32 : i32
    %1 = arith.addi %0, %arg1 : i32
    %c0_i32 = arith.constant 0 : i32
    %c0_i32_0 = arith.constant 0 : i32
    return %1, %c0_i32 : i32, i32
  }
  func.func @transform_2(%arg0: i32, %arg1: i32) -> (i32, i32, i32) {
    %c0_i32 = arith.constant 0 : i32
    %c0_i32_0 = arith.constant 0 : i32
    %c0_i32_1 = arith.constant 0 : i32
    return %arg0, %c0_i32, %c0_i32_0 : i32, i32, i32
  }
}

module attributes {stable_mosaic.version = 11 : i64} {
  func.func @_epilogue_kernel(%arg0: memref<2x2x100xf32, #tpu.memory_space<vmem>>, %arg1: memref<1x100xf32, #tpu.memory_space<vmem>>, %arg2: memref<100x25xf32, #tpu.memory_space<vmem>>, %arg3: memref<1x25xf32, #tpu.memory_space<vmem>>, %arg4: memref<25x1xf32, #tpu.memory_space<vmem>>, %arg5: memref<1x1xf32, #tpu.memory_space<vmem>>, %arg6: memref<2x1xf32, #tpu.memory_space<vmem>>) attributes {dimension_semantics = [], scalar_prefetch = 0 : i64, scratch_operands = 0 : i64, tpu.core_type = #tpu.core_type<tc>} {
    %c0 = arith.constant 0 : index
    %c0_0 = arith.constant 0 : index
    %c0_1 = arith.constant 0 : index
    %0 = vector.load %arg0[%c0, %c0_0, %c0_1] : memref<2x2x100xf32, #tpu.memory_space<vmem>>, vector<1x2x100xf32>
    %1 = vector.shape_cast %0 : vector<1x2x100xf32> to vector<2x100xf32>
    %c1 = arith.constant 1 : index
    %c0_2 = arith.constant 0 : index
    %c0_3 = arith.constant 0 : index
    %2 = vector.load %arg0[%c1, %c0_2, %c0_3] : memref<2x2x100xf32, #tpu.memory_space<vmem>>, vector<1x2x100xf32>
    %3 = vector.shape_cast %2 : vector<1x2x100xf32> to vector<2x100xf32>
    %4 = arith.addf %1, %3 : vector<2x100xf32>
    %c0_4 = arith.constant 0 : index
    %c0_5 = arith.constant 0 : index
    %5 = vector.load %arg1[%c0_4, %c0_5] : memref<1x100xf32, #tpu.memory_space<vmem>>, vector<1x100xf32>
    %6 = vector.broadcast %5 : vector<1x100xf32> to vector<2x100xf32>
    %7 = arith.addf %4, %6 : vector<2x100xf32>
    %cst = arith.constant 0.000000e+00 : f32
    %8 = vector.broadcast %cst : f32 to vector<2x100xf32>
    %9 = arith.maximumf %7, %8 : vector<2x100xf32>
    %c0_6 = arith.constant 0 : index
    %c0_7 = arith.constant 0 : index
    %10 = vector.load %arg2[%c0_6, %c0_7] : memref<100x25xf32, #tpu.memory_space<vmem>>, vector<100x25xf32>
    %cst_8 = arith.constant dense<0.000000e+00> : vector<2x25xf32>
    %11 = tpu.matmul %9, %10, %cst_8 {dimension_numbers = #tpu.dot_dimension_numbers<[1], [0], [0], [1], [0, 0, 1, 1], [], []>} : vector<2x100xf32>, vector<100x25xf32>, vector<2x25xf32> -> vector<2x25xf32>
    %c0_9 = arith.constant 0 : index
    %c0_10 = arith.constant 0 : index
    %12 = vector.load %arg3[%c0_9, %c0_10] : memref<1x25xf32, #tpu.memory_space<vmem>>, vector<1x25xf32>
    %13 = vector.broadcast %12 : vector<1x25xf32> to vector<2x25xf32>
    %14 = arith.addf %11, %13 : vector<2x25xf32>
    %cst_11 = arith.constant 0.000000e+00 : f32
    %15 = vector.broadcast %cst_11 : f32 to vector<2x25xf32>
    %16 = arith.maximumf %14, %15 : vector<2x25xf32>
    %c0_12 = arith.constant 0 : index
    %c0_13 = arith.constant 0 : index
    %17 = vector.load %arg4[%c0_12, %c0_13] : memref<25x1xf32, #tpu.memory_space<vmem>>, vector<25x1xf32>
    %cst_14 = arith.constant dense<0.000000e+00> : vector<2x1xf32>
    %18 = tpu.matmul %16, %17, %cst_14 {dimension_numbers = #tpu.dot_dimension_numbers<[1], [0], [0], [1], [0, 0, 1, 1], [], []>} : vector<2x25xf32>, vector<25x1xf32>, vector<2x1xf32> -> vector<2x1xf32>
    %c0_15 = arith.constant 0 : index
    %c0_16 = arith.constant 0 : index
    %19 = vector.load %arg5[%c0_15, %c0_16] : memref<1x1xf32, #tpu.memory_space<vmem>>, vector<1x1xf32>
    %20 = vector.broadcast %19 : vector<1x1xf32> to vector<2x1xf32>
    %21 = arith.addf %18, %20 : vector<2x1xf32>
    %22 = arith.negf %21 : vector<2x1xf32>
    %23 = math.exp %22 : vector<2x1xf32>
    %cst_17 = arith.constant 1.000000e+00 : f32
    %24 = vector.broadcast %cst_17 : f32 to vector<2x1xf32>
    %25 = arith.addf %24, %23 : vector<2x1xf32>
    %26 = arith.divf %24, %25 : vector<2x1xf32>
    %c0_18 = arith.constant 0 : index
    %c0_19 = arith.constant 0 : index
    %27 = vector.load %arg6[%c0_18, %c0_19] : memref<2x1xf32, #tpu.memory_space<vmem>>, vector<2x1xf32>
    tpu.vector_store %arg6[%c0_18, %c0_19], %26 {strides = array<i32>} : memref<2x1xf32, #tpu.memory_space<vmem>>, vector<2x1xf32>,
    return
  }
}

</mosaic_0001>

<bundles_post_ra>
// kernel: baseline_forward.3
= control target key start
LH: loop header
LB: loop body
LE: loop exit
PB: predicated region body
PF: predicated region fallthrough
CT: control target
= control target key end

     0   :  { %v339_v0 = vmov 0.0|0.0   ;;  %vm340_vm0 = vmmov 0   ;;  %v341_v4 = vmov 0.0   ;;  %vm62_vm1 = vcmask 1043456   ;;  %s447_s2 = inlined_call_operand.vmem [shape: f32[100,25], index: 2, kind: input, shape index: {}]   ;;  %s448_s4 = inlined_call_operand.vmem [shape: f32[25,1], index: 4, kind: input, shape index: {}]   ;;  %s449_s0 = inlined_call_operand.vmem [shape: f32[2,2,100], index: 0, kind: input, shape index: {}]   ;;  %s450_s1 = inlined_call_operand.vmem [shape: f32[1,100], index: 1, kind: input, shape index: {}]   ;;  %s451_s5 = inlined_call_operand.<no memory space> [shape: f32[1,1], index: 5, kind: input, shape index: {}]   ;;  %s452_s3 = inlined_call_operand.vmem [shape: f32[1,25], index: 3, kind: input, shape index: {}]   ;;  %s453_s6 = inlined_call_operand.vmem [shape: f32[2,1], index: 6, kind: output, shape index: {}]  }
   0x1   :  { %306 = vmatprep.subr.bf16.mxu0 %v339_v0  ;;  %v38_v1 = vld [vmem:[%s447_s2] sm:$0xff]  ;;  %v39_v2 = vld [vmem:[%s447_s2 + $0x8] sm:$0xff]  ;;  %v40_v3 = vld [vmem:[%s447_s2 + $0x10] sm:$0xff]  ;;  %292 = vmatprep.mubr.msk.f32.mxu0 %vm340_vm0, %v341_v4  ;;  %vm58_vm2 = vcmask 818176   ;;  %vm152_vm3 = vcmask 1040384   ;;  %vm342_vm4 = vmmov 1   ;;  %v11_v33 = vstv %s451_s5 }
   0x2   :  { %v307_v5 = vpack.c.bf16 %v39_v2, %v38_v1  ;;  %v41_v6 = vld [vmem:[%s447_s2 + $0x18] sm:$0xff]  ;;  %324 = vmatprep.subr.bf16.mxu1 %v339_v0  ;;  %303 = vmatprep.mubr.msk.f32.mxu1 %vm340_vm0, %v341_v4  ;;  %v42_v8 = vld [vmem:[%s447_s2 + $0x20] sm:$0xff]  ;;  %v43_v9 = vld [vmem:[%s447_s2 + $0x28] sm:$0xff]  ;;  %12 = vst [vmem:[#allocation2] sm:$0x1] %v11_v33  ;;  %vm148_vm6 = vcmask 203776  }
   0x3   :  { %v310_v7 = vpack.c.bf16 %v41_v6, %v40_v3  ;;  %v137_v10 = vld [vmem:[%s448_s4] sm:$0xff]  ;;  %v138_v11 = vld [vmem:[%s448_s4 + $0x8] sm:$0xff]  ;;  %v313_v13 = vpack.c.bf16 %v43_v9, %v42_v8  ;;  %v44_v14 = vld [vmem:[%s447_s2 + $0x30] sm:$0xff]  ;;  %vm232_vm7 = vcmask 1024  }
   0x4   :  { %308 = vmatpush3.bf16.msra.mxu0 %v307_v5  ;;  %v325_v12 = vpack.c.bf16 %v138_v11, %v137_v10  ;;  %v45_v15 = vld [vmem:[%s447_s2 + $0x38] sm:$0xff]  ;;  %v46_v17 = vld [vmem:[%s447_s2 + $0x40] sm:$0xff]  ;;  %v47_v18 = vld [vmem:[%s447_s2 + $0x48] sm:$0xff] }
   0x5   :  { %309 = vmatprep.subr.bf16.mxu0 %v339_v0  ;;  %v316_v16 = vpack.c.bf16 %v45_v15, %v44_v14  ;;  %v25_v19 = vld [vmem:[%s449_s0] sm:$0x3]  ;;  %v238_v20 = vld [vmem:[%s449_s0 + $0x2] sm:$0x3]  ;;  %v319_v21 = vpack.c.bf16 %v47_v18, %v46_v17  ;;  %v48_v22 = vld [vmem:[%s447_s2 + $0x50] sm:$0xff] }
   0x6   :  { %326 = vmatpush3.bf16.msra.mxu1 %v325_v12  ;;  %v49_v23 = vld [vmem:[%s447_s2 + $0x58] sm:$0xff]  ;;  %v28_v24 = vadd.f32 %v238_v20, %v25_v19  ;;  %v239_v25 = vld [vmem:[%s450_s1] ss:$0 sm:$0xff]  ;;  %v139_v30 = vld [vmem:[%s448_s4 + $0x10] sm:$0xff] }
   0x7   :  { %327 = vmatprep.subr.bf16.mxu1 %v339_v0  ;;  %v322_v26 = vpack.c.bf16 %v49_v23, %v48_v22  ;;  %v50_v28 = vld [vmem:[%s447_s2 + $0x60] sm:$0xf]  ;;  %v140_v31 = vld [vmem:[%s448_s4 + $0x18] sm:$0x1]  ;;  %vm329_vm5 = vmpackc.low %vm152_vm3, %vm342_vm4 }
   0x8   :  { %311 = vmatpush3.bf16.msra.mxu0 %v310_v7  ;;  %v36_v27 = vadd.f32 %v239_v25, %v28_v24  ;;  %v328_v32 = vpack.c.bf16 %v140_v31, %v139_v30  ;;  %v240_v34 = vld [vmem:[%s452_s3] ss:$0 sm:$0xff] }
   0x9   :  { %312 = vmatprep.subr.bf16.mxu0 %v339_v0  ;;  %v243_v39 = vld [vmem:[#allocation2] ss:$0 sm:$0xff] }
   0xa   :  { %v37_v29 = vmax.f32 %v36_v27, 0.0  ;;  %330 = vmatpush3.bf16.msk.msra.mxu1 %vm329_vm5, %v328_v32 }
   0xc   :  { %314 = vmatpush3.bf16.msra.mxu0 %v313_v13 }
   0xd   :  { %315 = vmatprep.subr.bf16.mxu0 %v339_v0 }
  0x10   :  { %317 = vmatpush3.bf16.msra.mxu0 %v316_v16 }
  0x11   :  { %318 = vmatprep.subr.bf16.mxu0 %v339_v0 }
  0x14   :  { %320 = vmatpush3.bf16.msra.mxu0 %v319_v21 }
  0x15   :  { %321 = vmatprep.subr.bf16.mxu0 %v339_v0 }
  0x18   :  { %323 = vmatpush3.bf16.msra.mxu0 %v322_v26 }
  0x19   :  { %290 = vmatprep.subr.mxu0 %v341_v4 }
  0x1c   :  { %291 = vmatpush3.msk.msra.mxu0 %vm62_vm1, %v50_v28 }
  0x1d   :  { %293 = vmatmul.mubr.msk.f32.vlgmr.msra.gmra.mrb[0].mxu0 %vm58_vm2, %v37_v29 }
  0xf0   :  { %v132_v35 = vpop.f32.mrb[0].mxu0 }
  0xf1   :  { %v133_v36 = vadd.f32 %v240_v34, %v132_v35  ;;  %v294_v37 = vpop.f32.mrb[1].mxu0 }
  0xf3   :  { %v136_v38 = vmax.f32 %v133_v36, 0.0 }
  0xf5   :  { %304 = vmatmul.mubr.msk.f32.vlgmr.msra.gmra.mrb[0].mxu1 %vm148_vm6, %v136_v38 }
 0x1c8   :  { %v222_v40 = vpop.f32.mrb[0].mxu1 }
 0x1c9   :  { %v223_v41 = vadd.f32 %v243_v39, %v222_v40  ;;  %v305_v42 = vpop.f32.mrb[1].mxu1 }
 0x1cb   :  { %v246_v43 = vmul.f32 -1.442695, %v223_v41 }
 0x1cd   :  { %335 = vpow2.f32 %v246_v43 }
 0x1d7   :  { %v336_v44 = vpop.eup %335 }
 0x1d8   :  { %v229_v45 = vadd.f32 1.0, %v336_v44 }
 0x1da   :  { %337 = vrcp.f32 %v229_v45 }
 0x1e4   :  { %v338_v46 = vpop.eup %337 }
 0x1e5   :  { %233 = vst.msk [vmem:[%s453_s6] sm:$0x3] %vm232_vm7, %v338_v46 }

// kernel: baseline_forward.2
= control target key start
LH: loop header
LB: loop body
LE: loop exit
PB: predicated region body
PF: predicated region fallthrough
CT: control target
= control target key end

     0   :  { %7 = vsyncpa [#allocation4], 0  ;;  %s13955_s0 = inlined_call_operand.vmem [shape: f32[2,113100], index: 0, kind: input, shape index: {}]   ;;  %s13956_s1 = inlined_call_operand.hbm [shape: f32[114688,100], index: 1, kind: input, shape index: {}]   ;;  %s13957_s2 = inlined_call_operand.vmem [shape: f32[2,2,100], index: 2, kind: output, shape index: {}]  }
   0x1   :  { %9 = vsyncpa [#allocation4 + $0x1], 0  ;;  %s11150_s9 = smov 0   ;;  %s11152_s10 = smov 0  }
   0x2   :  { %s11154_s11 = smov 0   ;;  %s11156_s12 = smov 0  }
   0x3   :  { %s11158_s13 = smov 0   ;;  %s11160_s14 = smov 0  }
   0x4   :  { %s11162_s15 = smov 0   ;;  %s11164_s16 = smov 0  }
   0x5 LB: > { %s7043_s17 = sadd.s32 4294967295, %s11128_s16   ;;  %s24_s18 = sadd.s32 1, %s11120_s14  ;;  %s11128_s16 = sphi %s11164_s16, %s15_s16   ;;  %s11124_s15 = sphi %s11162_s15, %s13966_s15   ;;  %s11120_s14 = sphi %s11160_s14, %s13965_s14   ;;  %s11116_s13 = sphi %s11158_s13, %s13964_s13   ;;  %s11112_s12 = sphi %s11156_s12, %s13963_s12   ;;  %s11108_s11 = sphi %s11154_s11, %s13962_s11   ;;  %s11104_s10 = sphi %s11152_s10, %s13961_s10   ;;  %s11100_s9 = sphi %s11150_s9, %s13960_s9  }
   0x6   : > { %p25_p0 = scmp.ge.s32.totalorder %s24_s18, 4  ;;  %s27_s19 = sadd.s32 1, %s11124_s15 }
   0x7   : > { %s7047_s20 = sshll.u32 %s11124_s15, 2  ;;  %s68_s21 = sadd.s32 1, %s11108_s11 }
   0x8   : > { %s13968_s18 = smov (%p25_p0, %s24_s18), 0  ;;  %s13970_s19 = smov (!%p25_p0, %s27_s19), %s11124_s15 }
   0x9   : > { %s62_s22 = sadd.s32 %s11120_s14, %s7047_s20  ;;  %p75_p1 = scmp.ne.s32.totalorder %s11108_s11, %s11104_s10 }
   0xa   : > { %p29_p2 = scmp.ge.s32.totalorder %s13970_s19, 2  ;;  %p76_p3 = scmp.eq.s32.totalorder %s11128_s16, 0 }
   0xb   : > { %p81_p4 = scmp.ne.s32.totalorder %s11104_s10, %s11100_s9  ;;  %p82_p5 = scmp.eq.s32.totalorder %s7043_s17, 0 }
   0xc   : > { %s13972_s19 = smov (%p29_p2, %s13970_s19), 0  ;;  %p77_p6 = por %p76_p3, %p75_p1 }
   0xd   : > { %p11203_p7 = por %p82_p5, %p81_p4  ;;  %s7048_s24 = sshll.u32 %s13972_s19, 2 }
   0xe   : > { %s64_s25 = sadd.s32 %s7048_s24, %s13968_s18  ;;  %p10935_p8 = scmp.lt.s32.totalorder %s11128_s16, 8 }
   0xf   : > { %s65_s26 = ssub.s32 %s62_s22, %s64_s25  ;;  %s152_s27 = sand.u32 1, %s11108_s11  }
  0x10   : > { %p66_p9 = scmp.eq.s32.totalorder %s65_s26, 0  ;;  %s10927_s28 = smul.u32 14336, %s152_s27 }
  0x11   : > { %p11211_p10 = pnand %p10935_p8, %p77_p6  ;;  %s7174_s3 = smul.u32 229376, %s62_s22 }
  0x12   : > { %s11216_s30 = scalar_select %p66_p9, %s11108_s11, %s68_s21  }
  0x13   : > { %s156_s4 = scalar_lea.vmem [#allocation3], %s10927_s28  ;;  %s11221_s8 = scalar_lea.hbm %s13956_s1, %s7174_s3 }
  0x14   : > { %s165_s5 = sshll.u32 %s156_s4, 4  ;;  %s11225_s9 = scalar_lea.sflag [#allocation4], %s152_s27  ;;  %s11223_s5 = int_to_ptr.vmem [resolvable:$true] %s165_s5 }
  0x15   : > { %s11032_s17 = scalar_lea.hbm %s11221_s8, 229376  ;;  %p11034_p12 = pneg %p11211_p10 }
  0x16   : > { %p11033_p11 = scmp.ne.s32.totalorder %s11221_s8, %s11032_s17  ;;  %s11037_s22 = scalar_lea.hbm %s13956_s1, 1835008 }
  0x17   : > { %p11038_p1 = scmp.lt.u32.totalorder %s11221_s8, %s13956_s1  ;;  %p11039_p2 = scmp.lt.u32.totalorder %s11037_s22, %s11032_s17 }
  0x18   : > { %p11035_p13 = pnand %p11034_p12, %p11033_p11  ;;  %p11041_p4 = scmp.lt.u32.totalorder %s11032_s17, %s11221_s8 }
  0x19   : > { %p11040_p3 = por %p11039_p2, %p11038_p1 }
  0x1a   : > { %p11036_p0 = pneg %p11035_p13 }
  0x1b   : > { %p11042_p5 = por %p11041_p4, %p11040_p3 }
  0x1d   : > { %p11043_p6 = pnand %p11042_p5, %p11036_p0 }
  0x1f   : > { %11046 = shalt.err (!%p11043_p6)
}
  0x20   : > { %s11047_s26 = scalar_lea.vmem %s11223_s5, 229376  ;;  %s11130_s27 = smov [#allocation3]  }
  0x21   : > { %p11048_p8 = scmp.ne.s32.totalorder %s11223_s5, %s11047_s26  ;;  %s11052_s28 = sshll.u32 %s11130_s27, 4  ;;  %s11053_s28 = int_to_ptr.vmem [resolvable:$false] %s11052_s28 }
  0x22   : > { %s11054_s3 = scalar_lea.vmem %s11053_s28, 458752  ;;  %p11055_p13 = scmp.lt.s32.totalorder %s11223_s5, %s11053_s28 }
  0x23   : > { %p11050_p9 = pnand %p11048_p8, %p11034_p12  ;;  %p11056_p1 = scmp.lt.s32.totalorder %s11054_s3, %s11047_s26 }
  0x25   : > { %p11051_p11 = pneg %p11050_p9  ;;  %p11057_p2 = por %p11056_p1, %p11055_p13 }
  0x27   : > { %p11058_p3 = pnand %p11057_p2, %p11051_p11 }
  0x29   : > { %11061 = shalt.err (!%p11058_p3)
}
  0x2a   : > { %s11131_s4 = smov 128   ;;  %s11132_s6 = smov 8  }
  0x2b   : > { %10934 = dma.hbm_to_vmem [thread:$0]  (!%p11211_p10), %s11221_s8, 229376, %s11223_s5, %s11225_s9, %s11131_s4, %s11131_s4, %s11132_s6  }
  0x2c   : > { %p7053_p12 = scmp.ge.s32.totalorder %s11128_s16, 1  ;;  %p173_p0 = scmp.lt.s32.totalorder %s11128_s16, 9 }
  0x2e   : > { %p174_p4 = pnand %p7053_p12, %p173_p0 }
  0x2f   : > { %s179_s7 = sand.u32 (!%p174_p4), 1, %s11104_s10  }
  0x30   : > { %177 = sbr.rel (%p174_p4) target bundleno = 1196 (0x4ac), region = 28  ;;  %s180_s20 = scalar_lea.sflag (!%p174_p4), [#allocation4], %s179_s7 }
  0x31   : > { %s10928_s17 = smul.u32 (!%p174_p4), 14336, %s179_s7 }
  0x33   : > { %s11256_s21 = scalar_lea.vmem (!%p174_p4), [#allocation3], %s10928_s17 }
  0x37   : > { %11095 = dma.done.wait (%p11203_p7), %s180_s20, 229376  }
  0x38   : > { %11097 = vsyncadd (%p11203_p7), %s180_s20, 4294737920  ;;  %s7054_s29 = sshll.u32 %s11116_s13, 2  ;;  %p235_p10 = scmp.lt.s32.totalorder %s11116_s13, 1 }
  0x39   : > { %s11265_s5 = sadd.s32 %s11112_s12, %s7054_s29  ;;  %p7057_p7 = scmp.ne.s32.totalorder %s11112_s12, 0 }
  0x3a   : > { %s216_s8 = smul.u32 112, %s11265_s5  ;;  %s13974_s13 = smov (!%p235_p10, %s11116_s13), 1  ;;  %vm243_vm0 = vcmask (!%p7057_p7), 812032   ;;  %v11133_v0 = vmov (!%p7057_p7), 0.0  }
  0x3b   : > { %s7056_s9 = sshll.u32 %s13974_s13, 1  ;;  %242 = sbr.rel (%p7057_p7) target bundleno = 66 (0x42), region = 36  ;;  %244 = vst.msk [vmem:[#allocation2] sm:$0x3] (!%p7057_p7), %vm243_vm0, %v11133_v0 }
  0x3c   : > { %p221_p5 = scmp.lt.s32.totalorder %s216_s8, 883  ;;  %s11272_s25 = scalar_lea.vmem %s13957_s2, %s7056_s9 }
  0x3e   : > { %s13976_s8 = smov (!%p221_p5, %s216_s8), 883 }
  0x3f   : > { %s7055_s23 = sshll.u32 %s13976_s8, 1 }
  0x40   : > { %s11277_s28 = scalar_lea.vmem %s13955_s0, %s7055_s23 }
  0x42 PF: > { %v1248_v1 = vld [vmem:[%s11256_s21 + $0x80] sm:$0xff]  ;;  %v1249_v2 = vld [vmem:[%s11256_s21 + $0x88] sm:$0xff]  ;;  %v1250_v12 = vld [vmem:[%s11256_s21 + $0x90] sm:$0xff]  ;;  %v248_v48 = vlaneseq  ;;  %v11134_v49 = vmov 1983009808   ;;  %s247_s13 = smul.u32 14336, %s11265_s5 }
  0x43   : > { %v1280_v3 = vld [vmem:[%s11256_s21 + $0x180] sm:$0xff]  ;;  %v9135_v4 = vpack.c.bf16 %v1249_v2, %v1248_v1  ;;  %v1281_v5 = vld [vmem:[%s11256_s21 + $0x188] sm:$0xff]  ;;  %v1251_v14 = vld [vmem:[%s11256_s21 + $0x98] sm:$0xff]  ;;  %v533_v50 = vunpack.c.l.s4 %v11134_v49  ;;  %p7171_p6 = scmp.ne.s32.totalorder %s11112_s12, 3 }
  0x44   : > { %v1232_v6 = vld [vmem:[%s11256_s21] sm:$0xff]  ;;  %v1233_v7 = vld [vmem:[%s11256_s21 + $0x8] sm:$0xff]  ;;  %v9167_v8 = vpack.c.bf16 %v1281_v5, %v1280_v3  ;;  %v1282_v15 = vld [vmem:[%s11256_s21 + $0x190] sm:$0xff]  ;;  %v9139_v17 = vpack.c.bf16 %v1251_v14, %v1250_v12  ;;  %v536_v1 = vshrl.u32 %v248_v48, 7  ;;  %s361_s3 = ssub.s32 113100, %s247_s13 }
  0x45   : > { %v9137_v9 = vpack.c.bf16 %v1233_v7, %v1232_v6  ;;  %v1264_v10 = vld [vmem:[%s11256_s21 + $0x100] sm:$0xff]  ;;  %v1265_v11 = vld [vmem:[%s11256_s21 + $0x108] sm:$0xff]  ;;  %9136 = vmatprep.subr.bf16.mxu0 %v9135_v4  ;;  %v1283_v16 = vld [vmem:[%s11256_s21 + $0x198] sm:$0xff]  ;;  %v534_v0 = vunpack.c.0.s8 %v533_v50  ;;  %v11325_v4 = vand.u32 127, %v248_v48 }
  0x46   : > { %v9169_v13 = vpack.c.bf16 %v1265_v11, %v1264_v10  ;;  %9168 = vmatprep.subr.bf16.mxu1 %v9167_v8  ;;  %v9171_v18 = vpack.c.bf16 %v1283_v16, %v1282_v15  ;;  %v1234_v19 = vld [vmem:[%s11256_s21 + $0x10] sm:$0xff]  ;;  %v1235_v20 = vld [vmem:[%s11256_s21 + $0x18] sm:$0xff]  ;;  %v1252_v24 = vld [vmem:[%s11256_s21 + $0xa0] sm:$0xff] }
  0x47   : > { %9138 = vmatpush3.bf16.msra.mxu0 %v9137_v9  ;;  %v1266_v21 = vld [vmem:[%s11256_s21 + $0x110] sm:$0xff]  ;;  %v9141_v22 = vpack.c.bf16 %v1235_v20, %v1234_v19  ;;  %v1267_v23 = vld [vmem:[%s11256_s21 + $0x118] sm:$0xff]  ;;  %v1253_v25 = vld [vmem:[%s11256_s21 + $0xa8] sm:$0xff]  ;;  %v11333_v15 = vsub.s32 %v534_v0, %v536_v1 }
  0x48   : > { %9170 = vmatpush3.bf16.msra.mxu1 %v9169_v13  ;;  %9140 = vmatprep.subr.bf16.mxu0 %v9139_v17  ;;  %v9173_v26 = vpack.c.bf16 %v1267_v23, %v1266_v21  ;;  %v9143_v27 = vpack.c.bf16 %v1253_v25, %v1252_v24  ;;  %v1284_v28 = vld [vmem:[%s11256_s21 + $0x1a0] sm:$0xff]  ;;  %v1285_v29 = vld [vmem:[%s11256_s21 + $0x1a8] sm:$0xff]  ;;  %v1254_v36 = vld [vmem:[%s11256_s21 + $0xb0] sm:$0xff]  ;;  %v11339_v21 = vstv %s361_s3 }
  0x49   : > { %9172 = vmatprep.subr.bf16.mxu1 %v9171_v18  ;;  %v1236_v30 = vld [vmem:[%s11256_s21 + $0x20] sm:$0xff]  ;;  %v9175_v31 = vpack.c.bf16 %v1285_v29, %v1284_v28  ;;  %v1237_v32 = vld [vmem:[%s11256_s21 + $0x28] sm:$0xff]  ;;  %v1255_v37 = vld [vmem:[%s11256_s21 + $0xb8] sm:$0xff]  ;;  %v250_v18 = vadd.s32 128, %v11325_v4  ;;  %vm363_vm3 = vcmp.lt.s32.totalorder %v11325_v4, %v11339_v21 }
  0x4a   : > { %v1268_v33 = vld [vmem:[%s11256_s21 + $0x120] sm:$0xff]  ;;  %v1269_v34 = vld [vmem:[%s11256_s21 + $0x128] sm:$0xff]  ;;  %v9145_v35 = vpack.c.bf16 %v1237_v32, %v1236_v30  ;;  %v1286_v38 = vld [vmem:[%s11256_s21 + $0x1b0] sm:$0xff]  ;;  %v9147_v40 = vpack.c.bf16 %v1255_v37, %v1254_v36 }
  0x4b   : > { %9142 = vmatpush3.bf16.msra.mxu0 %v9141_v22  ;;  %v9177_v39 = vpack.c.bf16 %v1269_v34, %v1268_v33  ;;  %v1287_v41 = vld [vmem:[%s11256_s21 + $0x1b8] sm:$0xff]  ;;  %v1238_v42 = vld [vmem:[%s11256_s21 + $0x30] sm:$0xff]  ;;  %v1256_v47 = vld [vmem:[%s11256_s21 + $0xc0] sm:$0xff]  ;;  %vm364_vm1 = vcmp.lt.s32.totalorder %v250_v18, %v11339_v21 }
  0x4c   : > { %9174 = vmatpush3.bf16.msra.mxu1 %v9173_v26  ;;  %9144 = vmatprep.subr.bf16.mxu0 %v9143_v27  ;;  %v1239_v43 = vld [vmem:[%s11256_s21 + $0x38] sm:$0xff]  ;;  %v9179_v44 = vpack.c.bf16 %v1287_v41, %v1286_v38  ;;  %v1270_v45 = vld [vmem:[%s11256_s21 + $0x130] sm:$0xff]  ;;  %v1257_v51 = vld [vmem:[%s11256_s21 + $0xc8] sm:$0xff]  ;;  %v252_v27 = vadd.s32 384, %v11325_v4 }
  0x4d   : > { %9176 = vmatprep.subr.bf16.mxu1 %v9175_v31  ;;  %v1271_v46 = vld [vmem:[%s11256_s21 + $0x138] sm:$0xff]  ;;  %v1288_v52 = vld [vmem:[%s11256_s21 + $0x1c0] sm:$0xff]  ;;  %v1289_v53 = vld [vmem:[%s11256_s21 + $0x1c8] sm:$0xff]  ;;  %v9149_v54 = vpack.c.bf16 %v1239_v43, %v1238_v42  ;;  %v9151_v56 = vpack.c.bf16 %v1257_v51, %v1256_v47 }
  0x4e   : > { %v9181_v55 = vpack.c.bf16 %v1271_v46, %v1270_v45  ;;  %v1240_v57 = vld [vmem:[%s11256_s21 + $0x40] sm:$0xff]  ;;  %v1241_v58 = vld [vmem:[%s11256_s21 + $0x48] sm:$0xff]  ;;  %v9183_v60 = vpack.c.bf16 %v1289_v53, %v1288_v52  ;;  %v1258_v62 = vld [vmem:[%s11256_s21 + $0xd0] sm:$0xff]  ;;  %vm366_vm2 = vcmp.lt.s32.totalorder %v252_v27, %v11339_v21  ;;  %v251_v53 = vadd.s32 256, %v11325_v4 }
  0x4f   : > { %9146 = vmatpush3.bf16.msra.mxu0 %v9145_v35  ;;  %v1272_v59 = vld [vmem:[%s11256_s21 + $0x140] sm:$0xff]  ;;  %v1273_v61 = vld [vmem:[%s11256_s21 + $0x148] sm:$0xff]  ;;  %v1259_v63 = vld [vmem:[%s11256_s21 + $0xd8] sm:$0xff]  ;;  %v9153_v5 = vpack.c.bf16 %v1241_v58, %v1240_v57 }
  0x50   : > { %9178 = vmatpush3.bf16.msra.mxu1 %v9177_v39  ;;  %9148 = vmatprep.subr.bf16.mxu0 %v9147_v40  ;;  %v1290_v2 = vld [vmem:[%s11256_s21 + $0x1d0] sm:$0xff]  ;;  %v1291_v3 = vld [vmem:[%s11256_s21 + $0x1d8] sm:$0xff]  ;;  %v9185_v6 = vpack.c.bf16 %v1273_v61, %v1272_v59  ;;  %v9155_v7 = vpack.c.bf16 %v1259_v63, %v1258_v62  ;;  %v1260_v13 = vld [vmem:[%s11256_s21 + $0xe0] sm:$0xff]  ;;  %vm365_vm4 = vcmp.lt.s32.totalorder %v251_v53, %v11339_v21 }
  0x51   : > { %9180 = vmatprep.subr.bf16.mxu1 %v9179_v44  ;;  %v1242_v8 = vld [vmem:[%s11256_s21 + $0x50] sm:$0xff]  ;;  %v1243_v9 = vld [vmem:[%s11256_s21 + $0x58] sm:$0xff]  ;;  %v9187_v11 = vpack.c.bf16 %v1291_v3, %v1290_v2  ;;  %v1261_v14 = vld [vmem:[%s11256_s21 + $0xe8] sm:$0xff] }
  0x52   : > { %v1274_v10 = vld [vmem:[%s11256_s21 + $0x150] sm:$0xff]  ;;  %v1275_v12 = vld [vmem:[%s11256_s21 + $0x158] sm:$0xff]  ;;  %v1292_v16 = vld [vmem:[%s11256_s21 + $0x1e0] sm:$0xff]  ;;  %v9157_v19 = vpack.c.bf16 %v1243_v9, %v1242_v8  ;;  %v9159_v23 = vpack.c.bf16 %v1261_v14, %v1260_v13 }
  0x53   : > { %9150 = vmatpush3.bf16.msra.mxu0 %v9149_v54  ;;  %v1293_v17 = vld [vmem:[%s11256_s21 + $0x1e8] sm:$0xff]  ;;  %v1244_v20 = vld [vmem:[%s11256_s21 + $0x60] sm:$0xff]  ;;  %v9189_v22 = vpack.c.bf16 %v1275_v12, %v1274_v10  ;;  %v1262_v30 = vld [vmem:[%s11256_s21 + $0xf0] sm:$0xff] }
  0x54   : > { %9182 = vmatpush3.bf16.msra.mxu1 %v9181_v55  ;;  %9152 = vmatprep.subr.bf16.mxu0 %v9151_v56  ;;  %v1245_v24 = vld [vmem:[%s11256_s21 + $0x68] sm:$0xff]  ;;  %v1276_v25 = vld [vmem:[%s11256_s21 + $0x160] sm:$0xff]  ;;  %v9191_v28 = vpack.c.bf16 %v1293_v17, %v1292_v16  ;;  %v1263_v31 = vld [vmem:[%s11256_s21 + $0xf8] sm:$0xff] }
  0x55   : > { %9184 = vmatprep.subr.bf16.mxu1 %v9183_v60  ;;  %v475_v26 = vld [vmem:[%s11277_s28] sm:$0xff]  ;;  %v1277_v29 = vld [vmem:[%s11256_s21 + $0x168] sm:$0xff]  ;;  %v1294_v34 = vld [vmem:[%s11256_s21 + $0x1f0] sm:$0xff]  ;;  %v9161_v36 = vpack.c.bf16 %v1245_v24, %v1244_v20  ;;  %v9163_v40 = vpack.c.bf16 %v1263_v31, %v1262_v30 }
  0x56   : > { %v538_v32 = vrot.slane %v475_v26, %v11333_v15  ;;  %v531_v33 = vcombine.high %v475_v26, %v475_v26  ;;  %v1295_v35 = vld [vmem:[%s11256_s21 + $0x1f8] sm:$0xff]  ;;  %v9193_v39 = vpack.c.bf16 %v1277_v29, %v1276_v25  ;;  %v1246_v41 = vld [vmem:[%s11256_s21 + $0x70] sm:$0xff]  ;;  %v1312_v47 = vld [vmem:[%s11256_s21 + $0x280] sm:$0xff] }
  0x57   : > { %9154 = vmatpush3.bf16.msra.mxu0 %v9153_v5  ;;  %v1247_v42 = vld [vmem:[%s11256_s21 + $0x78] sm:$0xff]  ;;  %v1278_v43 = vld [vmem:[%s11256_s21 + $0x170] sm:$0xff]  ;;  %v9195_v44 = vpack.c.bf16 %v1295_v35, %v1294_v34  ;;  %v1313_v48 = vld [vmem:[%s11256_s21 + $0x288] sm:$0xff] }
  0x58   : > { %9186 = vmatpush3.bf16.msra.mxu1 %v9185_v6  ;;  %9156 = vmatprep.subr.bf16.mxu0 %v9155_v7  ;;  %v546_v37 = vcombine.high %v538_v32, %v538_v32  ;;  %v545_v38 = vrot.slane %v531_v33, %v11333_v15  ;;  %v1279_v45 = vld [vmem:[%s11256_s21 + $0x178] sm:$0xff]  ;;  %v1344_v49 = vld [vmem:[%s11256_s21 + $0x380] sm:$0xff]  ;;  %v1345_v50 = vld [vmem:[%s11256_s21 + $0x388] sm:$0xff]  ;;  %v9165_v51 = vpack.c.bf16 %v1247_v42, %v1246_v41  ;;  %v254_v33 = vadd.s32 640, %v11325_v4 }
  0x59   : > { %9188 = vmatprep.subr.bf16.mxu1 %v9187_v11  ;;  %v9197_v52 = vpack.c.bf16 %v1279_v45, %v1278_v43  ;;  %v9199_v54 = vpack.c.bf16 %v1313_v48, %v1312_v47  ;;  %v1296_v55 = vld [vmem:[%s11256_s21 + $0x200] sm:$0xff]  ;;  %v1297_v56 = vld [vmem:[%s11256_s21 + $0x208] sm:$0xff]  ;;  %v9231_v58 = vpack.c.bf16 %v1345_v50, %v1344_v49  ;;  %v1314_v60 = vld [vmem:[%s11256_s21 + $0x290] sm:$0xff]  ;;  %v256_v41 = vadd.s32 896, %v11325_v4 }
  0x5a   : > { %7059 = vmatprep.mubr.msk.f32.mxu0 %vm364_vm1, %v546_v37  ;;  %v547_v46 = vcombine.high %v545_v38, %v545_v38  ;;  %v1328_v57 = vld [vmem:[%s11256_s21 + $0x300] sm:$0xff]  ;;  %v1329_v59 = vld [vmem:[%s11256_s21 + $0x308] sm:$0xff]  ;;  %v1315_v61 = vld [vmem:[%s11256_s21 + $0x298] sm:$0xff]  ;;  %v9201_v0 = vpack.c.bf16 %v1297_v56, %v1296_v55  ;;  %vm368_vm5 = vcmp.lt.s32.totalorder %v254_v33, %v11339_v21 }
  0x5b   : > { %9158 = vmatpush3.bf16.msra.mxu0 %v9157_v19  ;;  %v1346_v62 = vld [vmem:[%s11256_s21 + $0x390] sm:$0xff]  ;;  %v1347_v63 = vld [vmem:[%s11256_s21 + $0x398] sm:$0xff]  ;;  %v9233_v1 = vpack.c.bf16 %v1329_v59, %v1328_v57  ;;  %v9203_v2 = vpack.c.bf16 %v1315_v61, %v1314_v60  ;;  %v1316_v9 = vld [vmem:[%s11256_s21 + $0x2a0] sm:$0xff]  ;;  %vm370_vm6 = vcmp.lt.s32.totalorder %v256_v41, %v11339_v21 }
  0x5c   : > { %9190 = vmatpush3.bf16.msra.mxu1 %v9189_v22  ;;  %9160 = vmatprep.subr.bf16.mxu0 %v9159_v23  ;;  %v1298_v3 = vld [vmem:[%s11256_s21 + $0x210] sm:$0xff]  ;;  %v1299_v5 = vld [vmem:[%s11256_s21 + $0x218] sm:$0xff]  ;;  %v9235_v7 = vpack.c.bf16 %v1347_v63, %v1346_v62  ;;  %v1317_v10 = vld [vmem:[%s11256_s21 + $0x2a8] sm:$0xff] }
  0x5d   : > { %9192 = vmatprep.subr.bf16.mxu1 %v9191_v28  ;;  %7061 = vmatprep.mubr.msk.f32.mxu1 %vm366_vm2, %v547_v46  ;;  %v1330_v6 = vld [vmem:[%s11256_s21 + $0x310] sm:$0xff]  ;;  %v1331_v8 = vld [vmem:[%s11256_s21 + $0x318] sm:$0xff]  ;;  %v1348_v11 = vld [vmem:[%s11256_s21 + $0x3a0] sm:$0xff]  ;;  %v9205_v13 = vpack.c.bf16 %v1299_v5, %v1298_v3  ;;  %v9207_v16 = vpack.c.bf16 %v1317_v10, %v1316_v9 }
  0x5e   : > { %v1349_v12 = vld [vmem:[%s11256_s21 + $0x3a8] sm:$0xff]  ;;  %v9237_v14 = vpack.c.bf16 %v1331_v8, %v1330_v6  ;;  %v1300_v17 = vld [vmem:[%s11256_s21 + $0x220] sm:$0xff]  ;;  %v1318_v23 = vld [vmem:[%s11256_s21 + $0x2b0] sm:$0xff] }
  0x5f   : > { %9162 = vmatpush3.bf16.msra.mxu0 %v9161_v36  ;;  %v1301_v18 = vld [vmem:[%s11256_s21 + $0x228] sm:$0xff]  ;;  %v1332_v19 = vld [vmem:[%s11256_s21 + $0x320] sm:$0xff]  ;;  %v9239_v20 = vpack.c.bf16 %v1349_v12, %v1348_v11  ;;  %v1319_v24 = vld [vmem:[%s11256_s21 + $0x2b8] sm:$0xff] }
  0x60   : > { %9194 = vmatpush3.bf16.msra.mxu1 %v9193_v39  ;;  %9164 = vmatprep.subr.bf16.mxu0 %v9163_v40  ;;  %v1333_v22 = vld [vmem:[%s11256_s21 + $0x328] sm:$0xff]  ;;  %v1350_v25 = vld [vmem:[%s11256_s21 + $0x3b0] sm:$0xff]  ;;  %v1351_v26 = vld [vmem:[%s11256_s21 + $0x3b8] sm:$0xff]  ;;  %v9209_v27 = vpack.c.bf16 %v1301_v18, %v1300_v17  ;;  %v9211_v29 = vpack.c.bf16 %v1319_v24, %v1318_v23 }
  0x61   : > { %9196 = vmatprep.subr.bf16.mxu1 %v9195_v44  ;;  %v9241_v28 = vpack.c.bf16 %v1333_v22, %v1332_v19  ;;  %v1302_v30 = vld [vmem:[%s11256_s21 + $0x230] sm:$0xff]  ;;  %v1303_v31 = vld [vmem:[%s11256_s21 + $0x238] sm:$0xff]  ;;  %v9243_v34 = vpack.c.bf16 %v1351_v26, %v1350_v25  ;;  %v1320_v36 = vld [vmem:[%s11256_s21 + $0x2c0] sm:$0xff] }
  0x62   : > { %v1335_v35 = vld [vmem:[%s11256_s21 + $0x338] sm:$0xff]  ;;  %v1321_v37 = vld [vmem:[%s11256_s21 + $0x2c8] sm:$0xff]  ;;  %v9213_v42 = vpack.c.bf16 %v1303_v31, %v1302_v30  ;;  %v1304_v47 = vld [vmem:[%s11256_s21 + $0x240] sm:$0xff] }
  0x63   : > { %9166 = vmatpush3.bf16.msra.mxu0 %v9165_v51  ;;  %v1353_v39 = vld [vmem:[%s11256_s21 + $0x3c8] sm:$0xff]  ;;  %v9215_v46 = vpack.c.bf16 %v1321_v37, %v1320_v36  ;;  %v1336_v49 = vld [vmem:[%s11256_s21 + $0x340] sm:$0xff]  ;;  %v1323_v53 = vld [vmem:[%s11256_s21 + $0x2d8] sm:$0xff]  ;;  %v255_v37 = vadd.s32 768, %v11325_v4 }
  0x64   : > { %9198 = vmatpush3.bf16.msra.mxu1 %v9197_v52  ;;  %9200 = vmatprep.subr.bf16.mxu0 %v9199_v54  ;;  %v476_v40 = vld [vmem:[%s11277_s28 + $0x8] sm:$0xff]  ;;  %v1322_v52 = vld [vmem:[%s11256_s21 + $0x2d0] sm:$0xff]  ;;  %v1355_v57 = vld [vmem:[%s11256_s21 + $0x3d8] sm:$0xff] }
  0x65   : > { %9232 = vmatprep.subr.bf16.mxu1 %v9231_v58  ;;  %v11404_v43 = vrot.slane %v476_v40, %v11333_v15  ;;  %v548_v44 = vcombine.high %v476_v40, %v476_v40  ;;  %v1305_v48 = vld [vmem:[%s11256_s21 + $0x248] sm:$0xff]  ;;  %v1354_v56 = vld [vmem:[%s11256_s21 + $0x3d0] sm:$0xff]  ;;  %v9219_v61 = vpack.c.bf16 %v1323_v53, %v1322_v52  ;;  %v1307_v63 = vld [vmem:[%s11256_s21 + $0x258] sm:$0xff]  ;;  %vm369_vm8 = vcmp.lt.s32.totalorder %v255_v37, %v11339_v21 }
  0x66   : > { %7060 = vmatmul.mubr.msk.f32.vlgmr.msra.gmra.mrb[0].mxu0 %vm363_vm3, %v538_v32  ;;  %v1334_v32 = vld [vmem:[%s11256_s21 + $0x330] sm:$0xff]  ;;  %v1337_v51 = vld [vmem:[%s11256_s21 + $0x348] sm:$0xff]  ;;  %v9217_v58 = vpack.c.bf16 %v1305_v48, %v1304_v47  ;;  %v1324_v3 = vld [vmem:[%s11256_s21 + $0x2e0] sm:$0xff]  ;;  %v260_v53 = vadd.s32 1408, %v11325_v4 }
  0x67   : > { %7062 = vmatmul.mubr.msk.f32.vlgmr.msra.gmra.mrb[0].mxu1 %vm365_vm4, %v545_v38  ;;  %9202 = vmatpush3.bf16.msra.mxu0 %v9201_v0  ;;  %v1352_v38 = vld [vmem:[%s11256_s21 + $0x3c0] sm:$0xff]  ;;  %v9245_v45 = vpack.c.bf16 %v1335_v35, %v1334_v32  ;;  %v563_v54 = vcombine.high %v11404_v43, %v11404_v43  ;;  %v11416_v55 = vrot.slane %v548_v44, %v11333_v15  ;;  %v1306_v62 = vld [vmem:[%s11256_s21 + $0x250] sm:$0xff]  ;;  %v1325_v5 = vld [vmem:[%s11256_s21 + $0x2e8] sm:$0xff]  ;;  %v253_v32 = vadd.s32 512, %v11325_v4 }
  0x68   : > { %9234 = vmatpush3.bf16.msra.mxu1 %v9233_v1  ;;  %9204 = vmatprep.subr.bf16.mxu0 %v9203_v2  ;;  %v9247_v50 = vpack.c.bf16 %v1353_v39, %v1352_v38  ;;  %v9249_v60 = vpack.c.bf16 %v1337_v51, %v1336_v49  ;;  %v1338_v0 = vld [vmem:[%s11256_s21 + $0x350] sm:$0xff]  ;;  %v9251_v1 = vpack.c.bf16 %v1355_v57, %v1354_v56  ;;  %v1339_v2 = vld [vmem:[%s11256_s21 + $0x358] sm:$0xff]  ;;  %v1356_v6 = vld [vmem:[%s11256_s21 + $0x3e0] sm:$0xff]  ;;  %v258_v49 = vadd.s32 1152, %v11325_v4 }
  0x69   : > { %9236 = vmatprep.subr.bf16.mxu1 %v9235_v7  ;;  %7063 = vmatprep.mubr.msk.f32.mxu0 %vm368_vm5, %v563_v54  ;;  %v564_v59 = vcombine.high %v11416_v55, %v11416_v55  ;;  %v1357_v7 = vld [vmem:[%s11256_s21 + $0x3e8] sm:$0xff]  ;;  %v9221_v8 = vpack.c.bf16 %v1307_v63, %v1306_v62  ;;  %v9253_v9 = vpack.c.bf16 %v1339_v2, %v1338_v0  ;;  %v1308_v11 = vld [vmem:[%s11256_s21 + $0x260] sm:$0xff]  ;;  %v1326_v17 = vld [vmem:[%s11256_s21 + $0x2f0] sm:$0xff] }
  0x6a   : > { %v9223_v10 = vpack.c.bf16 %v1325_v5, %v1324_v3  ;;  %v1309_v12 = vld [vmem:[%s11256_s21 + $0x268] sm:$0xff]  ;;  %v1327_v18 = vld [vmem:[%s11256_s21 + $0x2f8] sm:$0xff]  ;;  %v1358_v19 = vld [vmem:[%s11256_s21 + $0x3f0] sm:$0xff]  ;;  %vm367_vm7 = vcmp.lt.s32.totalorder %v253_v32, %v11339_v21  ;;  %vm372_vm9 = vcmp.lt.s32.totalorder %v258_v49, %v11339_v21  ;;  %vm374_vm10 = vcmp.lt.s32.totalorder %v260_v53, %v11339_v21 }
  0x6b   : > { %9206 = vmatpush3.bf16.msra.mxu0 %v9205_v13  ;;  %7065 = vmatprep.mubr.msk.f32.mxu1 %vm370_vm6, %v564_v59  ;;  %v1340_v13 = vld [vmem:[%s11256_s21 + $0x360] sm:$0xff]  ;;  %v9225_v22 = vpack.c.bf16 %v1309_v12, %v1308_v11  ;;  %v9227_v24 = vpack.c.bf16 %v1327_v18, %v1326_v17  ;;  %v1310_v25 = vld [vmem:[%s11256_s21 + $0x270] sm:$0xff]  ;;  %v1311_v26 = vld [vmem:[%s11256_s21 + $0x278] sm:$0xff] }
  0x6c   : > { %9238 = vmatpush3.bf16.msra.mxu1 %v9237_v14  ;;  %9208 = vmatprep.subr.bf16.mxu0 %v9207_v16  ;;  %v9255_v14 = vpack.c.bf16 %v1357_v7, %v1356_v6  ;;  %v1341_v16 = vld [vmem:[%s11256_s21 + $0x368] sm:$0xff]  ;;  %v1376_v30 = vld [vmem:[%s11256_s21 + $0x480] sm:$0xff]  ;;  %v9229_v35 = vpack.c.bf16 %v1311_v26, %v1310_v25  ;;  %v1410_v47 = vld [vmem:[%s11256_s21 + $0x590] sm:$0xff] }
  0x6d   : > { %9240 = vmatprep.subr.bf16.mxu1 %v9239_v20  ;;  %v1359_v20 = vld [vmem:[%s11256_s21 + $0x3f8] sm:$0xff]  ;;  %v9257_v23 = vpack.c.bf16 %v1341_v16, %v1340_v13  ;;  %v1377_v31 = vld [vmem:[%s11256_s21 + $0x488] sm:$0xff]  ;;  %v1408_v33 = vld [vmem:[%s11256_s21 + $0x580] sm:$0xff] }
  0x6e   : > { %v1360_v36 = vld [vmem:[%s11256_s21 + $0x400] sm:$0xff]  ;;  %v9263_v39 = vpack.c.bf16 %v1377_v31, %v1376_v30  ;;  %v1361_v40 = vld [vmem:[%s11256_s21 + $0x408] sm:$0xff]  ;;  %v1411_v48 = vld [vmem:[%s11256_s21 + $0x598] sm:$0xff] }
  0x6f   : > { %9210 = vmatpush3.bf16.msra.mxu0 %v9209_v27  ;;  %v1342_v27 = vld [vmem:[%s11256_s21 + $0x370] sm:$0xff]  ;;  %v1392_v41 = vld [vmem:[%s11256_s21 + $0x500] sm:$0xff]  ;;  %v1363_v57 = vld [vmem:[%s11256_s21 + $0x418] sm:$0xff] }
  0x70   : > { %9242 = vmatpush3.bf16.msra.mxu1 %v9241_v28  ;;  %9212 = vmatprep.subr.bf16.mxu0 %v9211_v29  ;;  %v9259_v28 = vpack.c.bf16 %v1359_v20, %v1358_v19  ;;  %v1343_v29 = vld [vmem:[%s11256_s21 + $0x378] sm:$0xff]  ;;  %v477_v52 = vld [vmem:[%s11277_s28 + $0x10] sm:$0xff]  ;;  %v1380_v63 = vld [vmem:[%s11256_s21 + $0x4a0] sm:$0xff] }
  0x71   : > { %9244 = vmatprep.subr.bf16.mxu1 %v9243_v34  ;;  %v1409_v34 = vld [vmem:[%s11256_s21 + $0x588] sm:$0xff]  ;;  %v9261_v38 = vpack.c.bf16 %v1343_v29, %v1342_v27  ;;  %v1362_v56 = vld [vmem:[%s11256_s21 + $0x410] sm:$0xff]  ;;  %v11468_v59 = vrot.slane %v477_v52, %v11333_v15  ;;  %v1395_v62 = vld [vmem:[%s11256_s21 + $0x518] sm:$0xff] }
  0x72   : > { %v9295_v44 = vpack.c.bf16 %v1409_v34, %v1408_v33  ;;  %v1381_v0 = vld [vmem:[%s11256_s21 + $0x4a8] sm:$0xff]  ;;  %v1382_v13 = vld [vmem:[%s11256_s21 + $0x4b0] sm:$0xff]  ;;  %v1415_v17 = vld [vmem:[%s11256_s21 + $0x5b8] sm:$0xff] }
  0x73   : > { %9214 = vmatpush3.bf16.msra.mxu0 %v9213_v42  ;;  %v1393_v42 = vld [vmem:[%s11256_s21 + $0x508] sm:$0xff]  ;;  %v580_v3 = vcombine.high %v11468_v59, %v11468_v59  ;;  %v9271_v7 = vpack.c.bf16 %v1381_v0, %v1380_v63  ;;  %v1414_v16 = vld [vmem:[%s11256_s21 + $0x5b0] sm:$0xff]  ;;  %v1399_v26 = vld [vmem:[%s11256_s21 + $0x538] sm:$0xff] }
  0x74   : > { %9246 = vmatpush3.bf16.msra.mxu1 %v9245_v45  ;;  %9216 = vmatprep.subr.bf16.mxu0 %v9215_v46  ;;  %v1378_v45 = vld [vmem:[%s11256_s21 + $0x490] sm:$0xff]  ;;  %v1379_v46 = vld [vmem:[%s11256_s21 + $0x498] sm:$0xff]  ;;  %v9297_v51 = vpack.c.bf16 %v1393_v42, %v1392_v41  ;;  %v1413_v2 = vld [vmem:[%s11256_s21 + $0x5a8] sm:$0xff]  ;;  %v9307_v25 = vpack.c.bf16 %v1415_v17, %v1414_v16 }
  0x75   : > { %9248 = vmatprep.subr.bf16.mxu1 %v9247_v50  ;;  %v9265_v50 = vpack.c.bf16 %v1361_v40, %v1360_v36  ;;  %v9267_v54 = vpack.c.bf16 %v1379_v46, %v1378_v45  ;;  %v1384_v27 = vld [vmem:[%s11256_s21 + $0x4c0] sm:$0xff]  ;;  %v1417_v30 = vld [vmem:[%s11256_s21 + $0x5c8] sm:$0xff]  ;;  %v1387_v40 = vld [vmem:[%s11256_s21 + $0x4d8] sm:$0xff] }
  0x76   : > { %v1416_v29 = vld [vmem:[%s11256_s21 + $0x5c0] sm:$0xff]  ;;  %v1418_v41 = vld [vmem:[%s11256_s21 + $0x5d0] sm:$0xff]  ;;  %v1419_v42 = vld [vmem:[%s11256_s21 + $0x5d8] sm:$0xff] }
  0x77   : > { %9218 = vmatpush3.bf16.msra.mxu0 %v9217_v58  ;;  %v1394_v58 = vld [vmem:[%s11256_s21 + $0x510] sm:$0xff]  ;;  %v1368_v34 = vld [vmem:[%s11256_s21 + $0x440] sm:$0xff]  ;;  %v9311_v37 = vpack.c.bf16 %v1417_v30, %v1416_v29  ;;  %v1389_v53 = vld [vmem:[%s11256_s21 + $0x4e8] sm:$0xff] }
  0x78   : > { %9250 = vmatpush3.bf16.msra.mxu1 %v9249_v60  ;;  %9220 = vmatprep.subr.bf16.mxu0 %v9219_v61  ;;  %v565_v60 = vcombine.high %v477_v52, %v477_v52  ;;  %v9299_v61 = vpack.c.bf16 %v1411_v48, %v1410_v47  ;;  %v9301_v6 = vpack.c.bf16 %v1395_v62, %v1394_v58  ;;  %v1400_v36 = vld [vmem:[%s11256_s21 + $0x540] sm:$0xff]  ;;  %v1370_v47 = vld [vmem:[%s11256_s21 + $0x450] sm:$0xff]  ;;  %v1371_v48 = vld [vmem:[%s11256_s21 + $0x458] sm:$0xff] }
  0x79   : > { %9252 = vmatprep.subr.bf16.mxu1 %v9251_v1  ;;  %v1412_v1 = vld [vmem:[%s11256_s21 + $0x5a0] sm:$0xff]  ;;  %v1402_v49 = vld [vmem:[%s11256_s21 + $0x550] sm:$0xff]  ;;  %v1373_v62 = vld [vmem:[%s11256_s21 + $0x468] sm:$0xff] }
  0x7a   : > { %v11482_v5 = vrot.slane %v565_v60, %v11333_v15  ;;  %v9303_v12 = vpack.c.bf16 %v1413_v2, %v1412_v1  ;;  %v1388_v52 = vld [vmem:[%s11256_s21 + $0x4e0] sm:$0xff]  ;;  %v1405_v1 = vld [vmem:[%s11256_s21 + $0x568] sm:$0xff]  ;;  %v1390_v2 = vld [vmem:[%s11256_s21 + $0x4f0] sm:$0xff] }
  0x7b   : > { %9222 = vmatpush3.bf16.msra.mxu0 %v9221_v8  ;;  %v1364_v8 = vld [vmem:[%s11256_s21 + $0x420] sm:$0xff]  ;;  %v9287_v60 = vpack.c.bf16 %v1389_v53, %v1388_v52  ;;  %v1441_v17 = vld [vmem:[%s11256_s21 + $0x688] sm:$0xff] }
  0x7c   : > { %9254 = vmatpush3.bf16.msra.mxu1 %v9253_v9  ;;  %9224 = vmatprep.subr.bf16.mxu0 %v9223_v10  ;;  %v1365_v9 = vld [vmem:[%s11256_s21 + $0x428] sm:$0xff]  ;;  %v1396_v10 = vld [vmem:[%s11256_s21 + $0x520] sm:$0xff]  ;;  %v581_v11 = vcombine.high %v11482_v5, %v11482_v5 }
  0x7d   : > { %9256 = vmatprep.subr.bf16.mxu1 %v9255_v14  ;;  %v1383_v14 = vld [vmem:[%s11256_s21 + $0x4b8] sm:$0xff]  ;;  %v9273_v18 = vpack.c.bf16 %v1365_v9, %v1364_v8  ;;  %v1404_v63 = vld [vmem:[%s11256_s21 + $0x560] sm:$0xff]  ;;  %v1477_v53 = vld [vmem:[%s11256_s21 + $0x7a8] sm:$0xff] }
  0x7e   : > { %v9275_v20 = vpack.c.bf16 %v1383_v14, %v1382_v13  ;;  %v478_v8 = vld [vmem:[%s11277_s28 + $0x18] sm:$0xff]  ;;  %v9321_v9 = vpack.c.bf16 %v1405_v1, %v1404_v63  ;;  %v1440_v16 = vld [vmem:[%s11256_s21 + $0x680] sm:$0xff]  ;;  %v1461_v63 = vld [vmem:[%s11256_s21 + $0x728] sm:$0xff] }
  0x7f   : > { %9226 = vmatpush3.bf16.msra.mxu0 %v9225_v22  ;;  %v1366_v22 = vld [vmem:[%s11256_s21 + $0x430] sm:$0xff]  ;;  %v1407_v14 = vld [vmem:[%s11256_s21 + $0x578] sm:$0xff]  ;;  %v1456_v29 = vld [vmem:[%s11256_s21 + $0x700] sm:$0xff] }
  0x80   : > { %9258 = vmatpush3.bf16.msra.mxu1 %v9257_v23  ;;  %9228 = vmatprep.subr.bf16.mxu0 %v9227_v24  ;;  %v1367_v23 = vld [vmem:[%s11256_s21 + $0x438] sm:$0xff]  ;;  %v1398_v24 = vld [vmem:[%s11256_s21 + $0x530] sm:$0xff]  ;;  %v1476_v52 = vld [vmem:[%s11256_s21 + $0x7a0] sm:$0xff] }
  0x81   : > { %9260 = vmatprep.subr.bf16.mxu1 %v9259_v28  ;;  %v1385_v28 = vld [vmem:[%s11256_s21 + $0x4c8] sm:$0xff]  ;;  %v9277_v31 = vpack.c.bf16 %v1367_v23, %v1366_v22  ;;  %v9309_v32 = vpack.c.bf16 %v1399_v26, %v1398_v24  ;;  %v257_v23 = vadd.s32 1024, %v11325_v4  ;;  %v1424_v26 = vld [vmem:[%s11256_s21 + $0x600] sm:$0xff]  ;;  %v1478_v1 = vld [vmem:[%s11256_s21 + $0x7b0] sm:$0xff] }
  0x82   : > { %v9279_v33 = vpack.c.bf16 %v1385_v28, %v1384_v27  ;;  %v1425_v27 = vld [vmem:[%s11256_s21 + $0x608] sm:$0xff]  ;;  %v259_v28 = vadd.s32 1280, %v11325_v4 }
  0x83   : > { %9230 = vmatpush3.bf16.msra.mxu0 %v9229_v35  ;;  %v1369_v35 = vld [vmem:[%s11256_s21 + $0x448] sm:$0xff]  ;;  %vm371_vm11 = vcmp.lt.s32.totalorder %v257_v23, %v11339_v21 }
  0x84   : > { %9262 = vmatpush3.bf16.msra.mxu1 %v9261_v38  ;;  %9264 = vmatprep.subr.bf16.mxu0 %v9263_v39  ;;  %v1401_v38 = vld [vmem:[%s11256_s21 + $0x548] sm:$0xff]  ;;  %v1386_v39 = vld [vmem:[%s11256_s21 + $0x4d0] sm:$0xff]  ;;  %vm373_vm12 = vcmp.lt.s32.totalorder %v259_v28, %v11339_v21  ;;  %v1483_v28 = vld [vmem:[%s11256_s21 + $0x7d8] sm:$0xff] }
  0x85   : > { %9296 = vmatprep.subr.bf16.mxu1 %v9295_v44  ;;  %v9281_v44 = vpack.c.bf16 %v1369_v35, %v1368_v34  ;;  %v9313_v45 = vpack.c.bf16 %v1401_v38, %v1400_v36  ;;  %v9283_v46 = vpack.c.bf16 %v1387_v40, %v1386_v39  ;;  %v11552_v34 = vrot.slane %v478_v8, %v11333_v15  ;;  %v1474_v35 = vld [vmem:[%s11256_s21 + $0x790] sm:$0xff]  ;;  %v1475_v36 = vld [vmem:[%s11256_s21 + $0x798] sm:$0xff] }
  0x86   : > { %7064 = vmatmul.mubr.msk.f32.vlgmr.msra.gmra.mrb[2].mxu0 %vm367_vm7, %v11404_v43  ;;  %v9269_v43 = vpack.c.bf16 %v1363_v57, %v1362_v56  ;;  %v1421_v56 = vld [vmem:[%s11256_s21 + $0x5e8] sm:$0xff]  ;;  %v9285_v57 = vpack.c.bf16 %v1371_v48, %v1370_v47  ;;  %v9329_v39 = vpack.c.bf16 %v1425_v27, %v1424_v26  ;;  %v264_v40 = vadd.s32 1920, %v11325_v4  ;;  %v1459_v48 = vld [vmem:[%s11256_s21 + $0x718] sm:$0xff]  ;;  %v1482_v27 = vld [vmem:[%s11256_s21 + $0x7d0] sm:$0xff] }
  0x87   : > { %9266 = vmatpush3.bf16.msra.mxu0 %v9265_v50  ;;  %7066 = vmatmul.mubr.msk.f32.vlgmr.msra.gmra.mrb[2].mxu1 %vm369_vm8, %v11416_v55  ;;  %v1397_v55 = vld [vmem:[%s11256_s21 + $0x528] sm:$0xff]  ;;  %v9315_v50 = vpack.c.bf16 %v1419_v42, %v1418_v41  ;;  %v9363_v47 = vpack.c.bf16 %v1475_v36, %v1474_v35  ;;  %v1451_v26 = vld [vmem:[%s11256_s21 + $0x6d8] sm:$0xff]  ;;  %v1466_v35 = vld [vmem:[%s11256_s21 + $0x750] sm:$0xff]  ;;  %v9379_v36 = vpack.c.bf16 %v1483_v28, %v1482_v27 }
  0x88   : > { %9298 = vmatpush3.bf16.msra.mxu1 %v9297_v51  ;;  %9268 = vmatprep.subr.bf16.mxu0 %v9267_v54  ;;  %v9305_v19 = vpack.c.bf16 %v1397_v55, %v1396_v10  ;;  %v1403_v51 = vld [vmem:[%s11256_s21 + $0x558] sm:$0xff]  ;;  %v1420_v54 = vld [vmem:[%s11256_s21 + $0x5e0] sm:$0xff]  ;;  %v1406_v55 = vld [vmem:[%s11256_s21 + $0x570] sm:$0xff]  ;;  %vm378_vm14 = vcmp.lt.s32.totalorder %v264_v40, %v11339_v21 }
  0x89   : > { %9300 = vmatprep.subr.bf16.mxu1 %v9299_v61  ;;  %7067 = vmatprep.mubr.msk.f32.mxu0 %vm372_vm9, %v580_v3  ;;  %v9317_v58 = vpack.c.bf16 %v1403_v51, %v1402_v49  ;;  %v1372_v61 = vld [vmem:[%s11256_s21 + $0x460] sm:$0xff]  ;;  %v9319_v0 = vpack.c.bf16 %v1421_v56, %v1420_v54  ;;  %v1391_v3 = vld [vmem:[%s11256_s21 + $0x4f8] sm:$0xff]  ;;  %v9325_v24 = vpack.c.bf16 %v1407_v14, %v1406_v55  ;;  %v1449_v55 = vld [vmem:[%s11256_s21 + $0x6c8] sm:$0xff] }
  0x8a   : > { %7069 = vmatprep.mubr.msk.f32.mxu1 %vm374_vm10, %v581_v11  ;;  %v9291_v10 = vpack.c.bf16 %v1391_v3, %v1390_v2  ;;  %v1374_v11 = vld [vmem:[%s11256_s21 + $0x470] sm:$0xff]  ;;  %v1444_v49 = vld [vmem:[%s11256_s21 + $0x6a0] sm:$0xff]  ;;  %v597_v51 = vcombine.high %v11552_v34, %v11552_v34  ;;  %v1479_v2 = vld [vmem:[%s11256_s21 + $0x7b8] sm:$0xff] }
  0x8b   : > { %9270 = vmatpush3.bf16.msra.mxu0 %v9269_v43  ;;  %v1422_v43 = vld [vmem:[%s11256_s21 + $0x5f0] sm:$0xff]  ;;  %v1481_v14 = vld [vmem:[%s11256_s21 + $0x7c8] sm:$0xff] }
  0x8c   : > { %9302 = vmatpush3.bf16.msra.mxu1 %v9301_v6  ;;  %9272 = vmatprep.subr.bf16.mxu0 %v9271_v7  ;;  %v1423_v6 = vld [vmem:[%s11256_s21 + $0x5f8] sm:$0xff]  ;;  %v9289_v7 = vpack.c.bf16 %v1373_v62, %v1372_v61  ;;  %v1460_v61 = vld [vmem:[%s11256_s21 + $0x720] sm:$0xff]  ;;  %v9367_v62 = vpack.c.bf16 %v1477_v53, %v1476_v52  ;;  %v1453_v40 = vld [vmem:[%s11256_s21 + $0x6e8] sm:$0xff] }
  0x8d   : > { %9304 = vmatprep.subr.bf16.mxu1 %v9303_v12  ;;  %v1375_v12 = vld [vmem:[%s11256_s21 + $0x478] sm:$0xff]  ;;  %v9323_v13 = vpack.c.bf16 %v1423_v6, %v1422_v43  ;;  %v9369_v43 = vpack.c.bf16 %v1461_v63, %v1460_v61  ;;  %v1454_v52 = vld [vmem:[%s11256_s21 + $0x6f0] sm:$0xff] }
  0x8e   : > { %v9293_v22 = vpack.c.bf16 %v1375_v12, %v1374_v11  ;;  %v1463_v11 = vld [vmem:[%s11256_s21 + $0x738] sm:$0xff]  ;;  %v1448_v12 = vld [vmem:[%s11256_s21 + $0x6c0] sm:$0xff]  ;;  %v1438_v61 = vld [vmem:[%s11256_s21 + $0x670] sm:$0xff] }
  0x8f   : > { %9274 = vmatpush3.bf16.msra.mxu0 %v9273_v18  ;;  %v1472_v18 = vld [vmem:[%s11256_s21 + $0x780] sm:$0xff]  ;;  %v1455_v53 = vld [vmem:[%s11256_s21 + $0x6f8] sm:$0xff]  ;;  %v1470_v63 = vld [vmem:[%s11256_s21 + $0x770] sm:$0xff] }
  0x90   : > { %9306 = vmatpush3.bf16.msra.mxu1 %v9305_v19  ;;  %9276 = vmatprep.subr.bf16.mxu0 %v9275_v20  ;;  %v1473_v19 = vld [vmem:[%s11256_s21 + $0x788] sm:$0xff]  ;;  %v582_v20 = vcombine.high %v478_v8, %v478_v8  ;;  %v1431_v8 = vld [vmem:[%s11256_s21 + $0x638] sm:$0xff] }
  0x91   : > { %9308 = vmatprep.subr.bf16.mxu1 %v9307_v25  ;;  %v9327_v25 = vpack.c.bf16 %v1441_v17, %v1440_v16  ;;  %v9359_v30 = vpack.c.bf16 %v1473_v19, %v1472_v18  ;;  %v9343_v18 = vpack.c.bf16 %v1449_v55, %v1448_v12  ;;  %v1432_v19 = vld [vmem:[%s11256_s21 + $0x640] sm:$0xff]  ;;  %v1489_v12 = vld [vmem:[%s11256_s21 + $0x808] sm:$0xff]  ;;  %v263_v55 = vadd.s32 1792, %v11325_v4 }
  0x92   : > { %v11558_v38 = vrot.slane %v582_v20, %v11333_v15  ;;  %v1433_v20 = vld [vmem:[%s11256_s21 + $0x648] sm:$0xff] }
  0x93   : > { %9278 = vmatpush3.bf16.msra.mxu0 %v9277_v31  ;;  %v1457_v31 = vld [vmem:[%s11256_s21 + $0x708] sm:$0xff]  ;;  %vm377_vm0 = vcmp.lt.s32.totalorder %v263_v55, %v11339_v21  ;;  %v1547_v55 = vld [vmem:[%s11256_s21 + $0x9d8] sm:$0xff] }
  0x94   : > { %9310 = vmatpush3.bf16.msra.mxu1 %v9309_v32  ;;  %9280 = vmatprep.subr.bf16.mxu0 %v9279_v33  ;;  %v1442_v32 = vld [vmem:[%s11256_s21 + $0x690] sm:$0xff]  ;;  %v1443_v33 = vld [vmem:[%s11256_s21 + $0x698] sm:$0xff]  ;;  %v9361_v41 = vpack.c.bf16 %v1457_v31, %v1456_v29  ;;  %v598_v54 = vcombine.high %v11558_v38, %v11558_v38  ;;  %v9345_v29 = vpack.c.bf16 %v1433_v20, %v1432_v19 }
  0x95   : > { %9312 = vmatprep.subr.bf16.mxu1 %v9311_v37  ;;  %v262_v37 = vadd.s32 1664, %v11325_v4  ;;  %v9331_v42 = vpack.c.bf16 %v1443_v33, %v1442_v32  ;;  %v1434_v32 = vld [vmem:[%s11256_s21 + $0x650] sm:$0xff]  ;;  %v1435_v33 = vld [vmem:[%s11256_s21 + $0x658] sm:$0xff] }
  0x96   : > { %v1538_v20 = vld [vmem:[%s11256_s21 + $0x990] sm:$0xff] }
  0x97   : > { %9282 = vmatpush3.bf16.msra.mxu0 %v9281_v44  ;;  %v1426_v44 = vld [vmem:[%s11256_s21 + $0x610] sm:$0xff]  ;;  %vm376_vm13 = vcmp.lt.s32.totalorder %v262_v37, %v11339_v21  ;;  %v1467_v37 = vld [vmem:[%s11256_s21 + $0x758] sm:$0xff] }
  0x98   : > { %9314 = vmatpush3.bf16.msra.mxu1 %v9313_v45  ;;  %9284 = vmatprep.subr.bf16.mxu0 %v9283_v46  ;;  %v1427_v45 = vld [vmem:[%s11256_s21 + $0x618] sm:$0xff]  ;;  %v1458_v46 = vld [vmem:[%s11256_s21 + $0x710] sm:$0xff] }
  0x99   : > { %9316 = vmatprep.subr.bf16.mxu1 %v9315_v50  ;;  %v1445_v50 = vld [vmem:[%s11256_s21 + $0x6a8] sm:$0xff]  ;;  %v9333_v56 = vpack.c.bf16 %v1427_v45, %v1426_v44  ;;  %v9349_v44 = vpack.c.bf16 %v1435_v33, %v1434_v32  ;;  %v9381_v45 = vpack.c.bf16 %v1467_v37, %v1466_v35  ;;  %v1523_v33 = vld [vmem:[%s11256_s21 + $0x918] sm:$0xff]  ;;  %v1508_v35 = vld [vmem:[%s11256_s21 + $0x8a0] sm:$0xff] }
  0x9b   : > { %9286 = vmatpush3.bf16.msra.mxu0 %v9285_v57  ;;  %v9335_v57 = vpack.c.bf16 %v1445_v50, %v1444_v49  ;;  %v1468_v49 = vld [vmem:[%s11256_s21 + $0x760] sm:$0xff] }
  0x9c   : > { %9318 = vmatpush3.bf16.msra.mxu1 %v9317_v58  ;;  %9288 = vmatprep.subr.bf16.mxu0 %v9287_v60  ;;  %v1428_v58 = vld [vmem:[%s11256_s21 + $0x620] sm:$0xff]  ;;  %v1429_v60 = vld [vmem:[%s11256_s21 + $0x628] sm:$0xff] }
  0x9d   : > { %9320 = vmatprep.subr.bf16.mxu1 %v9319_v0  ;;  %v1446_v0 = vld [vmem:[%s11256_s21 + $0x6b0] sm:$0xff]  ;;  %v9337_v3 = vpack.c.bf16 %v1429_v60, %v1428_v58  ;;  %v9355_v60 = vpack.c.bf16 %v1455_v53, %v1454_v52  ;;  %v1543_v52 = vld [vmem:[%s11256_s21 + $0x9b8] sm:$0xff] }
  0x9f   : > { %9290 = vmatpush3.bf16.msra.mxu0 %v9289_v7  ;;  %v1430_v7 = vld [vmem:[%s11256_s21 + $0x630] sm:$0xff] }
  0xa0   : > { %9322 = vmatpush3.bf16.msra.mxu1 %v9321_v9  ;;  %9292 = vmatprep.subr.bf16.mxu0 %v9291_v10  ;;  %v1462_v9 = vld [vmem:[%s11256_s21 + $0x730] sm:$0xff]  ;;  %v9371_v10 = vpack.c.bf16 %v1479_v2, %v1478_v1  ;;  %v9341_v16 = vpack.c.bf16 %v1431_v8, %v1430_v7  ;;  %v1504_v1 = vld [vmem:[%s11256_s21 + $0x880] sm:$0xff]  ;;  %v1505_v2 = vld [vmem:[%s11256_s21 + $0x888] sm:$0xff]  ;;  %v261_v8 = vadd.s32 1536, %v11325_v4 }
  0xa1   : > { %9324 = vmatprep.subr.bf16.mxu1 %v9323_v13  ;;  %v1480_v13 = vld [vmem:[%s11256_s21 + $0x7c0] sm:$0xff]  ;;  %v9373_v17 = vpack.c.bf16 %v1463_v11, %v1462_v9 }
  0xa2   : > { %v9375_v23 = vpack.c.bf16 %v1481_v14, %v1480_v13  ;;  %v1488_v11 = vld [vmem:[%s11256_s21 + $0x800] sm:$0xff]  ;;  %vm375_vm15 = vcmp.lt.s32.totalorder %v261_v8, %v11339_v21 }
  0xa3   : > { %9294 = vmatpush3.bf16.msra.mxu0 %v9293_v22  ;;  %v1464_v22 = vld [vmem:[%s11256_s21 + $0x740] sm:$0xff] }
  0xa4   : > { %9326 = vmatpush3.bf16.msra.mxu1 %v9325_v24  ;;  %9328 = vmatprep.subr.bf16.mxu0 %v9327_v25  ;;  %v1465_v24 = vld [vmem:[%s11256_s21 + $0x748] sm:$0xff]  ;;  %v1450_v25 = vld [vmem:[%s11256_s21 + $0x6d0] sm:$0xff]  ;;  %v1520_v13 = vld [vmem:[%s11256_s21 + $0x900] sm:$0xff] }
  0xa5   : > { %9360 = vmatprep.subr.bf16.mxu1 %v9359_v30  ;;  %v9377_v30 = vpack.c.bf16 %v1465_v24, %v1464_v22  ;;  %v9347_v31 = vpack.c.bf16 %v1451_v26, %v1450_v25  ;;  %v1539_v22 = vld [vmem:[%s11256_s21 + $0x998] sm:$0xff]  ;;  %v9393_v25 = vpack.c.bf16 %v1489_v12, %v1488_v11  ;;  %v268_v26 = vadd.s32 2432, %v11325_v4  ;;  %v1546_v12 = vld [vmem:[%s11256_s21 + $0x9d0] sm:$0xff] }
  0xa6   : > { %7068 = vmatmul.mubr.msk.f32.vlgmr.msra.gmra.mrb[4].mxu0 %vm371_vm11, %v11468_v59  ;;  %v9365_v59 = vpack.c.bf16 %v1459_v48, %v1458_v46  ;;  %v1437_v48 = vld [vmem:[%s11256_s21 + $0x668] sm:$0xff]  ;;  %v9427_v32 = vpack.c.bf16 %v1539_v22, %v1538_v20  ;;  %v1515_v11 = vld [vmem:[%s11256_s21 + $0x8d8] sm:$0xff]  ;;  %v1530_v20 = vld [vmem:[%s11256_s21 + $0x950] sm:$0xff]  ;;  %v9443_v22 = vpack.c.bf16 %v1547_v55, %v1546_v12 }
  0xa7   : > { %9330 = vmatpush3.bf16.msra.mxu0 %v9329_v39  ;;  %7070 = vmatmul.mubr.msk.f32.vlgmr.msra.gmra.mrb[4].mxu1 %vm373_vm12, %v11482_v5  ;;  %v1447_v5 = vld [vmem:[%s11256_s21 + $0x6b8] sm:$0xff]  ;;  %v1452_v39 = vld [vmem:[%s11256_s21 + $0x6e0] sm:$0xff]  ;;  %vm382_vm2 = vcmp.lt.s32.totalorder %v268_v26, %v11339_v21  ;;  %v1517_v26 = vld [vmem:[%s11256_s21 + $0x8e8] sm:$0xff] }
  0xa8   : > { %9362 = vmatpush3.bf16.msra.mxu1 %v9361_v41  ;;  %9332 = vmatprep.subr.bf16.mxu0 %v9331_v42  ;;  %v9339_v6 = vpack.c.bf16 %v1447_v5, %v1446_v0  ;;  %v1484_v41 = vld [vmem:[%s11256_s21 + $0x7e0] sm:$0xff]  ;;  %v1485_v42 = vld [vmem:[%s11256_s21 + $0x7e8] sm:$0xff]  ;;  %v9351_v46 = vpack.c.bf16 %v1453_v40, %v1452_v39  ;;  %v1471_v5 = vld [vmem:[%s11256_s21 + $0x778] sm:$0xff] }
  0xa9   : > { %9364 = vmatprep.subr.bf16.mxu1 %v9363_v47  ;;  %7071 = vmatprep.mubr.msk.f32.mxu0 %vm376_vm13, %v597_v51  ;;  %v1436_v47 = vld [vmem:[%s11256_s21 + $0x660] sm:$0xff]  ;;  %v9383_v50 = vpack.c.bf16 %v1485_v42, %v1484_v41  ;;  %v1469_v51 = vld [vmem:[%s11256_s21 + $0x768] sm:$0xff]  ;;  %v9389_v9 = vpack.c.bf16 %v1471_v5, %v1470_v63 }
  0xaa   : > { %7073 = vmatprep.mubr.msk.f32.mxu1 %vm378_vm14, %v598_v54  ;;  %v1486_v54 = vld [vmem:[%s11256_s21 + $0x7f0] sm:$0xff]  ;;  %v9385_v58 = vpack.c.bf16 %v1469_v51, %v1468_v49  ;;  %v1540_v39 = vld [vmem:[%s11256_s21 + $0x9a0] sm:$0xff]  ;;  %v1541_v40 = vld [vmem:[%s11256_s21 + $0x9a8] sm:$0xff] }
  0xab   : > { %9334 = vmatpush3.bf16.msra.mxu0 %v9333_v56  ;;  %v1487_v56 = vld [vmem:[%s11256_s21 + $0x7f8] sm:$0xff]  ;;  %v1525_v49 = vld [vmem:[%s11256_s21 + $0x928] sm:$0xff]  ;;  %v1542_v51 = vld [vmem:[%s11256_s21 + $0x9b0] sm:$0xff] }
  0xac   : > { %9366 = vmatpush3.bf16.msra.mxu1 %v9365_v59  ;;  %9336 = vmatprep.subr.bf16.mxu0 %v9335_v57  ;;  %v9353_v59 = vpack.c.bf16 %v1437_v48, %v1436_v47  ;;  %v479_v57 = vld [vmem:[%s11277_s28 + $0x20] sm:$0xff]  ;;  %v9387_v0 = vpack.c.bf16 %v1487_v56, %v1486_v54  ;;  %v9431_v48 = vpack.c.bf16 %v1541_v40, %v1540_v39  ;;  %v1513_v63 = vld [vmem:[%s11256_s21 + $0x8c8] sm:$0xff]  ;;  %v1518_v39 = vld [vmem:[%s11256_s21 + $0x8f0] sm:$0xff] }
  0xad   : > { %9368 = vmatprep.subr.bf16.mxu1 %v9367_v62  ;;  %v1439_v62 = vld [vmem:[%s11256_s21 + $0x678] sm:$0xff]  ;;  %v11645_v19 = vrot.slane %v479_v57, %v11333_v15  ;;  %v1524_v47 = vld [vmem:[%s11256_s21 + $0x920] sm:$0xff]  ;;  %v1545_v5 = vld [vmem:[%s11256_s21 + $0x9c8] sm:$0xff] }
  0xae   : > { %v9357_v7 = vpack.c.bf16 %v1439_v62, %v1438_v61  ;;  %v9433_v54 = vpack.c.bf16 %v1525_v49, %v1524_v47  ;;  %v1527_v61 = vld [vmem:[%s11256_s21 + $0x938] sm:$0xff]  ;;  %v1512_v62 = vld [vmem:[%s11256_s21 + $0x8c0] sm:$0xff]  ;;  %v1502_v47 = vld [vmem:[%s11256_s21 + $0x870] sm:$0xff] }
  0xaf   : > { %9338 = vmatpush3.bf16.msra.mxu0 %v9337_v3  ;;  %v1536_v3 = vld [vmem:[%s11256_s21 + $0x980] sm:$0xff]  ;;  %v614_v37 = vcombine.high %v11645_v19, %v11645_v19  ;;  %v1519_v40 = vld [vmem:[%s11256_s21 + $0x8f8] sm:$0xff]  ;;  %v1534_v49 = vld [vmem:[%s11256_s21 + $0x970] sm:$0xff] }
  0xb0   : > { %9370 = vmatpush3.bf16.msra.mxu1 %v9369_v43  ;;  %9340 = vmatprep.subr.bf16.mxu0 %v9339_v6  ;;  %v1537_v43 = vld [vmem:[%s11256_s21 + $0x988] sm:$0xff]  ;;  %v599_v6 = vcombine.high %v479_v57, %v479_v57  ;;  %v1495_v57 = vld [vmem:[%s11256_s21 + $0x838] sm:$0xff] }
  0xb1   : > { %9372 = vmatprep.subr.bf16.mxu1 %v9371_v10  ;;  %v9391_v10 = vpack.c.bf16 %v1505_v2, %v1504_v1  ;;  %v9423_v14 = vpack.c.bf16 %v1537_v43, %v1536_v3  ;;  %v9407_v3 = vpack.c.bf16 %v1513_v63, %v1512_v62  ;;  %v1496_v43 = vld [vmem:[%s11256_s21 + $0x840] sm:$0xff]  ;;  %v1553_v62 = vld [vmem:[%s11256_s21 + $0xa08] sm:$0xff]  ;;  %v267_v63 = vadd.s32 2304, %v11325_v4 }
  0xb2   : > { %v11651_v24 = vrot.slane %v599_v6, %v11333_v15  ;;  %v1497_v6 = vld [vmem:[%s11256_s21 + $0x848] sm:$0xff] }
  0xb3   : > { %9342 = vmatpush3.bf16.msra.mxu0 %v9341_v16  ;;  %v1521_v16 = vld [vmem:[%s11256_s21 + $0x908] sm:$0xff]  ;;  %vm381_vm4 = vcmp.lt.s32.totalorder %v267_v63, %v11339_v21  ;;  %v1611_v63 = vld [vmem:[%s11256_s21 + $0xbd8] sm:$0xff] }
  0xb4   : > { %9374 = vmatpush3.bf16.msra.mxu1 %v9373_v17  ;;  %9344 = vmatprep.subr.bf16.mxu0 %v9343_v18  ;;  %v1506_v17 = vld [vmem:[%s11256_s21 + $0x890] sm:$0xff]  ;;  %v1507_v18 = vld [vmem:[%s11256_s21 + $0x898] sm:$0xff]  ;;  %v9425_v27 = vpack.c.bf16 %v1521_v16, %v1520_v13  ;;  %v615_v41 = vcombine.high %v11651_v24, %v11651_v24  ;;  %v9409_v13 = vpack.c.bf16 %v1497_v6, %v1496_v43 }
  0xb5   : > { %9376 = vmatprep.subr.bf16.mxu1 %v9375_v23  ;;  %v266_v23 = vadd.s32 2176, %v11325_v4  ;;  %v9395_v28 = vpack.c.bf16 %v1507_v18, %v1506_v17  ;;  %v1498_v17 = vld [vmem:[%s11256_s21 + $0x850] sm:$0xff]  ;;  %v1499_v18 = vld [vmem:[%s11256_s21 + $0x858] sm:$0xff] }
  0xb6   : > { %v1602_v6 = vld [vmem:[%s11256_s21 + $0xb90] sm:$0xff] }
  0xb7   : > { %9346 = vmatpush3.bf16.msra.mxu0 %v9345_v29  ;;  %v1490_v29 = vld [vmem:[%s11256_s21 + $0x810] sm:$0xff]  ;;  %vm380_vm1 = vcmp.lt.s32.totalorder %v266_v23, %v11339_v21  ;;  %v1531_v23 = vld [vmem:[%s11256_s21 + $0x958] sm:$0xff] }
  0xb8   : > { %9378 = vmatpush3.bf16.msra.mxu1 %v9377_v30  ;;  %9348 = vmatprep.subr.bf16.mxu0 %v9347_v31  ;;  %v1491_v30 = vld [vmem:[%s11256_s21 + $0x818] sm:$0xff]  ;;  %v1522_v31 = vld [vmem:[%s11256_s21 + $0x910] sm:$0xff] }
  0xb9   : > { %9380 = vmatprep.subr.bf16.mxu1 %v9379_v36  ;;  %v1509_v36 = vld [vmem:[%s11256_s21 + $0x8a8] sm:$0xff]  ;;  %v9397_v42 = vpack.c.bf16 %v1491_v30, %v1490_v29  ;;  %v9413_v29 = vpack.c.bf16 %v1499_v18, %v1498_v17  ;;  %v9445_v30 = vpack.c.bf16 %v1531_v23, %v1530_v20  ;;  %v1587_v18 = vld [vmem:[%s11256_s21 + $0xb18] sm:$0xff]  ;;  %v1572_v20 = vld [vmem:[%s11256_s21 + $0xaa0] sm:$0xff] }
  0xbb   : > { %9350 = vmatpush3.bf16.msra.mxu0 %v9349_v44  ;;  %v9399_v44 = vpack.c.bf16 %v1509_v36, %v1508_v35  ;;  %v1532_v35 = vld [vmem:[%s11256_s21 + $0x960] sm:$0xff] }
  0xbc   : > { %9382 = vmatpush3.bf16.msra.mxu1 %v9381_v45  ;;  %9352 = vmatprep.subr.bf16.mxu0 %v9351_v46  ;;  %v1492_v45 = vld [vmem:[%s11256_s21 + $0x820] sm:$0xff]  ;;  %v1493_v46 = vld [vmem:[%s11256_s21 + $0x828] sm:$0xff] }
  0xbd   : > { %9384 = vmatprep.subr.bf16.mxu1 %v9383_v50  ;;  %v1510_v50 = vld [vmem:[%s11256_s21 + $0x8b0] sm:$0xff]  ;;  %v9401_v53 = vpack.c.bf16 %v1493_v46, %v1492_v45  ;;  %v9419_v46 = vpack.c.bf16 %v1519_v40, %v1518_v39  ;;  %v1607_v39 = vld [vmem:[%s11256_s21 + $0xbb8] sm:$0xff] }
  0xbf   : > { %9354 = vmatpush3.bf16.msra.mxu0 %v9353_v59  ;;  %v1494_v59 = vld [vmem:[%s11256_s21 + $0x830] sm:$0xff] }
  0xc0   : > { %9386 = vmatpush3.bf16.msra.mxu1 %v9385_v58  ;;  %9356 = vmatprep.subr.bf16.mxu0 %v9355_v60  ;;  %v1526_v58 = vld [vmem:[%s11256_s21 + $0x930] sm:$0xff]  ;;  %v9435_v60 = vpack.c.bf16 %v1543_v52, %v1542_v51  ;;  %v9405_v1 = vpack.c.bf16 %v1495_v57, %v1494_v59  ;;  %v1568_v51 = vld [vmem:[%s11256_s21 + $0xa80] sm:$0xff]  ;;  %v1569_v52 = vld [vmem:[%s11256_s21 + $0xa88] sm:$0xff]  ;;  %v265_v57 = vadd.s32 2048, %v11325_v4 }
  0xc1   : > { %9388 = vmatprep.subr.bf16.mxu1 %v9387_v0  ;;  %v1544_v0 = vld [vmem:[%s11256_s21 + $0x9c0] sm:$0xff]  ;;  %v9437_v2 = vpack.c.bf16 %v1527_v61, %v1526_v58 }
  0xc2   : > { %v9439_v8 = vpack.c.bf16 %v1545_v5, %v1544_v0  ;;  %v1552_v61 = vld [vmem:[%s11256_s21 + $0xa00] sm:$0xff]  ;;  %vm379_vm3 = vcmp.lt.s32.totalorder %v265_v57, %v11339_v21 }
  0xc3   : > { %9358 = vmatpush3.bf16.msra.mxu0 %v9357_v7  ;;  %v1528_v7 = vld [vmem:[%s11256_s21 + $0x940] sm:$0xff] }
  0xc4   : > { %9390 = vmatpush3.bf16.msra.mxu1 %v9389_v9  ;;  %9392 = vmatprep.subr.bf16.mxu0 %v9391_v10  ;;  %v1529_v9 = vld [vmem:[%s11256_s21 + $0x948] sm:$0xff]  ;;  %v1514_v10 = vld [vmem:[%s11256_s21 + $0x8d0] sm:$0xff]  ;;  %v1584_v0 = vld [vmem:[%s11256_s21 + $0xb00] sm:$0xff] }
  0xc5   : > { %9424 = vmatprep.subr.bf16.mxu1 %v9423_v14  ;;  %v9441_v14 = vpack.c.bf16 %v1529_v9, %v1528_v7  ;;  %v9411_v16 = vpack.c.bf16 %v1515_v11, %v1514_v10  ;;  %v1603_v7 = vld [vmem:[%s11256_s21 + $0xb98] sm:$0xff]  ;;  %v9457_v10 = vpack.c.bf16 %v1553_v62, %v1552_v61  ;;  %v272_v11 = vadd.s32 2944, %v11325_v4  ;;  %v1610_v62 = vld [vmem:[%s11256_s21 + $0xbd0] sm:$0xff] }
  0xc6   : > { %7072 = vmatmul.mubr.msk.f32.vlgmr.msra.gmra.mrb[6].mxu0 %vm375_vm15, %v11552_v34  ;;  %v9429_v34 = vpack.c.bf16 %v1523_v33, %v1522_v31  ;;  %v1501_v33 = vld [vmem:[%s11256_s21 + $0x868] sm:$0xff]  ;;  %v9491_v17 = vpack.c.bf16 %v1603_v7, %v1602_v6  ;;  %v1579_v61 = vld [vmem:[%s11256_s21 + $0xad8] sm:$0xff]  ;;  %v1594_v6 = vld [vmem:[%s11256_s21 + $0xb50] sm:$0xff]  ;;  %v9507_v7 = vpack.c.bf16 %v1611_v63, %v1610_v62 }
  0xc7   : > { %9394 = vmatpush3.bf16.msra.mxu0 %v9393_v25  ;;  %7074 = vmatmul.mubr.msk.f32.vlgmr.msra.gmra.mrb[6].mxu1 %vm377_vm0, %v11558_v38  ;;  %v1511_v38 = vld [vmem:[%s11256_s21 + $0x8b8] sm:$0xff]  ;;  %v1516_v25 = vld [vmem:[%s11256_s21 + $0x8e0] sm:$0xff]  ;;  %vm386_vm6 = vcmp.lt.s32.totalorder %v272_v11, %v11339_v21  ;;  %v1581_v11 = vld [vmem:[%s11256_s21 + $0xae8] sm:$0xff] }
  0xc8   : > { %9426 = vmatpush3.bf16.msra.mxu1 %v9425_v27  ;;  %9396 = vmatprep.subr.bf16.mxu0 %v9395_v28  ;;  %v9403_v56 = vpack.c.bf16 %v1511_v38, %v1510_v50  ;;  %v1548_v27 = vld [vmem:[%s11256_s21 + $0x9e0] sm:$0xff]  ;;  %v1549_v28 = vld [vmem:[%s11256_s21 + $0x9e8] sm:$0xff]  ;;  %v9415_v31 = vpack.c.bf16 %v1517_v26, %v1516_v25  ;;  %v1535_v38 = vld [vmem:[%s11256_s21 + $0x978] sm:$0xff] }
  0xc9   : > { %9428 = vmatprep.subr.bf16.mxu1 %v9427_v32  ;;  %7075 = vmatprep.mubr.msk.f32.mxu0 %vm380_vm1, %v614_v37  ;;  %v1500_v32 = vld [vmem:[%s11256_s21 + $0x860] sm:$0xff]  ;;  %v9447_v36 = vpack.c.bf16 %v1549_v28, %v1548_v27  ;;  %v1533_v37 = vld [vmem:[%s11256_s21 + $0x968] sm:$0xff]  ;;  %v9453_v58 = vpack.c.bf16 %v1535_v38, %v1534_v49 }
  0xca   : > { %7077 = vmatprep.mubr.msk.f32.mxu1 %vm382_vm2, %v615_v41  ;;  %v1550_v41 = vld [vmem:[%s11256_s21 + $0x9f0] sm:$0xff]  ;;  %v9449_v45 = vpack.c.bf16 %v1533_v37, %v1532_v35  ;;  %v1604_v25 = vld [vmem:[%s11256_s21 + $0xba0] sm:$0xff]  ;;  %v1605_v26 = vld [vmem:[%s11256_s21 + $0xba8] sm:$0xff] }
  0xcb   : > { %9398 = vmatpush3.bf16.msra.mxu0 %v9397_v42  ;;  %v1551_v42 = vld [vmem:[%s11256_s21 + $0x9f8] sm:$0xff]  ;;  %v1589_v35 = vld [vmem:[%s11256_s21 + $0xb28] sm:$0xff]  ;;  %v1606_v37 = vld [vmem:[%s11256_s21 + $0xbb0] sm:$0xff] }
  0xcc   : > { %9430 = vmatpush3.bf16.msra.mxu1 %v9429_v34  ;;  %9400 = vmatprep.subr.bf16.mxu0 %v9399_v44  ;;  %v9417_v34 = vpack.c.bf16 %v1501_v33, %v1500_v32  ;;  %v480_v44 = vld [vmem:[%s11277_s28 + $0x28] sm:$0xff]  ;;  %v9451_v50 = vpack.c.bf16 %v1551_v42, %v1550_v41  ;;  %v9495_v33 = vpack.c.bf16 %v1605_v26, %v1604_v25  ;;  %v1582_v25 = vld [vmem:[%s11256_s21 + $0xaf0] sm:$0xff]  ;;  %v1583_v26 = vld [vmem:[%s11256_s21 + $0xaf8] sm:$0xff] }
  0xcd   : > { %9432 = vmatprep.subr.bf16.mxu1 %v9431_v48  ;;  %v1503_v48 = vld [vmem:[%s11256_s21 + $0x878] sm:$0xff]  ;;  %v11738_v43 = vrot.slane %v480_v44, %v11333_v15  ;;  %v1588_v32 = vld [vmem:[%s11256_s21 + $0xb20] sm:$0xff]  ;;  %v1577_v49 = vld [vmem:[%s11256_s21 + $0xac8] sm:$0xff] }
  0xce   : > { %v9421_v59 = vpack.c.bf16 %v1503_v48, %v1502_v47  ;;  %v9497_v41 = vpack.c.bf16 %v1589_v35, %v1588_v32  ;;  %v1591_v47 = vld [vmem:[%s11256_s21 + $0xb38] sm:$0xff]  ;;  %v1576_v48 = vld [vmem:[%s11256_s21 + $0xac0] sm:$0xff]  ;;  %v1609_v38 = vld [vmem:[%s11256_s21 + $0xbc8] sm:$0xff] }
  0xcf   : > { %9402 = vmatpush3.bf16.msra.mxu0 %v9401_v53  ;;  %v1600_v53 = vld [vmem:[%s11256_s21 + $0xb80] sm:$0xff]  ;;  %v631_v23 = vcombine.high %v11738_v43, %v11738_v43  ;;  %v1566_v32 = vld [vmem:[%s11256_s21 + $0xa70] sm:$0xff] }
  0xd0   : > { %9434 = vmatpush3.bf16.msra.mxu1 %v9433_v54  ;;  %9404 = vmatprep.subr.bf16.mxu0 %v9403_v56  ;;  %v1601_v54 = vld [vmem:[%s11256_s21 + $0xb88] sm:$0xff]  ;;  %v616_v56 = vcombine.high %v480_v44, %v480_v44  ;;  %v1559_v44 = vld [vmem:[%s11256_s21 + $0xa38] sm:$0xff]  ;;  %v1598_v35 = vld [vmem:[%s11256_s21 + $0xb70] sm:$0xff] }
  0xd1   : > { %9436 = vmatprep.subr.bf16.mxu1 %v9435_v60  ;;  %v9455_v60 = vpack.c.bf16 %v1569_v52, %v1568_v51  ;;  %v9487_v5 = vpack.c.bf16 %v1601_v54, %v1600_v53  ;;  %v9471_v53 = vpack.c.bf16 %v1577_v49, %v1576_v48  ;;  %v1560_v54 = vld [vmem:[%s11256_s21 + $0xa40] sm:$0xff]  ;;  %v1617_v48 = vld [vmem:[%s11256_s21 + $0xc08] sm:$0xff]  ;;  %v271_v49 = vadd.s32 2816, %v11325_v4 }
  0xd2   : > { %v11744_v9 = vrot.slane %v616_v56, %v11333_v15  ;;  %v1561_v56 = vld [vmem:[%s11256_s21 + $0xa48] sm:$0xff] }
  0xd3   : > { %9406 = vmatpush3.bf16.msra.mxu0 %v9405_v1  ;;  %v1585_v1 = vld [vmem:[%s11256_s21 + $0xb08] sm:$0xff]  ;;  %vm385_vm8 = vcmp.lt.s32.totalorder %v271_v49, %v11339_v21  ;;  %v1675_v49 = vld [vmem:[%s11256_s21 + $0xdd8] sm:$0xff] }
  0xd4   : > { %9438 = vmatpush3.bf16.msra.mxu1 %v9437_v2  ;;  %9408 = vmatprep.subr.bf16.mxu0 %v9407_v3  ;;  %v1570_v2 = vld [vmem:[%s11256_s21 + $0xa90] sm:$0xff]  ;;  %v1571_v3 = vld [vmem:[%s11256_s21 + $0xa98] sm:$0xff]  ;;  %v9489_v12 = vpack.c.bf16 %v1585_v1, %v1584_v0  ;;  %v632_v27 = vcombine.high %v11744_v9, %v11744_v9  ;;  %v9473_v0 = vpack.c.bf16 %v1561_v56, %v1560_v54 }
  0xd5   : > { %9440 = vmatprep.subr.bf16.mxu1 %v9439_v8  ;;  %v270_v8 = vadd.s32 2688, %v11325_v4  ;;  %v9459_v55 = vpack.c.bf16 %v1571_v3, %v1570_v2  ;;  %v1562_v2 = vld [vmem:[%s11256_s21 + $0xa50] sm:$0xff]  ;;  %v1563_v3 = vld [vmem:[%s11256_s21 + $0xa58] sm:$0xff] }
  0xd6   : > { %v1666_v56 = vld [vmem:[%s11256_s21 + $0xd90] sm:$0xff] }
  0xd7   : > { %9410 = vmatpush3.bf16.msra.mxu0 %v9409_v13  ;;  %v1554_v13 = vld [vmem:[%s11256_s21 + $0xa10] sm:$0xff]  ;;  %vm384_vm5 = vcmp.lt.s32.totalorder %v270_v8, %v11339_v21  ;;  %v1595_v8 = vld [vmem:[%s11256_s21 + $0xb58] sm:$0xff] }
  0xd8   : > { %9442 = vmatpush3.bf16.msra.mxu1 %v9441_v14  ;;  %9412 = vmatprep.subr.bf16.mxu0 %v9411_v16  ;;  %v1555_v14 = vld [vmem:[%s11256_s21 + $0xa18] sm:$0xff]  ;;  %v1586_v16 = vld [vmem:[%s11256_s21 + $0xb10] sm:$0xff] }
  0xd9   : > { %9444 = vmatprep.subr.bf16.mxu1 %v9443_v22  ;;  %v1573_v22 = vld [vmem:[%s11256_s21 + $0xaa8] sm:$0xff]  ;;  %v9461_v28 = vpack.c.bf16 %v1555_v14, %v1554_v13  ;;  %v9477_v13 = vpack.c.bf16 %v1563_v3, %v1562_v2  ;;  %v9509_v14 = vpack.c.bf16 %v1595_v8, %v1594_v6  ;;  %v1651_v3 = vld [vmem:[%s11256_s21 + $0xd18] sm:$0xff]  ;;  %v1636_v6 = vld [vmem:[%s11256_s21 + $0xca0] sm:$0xff] }
  0xdb   : > { %9414 = vmatpush3.bf16.msra.mxu0 %v9413_v29  ;;  %v9463_v29 = vpack.c.bf16 %v1573_v22, %v1572_v20  ;;  %v1596_v20 = vld [vmem:[%s11256_s21 + $0xb60] sm:$0xff] }
  0xdc   : > { %9446 = vmatpush3.bf16.msra.mxu1 %v9445_v30  ;;  %9416 = vmatprep.subr.bf16.mxu0 %v9415_v31  ;;  %v1556_v30 = vld [vmem:[%s11256_s21 + $0xa20] sm:$0xff]  ;;  %v1557_v31 = vld [vmem:[%s11256_s21 + $0xa28] sm:$0xff] }
  0xdd   : > { %9448 = vmatprep.subr.bf16.mxu1 %v9447_v36  ;;  %v1574_v36 = vld [vmem:[%s11256_s21 + $0xab0] sm:$0xff]  ;;  %v9465_v40 = vpack.c.bf16 %v1557_v31, %v1556_v30  ;;  %v9483_v31 = vpack.c.bf16 %v1583_v26, %v1582_v25  ;;  %v1671_v25 = vld [vmem:[%s11256_s21 + $0xdb8] sm:$0xff] }
  0xdf   : > { %9418 = vmatpush3.bf16.msra.mxu0 %v9417_v34  ;;  %v1558_v34 = vld [vmem:[%s11256_s21 + $0xa30] sm:$0xff] }
  0xe0   : > { %9450 = vmatpush3.bf16.msra.mxu1 %v9449_v45  ;;  %9420 = vmatprep.subr.bf16.mxu0 %v9419_v46  ;;  %v1590_v45 = vld [vmem:[%s11256_s21 + $0xb30] sm:$0xff]  ;;  %v9499_v46 = vpack.c.bf16 %v1607_v39, %v1606_v37  ;;  %v9469_v51 = vpack.c.bf16 %v1559_v44, %v1558_v34  ;;  %v1632_v37 = vld [vmem:[%s11256_s21 + $0xc80] sm:$0xff]  ;;  %v1633_v39 = vld [vmem:[%s11256_s21 + $0xc88] sm:$0xff]  ;;  %v269_v44 = vadd.s32 2560, %v11325_v4 }
  0xe1   : > { %9452 = vmatprep.subr.bf16.mxu1 %v9451_v50  ;;  %v1608_v50 = vld [vmem:[%s11256_s21 + $0xbc0] sm:$0xff]  ;;  %v9501_v52 = vpack.c.bf16 %v1591_v47, %v1590_v45 }
  0xe2   : > { %v9503_v57 = vpack.c.bf16 %v1609_v38, %v1608_v50  ;;  %v1616_v47 = vld [vmem:[%s11256_s21 + $0xc00] sm:$0xff]  ;;  %vm383_vm7 = vcmp.lt.s32.totalorder %v269_v44, %v11339_v21 }
  0xe3   : > { %9422 = vmatpush3.bf16.msra.mxu0 %v9421_v59  ;;  %v1592_v59 = vld [vmem:[%s11256_s21 + $0xb40] sm:$0xff] }
  0xe4   : > { %9454 = vmatpush3.bf16.msra.mxu1 %v9453_v58  ;;  %9456 = vmatprep.subr.bf16.mxu0 %v9455_v60  ;;  %v1593_v58 = vld [vmem:[%s11256_s21 + $0xb48] sm:$0xff]  ;;  %v1578_v60 = vld [vmem:[%s11256_s21 + $0xad0] sm:$0xff]  ;;  %v1648_v50 = vld [vmem:[%s11256_s21 + $0xd00] sm:$0xff] }
  0xe5   : > { %9488 = vmatprep.subr.bf16.mxu1 %v9487_v5  ;;  %v9505_v5 = vpack.c.bf16 %v1593_v58, %v1592_v59  ;;  %v9475_v1 = vpack.c.bf16 %v1579_v61, %v1578_v60  ;;  %v1667_v59 = vld [vmem:[%s11256_s21 + $0xd98] sm:$0xff]  ;;  %v9521_v60 = vpack.c.bf16 %v1617_v48, %v1616_v47  ;;  %v276_v61 = vadd.s32 3456, %v11325_v4  ;;  %v1674_v48 = vld [vmem:[%s11256_s21 + $0xdd0] sm:$0xff] }
  0xe6   : > { %7076 = vmatmul.mubr.msk.f32.vlgmr.msra.gmra.mrb[8].mxu0 %vm379_vm3, %v11645_v19  ;;  %v9493_v19 = vpack.c.bf16 %v1587_v18, %v1586_v16  ;;  %v1565_v18 = vld [vmem:[%s11256_s21 + $0xa68] sm:$0xff]  ;;  %v9555_v2 = vpack.c.bf16 %v1667_v59, %v1666_v56  ;;  %v1643_v47 = vld [vmem:[%s11256_s21 + $0xcd8] sm:$0xff]  ;;  %v1658_v56 = vld [vmem:[%s11256_s21 + $0xd50] sm:$0xff]  ;;  %v9571_v59 = vpack.c.bf16 %v1675_v49, %v1674_v48 }
  0xe7   : > { %9458 = vmatpush3.bf16.msra.mxu0 %v9457_v10  ;;  %7078 = vmatmul.mubr.msk.f32.vlgmr.msra.gmra.mrb[8].mxu1 %vm381_vm4, %v11651_v24  ;;  %v1575_v24 = vld [vmem:[%s11256_s21 + $0xab8] sm:$0xff]  ;;  %v1580_v10 = vld [vmem:[%s11256_s21 + $0xae0] sm:$0xff]  ;;  %vm390_vm10 = vcmp.lt.s32.totalorder %v276_v61, %v11339_v21  ;;  %v1645_v61 = vld [vmem:[%s11256_s21 + $0xce8] sm:$0xff] }
  0xe8   : > { %9490 = vmatpush3.bf16.msra.mxu1 %v9489_v12  ;;  %9460 = vmatprep.subr.bf16.mxu0 %v9459_v55  ;;  %v9467_v42 = vpack.c.bf16 %v1575_v24, %v1574_v36  ;;  %v1612_v12 = vld [vmem:[%s11256_s21 + $0xbe0] sm:$0xff]  ;;  %v1613_v55 = vld [vmem:[%s11256_s21 + $0xbe8] sm:$0xff]  ;;  %v9479_v16 = vpack.c.bf16 %v1581_v11, %v1580_v10  ;;  %v1599_v24 = vld [vmem:[%s11256_s21 + $0xb78] sm:$0xff] }
  0xe9   : > { %9492 = vmatprep.subr.bf16.mxu1 %v9491_v17  ;;  %7079 = vmatprep.mubr.msk.f32.mxu0 %vm384_vm5, %v631_v23  ;;  %v1564_v17 = vld [vmem:[%s11256_s21 + $0xa60] sm:$0xff]  ;;  %v9511_v22 = vpack.c.bf16 %v1613_v55, %v1612_v12  ;;  %v1597_v23 = vld [vmem:[%s11256_s21 + $0xb68] sm:$0xff]  ;;  %v9517_v45 = vpack.c.bf16 %v1599_v24, %v1598_v35 }
  0xea   : > { %7081 = vmatprep.mubr.msk.f32.mxu1 %vm386_vm6, %v632_v27  ;;  %v1614_v27 = vld [vmem:[%s11256_s21 + $0xbf0] sm:$0xff]  ;;  %v9513_v30 = vpack.c.bf16 %v1597_v23, %v1596_v20  ;;  %v1668_v10 = vld [vmem:[%s11256_s21 + $0xda0] sm:$0xff]  ;;  %v1669_v11 = vld [vmem:[%s11256_s21 + $0xda8] sm:$0xff] }
  0xeb   : > { %9462 = vmatpush3.bf16.msra.mxu0 %v9461_v28  ;;  %v1615_v28 = vld [vmem:[%s11256_s21 + $0xbf8] sm:$0xff]  ;;  %v1653_v20 = vld [vmem:[%s11256_s21 + $0xd28] sm:$0xff]  ;;  %v1670_v23 = vld [vmem:[%s11256_s21 + $0xdb0] sm:$0xff] }
  0xec   : > { %9494 = vmatpush3.bf16.msra.mxu1 %v9493_v19  ;;  %9464 = vmatprep.subr.bf16.mxu0 %v9463_v29  ;;  %v9481_v19 = vpack.c.bf16 %v1565_v18, %v1564_v17  ;;  %v481_v29 = vld [vmem:[%s11277_s28 + $0x30] sm:$0xff]  ;;  %v9515_v36 = vpack.c.bf16 %v1615_v28, %v1614_v27  ;;  %v1652_v17 = vld [vmem:[%s11256_s21 + $0xd20] sm:$0xff]  ;;  %v9559_v18 = vpack.c.bf16 %v1669_v11, %v1668_v10  ;;  %v1647_v11 = vld [vmem:[%s11256_s21 + $0xcf8] sm:$0xff] }
  0xed   : > { %9496 = vmatprep.subr.bf16.mxu1 %v9495_v33  ;;  %v1567_v33 = vld [vmem:[%s11256_s21 + $0xa78] sm:$0xff]  ;;  %v11831_v54 = vrot.slane %v481_v29, %v11333_v15  ;;  %v9561_v27 = vpack.c.bf16 %v1653_v20, %v1652_v17  ;;  %v1641_v35 = vld [vmem:[%s11256_s21 + $0xcc8] sm:$0xff]  ;;  %v1646_v10 = vld [vmem:[%s11256_s21 + $0xcf0] sm:$0xff] }
  0xee   : > { %v9485_v34 = vpack.c.bf16 %v1567_v33, %v1566_v32  ;;  %v1655_v32 = vld [vmem:[%s11256_s21 + $0xd38] sm:$0xff]  ;;  %v1640_v33 = vld [vmem:[%s11256_s21 + $0xcc0] sm:$0xff]  ;;  %v1673_v24 = vld [vmem:[%s11256_s21 + $0xdc8] sm:$0xff] }
  0xef   : > { %9466 = vmatpush3.bf16.msra.mxu0 %v9465_v40  ;;  %v1664_v40 = vld [vmem:[%s11256_s21 + $0xd80] sm:$0xff]  ;;  %v648_v8 = vcombine.high %v11831_v54, %v11831_v54  ;;  %v1630_v17 = vld [vmem:[%s11256_s21 + $0xc70] sm:$0xff] }
  0xf0   : > { %9498 = vmatpush3.bf16.msra.mxu1 %v9497_v41  ;;  %9468 = vmatprep.subr.bf16.mxu0 %v9467_v42  ;;  %v1665_v41 = vld [vmem:[%s11256_s21 + $0xd88] sm:$0xff]  ;;  %v633_v42 = vcombine.high %v481_v29, %v481_v29  ;;  %v1623_v29 = vld [vmem:[%s11256_s21 + $0xc38] sm:$0xff]  ;;  %v1662_v20 = vld [vmem:[%s11256_s21 + $0xd70] sm:$0xff] }
  0xf1   : > { %9500 = vmatprep.subr.bf16.mxu1 %v9499_v46  ;;  %v9519_v46 = vpack.c.bf16 %v1633_v39, %v1632_v37  ;;  %v9551_v38 = vpack.c.bf16 %v1665_v41, %v1664_v40  ;;  %v9535_v40 = vpack.c.bf16 %v1641_v35, %v1640_v33  ;;  %v1624_v41 = vld [vmem:[%s11256_s21 + $0xc40] sm:$0xff]  ;;  %v1681_v33 = vld [vmem:[%s11256_s21 + $0xe08] sm:$0xff]  ;;  %v275_v35 = vadd.s32 3328, %v11325_v4 }
  0xf2   : > { %v11837_v58 = vrot.slane %v633_v42, %v11333_v15  ;;  %v1625_v42 = vld [vmem:[%s11256_s21 + $0xc48] sm:$0xff] }
  0xf3   : > { %9470 = vmatpush3.bf16.msra.mxu0 %v9469_v51  ;;  %v1649_v51 = vld [vmem:[%s11256_s21 + $0xd08] sm:$0xff]  ;;  %vm389_vm12 = vcmp.lt.s32.totalorder %v275_v35, %v11339_v21  ;;  %v1739_v35 = vld [vmem:[%s11256_s21 + $0xfd8] sm:$0xff] }
  0xf4   : > { %9502 = vmatpush3.bf16.msra.mxu1 %v9501_v52  ;;  %9472 = vmatprep.subr.bf16.mxu0 %v9471_v53  ;;  %v1634_v52 = vld [vmem:[%s11256_s21 + $0xc90] sm:$0xff]  ;;  %v1635_v53 = vld [vmem:[%s11256_s21 + $0xc98] sm:$0xff]  ;;  %v9553_v62 = vpack.c.bf16 %v1649_v51, %v1648_v50  ;;  %v649_v12 = vcombine.high %v11837_v58, %v11837_v58  ;;  %v9537_v50 = vpack.c.bf16 %v1625_v42, %v1624_v41 }
  0xf5   : > { %9504 = vmatprep.subr.bf16.mxu1 %v9503_v57  ;;  %v274_v57 = vadd.s32 3200, %v11325_v4  ;;  %v9523_v63 = vpack.c.bf16 %v1635_v53, %v1634_v52  ;;  %v1626_v52 = vld [vmem:[%s11256_s21 + $0xc50] sm:$0xff]  ;;  %v1627_v53 = vld [vmem:[%s11256_s21 + $0xc58] sm:$0xff] }
  0xf6   : > { %v1730_v42 = vld [vmem:[%s11256_s21 + $0xf90] sm:$0xff] }
  0xf7   : > { %9474 = vmatpush3.bf16.msra.mxu0 %v9473_v0  ;;  %v1618_v0 = vld [vmem:[%s11256_s21 + $0xc10] sm:$0xff]  ;;  %vm388_vm9 = vcmp.lt.s32.totalorder %v274_v57, %v11339_v21  ;;  %v1659_v57 = vld [vmem:[%s11256_s21 + $0xd58] sm:$0xff] }
  0xf8   : > { %9506 = vmatpush3.bf16.msra.mxu1 %v9505_v5  ;;  %9476 = vmatprep.subr.bf16.mxu0 %v9475_v1  ;;  %v1619_v5 = vld [vmem:[%s11256_s21 + $0xc18] sm:$0xff]  ;;  %v1650_v1 = vld [vmem:[%s11256_s21 + $0xd10] sm:$0xff] }
  0xf9   : > { %9508 = vmatprep.subr.bf16.mxu1 %v9507_v7  ;;  %v1637_v7 = vld [vmem:[%s11256_s21 + $0xca8] sm:$0xff]  ;;  %v9525_v55 = vpack.c.bf16 %v1619_v5, %v1618_v0  ;;  %v9541_v0 = vpack.c.bf16 %v1627_v53, %v1626_v52  ;;  %v9573_v5 = vpack.c.bf16 %v1659_v57, %v1658_v56  ;;  %v1715_v53 = vld [vmem:[%s11256_s21 + $0xf18] sm:$0xff]  ;;  %v1700_v56 = vld [vmem:[%s11256_s21 + $0xea0] sm:$0xff] }
  0xfb   : > { %9478 = vmatpush3.bf16.msra.mxu0 %v9477_v13  ;;  %v9527_v13 = vpack.c.bf16 %v1637_v7, %v1636_v6  ;;  %v1660_v6 = vld [vmem:[%s11256_s21 + $0xd60] sm:$0xff] }
  0xfc   : > { %9510 = vmatpush3.bf16.msra.mxu1 %v9509_v14  ;;  %9480 = vmatprep.subr.bf16.mxu0 %v9479_v16  ;;  %v1620_v14 = vld [vmem:[%s11256_s21 + $0xc20] sm:$0xff]  ;;  %v1621_v16 = vld [vmem:[%s11256_s21 + $0xc28] sm:$0xff] }
  0xfd   : > { %9512 = vmatprep.subr.bf16.mxu1 %v9511_v22  ;;  %v1638_v22 = vld [vmem:[%s11256_s21 + $0xcb0] sm:$0xff]  ;;  %v9529_v26 = vpack.c.bf16 %v1621_v16, %v1620_v14  ;;  %v9547_v16 = vpack.c.bf16 %v1647_v11, %v1646_v10  ;;  %v1735_v10 = vld [vmem:[%s11256_s21 + $0xfb8] sm:$0xff] }
  0xff   : > { %9482 = vmatpush3.bf16.msra.mxu0 %v9481_v19  ;;  %v1622_v19 = vld [vmem:[%s11256_s21 + $0xc30] sm:$0xff] }
 0x100   : > { %9514 = vmatpush3.bf16.msra.mxu1 %v9513_v30  ;;  %9484 = vmatprep.subr.bf16.mxu0 %v9483_v31  ;;  %v1654_v30 = vld [vmem:[%s11256_s21 + $0xd30] sm:$0xff]  ;;  %v9563_v31 = vpack.c.bf16 %v1671_v25, %v1670_v23  ;;  %v9533_v37 = vpack.c.bf16 %v1623_v29, %v1622_v19  ;;  %v1696_v23 = vld [vmem:[%s11256_s21 + $0xe80] sm:$0xff]  ;;  %v1697_v25 = vld [vmem:[%s11256_s21 + $0xe88] sm:$0xff]  ;;  %v273_v29 = vadd.s32 3072, %v11325_v4 }
 0x101   : > { %9516 = vmatprep.subr.bf16.mxu1 %v9515_v36  ;;  %v1672_v36 = vld [vmem:[%s11256_s21 + $0xdc0] sm:$0xff]  ;;  %v9565_v39 = vpack.c.bf16 %v1655_v32, %v1654_v30 }
 0x102   : > { %v9567_v44 = vpack.c.bf16 %v1673_v24, %v1672_v36  ;;  %v1680_v32 = vld [vmem:[%s11256_s21 + $0xe00] sm:$0xff]  ;;  %vm387_vm11 = vcmp.lt.s32.totalorder %v273_v29, %v11339_v21 }
 0x103   : > { %9486 = vmatpush3.bf16.msra.mxu0 %v9485_v34  ;;  %v1656_v34 = vld [vmem:[%s11256_s21 + $0xd40] sm:$0xff] }
 0x104   : > { %9518 = vmatpush3.bf16.msra.mxu1 %v9517_v45  ;;  %9520 = vmatprep.subr.bf16.mxu0 %v9519_v46  ;;  %v1657_v45 = vld [vmem:[%s11256_s21 + $0xd48] sm:$0xff]  ;;  %v1642_v46 = vld [vmem:[%s11256_s21 + $0xcd0] sm:$0xff]  ;;  %v1712_v36 = vld [vmem:[%s11256_s21 + $0xf00] sm:$0xff] }
 0x105   : > { %9552 = vmatprep.subr.bf16.mxu1 %v9551_v38  ;;  %v9569_v38 = vpack.c.bf16 %v1657_v45, %v1656_v34  ;;  %v9539_v51 = vpack.c.bf16 %v1643_v47, %v1642_v46  ;;  %v1731_v34 = vld [vmem:[%s11256_s21 + $0xf98] sm:$0xff]  ;;  %v9585_v46 = vpack.c.bf16 %v1681_v33, %v1680_v32  ;;  %v280_v47 = vadd.s32 3968, %v11325_v4  ;;  %v1738_v33 = vld [vmem:[%s11256_s21 + $0xfd0] sm:$0xff] }
 0x106   : > { %7080 = vmatmul.mubr.msk.f32.vlgmr.msra.gmra.mrb[10].mxu0 %vm383_vm7, %v11738_v43  ;;  %v9557_v43 = vpack.c.bf16 %v1651_v3, %v1650_v1  ;;  %v1629_v3 = vld [vmem:[%s11256_s21 + $0xc68] sm:$0xff]  ;;  %v9619_v52 = vpack.c.bf16 %v1731_v34, %v1730_v42  ;;  %v1707_v32 = vld [vmem:[%s11256_s21 + $0xed8] sm:$0xff]  ;;  %v1722_v42 = vld [vmem:[%s11256_s21 + $0xf50] sm:$0xff]  ;;  %v9635_v34 = vpack.c.bf16 %v1739_v35, %v1738_v33 }
 0x107   : > { %9522 = vmatpush3.bf16.msra.mxu0 %v9521_v60  ;;  %7082 = vmatmul.mubr.msk.f32.vlgmr.msra.gmra.mrb[10].mxu1 %vm385_vm8, %v11744_v9  ;;  %v1639_v9 = vld [vmem:[%s11256_s21 + $0xcb8] sm:$0xff]  ;;  %v1644_v60 = vld [vmem:[%s11256_s21 + $0xce0] sm:$0xff]  ;;  %vm394_vm14 = vcmp.lt.s32.totalorder %v280_v47, %v11339_v21  ;;  %v1709_v47 = vld [vmem:[%s11256_s21 + $0xee8] sm:$0xff] }
 0x108   : > { %9554 = vmatpush3.bf16.msra.mxu1 %v9553_v62  ;;  %9524 = vmatprep.subr.bf16.mxu0 %v9523_v63  ;;  %v9531_v28 = vpack.c.bf16 %v1639_v9, %v1638_v22  ;;  %v1676_v62 = vld [vmem:[%s11256_s21 + $0xde0] sm:$0xff]  ;;  %v1677_v63 = vld [vmem:[%s11256_s21 + $0xde8] sm:$0xff]  ;;  %v9543_v1 = vpack.c.bf16 %v1645_v61, %v1644_v60  ;;  %v1663_v9 = vld [vmem:[%s11256_s21 + $0xd78] sm:$0xff] }
 0x109   : > { %9556 = vmatprep.subr.bf16.mxu1 %v9555_v2  ;;  %7083 = vmatprep.mubr.msk.f32.mxu0 %vm388_vm9, %v648_v8  ;;  %v1628_v2 = vld [vmem:[%s11256_s21 + $0xc60] sm:$0xff]  ;;  %v9575_v7 = vpack.c.bf16 %v1677_v63, %v1676_v62  ;;  %v1661_v8 = vld [vmem:[%s11256_s21 + $0xd68] sm:$0xff]  ;;  %v9581_v30 = vpack.c.bf16 %v1663_v9, %v1662_v20  ;;  %v1794_v35 = vld [vmem:[%s11256_s21 + $0x1190] sm:$0xff] }
 0x10a   : > { %7085 = vmatprep.mubr.msk.f32.mxu1 %vm390_vm10, %v649_v12  ;;  %v1678_v12 = vld [vmem:[%s11256_s21 + $0xdf0] sm:$0xff]  ;;  %v9577_v14 = vpack.c.bf16 %v1661_v8, %v1660_v6  ;;  %v1732_v60 = vld [vmem:[%s11256_s21 + $0xfa0] sm:$0xff]  ;;  %v1733_v61 = vld [vmem:[%s11256_s21 + $0xfa8] sm:$0xff] }
 0x10b   : > { %9526 = vmatpush3.bf16.msra.mxu0 %v9525_v55  ;;  %v1679_v55 = vld [vmem:[%s11256_s21 + $0xdf8] sm:$0xff]  ;;  %v1717_v6 = vld [vmem:[%s11256_s21 + $0xf28] sm:$0xff]  ;;  %v1734_v8 = vld [vmem:[%s11256_s21 + $0xfb0] sm:$0xff] }
 0x10c   : > { %9558 = vmatpush3.bf16.msra.mxu1 %v9557_v43  ;;  %9528 = vmatprep.subr.bf16.mxu0 %v9527_v13  ;;  %v9545_v43 = vpack.c.bf16 %v1629_v3, %v1628_v2  ;;  %v482_v13 = vld [vmem:[%s11277_s28 + $0x38] sm:$0xff]  ;;  %v9579_v22 = vpack.c.bf16 %v1679_v55, %v1678_v12  ;;  %v1716_v2 = vld [vmem:[%s11256_s21 + $0xf20] sm:$0xff]  ;;  %v9623_v3 = vpack.c.bf16 %v1733_v61, %v1732_v60  ;;  %v1705_v20 = vld [vmem:[%s11256_s21 + $0xec8] sm:$0xff] }
 0x10d   : > { %9560 = vmatprep.subr.bf16.mxu1 %v9559_v18  ;;  %v1631_v18 = vld [vmem:[%s11256_s21 + $0xc78] sm:$0xff]  ;;  %v11924_v41 = vrot.slane %v482_v13, %v11333_v15  ;;  %v9625_v12 = vpack.c.bf16 %v1717_v6, %v1716_v2  ;;  %v1737_v9 = vld [vmem:[%s11256_s21 + $0xfc8] sm:$0xff]  ;;  %v1710_v61 = vld [vmem:[%s11256_s21 + $0xef0] sm:$0xff] }
 0x10e   : > { %v9549_v19 = vpack.c.bf16 %v1631_v18, %v1630_v17  ;;  %v1719_v17 = vld [vmem:[%s11256_s21 + $0xf38] sm:$0xff]  ;;  %v1704_v18 = vld [vmem:[%s11256_s21 + $0xec0] sm:$0xff]  ;;  %v1725_v60 = vld [vmem:[%s11256_s21 + $0xf68] sm:$0xff] }
 0x10f   : > { %9530 = vmatpush3.bf16.msra.mxu0 %v9529_v26  ;;  %v1728_v26 = vld [vmem:[%s11256_s21 + $0xf80] sm:$0xff]  ;;  %v665_v57 = vcombine.high %v11924_v41, %v11924_v41 }
 0x110   : > { %9562 = vmatpush3.bf16.msra.mxu1 %v9561_v27  ;;  %9532 = vmatprep.subr.bf16.mxu0 %v9531_v28  ;;  %v1729_v27 = vld [vmem:[%s11256_s21 + $0xf88] sm:$0xff]  ;;  %v650_v28 = vcombine.high %v482_v13, %v482_v13  ;;  %v1687_v13 = vld [vmem:[%s11256_s21 + $0xe38] sm:$0xff] }
 0x111   : > { %9564 = vmatprep.subr.bf16.mxu1 %v9563_v31  ;;  %v9583_v31 = vpack.c.bf16 %v1697_v25, %v1696_v23  ;;  %v9615_v24 = vpack.c.bf16 %v1729_v27, %v1728_v26  ;;  %v9599_v26 = vpack.c.bf16 %v1705_v20, %v1704_v18  ;;  %v1688_v27 = vld [vmem:[%s11256_s21 + $0xe40] sm:$0xff]  ;;  %v1793_v18 = vld [vmem:[%s11256_s21 + $0x1188] sm:$0xff] }
 0x112   : > { %v11930_v45 = vrot.slane %v650_v28, %v11333_v15  ;;  %v1689_v28 = vld [vmem:[%s11256_s21 + $0xe48] sm:$0xff]  ;;  %v483_v6 = vld [vmem:[%s11277_s28 + $0x40] sm:$0xff] }
 0x113   : > { %9534 = vmatpush3.bf16.msra.mxu0 %v9533_v37  ;;  %v1713_v37 = vld [vmem:[%s11256_s21 + $0xf08] sm:$0xff]  ;;  %v667_v20 = vcombine.high %v483_v6, %v483_v6  ;;  %v12019_v33 = vrot.slane %v483_v6, %v11333_v15 }
 0x114   : > { %9566 = vmatpush3.bf16.msra.mxu1 %v9565_v39  ;;  %9536 = vmatprep.subr.bf16.mxu0 %v9535_v40  ;;  %v1698_v39 = vld [vmem:[%s11256_s21 + $0xe90] sm:$0xff]  ;;  %v1699_v40 = vld [vmem:[%s11256_s21 + $0xe98] sm:$0xff]  ;;  %v9617_v48 = vpack.c.bf16 %v1713_v37, %v1712_v36  ;;  %v666_v62 = vcombine.high %v11930_v45, %v11930_v45  ;;  %v9601_v36 = vpack.c.bf16 %v1689_v28, %v1688_v27  ;;  %v1745_v27 = vld [vmem:[%s11256_s21 + $0x1008] sm:$0xff]  ;;  %v279_v28 = vadd.s32 3840, %v11325_v4 }
 0x115   : > { %9568 = vmatprep.subr.bf16.mxu1 %v9567_v44  ;;  %v278_v44 = vadd.s32 3712, %v11325_v4  ;;  %v9587_v49 = vpack.c.bf16 %v1699_v40, %v1698_v39  ;;  %v1690_v39 = vld [vmem:[%s11256_s21 + $0xe50] sm:$0xff]  ;;  %v1691_v40 = vld [vmem:[%s11256_s21 + $0xe58] sm:$0xff] }
 0x116   : > { %vm393_vm0 = vcmp.lt.s32.totalorder %v279_v28, %v11339_v21  ;;  %v1802_v28 = vld [vmem:[%s11256_s21 + $0x11d0] sm:$0xff] }
 0x117   : > { %9538 = vmatpush3.bf16.msra.mxu0 %v9537_v50  ;;  %v1682_v50 = vld [vmem:[%s11256_s21 + $0xe10] sm:$0xff]  ;;  %vm392_vm13 = vcmp.lt.s32.totalorder %v278_v44, %v11339_v21  ;;  %v1723_v44 = vld [vmem:[%s11256_s21 + $0xf58] sm:$0xff] }
 0x118   : > { %9570 = vmatpush3.bf16.msra.mxu1 %v9569_v38  ;;  %9540 = vmatprep.subr.bf16.mxu0 %v9539_v51  ;;  %v1683_v38 = vld [vmem:[%s11256_s21 + $0xe18] sm:$0xff]  ;;  %v1714_v51 = vld [vmem:[%s11256_s21 + $0xf10] sm:$0xff] }
 0x119   : > { %9572 = vmatprep.subr.bf16.mxu1 %v9571_v59  ;;  %v1701_v59 = vld [vmem:[%s11256_s21 + $0xea8] sm:$0xff]  ;;  %v9589_v63 = vpack.c.bf16 %v1683_v38, %v1682_v50  ;;  %v9605_v50 = vpack.c.bf16 %v1691_v40, %v1690_v39  ;;  %v9637_v38 = vpack.c.bf16 %v1723_v44, %v1722_v42  ;;  %v284_v40 = vadd.s32 4480, %v11325_v4  ;;  %v1746_v44 = vld [vmem:[%s11256_s21 + $0x1010] sm:$0xff] }
 0x11b   : > { %9542 = vmatpush3.bf16.msra.mxu0 %v9541_v0  ;;  %v9591_v0 = vpack.c.bf16 %v1701_v59, %v1700_v56  ;;  %v1724_v56 = vld [vmem:[%s11256_s21 + $0xf60] sm:$0xff]  ;;  %vm398_vm2 = vcmp.lt.s32.totalorder %v284_v40, %v11339_v21 }
 0x11c   : > { %9574 = vmatpush3.bf16.msra.mxu1 %v9573_v5  ;;  %9544 = vmatprep.subr.bf16.mxu0 %v9543_v1  ;;  %v1684_v5 = vld [vmem:[%s11256_s21 + $0xe20] sm:$0xff]  ;;  %v1685_v1 = vld [vmem:[%s11256_s21 + $0xe28] sm:$0xff] }
 0x11d   : > { %9576 = vmatprep.subr.bf16.mxu1 %v9575_v7  ;;  %v1702_v7 = vld [vmem:[%s11256_s21 + $0xeb0] sm:$0xff]  ;;  %v9593_v11 = vpack.c.bf16 %v1685_v1, %v1684_v5  ;;  %v1743_v5 = vld [vmem:[%s11256_s21 + $0xff8] sm:$0xff]  ;;  %v1772_v40 = vld [vmem:[%s11256_s21 + $0x10e0] sm:$0xff] }
 0x11f   : > { %9546 = vmatpush3.bf16.msra.mxu0 %v9545_v43  ;;  %v1686_v43 = vld [vmem:[%s11256_s21 + $0xe30] sm:$0xff] }
 0x120   : > { %9578 = vmatpush3.bf16.msra.mxu1 %v9577_v14  ;;  %9548 = vmatprep.subr.bf16.mxu0 %v9547_v16  ;;  %v1718_v14 = vld [vmem:[%s11256_s21 + $0xf30] sm:$0xff]  ;;  %v9627_v16 = vpack.c.bf16 %v1735_v10, %v1734_v8  ;;  %v9597_v23 = vpack.c.bf16 %v1687_v13, %v1686_v43  ;;  %v1727_v43 = vld [vmem:[%s11256_s21 + $0xf78] sm:$0xff]  ;;  %v1760_v13 = vld [vmem:[%s11256_s21 + $0x1080] sm:$0xff] }
 0x121   : > { %9580 = vmatprep.subr.bf16.mxu1 %v9579_v22  ;;  %v1736_v22 = vld [vmem:[%s11256_s21 + $0xfc0] sm:$0xff]  ;;  %v9629_v25 = vpack.c.bf16 %v1719_v17, %v1718_v14  ;;  %v1694_v10 = vld [vmem:[%s11256_s21 + $0xe70] sm:$0xff]  ;;  %v1761_v14 = vld [vmem:[%s11256_s21 + $0x1088] sm:$0xff] }
 0x122   : > { %v9631_v29 = vpack.c.bf16 %v1737_v9, %v1736_v22  ;;  %v1792_v17 = vld [vmem:[%s11256_s21 + $0x1180] sm:$0xff]  ;;  %v277_v9 = vadd.s32 3584, %v11325_v4 }
 0x123   : > { %9550 = vmatpush3.bf16.msra.mxu0 %v9549_v19  ;;  %v1720_v19 = vld [vmem:[%s11256_s21 + $0xf40] sm:$0xff] }
 0x124   : > { %9582 = vmatpush3.bf16.msra.mxu1 %v9581_v30  ;;  %9584 = vmatprep.subr.bf16.mxu0 %v9583_v31  ;;  %v1721_v30 = vld [vmem:[%s11256_s21 + $0xf48] sm:$0xff]  ;;  %v1706_v31 = vld [vmem:[%s11256_s21 + $0xed0] sm:$0xff]  ;;  %vm391_vm15 = vcmp.lt.s32.totalorder %v277_v9, %v11339_v21  ;;  %v1784_v9 = vld [vmem:[%s11256_s21 + $0x1140] sm:$0xff] }
 0x125   : > { %9616 = vmatprep.subr.bf16.mxu1 %v9615_v24  ;;  %v9633_v24 = vpack.c.bf16 %v1721_v30, %v1720_v19  ;;  %v9603_v37 = vpack.c.bf16 %v1707_v32, %v1706_v31  ;;  %v1776_v19 = vld [vmem:[%s11256_s21 + $0x1100] sm:$0xff]  ;;  %v1777_v30 = vld [vmem:[%s11256_s21 + $0x1108] sm:$0xff]  ;;  %v1762_v31 = vld [vmem:[%s11256_s21 + $0x1090] sm:$0xff] }
 0x126   : > { %7084 = vmatmul.mubr.msk.f32.vlgmr.msra.gmra.mrb[12].mxu0 %vm387_vm11, %v11831_v54  ;;  %v9621_v54 = vpack.c.bf16 %v1715_v53, %v1714_v51  ;;  %v1693_v53 = vld [vmem:[%s11256_s21 + $0xe68] sm:$0xff]  ;;  %v1763_v32 = vld [vmem:[%s11256_s21 + $0x1098] sm:$0xff]  ;;  %v9681_v42 = vpack.c.bf16 %v1777_v30, %v1776_v19 }
 0x127   : > { %9586 = vmatpush3.bf16.msra.mxu0 %v9585_v46  ;;  %7086 = vmatmul.mubr.msk.f32.vlgmr.msra.gmra.mrb[12].mxu1 %vm389_vm12, %v11837_v58  ;;  %v1703_v58 = vld [vmem:[%s11256_s21 + $0xeb8] sm:$0xff]  ;;  %v1708_v46 = vld [vmem:[%s11256_s21 + $0xee0] sm:$0xff] }
 0x128   : > { %9618 = vmatpush3.bf16.msra.mxu1 %v9617_v48  ;;  %9588 = vmatprep.subr.bf16.mxu0 %v9587_v49  ;;  %v9595_v55 = vpack.c.bf16 %v1703_v58, %v1702_v7  ;;  %v1740_v48 = vld [vmem:[%s11256_s21 + $0xfe0] sm:$0xff]  ;;  %v1741_v49 = vld [vmem:[%s11256_s21 + $0xfe8] sm:$0xff]  ;;  %v9607_v51 = vpack.c.bf16 %v1709_v47, %v1708_v46  ;;  %v9641_v58 = vpack.c.bf16 %v1725_v60, %v1724_v56  ;;  %v1747_v46 = vld [vmem:[%s11256_s21 + $0x1018] sm:$0xff] }
 0x129   : > { %9620 = vmatprep.subr.bf16.mxu1 %v9619_v52  ;;  %7087 = vmatprep.mubr.msk.f32.mxu0 %vm392_vm13, %v665_v57  ;;  %v1692_v52 = vld [vmem:[%s11256_s21 + $0xe60] sm:$0xff]  ;;  %v9639_v57 = vpack.c.bf16 %v1741_v49, %v1740_v48  ;;  %v1778_v47 = vld [vmem:[%s11256_s21 + $0x1110] sm:$0xff]  ;;  %v1779_v49 = vld [vmem:[%s11256_s21 + $0x1118] sm:$0xff] }
 0x12a   : > { %7089 = vmatprep.mubr.msk.f32.mxu1 %vm394_vm14, %v666_v62  ;;  %v1711_v62 = vld [vmem:[%s11256_s21 + $0xef8] sm:$0xff]  ;;  %v1748_v60 = vld [vmem:[%s11256_s21 + $0x1020] sm:$0xff] }
 0x12b   : > { %9590 = vmatpush3.bf16.msra.mxu0 %v9589_v63  ;;  %v9611_v8 = vpack.c.bf16 %v1711_v62, %v1710_v61  ;;  %v1749_v61 = vld [vmem:[%s11256_s21 + $0x1028] sm:$0xff]  ;;  %v1780_v62 = vld [vmem:[%s11256_s21 + $0x1120] sm:$0xff]  ;;  %v1803_v19 = vld [vmem:[%s11256_s21 + $0x11d8] sm:$0xff] }
 0x12c   : > { %9622 = vmatpush3.bf16.msra.mxu1 %v9621_v54  ;;  %9592 = vmatprep.subr.bf16.mxu0 %v9591_v0  ;;  %v1742_v0 = vld [vmem:[%s11256_s21 + $0xff0] sm:$0xff] }
 0x12d   : > { %9624 = vmatprep.subr.bf16.mxu1 %v9623_v3  ;;  %v9609_v3 = vpack.c.bf16 %v1693_v53, %v1692_v52  ;;  %v1796_v52 = vld [vmem:[%s11256_s21 + $0x11a0] sm:$0xff]  ;;  %v1797_v53 = vld [vmem:[%s11256_s21 + $0x11a8] sm:$0xff] }
 0x12f   : > { %9594 = vmatpush3.bf16.msra.mxu0 %v9593_v11  ;;  %v1695_v11 = vld [vmem:[%s11256_s21 + $0xe78] sm:$0xff] }
 0x130   : > { %9626 = vmatpush3.bf16.msra.mxu1 %v9625_v12  ;;  %9596 = vmatprep.subr.bf16.mxu0 %v9595_v55  ;;  %v1726_v12 = vld [vmem:[%s11256_s21 + $0xf70] sm:$0xff]  ;;  %v9643_v55 = vpack.c.bf16 %v1743_v5, %v1742_v0  ;;  %v9613_v22 = vpack.c.bf16 %v1695_v11, %v1694_v10  ;;  %v1783_v11 = vld [vmem:[%s11256_s21 + $0x1138] sm:$0xff] }
 0x131   : > { %9628 = vmatprep.subr.bf16.mxu1 %v9627_v16  ;;  %v1766_v0 = vld [vmem:[%s11256_s21 + $0x10b0] sm:$0xff] }
 0x132   : > { %v1798_v5 = vld [vmem:[%s11256_s21 + $0x11b0] sm:$0xff] }
 0x133   : > { %9598 = vmatpush3.bf16.msra.mxu0 %v9597_v23  ;;  %v9645_v23 = vpack.c.bf16 %v1727_v43, %v1726_v12  ;;  %v1768_v12 = vld [vmem:[%s11256_s21 + $0x10c0] sm:$0xff] }
 0x134   : > { %9630 = vmatpush3.bf16.msra.mxu1 %v9629_v25  ;;  %9600 = vmatprep.subr.bf16.mxu0 %v9599_v26  ;;  %v9647_v25 = vpack.c.bf16 %v1761_v14, %v1760_v13  ;;  %v1744_v26 = vld [vmem:[%s11256_s21 + $0x1000] sm:$0xff]  ;;  %v1801_v13 = vld [vmem:[%s11256_s21 + $0x11c8] sm:$0xff] }
 0x135   : > { %9632 = vmatprep.subr.bf16.mxu1 %v9631_v29  ;;  %v9679_v29 = vpack.c.bf16 %v1793_v18, %v1792_v17  ;;  %v9649_v39 = vpack.c.bf16 %v1745_v27, %v1744_v26  ;;  %v1800_v43 = vld [vmem:[%s11256_s21 + $0x11c0] sm:$0xff]  ;;  %v1770_v26 = vld [vmem:[%s11256_s21 + $0x10d0] sm:$0xff]  ;;  %v1771_v27 = vld [vmem:[%s11256_s21 + $0x10d8] sm:$0xff] }
 0x137   : > { %9602 = vmatpush3.bf16.msra.mxu0 %v9601_v36  ;;  %v1795_v36 = vld [vmem:[%s11256_s21 + $0x1198] sm:$0xff] }
 0x138   : > { %9634 = vmatpush3.bf16.msra.mxu1 %v9633_v24  ;;  %9604 = vmatprep.subr.bf16.mxu0 %v9603_v37  ;;  %v282_v24 = vadd.s32 4224, %v11325_v4  ;;  %v12025_v37 = vrot.slane %v667_v20, %v11333_v15  ;;  %v9683_v48 = vpack.c.bf16 %v1795_v36, %v1794_v35  ;;  %v1752_v20 = vld [vmem:[%s11256_s21 + $0x1040] sm:$0xff]  ;;  %v1755_v35 = vld [vmem:[%s11256_s21 + $0x1058] sm:$0xff]  ;;  %v1786_v36 = vld [vmem:[%s11256_s21 + $0x1150] sm:$0xff] }
 0x139   : > { %v7207_v59 = vpop.f32.mrb[0].mxu0  ;;  %9636 = vmatprep.subr.bf16.mxu1 %v9635_v34  ;;  %v9651_v34 = vpack.c.bf16 %v1763_v32, %v1762_v31  ;;  %v9667_v31 = vpack.c.bf16 %v1771_v27, %v1770_v26  ;;  %v1754_v32 = vld [vmem:[%s11256_s21 + $0x1050] sm:$0xff]  ;;  %v1841_v26 = vld [vmem:[%s11256_s21 + $0x1308] sm:$0xff] }
 0x13a   : > { %v7242_v63 = vpop.f32.mrb[0].mxu1  ;;  %v7208_v54 = vpop.f32.mrb[1].mxu0  ;;  %vm396_vm1 = vcmp.lt.s32.totalorder %v282_v24, %v11339_v21  ;;  %v683_v56 = vcombine.high %v12025_v37, %v12025_v37  ;;  %v9699_v24 = vpack.c.bf16 %v1803_v19, %v1802_v28  ;;  %v1826_v27 = vld [vmem:[%s11256_s21 + $0x1290] sm:$0xff]  ;;  %v1827_v28 = vld [vmem:[%s11256_s21 + $0x1298] sm:$0xff] }
 0x13b   : > { %v7209_v1 = vadd.f32 %v7208_v54, %v7207_v59  ;;  %v7243_v2 = vpop.f32.mrb[1].mxu1  ;;  %9606 = vmatpush3.bf16.msra.mxu0 %v9605_v50  ;;  %v1764_v50 = vld [vmem:[%s11256_s21 + $0x10a0] sm:$0xff]  ;;  %v9653_v59 = vpack.c.bf16 %v1747_v46, %v1746_v44  ;;  %v1781_v54 = vld [vmem:[%s11256_s21 + $0x1128] sm:$0xff]  ;;  %v9669_v46 = vpack.c.bf16 %v1755_v35, %v1754_v32 }
 0x13c   : > { %v7244_v7 = vadd.f32 %v7243_v2, %v7242_v63  ;;  %9638 = vmatpush3.bf16.msra.mxu1 %v9637_v38  ;;  %9608 = vmatprep.subr.bf16.mxu0 %v9607_v51  ;;  %v1765_v38 = vld [vmem:[%s11256_s21 + $0x10a8] sm:$0xff]  ;;  %v682_v51 = vcombine.high %v12019_v33, %v12019_v33  ;;  %v9687_v63 = vpack.c.bf16 %v1797_v53, %v1796_v52 }
 0x13d   : > { %9640 = vmatprep.subr.bf16.mxu1 %v9639_v57  ;;  %v9655_v57 = vpack.c.bf16 %v1765_v38, %v1764_v50  ;;  %v9657_v2 = vpack.c.bf16 %v1749_v61, %v1748_v60  ;;  %v1805_v44 = vld [vmem:[%s11256_s21 + $0x11e8] sm:$0xff]  ;;  %v1788_v38 = vld [vmem:[%s11256_s21 + $0x1160] sm:$0xff]  ;;  %v1806_v60 = vld [vmem:[%s11256_s21 + $0x11f0] sm:$0xff] }
 0x13e   : > { %v12006_v16 = vadd.f32 %v7244_v7, %v7209_v1  ;;  %v1799_v1 = vld [vmem:[%s11256_s21 + $0x11b8] sm:$0xff]  ;;  %v1750_v7 = vld [vmem:[%s11256_s21 + $0x1030] sm:$0xff]  ;;  %v1757_v50 = vld [vmem:[%s11256_s21 + $0x1068] sm:$0xff] }
 0x13f   : > { %9610 = vmatpush3.bf16.msra.mxu0 %v9609_v3  ;;  %v9689_v3 = vpack.c.bf16 %v1781_v54, %v1780_v62  ;;  %v9691_v10 = vpack.c.bf16 %v1799_v1, %v1798_v5  ;;  %v1789_v53 = vld [vmem:[%s11256_s21 + $0x1168] sm:$0xff]  ;;  %v1807_v61 = vld [vmem:[%s11256_s21 + $0x11f8] sm:$0xff] }
 0x140   : > { %9642 = vmatpush3.bf16.msra.mxu1 %v9641_v58  ;;  %9612 = vmatprep.subr.bf16.mxu0 %v9611_v8  ;;  %v1751_v58 = vld [vmem:[%s11256_s21 + $0x1038] sm:$0xff]  ;;  %v1782_v8 = vld [vmem:[%s11256_s21 + $0x1130] sm:$0xff]  ;;  %v9705_v5 = vpack.c.bf16 %v1789_v53, %v1788_v38  ;;  %v1861_v38 = vld [vmem:[%s11256_s21 + $0x13a8] sm:$0xff] }
 0x141   : > { %9644 = vmatprep.subr.bf16.mxu1 %v9643_v55  ;;  %v1769_v55 = vld [vmem:[%s11256_s21 + $0x10c8] sm:$0xff]  ;;  %v9661_v14 = vpack.c.bf16 %v1751_v58, %v1750_v7  ;;  %v9693_v17 = vpack.c.bf16 %v1783_v11, %v1782_v8  ;;  %v9707_v58 = vpack.c.bf16 %v1807_v61, %v1806_v60  ;;  %v1791_v8 = vld [vmem:[%s11256_s21 + $0x1178] sm:$0xff]  ;;  %v1830_v61 = vld [vmem:[%s11256_s21 + $0x12b0] sm:$0xff] }
 0x142   : > { %v9663_v18 = vpack.c.bf16 %v1769_v55, %v1768_v12  ;;  %v1825_v11 = vld [vmem:[%s11256_s21 + $0x1288] sm:$0xff]  ;;  %v1856_v12 = vld [vmem:[%s11256_s21 + $0x1380] sm:$0xff] }
 0x143   : > { %9614 = vmatpush3.bf16.msra.mxu0 %v9613_v22  ;;  %v1753_v22 = vld [vmem:[%s11256_s21 + $0x1048] sm:$0xff] }
 0x144   : > { %9646 = vmatpush3.bf16.msra.mxu1 %v9645_v23  ;;  %9648 = vmatprep.subr.bf16.mxu0 %v9647_v25  ;;  %v9695_v23 = vpack.c.bf16 %v1801_v13, %v1800_v43  ;;  %v1785_v25 = vld [vmem:[%s11256_s21 + $0x1148] sm:$0xff] }
 0x145   : > { %9680 = vmatprep.subr.bf16.mxu1 %v9679_v29  ;;  %v9665_v29 = vpack.c.bf16 %v1753_v22, %v1752_v20  ;;  %v9697_v30 = vpack.c.bf16 %v1785_v25, %v1784_v9  ;;  %v1857_v55 = vld [vmem:[%s11256_s21 + $0x1388] sm:$0xff]  ;;  %v1808_v20 = vld [vmem:[%s11256_s21 + $0x1200] sm:$0xff]  ;;  %v283_v9 = vadd.s32 4352, %v11325_v4 }
 0x146   : > { %7088 = vmatmul.mubr.msk.f32.vlgmr.msra.gmra.mrb[14].mxu0 %vm391_vm15, %v11924_v41  ;;  %v9685_v41 = vpack.c.bf16 %v1779_v49, %v1778_v47  ;;  %v1756_v49 = vld [vmem:[%s11256_s21 + $0x1060] sm:$0xff]  ;;  %v1809_v22 = vld [vmem:[%s11256_s21 + $0x1208] sm:$0xff]  ;;  %v9743_v25 = vpack.c.bf16 %v1857_v55, %v1856_v12 }
 0x147   : > { %9650 = vmatpush3.bf16.msra.mxu0 %v9649_v39  ;;  %7090 = vmatmul.mubr.msk.f32.vlgmr.msra.gmra.mrb[14].mxu1 %vm393_vm0, %v11930_v45  ;;  %v1767_v45 = vld [vmem:[%s11256_s21 + $0x10b8] sm:$0xff]  ;;  %v9673_v54 = vpack.c.bf16 %v1757_v50, %v1756_v49  ;;  %v9713_v35 = vpack.c.bf16 %v1809_v22, %v1808_v20  ;;  %vm397_vm4 = vcmp.lt.s32.totalorder %v283_v9, %v11339_v21  ;;  %v1860_v50 = vld [vmem:[%s11256_s21 + $0x13a0] sm:$0xff]  ;;  %v1845_v60 = vld [vmem:[%s11256_s21 + $0x1328] sm:$0xff] }
 0x148   : > { %9682 = vmatpush3.bf16.msra.mxu1 %v9681_v42  ;;  %9652 = vmatprep.subr.bf16.mxu0 %v9651_v34  ;;  %v9659_v6 = vpack.c.bf16 %v1767_v45, %v1766_v0  ;;  %v1787_v39 = vld [vmem:[%s11256_s21 + $0x1158] sm:$0xff]  ;;  %v1773_v42 = vld [vmem:[%s11256_s21 + $0x10e8] sm:$0xff]  ;;  %v1804_v34 = vld [vmem:[%s11256_s21 + $0x11e0] sm:$0xff] }
 0x149   : > { %9684 = vmatprep.subr.bf16.mxu1 %v9683_v48  ;;  %7091 = vmatprep.mubr.msk.f32.mxu0 %vm396_vm1, %v682_v51  ;;  %v9701_v47 = vpack.c.bf16 %v1787_v39, %v1786_v36  ;;  %v9671_v48 = vpack.c.bf16 %v1773_v42, %v1772_v40  ;;  %v9703_v52 = vpack.c.bf16 %v1805_v44, %v1804_v34  ;;  %v484_v0 = vld [vmem:[%s11277_s28 + $0x48] sm:$0xff]  ;;  %v288_v36 = vadd.s32 4992, %v11325_v4  ;;  %v1810_v40 = vld [vmem:[%s11256_s21 + $0x1210] sm:$0xff]  ;;  %v1811_v42 = vld [vmem:[%s11256_s21 + $0x1218] sm:$0xff] }
 0x14a   : > { %7093 = vmatprep.mubr.msk.f32.mxu1 %vm398_vm2, %v683_v56  ;;  %v1774_v56 = vld [vmem:[%s11256_s21 + $0x10f0] sm:$0xff]  ;;  %v684_v43 = vcombine.high %v484_v0, %v484_v0  ;;  %v12115_v19 = vrot.slane %v484_v0, %v11333_v15  ;;  %v9715_v39 = vpack.c.bf16 %v1827_v28, %v1826_v27  ;;  %v1835_v22 = vld [vmem:[%s11256_s21 + $0x12d8] sm:$0xff] }
 0x14b   : > { %9654 = vmatpush3.bf16.msra.mxu0 %v9653_v59  ;;  %v1775_v59 = vld [vmem:[%s11256_s21 + $0x10f8] sm:$0xff]  ;;  %v1842_v34 = vld [vmem:[%s11256_s21 + $0x1310] sm:$0xff]  ;;  %vm402_vm6 = vcmp.lt.s32.totalorder %v288_v36, %v11339_v21  ;;  %v1836_v36 = vld [vmem:[%s11256_s21 + $0x12e0] sm:$0xff] }
 0x14c   : > { %9686 = vmatpush3.bf16.msra.mxu1 %v9685_v41  ;;  %9656 = vmatprep.subr.bf16.mxu0 %v9655_v57  ;;  %v9675_v1 = vpack.c.bf16 %v1775_v59, %v1774_v56  ;;  %v12121_v32 = vrot.slane %v684_v43, %v11333_v15  ;;  %v699_v49 = vcombine.high %v12115_v19, %v12115_v19  ;;  %v1812_v56 = vld [vmem:[%s11256_s21 + $0x1220] sm:$0xff]  ;;  %v1813_v59 = vld [vmem:[%s11256_s21 + $0x1228] sm:$0xff]  ;;  %v1834_v20 = vld [vmem:[%s11256_s21 + $0x12d0] sm:$0xff] }
 0x14d   : > { %9688 = vmatprep.subr.bf16.mxu1 %v9687_v63  ;;  %v1816_v43 = vld [vmem:[%s11256_s21 + $0x1240] sm:$0xff]  ;;  %v1866_v9 = vld [vmem:[%s11256_s21 + $0x13d0] sm:$0xff]  ;;  %v9731_v27 = vpack.c.bf16 %v1835_v22, %v1834_v20  ;;  %v1905_v20 = vld [vmem:[%s11256_s21 + $0x1508] sm:$0xff] }
 0x14e   : > { %v1818_v28 = vld [vmem:[%s11256_s21 + $0x1250] sm:$0xff] }
 0x14f   : > { %9658 = vmatpush3.bf16.msra.mxu0 %v9657_v2  ;;  %v1758_v2 = vld [vmem:[%s11256_s21 + $0x1070] sm:$0xff] }
 0x150   : > { %9690 = vmatpush3.bf16.msra.mxu1 %v9689_v3  ;;  %9660 = vmatprep.subr.bf16.mxu0 %v9659_v6  ;;  %v1759_v3 = vld [vmem:[%s11256_s21 + $0x1078] sm:$0xff]  ;;  %v1790_v6 = vld [vmem:[%s11256_s21 + $0x1170] sm:$0xff] }
 0x151   : > { %9692 = vmatprep.subr.bf16.mxu1 %v9691_v10  ;;  %v1824_v10 = vld [vmem:[%s11256_s21 + $0x1280] sm:$0xff]  ;;  %v1890_v22 = vld [vmem:[%s11256_s21 + $0x1490] sm:$0xff] }
 0x153   : > { %9662 = vmatpush3.bf16.msra.mxu0 %v9661_v14  ;;  %v9677_v14 = vpack.c.bf16 %v1759_v3, %v1758_v2  ;;  %v1846_v2 = vld [vmem:[%s11256_s21 + $0x1330] sm:$0xff] }
 0x154   : > { %9694 = vmatpush3.bf16.msra.mxu1 %v9693_v17  ;;  %9664 = vmatprep.subr.bf16.mxu0 %v9663_v18  ;;  %v9709_v17 = vpack.c.bf16 %v1791_v8, %v1790_v6  ;;  %v9711_v18 = vpack.c.bf16 %v1825_v11, %v1824_v10  ;;  %v1847_v6 = vld [vmem:[%s11256_s21 + $0x1338] sm:$0xff]  ;;  %v1864_v8 = vld [vmem:[%s11256_s21 + $0x13c0] sm:$0xff]  ;;  %v1865_v10 = vld [vmem:[%s11256_s21 + $0x13c8] sm:$0xff] }
 0x155   : > { %9696 = vmatprep.subr.bf16.mxu1 %v9695_v23  ;;  %v1840_v23 = vld [vmem:[%s11256_s21 + $0x1300] sm:$0xff]  ;;  %v9757_v12 = vpack.c.bf16 %v1847_v6, %v1846_v2  ;;  %v1855_v2 = vld [vmem:[%s11256_s21 + $0x1378] sm:$0xff]  ;;  %v1889_v6 = vld [vmem:[%s11256_s21 + $0x1488] sm:$0xff] }
 0x157   : > { %9666 = vmatpush3.bf16.msra.mxu0 %v9665_v29  ;;  %v1858_v29 = vld [vmem:[%s11256_s21 + $0x1390] sm:$0xff] }
 0x158   : > { %9698 = vmatpush3.bf16.msra.mxu1 %v9697_v30  ;;  %9668 = vmatprep.subr.bf16.mxu0 %v9667_v31  ;;  %v1859_v30 = vld [vmem:[%s11256_s21 + $0x1398] sm:$0xff]  ;;  %v286_v31 = vadd.s32 4736, %v11325_v4 }
 0x159   : > { %v7277_v51 = vpop.f32.mrb[2].mxu0  ;;  %9700 = vmatprep.subr.bf16.mxu1 %v9699_v24  ;;  %v9745_v24 = vpack.c.bf16 %v1841_v26, %v1840_v23  ;;  %v9747_v44 = vpack.c.bf16 %v1859_v30, %v1858_v29  ;;  %v1867_v23 = vld [vmem:[%s11256_s21 + $0x13d8] sm:$0xff]  ;;  %v1850_v30 = vld [vmem:[%s11256_s21 + $0x1350] sm:$0xff] }
 0x15a   : > { %v7278_v41 = vpop.f32.mrb[3].mxu0  ;;  %v7312_v57 = vpop.f32.mrb[2].mxu1  ;;  %vm400_vm5 = vcmp.lt.s32.totalorder %v286_v31, %v11339_v21  ;;  %v1819_v29 = vld [vmem:[%s11256_s21 + $0x1258] sm:$0xff]  ;;  %v9763_v31 = vpack.c.bf16 %v1867_v23, %v1866_v9 }
 0x15b   : > { %v7279_v62 = vadd.f32 %v7278_v41, %v7277_v51  ;;  %9670 = vmatpush3.bf16.msra.mxu0 %v9669_v46  ;;  %v7313_v63 = vpop.f32.mrb[3].mxu1  ;;  %v1843_v46 = vld [vmem:[%s11256_s21 + $0x1318] sm:$0xff]  ;;  %v700_v51 = vcombine.high %v12121_v32, %v12121_v32  ;;  %v1844_v41 = vld [vmem:[%s11256_s21 + $0x1320] sm:$0xff] }
 0x15c   : > { %v7314_v45 = vadd.f32 %v7313_v63, %v7312_v57  ;;  %9702 = vmatpush3.bf16.msra.mxu1 %v9701_v47  ;;  %9672 = vmatprep.subr.bf16.mxu0 %v9671_v48  ;;  %v1828_v47 = vld [vmem:[%s11256_s21 + $0x12a0] sm:$0xff]  ;;  %v1829_v48 = vld [vmem:[%s11256_s21 + $0x12a8] sm:$0xff]  ;;  %v9751_v57 = vpack.c.bf16 %v1861_v38, %v1860_v50  ;;  %v1863_v63 = vld [vmem:[%s11256_s21 + $0x13b8] sm:$0xff]  ;;  %v9753_v0 = vpack.c.bf16 %v1845_v60, %v1844_v41 }
 0x15d   : > { %v3231_v7 = vadd.f32 %v7279_v62, %v12006_v16  ;;  %9704 = vmatprep.subr.bf16.mxu1 %v9703_v52  ;;  %v281_v16 = vadd.s32 4096, %v11325_v4  ;;  %v9717_v52 = vpack.c.bf16 %v1811_v42, %v1810_v40  ;;  %v9719_v53 = vpack.c.bf16 %v1829_v48, %v1828_v47  ;;  %v1862_v62 = vld [vmem:[%s11256_s21 + $0x13b0] sm:$0xff]  ;;  %v1869_v40 = vld [vmem:[%s11256_s21 + $0x13e8] sm:$0xff]  ;;  %v1852_v48 = vld [vmem:[%s11256_s21 + $0x1360] sm:$0xff] }
 0x15e   : > { %v9755_v3 = vpack.c.bf16 %v1863_v63, %v1862_v62  ;;  %v9733_v42 = vpack.c.bf16 %v1819_v29, %v1818_v28  ;;  %v1821_v47 = vld [vmem:[%s11256_s21 + $0x1268] sm:$0xff]  ;;  %v1891_v9 = vld [vmem:[%s11256_s21 + $0x1498] sm:$0xff] }
 0x15f   : > { %v12104_v13 = vadd.f32 %v7314_v45, %v3231_v7  ;;  %9674 = vmatpush3.bf16.msra.mxu0 %v9673_v54  ;;  %vm395_vm3 = vcmp.lt.s32.totalorder %v281_v16, %v11339_v21  ;;  %v9721_v54 = vpack.c.bf16 %v1813_v59, %v1812_v56  ;;  %v1832_v7 = vld [vmem:[%s11256_s21 + $0x12c0] sm:$0xff]  ;;  %v1853_v38 = vld [vmem:[%s11256_s21 + $0x1368] sm:$0xff]  ;;  %v1870_v56 = vld [vmem:[%s11256_s21 + $0x13f0] sm:$0xff] }
 0x160   : > { %9706 = vmatpush3.bf16.msra.mxu1 %v9705_v5  ;;  %9676 = vmatprep.subr.bf16.mxu0 %v9675_v1  ;;  %v1814_v5 = vld [vmem:[%s11256_s21 + $0x1230] sm:$0xff]  ;;  %v1815_v1 = vld [vmem:[%s11256_s21 + $0x1238] sm:$0xff]  ;;  %v1848_v16 = vld [vmem:[%s11256_s21 + $0x1340] sm:$0xff]  ;;  %v9769_v62 = vpack.c.bf16 %v1853_v38, %v1852_v48 }
 0x161   : > { %9708 = vmatprep.subr.bf16.mxu1 %v9707_v58  ;;  %v1833_v58 = vld [vmem:[%s11256_s21 + $0x12c8] sm:$0xff]  ;;  %v9725_v11 = vpack.c.bf16 %v1815_v1, %v1814_v5  ;;  %v1871_v59 = vld [vmem:[%s11256_s21 + $0x13f8] sm:$0xff] }
 0x162   : > { %v9727_v55 = vpack.c.bf16 %v1833_v58, %v1832_v7  ;;  %v9771_v1 = vpack.c.bf16 %v1871_v59, %v1870_v56  ;;  %v1920_v7 = vld [vmem:[%s11256_s21 + $0x1580] sm:$0xff]  ;;  %v1921_v58 = vld [vmem:[%s11256_s21 + $0x1588] sm:$0xff]  ;;  %v1894_v59 = vld [vmem:[%s11256_s21 + $0x14b0] sm:$0xff] }
 0x163   : > { %9678 = vmatpush3.bf16.msra.mxu0 %v9677_v14  ;;  %v1817_v14 = vld [vmem:[%s11256_s21 + $0x1248] sm:$0xff] }
 0x164   : > { %9710 = vmatpush3.bf16.msra.mxu1 %v9709_v17  ;;  %9712 = vmatprep.subr.bf16.mxu0 %v9711_v18  ;;  %v9759_v17 = vpack.c.bf16 %v1865_v10, %v1864_v8  ;;  %v1849_v18 = vld [vmem:[%s11256_s21 + $0x1348] sm:$0xff] }
 0x165   : > { %9744 = vmatprep.subr.bf16.mxu1 %v9743_v25  ;;  %v9729_v25 = vpack.c.bf16 %v1817_v14, %v1816_v43  ;;  %v9761_v26 = vpack.c.bf16 %v1849_v18, %v1848_v16  ;;  %v1872_v43 = vld [vmem:[%s11256_s21 + $0x1400] sm:$0xff]  ;;  %v1873_v14 = vld [vmem:[%s11256_s21 + $0x1408] sm:$0xff]  ;;  %v287_v16 = vadd.s32 4864, %v11325_v4  ;;  %v9807_v18 = vpack.c.bf16 %v1921_v58, %v1920_v7 }
 0x166   : > { %7092 = vmatmul.mubr.msk.f32.vlgmr.msra.gmra.mrb[16].mxu0 %vm395_vm3, %v12019_v33  ;;  %v9749_v33 = vpack.c.bf16 %v1843_v46, %v1842_v34  ;;  %v1820_v46 = vld [vmem:[%s11256_s21 + $0x1260] sm:$0xff]  ;;  %v9777_v29 = vpack.c.bf16 %v1873_v14, %v1872_v43  ;;  %v1925_v48 = vld [vmem:[%s11256_s21 + $0x15a8] sm:$0xff]  ;;  %v1898_v43 = vld [vmem:[%s11256_s21 + $0x14d0] sm:$0xff] }
 0x167   : > { %9714 = vmatpush3.bf16.msra.mxu0 %v9713_v35  ;;  %7094 = vmatmul.mubr.msk.f32.vlgmr.msra.gmra.mrb[16].mxu1 %vm397_vm4, %v12025_v37  ;;  %v1831_v37 = vld [vmem:[%s11256_s21 + $0x12b8] sm:$0xff]  ;;  %v9737_v60 = vpack.c.bf16 %v1821_v47, %v1820_v46  ;;  %vm401_vm8 = vcmp.lt.s32.totalorder %v287_v16, %v11339_v21  ;;  %v1924_v47 = vld [vmem:[%s11256_s21 + $0x15a0] sm:$0xff]  ;;  %v1909_v56 = vld [vmem:[%s11256_s21 + $0x1528] sm:$0xff] }
 0x168   : > { %9746 = vmatpush3.bf16.msra.mxu1 %v9745_v24  ;;  %9716 = vmatprep.subr.bf16.mxu0 %v9715_v39  ;;  %v9723_v45 = vpack.c.bf16 %v1831_v37, %v1830_v61  ;;  %v1851_v35 = vld [vmem:[%s11256_s21 + $0x1358] sm:$0xff]  ;;  %v1837_v24 = vld [vmem:[%s11256_s21 + $0x12e8] sm:$0xff]  ;;  %v1868_v39 = vld [vmem:[%s11256_s21 + $0x13e0] sm:$0xff] }
 0x169   : > { %9748 = vmatprep.subr.bf16.mxu1 %v9747_v44  ;;  %7095 = vmatprep.mubr.msk.f32.mxu0 %vm400_vm5, %v699_v49  ;;  %v9765_v34 = vpack.c.bf16 %v1851_v35, %v1850_v30  ;;  %v9735_v44 = vpack.c.bf16 %v1837_v24, %v1836_v36  ;;  %v9767_v50 = vpack.c.bf16 %v1869_v40, %v1868_v39  ;;  %v485_v61 = vld [vmem:[%s11277_s28 + $0x50] sm:$0xff]  ;;  %v292_v30 = vadd.s32 5504, %v11325_v4  ;;  %v1875_v24 = vld [vmem:[%s11256_s21 + $0x1418] sm:$0xff] }
 0x16a   : > { %7097 = vmatprep.mubr.msk.f32.mxu1 %vm402_vm6, %v700_v51  ;;  %v1838_v51 = vld [vmem:[%s11256_s21 + $0x12f0] sm:$0xff]  ;;  %v701_v8 = vcombine.high %v485_v61, %v485_v61  ;;  %v12211_v23 = vrot.slane %v485_v61, %v11333_v15  ;;  %v9779_v35 = vpack.c.bf16 %v1891_v9, %v1890_v22  ;;  %v1899_v14 = vld [vmem:[%s11256_s21 + $0x14d8] sm:$0xff] }
 0x16b   : > { %9718 = vmatpush3.bf16.msra.mxu0 %v9717_v52  ;;  %v1839_v52 = vld [vmem:[%s11256_s21 + $0x12f8] sm:$0xff]  ;;  %v1874_v36 = vld [vmem:[%s11256_s21 + $0x1410] sm:$0xff]  ;;  %vm406_vm10 = vcmp.lt.s32.totalorder %v292_v30, %v11339_v21  ;;  %v9795_v22 = vpack.c.bf16 %v1899_v14, %v1898_v43  ;;  %v1900_v30 = vld [vmem:[%s11256_s21 + $0x14e0] sm:$0xff] }
 0x16c   : > { %9750 = vmatpush3.bf16.msra.mxu1 %v9749_v33  ;;  %9720 = vmatprep.subr.bf16.mxu0 %v9719_v53  ;;  %v9739_v63 = vpack.c.bf16 %v1839_v52, %v1838_v51  ;;  %v12217_v28 = vrot.slane %v701_v8, %v11333_v15  ;;  %v1906_v39 = vld [vmem:[%s11256_s21 + $0x1510] sm:$0xff]  ;;  %v716_v46 = vcombine.high %v12211_v23, %v12211_v23  ;;  %v1876_v51 = vld [vmem:[%s11256_s21 + $0x1420] sm:$0xff]  ;;  %v1877_v52 = vld [vmem:[%s11256_s21 + $0x1428] sm:$0xff] }
 0x16d   : > { %9752 = vmatprep.subr.bf16.mxu1 %v9751_v57  ;;  %v1880_v8 = vld [vmem:[%s11256_s21 + $0x1440] sm:$0xff]  ;;  %v1930_v16 = vld [vmem:[%s11256_s21 + $0x15d0] sm:$0xff]  ;;  %v1969_v43 = vld [vmem:[%s11256_s21 + $0x1708] sm:$0xff] }
 0x16e   : > { %v1882_v9 = vld [vmem:[%s11256_s21 + $0x1450] sm:$0xff] }
 0x16f   : > { %9722 = vmatpush3.bf16.msra.mxu0 %v9721_v54  ;;  %v1822_v54 = vld [vmem:[%s11256_s21 + $0x1270] sm:$0xff] }
 0x170   : > { %9754 = vmatpush3.bf16.msra.mxu1 %v9753_v0  ;;  %9724 = vmatprep.subr.bf16.mxu0 %v9723_v45  ;;  %v1823_v0 = vld [vmem:[%s11256_s21 + $0x1278] sm:$0xff]  ;;  %v1854_v45 = vld [vmem:[%s11256_s21 + $0x1370] sm:$0xff] }
 0x171   : > { %9756 = vmatprep.subr.bf16.mxu1 %v9755_v3  ;;  %v1888_v3 = vld [vmem:[%s11256_s21 + $0x1480] sm:$0xff]  ;;  %v1954_v14 = vld [vmem:[%s11256_s21 + $0x1690] sm:$0xff] }
 0x173   : > { %9726 = vmatpush3.bf16.msra.mxu0 %v9725_v11  ;;  %v9741_v11 = vpack.c.bf16 %v1823_v0, %v1822_v54  ;;  %v1910_v54 = vld [vmem:[%s11256_s21 + $0x1530] sm:$0xff] }
 0x174   : > { %9758 = vmatpush3.bf16.msra.mxu1 %v9757_v12  ;;  %9728 = vmatprep.subr.bf16.mxu0 %v9727_v55  ;;  %v9773_v12 = vpack.c.bf16 %v1855_v2, %v1854_v45  ;;  %v9775_v55 = vpack.c.bf16 %v1889_v6, %v1888_v3  ;;  %v1911_v45 = vld [vmem:[%s11256_s21 + $0x1538] sm:$0xff]  ;;  %v1928_v2 = vld [vmem:[%s11256_s21 + $0x15c0] sm:$0xff]  ;;  %v1929_v3 = vld [vmem:[%s11256_s21 + $0x15c8] sm:$0xff] }
 0x175   : > { %9760 = vmatprep.subr.bf16.mxu1 %v9759_v17  ;;  %v1904_v17 = vld [vmem:[%s11256_s21 + $0x1500] sm:$0xff]  ;;  %v9821_v7 = vpack.c.bf16 %v1911_v45, %v1910_v54  ;;  %v1919_v54 = vld [vmem:[%s11256_s21 + $0x1578] sm:$0xff]  ;;  %v1953_v45 = vld [vmem:[%s11256_s21 + $0x1688] sm:$0xff] }
 0x177   : > { %9730 = vmatpush3.bf16.msra.mxu0 %v9729_v25  ;;  %v1922_v25 = vld [vmem:[%s11256_s21 + $0x1590] sm:$0xff] }
 0x178   : > { %9762 = vmatpush3.bf16.msra.mxu1 %v9761_v26  ;;  %9732 = vmatprep.subr.bf16.mxu0 %v9731_v27  ;;  %v1923_v26 = vld [vmem:[%s11256_s21 + $0x1598] sm:$0xff]  ;;  %v290_v27 = vadd.s32 5248, %v11325_v4 }
 0x179   : > { %v7347_v49 = vpop.f32.mrb[4].mxu0  ;;  %9764 = vmatprep.subr.bf16.mxu1 %v9763_v31  ;;  %v9809_v31 = vpack.c.bf16 %v1905_v20, %v1904_v17  ;;  %v9811_v40 = vpack.c.bf16 %v1923_v26, %v1922_v25  ;;  %v1931_v17 = vld [vmem:[%s11256_s21 + $0x15d8] sm:$0xff]  ;;  %v1914_v26 = vld [vmem:[%s11256_s21 + $0x1550] sm:$0xff] }
 0x17a   : > { %v7348_v33 = vpop.f32.mrb[5].mxu0  ;;  %v7382_v53 = vpop.f32.mrb[4].mxu1  ;;  %vm404_vm9 = vcmp.lt.s32.totalorder %v290_v27, %v11339_v21  ;;  %v1883_v25 = vld [vmem:[%s11256_s21 + $0x1458] sm:$0xff]  ;;  %v9827_v27 = vpack.c.bf16 %v1931_v17, %v1930_v16 }
 0x17b   : > { %v7349_v41 = vadd.f32 %v7348_v33, %v7347_v49  ;;  %9734 = vmatpush3.bf16.msra.mxu0 %v9733_v42  ;;  %v7383_v57 = vpop.f32.mrb[5].mxu1  ;;  %v1907_v42 = vld [vmem:[%s11256_s21 + $0x1518] sm:$0xff]  ;;  %v717_v49 = vcombine.high %v12217_v28, %v12217_v28  ;;  %v1908_v33 = vld [vmem:[%s11256_s21 + $0x1520] sm:$0xff] }
 0x17c   : > { %v7384_v37 = vadd.f32 %v7383_v57, %v7382_v53  ;;  %9766 = vmatpush3.bf16.msra.mxu1 %v9765_v34  ;;  %9736 = vmatprep.subr.bf16.mxu0 %v9735_v44  ;;  %v1892_v34 = vld [vmem:[%s11256_s21 + $0x14a0] sm:$0xff]  ;;  %v1893_v44 = vld [vmem:[%s11256_s21 + $0x14a8] sm:$0xff]  ;;  %v9815_v53 = vpack.c.bf16 %v1925_v48, %v1924_v47  ;;  %v1927_v57 = vld [vmem:[%s11256_s21 + $0x15b8] sm:$0xff]  ;;  %v9817_v61 = vpack.c.bf16 %v1909_v56, %v1908_v33 }
 0x17d   : > { %v3371_v5 = vadd.f32 %v7349_v41, %v12104_v13  ;;  %9768 = vmatprep.subr.bf16.mxu1 %v9767_v50  ;;  %v285_v13 = vadd.s32 4608, %v11325_v4  ;;  %v9781_v50 = vpack.c.bf16 %v1875_v24, %v1874_v36  ;;  %v9783_v38 = vpack.c.bf16 %v1893_v44, %v1892_v34  ;;  %v1926_v41 = vld [vmem:[%s11256_s21 + $0x15b0] sm:$0xff]  ;;  %v1933_v36 = vld [vmem:[%s11256_s21 + $0x15e8] sm:$0xff]  ;;  %v1916_v44 = vld [vmem:[%s11256_s21 + $0x1560] sm:$0xff] }
 0x17e   : > { %v9819_v0 = vpack.c.bf16 %v1927_v57, %v1926_v41  ;;  %v9797_v24 = vpack.c.bf16 %v1883_v25, %v1882_v9  ;;  %v1885_v34 = vld [vmem:[%s11256_s21 + $0x1468] sm:$0xff]  ;;  %v1955_v16 = vld [vmem:[%s11256_s21 + $0x1698] sm:$0xff] }
 0x17f   : > { %v12200_v10 = vadd.f32 %v7384_v37, %v3371_v5  ;;  %9738 = vmatpush3.bf16.msra.mxu0 %v9737_v60  ;;  %vm399_vm7 = vcmp.lt.s32.totalorder %v285_v13, %v11339_v21  ;;  %v9785_v60 = vpack.c.bf16 %v1877_v52, %v1876_v51  ;;  %v1896_v5 = vld [vmem:[%s11256_s21 + $0x14c0] sm:$0xff]  ;;  %v1917_v48 = vld [vmem:[%s11256_s21 + $0x1568] sm:$0xff]  ;;  %v1934_v51 = vld [vmem:[%s11256_s21 + $0x15f0] sm:$0xff] }
 0x180   : > { %9770 = vmatpush3.bf16.msra.mxu1 %v9769_v62  ;;  %9740 = vmatprep.subr.bf16.mxu0 %v9739_v63  ;;  %v1878_v62 = vld [vmem:[%s11256_s21 + $0x1430] sm:$0xff]  ;;  %v1879_v63 = vld [vmem:[%s11256_s21 + $0x1438] sm:$0xff]  ;;  %v1912_v13 = vld [vmem:[%s11256_s21 + $0x1540] sm:$0xff]  ;;  %v9833_v41 = vpack.c.bf16 %v1917_v48, %v1916_v44 }
 0x181   : > { %9772 = vmatprep.subr.bf16.mxu1 %v9771_v1  ;;  %v1897_v1 = vld [vmem:[%s11256_s21 + $0x14c8] sm:$0xff]  ;;  %v9789_v6 = vpack.c.bf16 %v1879_v63, %v1878_v62  ;;  %v1935_v52 = vld [vmem:[%s11256_s21 + $0x15f8] sm:$0xff] }
 0x182   : > { %v9791_v58 = vpack.c.bf16 %v1897_v1, %v1896_v5  ;;  %v9835_v63 = vpack.c.bf16 %v1935_v52, %v1934_v51  ;;  %v1984_v5 = vld [vmem:[%s11256_s21 + $0x1780] sm:$0xff]  ;;  %v1985_v1 = vld [vmem:[%s11256_s21 + $0x1788] sm:$0xff]  ;;  %v1958_v52 = vld [vmem:[%s11256_s21 + $0x16b0] sm:$0xff] }
 0x183   : > { %9742 = vmatpush3.bf16.msra.mxu0 %v9741_v11  ;;  %v1881_v11 = vld [vmem:[%s11256_s21 + $0x1448] sm:$0xff] }
 0x184   : > { %9774 = vmatpush3.bf16.msra.mxu1 %v9773_v12  ;;  %9776 = vmatprep.subr.bf16.mxu0 %v9775_v55  ;;  %v9823_v12 = vpack.c.bf16 %v1929_v3, %v1928_v2  ;;  %v1913_v55 = vld [vmem:[%s11256_s21 + $0x1548] sm:$0xff] }
 0x185   : > { %9808 = vmatprep.subr.bf16.mxu1 %v9807_v18  ;;  %v9793_v18 = vpack.c.bf16 %v1881_v11, %v1880_v8  ;;  %v9825_v20 = vpack.c.bf16 %v1913_v55, %v1912_v13  ;;  %v1936_v8 = vld [vmem:[%s11256_s21 + $0x1600] sm:$0xff]  ;;  %v1937_v11 = vld [vmem:[%s11256_s21 + $0x1608] sm:$0xff]  ;;  %v291_v13 = vadd.s32 5376, %v11325_v4  ;;  %v9871_v55 = vpack.c.bf16 %v1985_v1, %v1984_v5 }
 0x186   : > { %7096 = vmatmul.mubr.msk.f32.vlgmr.msra.gmra.mrb[18].mxu0 %vm399_vm7, %v12115_v19  ;;  %v9813_v19 = vpack.c.bf16 %v1907_v42, %v1906_v39  ;;  %v1884_v42 = vld [vmem:[%s11256_s21 + $0x1460] sm:$0xff]  ;;  %v9841_v25 = vpack.c.bf16 %v1937_v11, %v1936_v8  ;;  %v1989_v44 = vld [vmem:[%s11256_s21 + $0x17a8] sm:$0xff]  ;;  %v1962_v8 = vld [vmem:[%s11256_s21 + $0x16d0] sm:$0xff] }
 0x187   : > { %9778 = vmatpush3.bf16.msra.mxu0 %v9777_v29  ;;  %7098 = vmatmul.mubr.msk.f32.vlgmr.msra.gmra.mrb[18].mxu1 %vm401_vm8, %v12121_v32  ;;  %v1895_v32 = vld [vmem:[%s11256_s21 + $0x14b8] sm:$0xff]  ;;  %v9801_v56 = vpack.c.bf16 %v1885_v34, %v1884_v42  ;;  %vm405_vm12 = vcmp.lt.s32.totalorder %v291_v13, %v11339_v21  ;;  %v1988_v34 = vld [vmem:[%s11256_s21 + $0x17a0] sm:$0xff]  ;;  %v1973_v51 = vld [vmem:[%s11256_s21 + $0x1728] sm:$0xff] }
 0x188   : > { %9810 = vmatpush3.bf16.msra.mxu1 %v9809_v31  ;;  %9780 = vmatprep.subr.bf16.mxu0 %v9779_v35  ;;  %v9787_v37 = vpack.c.bf16 %v1895_v32, %v1894_v59  ;;  %v1915_v29 = vld [vmem:[%s11256_s21 + $0x1558] sm:$0xff]  ;;  %v1901_v31 = vld [vmem:[%s11256_s21 + $0x14e8] sm:$0xff]  ;;  %v1932_v35 = vld [vmem:[%s11256_s21 + $0x15e0] sm:$0xff] }
 0x189   : > { %9812 = vmatprep.subr.bf16.mxu1 %v9811_v40  ;;  %7099 = vmatprep.mubr.msk.f32.mxu0 %vm404_vm9, %v716_v46  ;;  %v9829_v39 = vpack.c.bf16 %v1915_v29, %v1914_v26  ;;  %v9799_v40 = vpack.c.bf16 %v1901_v31, %v1900_v30  ;;  %v9831_v47 = vpack.c.bf16 %v1933_v36, %v1932_v35  ;;  %v486_v59 = vld [vmem:[%s11277_s28 + $0x58] sm:$0xff]  ;;  %v296_v26 = vadd.s32 6016, %v11325_v4 }
 0x18a   : > { %7101 = vmatprep.mubr.msk.f32.mxu1 %vm406_vm10, %v717_v49  ;;  %v1902_v49 = vld [vmem:[%s11256_s21 + $0x14f0] sm:$0xff]  ;;  %v718_v2 = vcombine.high %v486_v59, %v486_v59  ;;  %v12307_v17 = vrot.slane %v486_v59, %v11333_v15  ;;  %v9843_v29 = vpack.c.bf16 %v1955_v16, %v1954_v14  ;;  %v1939_v31 = vld [vmem:[%s11256_s21 + $0x1618] sm:$0xff] }
 0x18b   : > { %9782 = vmatpush3.bf16.msra.mxu0 %v9781_v50  ;;  %v1903_v50 = vld [vmem:[%s11256_s21 + $0x14f8] sm:$0xff]  ;;  %v1938_v30 = vld [vmem:[%s11256_s21 + $0x1610] sm:$0xff]  ;;  %vm410_vm14 = vcmp.lt.s32.totalorder %v296_v26, %v11339_v21  ;;  %v1964_v26 = vld [vmem:[%s11256_s21 + $0x16e0] sm:$0xff] }
 0x18c   : > { %9814 = vmatpush3.bf16.msra.mxu1 %v9813_v19  ;;  %9784 = vmatprep.subr.bf16.mxu0 %v9783_v38  ;;  %v9803_v57 = vpack.c.bf16 %v1903_v50, %v1902_v49  ;;  %v12313_v9 = vrot.slane %v718_v2, %v11333_v15  ;;  %v1970_v35 = vld [vmem:[%s11256_s21 + $0x1710] sm:$0xff]  ;;  %v733_v42 = vcombine.high %v12307_v17, %v12307_v17  ;;  %v1940_v49 = vld [vmem:[%s11256_s21 + $0x1620] sm:$0xff]  ;;  %v1941_v50 = vld [vmem:[%s11256_s21 + $0x1628] sm:$0xff] }
 0x18d   : > { %9816 = vmatprep.subr.bf16.mxu1 %v9815_v53  ;;  %v1944_v2 = vld [vmem:[%s11256_s21 + $0x1640] sm:$0xff]  ;;  %v1963_v11 = vld [vmem:[%s11256_s21 + $0x16d8] sm:$0xff]  ;;  %v1994_v13 = vld [vmem:[%s11256_s21 + $0x17d0] sm:$0xff] }
 0x18e   : > { %v9859_v14 = vpack.c.bf16 %v1963_v11, %v1962_v8  ;;  %v1946_v16 = vld [vmem:[%s11256_s21 + $0x1650] sm:$0xff]  ;;  %v2033_v8 = vld [vmem:[%s11256_s21 + $0x1908] sm:$0xff] }
 0x18f   : > { %9786 = vmatpush3.bf16.msra.mxu0 %v9785_v60  ;;  %v1886_v60 = vld [vmem:[%s11256_s21 + $0x1470] sm:$0xff] }
 0x190   : > { %9818 = vmatpush3.bf16.msra.mxu1 %v9817_v61  ;;  %9788 = vmatprep.subr.bf16.mxu0 %v9787_v37  ;;  %v1887_v61 = vld [vmem:[%s11256_s21 + $0x1478] sm:$0xff]  ;;  %v1918_v37 = vld [vmem:[%s11256_s21 + $0x1570] sm:$0xff] }
 0x191   : > { %9820 = vmatprep.subr.bf16.mxu1 %v9819_v0  ;;  %v1952_v0 = vld [vmem:[%s11256_s21 + $0x1680] sm:$0xff]  ;;  %v2018_v11 = vld [vmem:[%s11256_s21 + $0x1890] sm:$0xff] }
 0x193   : > { %9790 = vmatpush3.bf16.msra.mxu0 %v9789_v6  ;;  %v9805_v6 = vpack.c.bf16 %v1887_v61, %v1886_v60  ;;  %v1974_v60 = vld [vmem:[%s11256_s21 + $0x1730] sm:$0xff] }
 0x194   : > { %9822 = vmatpush3.bf16.msra.mxu1 %v9821_v7  ;;  %9792 = vmatprep.subr.bf16.mxu0 %v9791_v58  ;;  %v9837_v7 = vpack.c.bf16 %v1919_v54, %v1918_v37  ;;  %v9839_v58 = vpack.c.bf16 %v1953_v45, %v1952_v0  ;;  %v1975_v37 = vld [vmem:[%s11256_s21 + $0x1738] sm:$0xff]  ;;  %v1992_v54 = vld [vmem:[%s11256_s21 + $0x17c0] sm:$0xff]  ;;  %v1993_v0 = vld [vmem:[%s11256_s21 + $0x17c8] sm:$0xff] }
 0x195   : > { %9824 = vmatprep.subr.bf16.mxu1 %v9823_v12  ;;  %v1968_v12 = vld [vmem:[%s11256_s21 + $0x1700] sm:$0xff]  ;;  %v9885_v5 = vpack.c.bf16 %v1975_v37, %v1974_v60  ;;  %v1983_v60 = vld [vmem:[%s11256_s21 + $0x1778] sm:$0xff]  ;;  %v2017_v37 = vld [vmem:[%s11256_s21 + $0x1888] sm:$0xff] }
 0x197   : > { %9794 = vmatpush3.bf16.msra.mxu0 %v9793_v18  ;;  %v1986_v18 = vld [vmem:[%s11256_s21 + $0x1790] sm:$0xff] }
 0x198   : > { %9826 = vmatpush3.bf16.msra.mxu1 %v9825_v20  ;;  %9796 = vmatprep.subr.bf16.mxu0 %v9795_v22  ;;  %v1987_v20 = vld [vmem:[%s11256_s21 + $0x1798] sm:$0xff]  ;;  %v294_v22 = vadd.s32 5760, %v11325_v4 }
 0x199   : > { %v7417_v46 = vpop.f32.mrb[6].mxu0  ;;  %9828 = vmatprep.subr.bf16.mxu1 %v9827_v27  ;;  %v9873_v27 = vpack.c.bf16 %v1969_v43, %v1968_v12  ;;  %v9875_v36 = vpack.c.bf16 %v1987_v20, %v1986_v18  ;;  %v1995_v12 = vld [vmem:[%s11256_s21 + $0x17d8] sm:$0xff]  ;;  %v1978_v20 = vld [vmem:[%s11256_s21 + $0x1750] sm:$0xff] }
 0x19a   : > { %v7418_v19 = vpop.f32.mrb[7].mxu0  ;;  %v7452_v38 = vpop.f32.mrb[6].mxu1  ;;  %vm408_vm13 = vcmp.lt.s32.totalorder %v294_v22, %v11339_v21  ;;  %v1947_v18 = vld [vmem:[%s11256_s21 + $0x1658] sm:$0xff]  ;;  %v9891_v22 = vpack.c.bf16 %v1995_v12, %v1994_v13 }
 0x19b   : > { %v7419_v33 = vadd.f32 %v7418_v19, %v7417_v46  ;;  %9798 = vmatpush3.bf16.msra.mxu0 %v9797_v24  ;;  %v7453_v53 = vpop.f32.mrb[7].mxu1  ;;  %v1971_v24 = vld [vmem:[%s11256_s21 + $0x1718] sm:$0xff]  ;;  %v734_v46 = vcombine.high %v12313_v9, %v12313_v9  ;;  %v1972_v19 = vld [vmem:[%s11256_s21 + $0x1720] sm:$0xff] }
 0x19c   : > { %v7454_v32 = vadd.f32 %v7453_v53, %v7452_v38  ;;  %9830 = vmatpush3.bf16.msra.mxu1 %v9829_v39  ;;  %9800 = vmatprep.subr.bf16.mxu0 %v9799_v40  ;;  %v1956_v39 = vld [vmem:[%s11256_s21 + $0x16a0] sm:$0xff]  ;;  %v1957_v40 = vld [vmem:[%s11256_s21 + $0x16a8] sm:$0xff]  ;;  %v9879_v38 = vpack.c.bf16 %v1989_v44, %v1988_v34  ;;  %v1991_v53 = vld [vmem:[%s11256_s21 + $0x17b8] sm:$0xff]  ;;  %v9881_v59 = vpack.c.bf16 %v1973_v51, %v1972_v19 }
 0x19d   : > { %v3511_v62 = vadd.f32 %v7419_v33, %v12200_v10  ;;  %9832 = vmatprep.subr.bf16.mxu1 %v9831_v47  ;;  %v289_v10 = vadd.s32 5120, %v11325_v4  ;;  %v9845_v47 = vpack.c.bf16 %v1939_v31, %v1938_v30  ;;  %v9847_v48 = vpack.c.bf16 %v1957_v40, %v1956_v39  ;;  %v1990_v33 = vld [vmem:[%s11256_s21 + $0x17b0] sm:$0xff]  ;;  %v1997_v30 = vld [vmem:[%s11256_s21 + $0x17e8] sm:$0xff]  ;;  %v1980_v40 = vld [vmem:[%s11256_s21 + $0x1760] sm:$0xff] }
 0x19e   : > { %v9883_v61 = vpack.c.bf16 %v1991_v53, %v1990_v33  ;;  %v9861_v31 = vpack.c.bf16 %v1947_v18, %v1946_v16  ;;  %v1949_v39 = vld [vmem:[%s11256_s21 + $0x1668] sm:$0xff]  ;;  %v2019_v13 = vld [vmem:[%s11256_s21 + $0x1898] sm:$0xff] }
 0x19f   : > { %v12296_v3 = vadd.f32 %v7454_v32, %v3511_v62  ;;  %9802 = vmatpush3.bf16.msra.mxu0 %v9801_v56  ;;  %vm403_vm11 = vcmp.lt.s32.totalorder %v289_v10, %v11339_v21  ;;  %v9849_v56 = vpack.c.bf16 %v1941_v50, %v1940_v49  ;;  %v1960_v62 = vld [vmem:[%s11256_s21 + $0x16c0] sm:$0xff]  ;;  %v1981_v44 = vld [vmem:[%s11256_s21 + $0x1768] sm:$0xff]  ;;  %v1998_v49 = vld [vmem:[%s11256_s21 + $0x17f0] sm:$0xff] }
 0x1a0   : > { %9834 = vmatpush3.bf16.msra.mxu1 %v9833_v41  ;;  %9804 = vmatprep.subr.bf16.mxu0 %v9803_v57  ;;  %v1942_v41 = vld [vmem:[%s11256_s21 + $0x1630] sm:$0xff]  ;;  %v1943_v57 = vld [vmem:[%s11256_s21 + $0x1638] sm:$0xff]  ;;  %v1976_v10 = vld [vmem:[%s11256_s21 + $0x1740] sm:$0xff]  ;;  %v9897_v33 = vpack.c.bf16 %v1981_v44, %v1980_v40 }
 0x1a1   : > { %9836 = vmatprep.subr.bf16.mxu1 %v9835_v63  ;;  %v1961_v63 = vld [vmem:[%s11256_s21 + $0x16c8] sm:$0xff]  ;;  %v9853_v45 = vpack.c.bf16 %v1943_v57, %v1942_v41  ;;  %v1999_v50 = vld [vmem:[%s11256_s21 + $0x17f8] sm:$0xff] }
 0x1a2   : > { %v9855_v1 = vpack.c.bf16 %v1961_v63, %v1960_v62  ;;  %v9899_v57 = vpack.c.bf16 %v1999_v50, %v1998_v49  ;;  %v2048_v62 = vld [vmem:[%s11256_s21 + $0x1980] sm:$0xff]  ;;  %v2049_v63 = vld [vmem:[%s11256_s21 + $0x1988] sm:$0xff]  ;;  %v2022_v50 = vld [vmem:[%s11256_s21 + $0x18b0] sm:$0xff] }
 0x1a3   : > { %9806 = vmatpush3.bf16.msra.mxu0 %v9805_v6  ;;  %v1945_v6 = vld [vmem:[%s11256_s21 + $0x1648] sm:$0xff] }
 0x1a4   : > { %9838 = vmatpush3.bf16.msra.mxu1 %v9837_v7  ;;  %9840 = vmatprep.subr.bf16.mxu0 %v9839_v58  ;;  %v9887_v7 = vpack.c.bf16 %v1993_v0, %v1992_v54  ;;  %v1977_v58 = vld [vmem:[%s11256_s21 + $0x1748] sm:$0xff] }
 0x1a5   : > { %9872 = vmatprep.subr.bf16.mxu1 %v9871_v55  ;;  %v9857_v55 = vpack.c.bf16 %v1945_v6, %v1944_v2  ;;  %v9889_v43 = vpack.c.bf16 %v1977_v58, %v1976_v10  ;;  %v2000_v2 = vld [vmem:[%s11256_s21 + $0x1800] sm:$0xff]  ;;  %v2001_v6 = vld [vmem:[%s11256_s21 + $0x1808] sm:$0xff]  ;;  %v295_v10 = vadd.s32 5888, %v11325_v4  ;;  %v9935_v58 = vpack.c.bf16 %v2049_v63, %v2048_v62 }
 0x1a6   : > { %7100 = vmatmul.mubr.msk.f32.vlgmr.msra.gmra.mrb[20].mxu0 %vm403_vm11, %v12211_v23  ;;  %v9877_v23 = vpack.c.bf16 %v1971_v24, %v1970_v35  ;;  %v1948_v24 = vld [vmem:[%s11256_s21 + $0x1660] sm:$0xff]  ;;  %v9905_v18 = vpack.c.bf16 %v2001_v6, %v2000_v2  ;;  %v2053_v40 = vld [vmem:[%s11256_s21 + $0x19a8] sm:$0xff]  ;;  %v2026_v2 = vld [vmem:[%s11256_s21 + $0x18d0] sm:$0xff] }
 0x1a7   : > { %9842 = vmatpush3.bf16.msra.mxu0 %v9841_v25  ;;  %7102 = vmatmul.mubr.msk.f32.vlgmr.msra.gmra.mrb[20].mxu1 %vm405_vm12, %v12217_v28  ;;  %v1959_v28 = vld [vmem:[%s11256_s21 + $0x16b8] sm:$0xff]  ;;  %v9865_v51 = vpack.c.bf16 %v1949_v39, %v1948_v24  ;;  %vm409_vm0 = vcmp.lt.s32.totalorder %v295_v10, %v11339_v21  ;;  %v2052_v39 = vld [vmem:[%s11256_s21 + $0x19a0] sm:$0xff]  ;;  %v2037_v49 = vld [vmem:[%s11256_s21 + $0x1928] sm:$0xff] }
 0x1a8   : > { %9874 = vmatpush3.bf16.msra.mxu1 %v9873_v27  ;;  %9844 = vmatprep.subr.bf16.mxu0 %v9843_v29  ;;  %v9851_v32 = vpack.c.bf16 %v1959_v28, %v1958_v52  ;;  %v1979_v25 = vld [vmem:[%s11256_s21 + $0x1758] sm:$0xff]  ;;  %v1965_v27 = vld [vmem:[%s11256_s21 + $0x16e8] sm:$0xff]  ;;  %v1996_v29 = vld [vmem:[%s11256_s21 + $0x17e0] sm:$0xff] }
 0x1a9   : > { %9876 = vmatprep.subr.bf16.mxu1 %v9875_v36  ;;  %7103 = vmatprep.mubr.msk.f32.mxu0 %vm408_vm13, %v733_v42  ;;  %v9893_v35 = vpack.c.bf16 %v1979_v25, %v1978_v20  ;;  %v9863_v36 = vpack.c.bf16 %v1965_v27, %v1964_v26  ;;  %v9895_v34 = vpack.c.bf16 %v1997_v30, %v1996_v29  ;;  %v487_v52 = vld [vmem:[%s11277_s28 + $0x60] sm:$0xff]  ;;  %v300_v20 = vadd.s32 6528, %v11325_v4  ;;  %v2002_v26 = vld [vmem:[%s11256_s21 + $0x1810] sm:$0xff] }
 0x1aa   : > { %7105 = vmatprep.mubr.msk.f32.mxu1 %vm410_vm14, %v734_v46  ;;  %v1966_v46 = vld [vmem:[%s11256_s21 + $0x16f0] sm:$0xff]  ;;  %v735_v54 = vcombine.high %v487_v52, %v487_v52  ;;  %v12403_v12 = vrot.slane %v487_v52, %v11333_v15  ;;  %v9907_v25 = vpack.c.bf16 %v2019_v13, %v2018_v11  ;;  %v2003_v27 = vld [vmem:[%s11256_s21 + $0x1818] sm:$0xff] }
 0x1ab   : > { %9846 = vmatpush3.bf16.msra.mxu0 %v9845_v47  ;;  %v1967_v47 = vld [vmem:[%s11256_s21 + $0x16f8] sm:$0xff]  ;;  %v2034_v29 = vld [vmem:[%s11256_s21 + $0x1910] sm:$0xff]  ;;  %vm414_vm2 = vcmp.lt.s32.totalorder %v300_v20, %v11339_v21  ;;  %v2028_v20 = vld [vmem:[%s11256_s21 + $0x18e0] sm:$0xff] }
 0x1ac   : > { %9878 = vmatpush3.bf16.msra.mxu1 %v9877_v23  ;;  %9848 = vmatprep.subr.bf16.mxu0 %v9847_v48  ;;  %v9867_v53 = vpack.c.bf16 %v1967_v47, %v1966_v46  ;;  %v12409_v16 = vrot.slane %v735_v54, %v11333_v15  ;;  %v750_v24 = vcombine.high %v12403_v12, %v12403_v12  ;;  %v2004_v46 = vld [vmem:[%s11256_s21 + $0x1820] sm:$0xff]  ;;  %v2005_v47 = vld [vmem:[%s11256_s21 + $0x1828] sm:$0xff]  ;;  %v2027_v6 = vld [vmem:[%s11256_s21 + $0x18d8] sm:$0xff] }
 0x1ad   : > { %9880 = vmatprep.subr.bf16.mxu1 %v9879_v38  ;;  %v2008_v54 = vld [vmem:[%s11256_s21 + $0x1840] sm:$0xff]  ;;  %v2058_v10 = vld [vmem:[%s11256_s21 + $0x19d0] sm:$0xff]  ;;  %v9923_v11 = vpack.c.bf16 %v2027_v6, %v2026_v2  ;;  %v2097_v2 = vld [vmem:[%s11256_s21 + $0x1b08] sm:$0xff] }
 0x1ae   : > { %v2010_v13 = vld [vmem:[%s11256_s21 + $0x1850] sm:$0xff] }
 0x1af   : > { %9850 = vmatpush3.bf16.msra.mxu0 %v9849_v56  ;;  %v1950_v56 = vld [vmem:[%s11256_s21 + $0x1670] sm:$0xff] }
 0x1b0   : > { %9882 = vmatpush3.bf16.msra.mxu1 %v9881_v59  ;;  %9852 = vmatprep.subr.bf16.mxu0 %v9851_v32  ;;  %v1951_v59 = vld [vmem:[%s11256_s21 + $0x1678] sm:$0xff]  ;;  %v1982_v32 = vld [vmem:[%s11256_s21 + $0x1770] sm:$0xff] }
 0x1b1   : > { %9884 = vmatprep.subr.bf16.mxu1 %v9883_v61  ;;  %v2016_v61 = vld [vmem:[%s11256_s21 + $0x1880] sm:$0xff]  ;;  %v2082_v6 = vld [vmem:[%s11256_s21 + $0x1a90] sm:$0xff] }
 0x1b3   : > { %9854 = vmatpush3.bf16.msra.mxu0 %v9853_v45  ;;  %v9869_v45 = vpack.c.bf16 %v1951_v59, %v1950_v56  ;;  %v2038_v56 = vld [vmem:[%s11256_s21 + $0x1930] sm:$0xff] }
 0x1b4   : > { %9886 = vmatpush3.bf16.msra.mxu1 %v9885_v5  ;;  %9856 = vmatprep.subr.bf16.mxu0 %v9855_v1  ;;  %v9901_v5 = vpack.c.bf16 %v1983_v60, %v1982_v32  ;;  %v9903_v1 = vpack.c.bf16 %v2017_v37, %v2016_v61  ;;  %v2039_v32 = vld [vmem:[%s11256_s21 + $0x1938] sm:$0xff]  ;;  %v2056_v60 = vld [vmem:[%s11256_s21 + $0x19c0] sm:$0xff]  ;;  %v2057_v61 = vld [vmem:[%s11256_s21 + $0x19c8] sm:$0xff] }
 0x1b5   : > { %9888 = vmatprep.subr.bf16.mxu1 %v9887_v7  ;;  %v2032_v7 = vld [vmem:[%s11256_s21 + $0x1900] sm:$0xff]  ;;  %v9949_v62 = vpack.c.bf16 %v2039_v32, %v2038_v56  ;;  %v2047_v56 = vld [vmem:[%s11256_s21 + $0x1978] sm:$0xff]  ;;  %v2081_v32 = vld [vmem:[%s11256_s21 + $0x1a88] sm:$0xff] }
 0x1b7   : > { %9858 = vmatpush3.bf16.msra.mxu0 %v9857_v55  ;;  %v2050_v55 = vld [vmem:[%s11256_s21 + $0x1990] sm:$0xff] }
 0x1b8   : > { %9890 = vmatpush3.bf16.msra.mxu1 %v9889_v43  ;;  %9860 = vmatprep.subr.bf16.mxu0 %v9859_v14  ;;  %v2051_v43 = vld [vmem:[%s11256_s21 + $0x1998] sm:$0xff]  ;;  %v298_v14 = vadd.s32 6272, %v11325_v4 }
 0x1b9   : > { %v7487_v42 = vpop.f32.mrb[8].mxu0  ;;  %9892 = vmatprep.subr.bf16.mxu1 %v9891_v22  ;;  %v9937_v22 = vpack.c.bf16 %v2033_v8, %v2032_v7  ;;  %v9939_v30 = vpack.c.bf16 %v2051_v43, %v2050_v55  ;;  %v2059_v7 = vld [vmem:[%s11256_s21 + $0x19d8] sm:$0xff]  ;;  %v2042_v43 = vld [vmem:[%s11256_s21 + $0x1950] sm:$0xff] }
 0x1ba   : > { %v7488_v23 = vpop.f32.mrb[9].mxu0  ;;  %v7522_v48 = vpop.f32.mrb[8].mxu1  ;;  %vm412_vm1 = vcmp.lt.s32.totalorder %v298_v14, %v11339_v21  ;;  %v2011_v55 = vld [vmem:[%s11256_s21 + $0x1858] sm:$0xff]  ;;  %v9955_v14 = vpack.c.bf16 %v2059_v7, %v2058_v10 }
 0x1bb   : > { %v7489_v19 = vadd.f32 %v7488_v23, %v7487_v42  ;;  %9862 = vmatpush3.bf16.msra.mxu0 %v9861_v31  ;;  %v7523_v38 = vpop.f32.mrb[9].mxu1  ;;  %v2035_v31 = vld [vmem:[%s11256_s21 + $0x1918] sm:$0xff]  ;;  %v751_v42 = vcombine.high %v12409_v16, %v12409_v16  ;;  %v2036_v23 = vld [vmem:[%s11256_s21 + $0x1920] sm:$0xff] }
 0x1bc   : > { %v7524_v28 = vadd.f32 %v7523_v38, %v7522_v48  ;;  %9894 = vmatpush3.bf16.msra.mxu1 %v9893_v35  ;;  %9864 = vmatprep.subr.bf16.mxu0 %v9863_v36  ;;  %v2020_v35 = vld [vmem:[%s11256_s21 + $0x18a0] sm:$0xff]  ;;  %v2021_v36 = vld [vmem:[%s11256_s21 + $0x18a8] sm:$0xff]  ;;  %v9943_v48 = vpack.c.bf16 %v2053_v40, %v2052_v39  ;;  %v2055_v38 = vld [vmem:[%s11256_s21 + $0x19b8] sm:$0xff]  ;;  %v9945_v52 = vpack.c.bf16 %v2037_v49, %v2036_v23 }
 0x1bd   : > { %v3651_v41 = vadd.f32 %v7489_v19, %v12296_v3  ;;  %9896 = vmatprep.subr.bf16.mxu1 %v9895_v34  ;;  %v293_v3 = vadd.s32 5632, %v11325_v4  ;;  %v9909_v34 = vpack.c.bf16 %v2003_v27, %v2002_v26  ;;  %v9911_v44 = vpack.c.bf16 %v2021_v36, %v2020_v35  ;;  %v2054_v19 = vld [vmem:[%s11256_s21 + $0x19b0] sm:$0xff]  ;;  %v2061_v26 = vld [vmem:[%s11256_s21 + $0x19e8] sm:$0xff]  ;;  %v2044_v36 = vld [vmem:[%s11256_s21 + $0x1960] sm:$0xff] }
 0x1be   : > { %v9947_v59 = vpack.c.bf16 %v2055_v38, %v2054_v19  ;;  %v9925_v27 = vpack.c.bf16 %v2011_v55, %v2010_v13  ;;  %v2013_v35 = vld [vmem:[%s11256_s21 + $0x1868] sm:$0xff]  ;;  %v2083_v10 = vld [vmem:[%s11256_s21 + $0x1a98] sm:$0xff] }
 0x1bf   : > { %v12392_v0 = vadd.f32 %v7524_v28, %v3651_v41  ;;  %9866 = vmatpush3.bf16.msra.mxu0 %v9865_v51  ;;  %vm407_vm15 = vcmp.lt.s32.totalorder %v293_v3, %v11339_v21  ;;  %v9913_v51 = vpack.c.bf16 %v2005_v47, %v2004_v46  ;;  %v2024_v41 = vld [vmem:[%s11256_s21 + $0x18c0] sm:$0xff]  ;;  %v2045_v40 = vld [vmem:[%s11256_s21 + $0x1968] sm:$0xff]  ;;  %v2062_v46 = vld [vmem:[%s11256_s21 + $0x19f0] sm:$0xff] }
 0x1c0   : > { %9898 = vmatpush3.bf16.msra.mxu1 %v9897_v33  ;;  %9868 = vmatprep.subr.bf16.mxu0 %v9867_v53  ;;  %v2006_v33 = vld [vmem:[%s11256_s21 + $0x1830] sm:$0xff]  ;;  %v2007_v53 = vld [vmem:[%s11256_s21 + $0x1838] sm:$0xff]  ;;  %v2040_v3 = vld [vmem:[%s11256_s21 + $0x1940] sm:$0xff]  ;;  %v9961_v19 = vpack.c.bf16 %v2045_v40, %v2044_v36 }
 0x1c1   : > { %9900 = vmatprep.subr.bf16.mxu1 %v9899_v57  ;;  %v2025_v57 = vld [vmem:[%s11256_s21 + $0x18c8] sm:$0xff]  ;;  %v9917_v37 = vpack.c.bf16 %v2007_v53, %v2006_v33  ;;  %v2063_v47 = vld [vmem:[%s11256_s21 + $0x19f8] sm:$0xff] }
 0x1c2   : > { %v9919_v63 = vpack.c.bf16 %v2025_v57, %v2024_v41  ;;  %v9963_v53 = vpack.c.bf16 %v2063_v47, %v2062_v46  ;;  %v2112_v41 = vld [vmem:[%s11256_s21 + $0x1b80] sm:$0xff]  ;;  %v2113_v57 = vld [vmem:[%s11256_s21 + $0x1b88] sm:$0xff]  ;;  %v2086_v47 = vld [vmem:[%s11256_s21 + $0x1ab0] sm:$0xff] }
 0x1c3   : > { %9870 = vmatpush3.bf16.msra.mxu0 %v9869_v45  ;;  %v2009_v45 = vld [vmem:[%s11256_s21 + $0x1848] sm:$0xff] }
 0x1c4   : > { %9902 = vmatpush3.bf16.msra.mxu1 %v9901_v5  ;;  %9904 = vmatprep.subr.bf16.mxu0 %v9903_v1  ;;  %v9951_v5 = vpack.c.bf16 %v2057_v61, %v2056_v60  ;;  %v2041_v1 = vld [vmem:[%s11256_s21 + $0x1948] sm:$0xff] }
 0x1c5   : > { %9936 = vmatprep.subr.bf16.mxu1 %v9935_v58  ;;  %v9921_v58 = vpack.c.bf16 %v2009_v45, %v2008_v54  ;;  %v9953_v8 = vpack.c.bf16 %v2041_v1, %v2040_v3  ;;  %v2064_v54 = vld [vmem:[%s11256_s21 + $0x1a00] sm:$0xff]  ;;  %v2065_v45 = vld [vmem:[%s11256_s21 + $0x1a08] sm:$0xff]  ;;  %v299_v3 = vadd.s32 6400, %v11325_v4  ;;  %v9999_v1 = vpack.c.bf16 %v2113_v57, %v2112_v41 }
 0x1c6   : > { %7104 = vmatmul.mubr.msk.f32.vlgmr.msra.gmra.mrb[22].mxu0 %vm407_vm15, %v12307_v17  ;;  %v9941_v17 = vpack.c.bf16 %v2035_v31, %v2034_v29  ;;  %v2012_v31 = vld [vmem:[%s11256_s21 + $0x1860] sm:$0xff]  ;;  %v9969_v55 = vpack.c.bf16 %v2065_v45, %v2064_v54  ;;  %v2117_v36 = vld [vmem:[%s11256_s21 + $0x1ba8] sm:$0xff]  ;;  %v2090_v54 = vld [vmem:[%s11256_s21 + $0x1ad0] sm:$0xff] }
 0x1c7   : > { %9906 = vmatpush3.bf16.msra.mxu0 %v9905_v18  ;;  %7106 = vmatmul.mubr.msk.f32.vlgmr.msra.gmra.mrb[22].mxu1 %vm409_vm0, %v12313_v9  ;;  %v2023_v9 = vld [vmem:[%s11256_s21 + $0x18b8] sm:$0xff]  ;;  %v9929_v49 = vpack.c.bf16 %v2013_v35, %v2012_v31  ;;  %vm413_vm4 = vcmp.lt.s32.totalorder %v299_v3, %v11339_v21  ;;  %v2116_v35 = vld [vmem:[%s11256_s21 + $0x1ba0] sm:$0xff]  ;;  %v2101_v46 = vld [vmem:[%s11256_s21 + $0x1b28] sm:$0xff] }
 0x1c8   : > { %9938 = vmatpush3.bf16.msra.mxu1 %v9937_v22  ;;  %9908 = vmatprep.subr.bf16.mxu0 %v9907_v25  ;;  %v9915_v28 = vpack.c.bf16 %v2023_v9, %v2022_v50  ;;  %v2043_v18 = vld [vmem:[%s11256_s21 + $0x1958] sm:$0xff]  ;;  %v2029_v22 = vld [vmem:[%s11256_s21 + $0x18e8] sm:$0xff]  ;;  %v2060_v25 = vld [vmem:[%s11256_s21 + $0x19e0] sm:$0xff] }
 0x1c9   : > { %9940 = vmatprep.subr.bf16.mxu1 %v9939_v30  ;;  %7107 = vmatprep.mubr.msk.f32.mxu0 %vm412_vm1, %v750_v24  ;;  %v9957_v29 = vpack.c.bf16 %v2043_v18, %v2042_v43  ;;  %v9927_v30 = vpack.c.bf16 %v2029_v22, %v2028_v20  ;;  %v9959_v39 = vpack.c.bf16 %v2061_v26, %v2060_v25  ;;  %v488_v50 = vld [vmem:[%s11277_s28 + $0x68] sm:$0xff]  ;;  %v304_v43 = vadd.s32 7040, %v11325_v4  ;;  %v2066_v20 = vld [vmem:[%s11256_s21 + $0x1a10] sm:$0xff]  ;;  %v2067_v22 = vld [vmem:[%s11256_s21 + $0x1a18] sm:$0xff] }
 0x1ca   : > { %7109 = vmatprep.mubr.msk.f32.mxu1 %vm414_vm2, %v751_v42  ;;  %v2030_v42 = vld [vmem:[%s11256_s21 + $0x18f0] sm:$0xff]  ;;  %v752_v60 = vcombine.high %v488_v50, %v488_v50  ;;  %v12499_v7 = vrot.slane %v488_v50, %v11333_v15  ;;  %v9971_v18 = vpack.c.bf16 %v2083_v10, %v2082_v6  ;;  %v2091_v45 = vld [vmem:[%s11256_s21 + $0x1ad8] sm:$0xff] }
 0x1cb   : > { %9910 = vmatpush3.bf16.msra.mxu0 %v9909_v34  ;;  %v2031_v34 = vld [vmem:[%s11256_s21 + $0x18f8] sm:$0xff]  ;;  %v2098_v25 = vld [vmem:[%s11256_s21 + $0x1b10] sm:$0xff]  ;;  %vm418_vm6 = vcmp.lt.s32.totalorder %v304_v43, %v11339_v21  ;;  %v9987_v6 = vpack.c.bf16 %v2091_v45, %v2090_v54  ;;  %v2092_v43 = vld [vmem:[%s11256_s21 + $0x1ae0] sm:$0xff] }
 0x1cc   : > { %9942 = vmatpush3.bf16.msra.mxu1 %v9941_v17  ;;  %9912 = vmatprep.subr.bf16.mxu0 %v9911_v44  ;;  %v9931_v38 = vpack.c.bf16 %v2031_v34, %v2030_v42  ;;  %v12505_v13 = vrot.slane %v752_v60, %v11333_v15  ;;  %v767_v31 = vcombine.high %v12499_v7, %v12499_v7  ;;  %v2068_v42 = vld [vmem:[%s11256_s21 + $0x1a20] sm:$0xff]  ;;  %v2069_v34 = vld [vmem:[%s11256_s21 + $0x1a28] sm:$0xff]  ;;  %v2122_v3 = vld [vmem:[%s11256_s21 + $0x1bd0] sm:$0xff] }
 0x1cd   : > { %9944 = vmatprep.subr.bf16.mxu1 %v9943_v48  ;;  %v2072_v60 = vld [vmem:[%s11256_s21 + $0x1a40] sm:$0xff]  ;;  %v2074_v10 = vld [vmem:[%s11256_s21 + $0x1a50] sm:$0xff]  ;;  %v2161_v54 = vld [vmem:[%s11256_s21 + $0x1d08] sm:$0xff] }
 0x1ce   : > { %v2146_v45 = vld [vmem:[%s11256_s21 + $0x1c90] sm:$0xff] }
 0x1cf   : > { %9914 = vmatpush3.bf16.msra.mxu0 %v9913_v51  ;;  %v2014_v51 = vld [vmem:[%s11256_s21 + $0x1870] sm:$0xff] }
 0x1d0   : > { %9946 = vmatpush3.bf16.msra.mxu1 %v9945_v52  ;;  %9916 = vmatprep.subr.bf16.mxu0 %v9915_v28  ;;  %v2015_v52 = vld [vmem:[%s11256_s21 + $0x1878] sm:$0xff]  ;;  %v2046_v28 = vld [vmem:[%s11256_s21 + $0x1970] sm:$0xff] }
 0x1d1   : > { %9948 = vmatprep.subr.bf16.mxu1 %v9947_v59  ;;  %v2080_v59 = vld [vmem:[%s11256_s21 + $0x1a80] sm:$0xff] }
 0x1d3   : > { %9918 = vmatpush3.bf16.msra.mxu0 %v9917_v37  ;;  %v9933_v37 = vpack.c.bf16 %v2015_v52, %v2014_v51  ;;  %v2102_v51 = vld [vmem:[%s11256_s21 + $0x1b30] sm:$0xff] }
 0x1d4   : > { %9950 = vmatpush3.bf16.msra.mxu1 %v9949_v62  ;;  %9920 = vmatprep.subr.bf16.mxu0 %v9919_v63  ;;  %v9965_v62 = vpack.c.bf16 %v2047_v56, %v2046_v28  ;;  %v9967_v63 = vpack.c.bf16 %v2081_v32, %v2080_v59  ;;  %v2103_v28 = vld [vmem:[%s11256_s21 + $0x1b38] sm:$0xff]  ;;  %v2120_v56 = vld [vmem:[%s11256_s21 + $0x1bc0] sm:$0xff]  ;;  %v2121_v59 = vld [vmem:[%s11256_s21 + $0x1bc8] sm:$0xff] }
 0x1d5   : > { %9952 = vmatprep.subr.bf16.mxu1 %v9951_v5  ;;  %v2096_v5 = vld [vmem:[%s11256_s21 + $0x1b00] sm:$0xff]  ;;  %v10013_v41 = vpack.c.bf16 %v2103_v28, %v2102_v51  ;;  %v2111_v51 = vld [vmem:[%s11256_s21 + $0x1b78] sm:$0xff]  ;;  %v2145_v28 = vld [vmem:[%s11256_s21 + $0x1c88] sm:$0xff] }
 0x1d7   : > { %9922 = vmatpush3.bf16.msra.mxu0 %v9921_v58  ;;  %v2114_v58 = vld [vmem:[%s11256_s21 + $0x1b90] sm:$0xff] }
 0x1d8   : > { %9954 = vmatpush3.bf16.msra.mxu1 %v9953_v8  ;;  %9924 = vmatprep.subr.bf16.mxu0 %v9923_v11  ;;  %v2115_v8 = vld [vmem:[%s11256_s21 + $0x1b98] sm:$0xff]  ;;  %v302_v11 = vadd.s32 6784, %v11325_v4 }
 0x1d9   : > { %v7557_v24 = vpop.f32.mrb[10].mxu0  ;;  %9956 = vmatprep.subr.bf16.mxu1 %v9955_v14  ;;  %v10001_v14 = vpack.c.bf16 %v2097_v2, %v2096_v5  ;;  %v10003_v26 = vpack.c.bf16 %v2115_v8, %v2114_v58  ;;  %v2123_v5 = vld [vmem:[%s11256_s21 + $0x1bd8] sm:$0xff]  ;;  %v2106_v8 = vld [vmem:[%s11256_s21 + $0x1b50] sm:$0xff] }
 0x1da   : > { %v7558_v17 = vpop.f32.mrb[11].mxu0  ;;  %v7592_v44 = vpop.f32.mrb[10].mxu1  ;;  %vm416_vm5 = vcmp.lt.s32.totalorder %v302_v11, %v11339_v21  ;;  %v2075_v58 = vld [vmem:[%s11256_s21 + $0x1a58] sm:$0xff]  ;;  %v10019_v11 = vpack.c.bf16 %v2123_v5, %v2122_v3 }
 0x1db   : > { %v7559_v23 = vadd.f32 %v7558_v17, %v7557_v24  ;;  %9926 = vmatpush3.bf16.msra.mxu0 %v9925_v27  ;;  %v7593_v48 = vpop.f32.mrb[11].mxu1  ;;  %v2099_v27 = vld [vmem:[%s11256_s21 + $0x1b18] sm:$0xff]  ;;  %v768_v24 = vcombine.high %v12505_v13, %v12505_v13  ;;  %v2100_v17 = vld [vmem:[%s11256_s21 + $0x1b20] sm:$0xff] }
 0x1dc   : > { %v7594_v9 = vadd.f32 %v7593_v48, %v7592_v44  ;;  %9958 = vmatpush3.bf16.msra.mxu1 %v9957_v29  ;;  %9928 = vmatprep.subr.bf16.mxu0 %v9927_v30  ;;  %v2084_v29 = vld [vmem:[%s11256_s21 + $0x1aa0] sm:$0xff]  ;;  %v2085_v30 = vld [vmem:[%s11256_s21 + $0x1aa8] sm:$0xff]  ;;  %v10007_v44 = vpack.c.bf16 %v2117_v36, %v2116_v35  ;;  %v2119_v48 = vld [vmem:[%s11256_s21 + $0x1bb8] sm:$0xff]  ;;  %v10009_v50 = vpack.c.bf16 %v2101_v46, %v2100_v17 }
 0x1dd   : > { %v3791_v33 = vadd.f32 %v7559_v23, %v12392_v0  ;;  %9960 = vmatprep.subr.bf16.mxu1 %v9959_v39  ;;  %v297_v0 = vadd.s32 6144, %v11325_v4  ;;  %v9973_v39 = vpack.c.bf16 %v2067_v22, %v2066_v20  ;;  %v9975_v40 = vpack.c.bf16 %v2085_v30, %v2084_v29  ;;  %v2118_v23 = vld [vmem:[%s11256_s21 + $0x1bb0] sm:$0xff]  ;;  %v2125_v20 = vld [vmem:[%s11256_s21 + $0x1be8] sm:$0xff]  ;;  %v2108_v30 = vld [vmem:[%s11256_s21 + $0x1b60] sm:$0xff] }
 0x1de   : > { %v10011_v52 = vpack.c.bf16 %v2119_v48, %v2118_v23  ;;  %v9989_v22 = vpack.c.bf16 %v2075_v58, %v2074_v10  ;;  %v2077_v29 = vld [vmem:[%s11256_s21 + $0x1a68] sm:$0xff]  ;;  %v2147_v3 = vld [vmem:[%s11256_s21 + $0x1c98] sm:$0xff] }
 0x1df   : > { %v12488_v61 = vadd.f32 %v7594_v9, %v3791_v33  ;;  %9930 = vmatpush3.bf16.msra.mxu0 %v9929_v49  ;;  %vm411_vm3 = vcmp.lt.s32.totalorder %v297_v0, %v11339_v21  ;;  %v9977_v49 = vpack.c.bf16 %v2069_v34, %v2068_v42  ;;  %v2088_v33 = vld [vmem:[%s11256_s21 + $0x1ac0] sm:$0xff]  ;;  %v2109_v36 = vld [vmem:[%s11256_s21 + $0x1b68] sm:$0xff]  ;;  %v2126_v42 = vld [vmem:[%s11256_s21 + $0x1bf0] sm:$0xff] }
 0x1e0   : > { %9962 = vmatpush3.bf16.msra.mxu1 %v9961_v19  ;;  %9932 = vmatprep.subr.bf16.mxu0 %v9931_v38  ;;  %v2070_v19 = vld [vmem:[%s11256_s21 + $0x1a30] sm:$0xff]  ;;  %v2071_v38 = vld [vmem:[%s11256_s21 + $0x1a38] sm:$0xff]  ;;  %v2104_v0 = vld [vmem:[%s11256_s21 + $0x1b40] sm:$0xff]  ;;  %v10025_v23 = vpack.c.bf16 %v2109_v36, %v2108_v30 }
 0x1e1   : > { %9964 = vmatprep.subr.bf16.mxu1 %v9963_v53  ;;  %v2089_v53 = vld [vmem:[%s11256_s21 + $0x1ac8] sm:$0xff]  ;;  %v9981_v32 = vpack.c.bf16 %v2071_v38, %v2070_v19  ;;  %v2127_v34 = vld [vmem:[%s11256_s21 + $0x1bf8] sm:$0xff] }
 0x1e2   : > { %v9983_v57 = vpack.c.bf16 %v2089_v53, %v2088_v33  ;;  %v10027_v38 = vpack.c.bf16 %v2127_v34, %v2126_v42  ;;  %v2176_v33 = vld [vmem:[%s11256_s21 + $0x1d80] sm:$0xff]  ;;  %v2177_v53 = vld [vmem:[%s11256_s21 + $0x1d88] sm:$0xff]  ;;  %v2150_v34 = vld [vmem:[%s11256_s21 + $0x1cb0] sm:$0xff] }
 0x1e3   : > { %9934 = vmatpush3.bf16.msra.mxu0 %v9933_v37  ;;  %v2073_v37 = vld [vmem:[%s11256_s21 + $0x1a48] sm:$0xff] }
 0x1e4   : > { %9966 = vmatpush3.bf16.msra.mxu1 %v9965_v62  ;;  %9968 = vmatprep.subr.bf16.mxu0 %v9967_v63  ;;  %v10015_v62 = vpack.c.bf16 %v2121_v59, %v2120_v56  ;;  %v2105_v63 = vld [vmem:[%s11256_s21 + $0x1b48] sm:$0xff] }
 0x1e5   : > { %10000 = vmatprep.subr.bf16.mxu1 %v9999_v1  ;;  %v9985_v1 = vpack.c.bf16 %v2073_v37, %v2072_v60  ;;  %v10017_v2 = vpack.c.bf16 %v2105_v63, %v2104_v0  ;;  %v2128_v60 = vld [vmem:[%s11256_s21 + $0x1c00] sm:$0xff]  ;;  %v2129_v37 = vld [vmem:[%s11256_s21 + $0x1c08] sm:$0xff]  ;;  %v303_v0 = vadd.s32 6912, %v11325_v4  ;;  %v10063_v63 = vpack.c.bf16 %v2177_v53, %v2176_v33 }
 0x1e6   : > { %7108 = vmatmul.mubr.msk.f32.vlgmr.msra.gmra.mrb[24].mxu0 %vm411_vm3, %v12403_v12  ;;  %v10005_v12 = vpack.c.bf16 %v2099_v27, %v2098_v25  ;;  %v2076_v27 = vld [vmem:[%s11256_s21 + $0x1a60] sm:$0xff]  ;;  %v10033_v58 = vpack.c.bf16 %v2129_v37, %v2128_v60  ;;  %v2181_v30 = vld [vmem:[%s11256_s21 + $0x1da8] sm:$0xff]  ;;  %v2154_v60 = vld [vmem:[%s11256_s21 + $0x1cd0] sm:$0xff] }
 0x1e7   : > { %9970 = vmatpush3.bf16.msra.mxu0 %v9969_v55  ;;  %7110 = vmatmul.mubr.msk.f32.vlgmr.msra.gmra.mrb[24].mxu1 %vm413_vm4, %v12409_v16  ;;  %v2087_v16 = vld [vmem:[%s11256_s21 + $0x1ab8] sm:$0xff]  ;;  %v9993_v46 = vpack.c.bf16 %v2077_v29, %v2076_v27  ;;  %vm417_vm8 = vcmp.lt.s32.totalorder %v303_v0, %v11339_v21  ;;  %v2180_v29 = vld [vmem:[%s11256_s21 + $0x1da0] sm:$0xff]  ;;  %v2165_v42 = vld [vmem:[%s11256_s21 + $0x1d28] sm:$0xff] }
 0x1e8   : > { %10002 = vmatpush3.bf16.msra.mxu1 %v10001_v14  ;;  %9972 = vmatprep.subr.bf16.mxu0 %v9971_v18  ;;  %v9979_v9 = vpack.c.bf16 %v2087_v16, %v2086_v47  ;;  %v2107_v55 = vld [vmem:[%s11256_s21 + $0x1b58] sm:$0xff]  ;;  %v2093_v14 = vld [vmem:[%s11256_s21 + $0x1ae8] sm:$0xff]  ;;  %v2124_v18 = vld [vmem:[%s11256_s21 + $0x1be0] sm:$0xff] }
 0x1e9   : > { %10004 = vmatprep.subr.bf16.mxu1 %v10003_v26  ;;  %7111 = vmatprep.mubr.msk.f32.mxu0 %vm416_vm5, %v767_v31  ;;  %v10021_v25 = vpack.c.bf16 %v2107_v55, %v2106_v8  ;;  %v9991_v26 = vpack.c.bf16 %v2093_v14, %v2092_v43  ;;  %v10023_v35 = vpack.c.bf16 %v2125_v20, %v2124_v18  ;;  %v489_v47 = vld [vmem:[%s11277_s28 + $0x70] sm:$0xff]  ;;  %v308_v8 = vadd.s32 7552, %v11325_v4  ;;  %v2131_v14 = vld [vmem:[%s11256_s21 + $0x1c18] sm:$0xff] }
 0x1ea   : > { %7113 = vmatprep.mubr.msk.f32.mxu1 %vm418_vm6, %v768_v24  ;;  %v2094_v24 = vld [vmem:[%s11256_s21 + $0x1af0] sm:$0xff]  ;;  %v769_v56 = vcombine.high %v489_v47, %v489_v47  ;;  %v12595_v5 = vrot.slane %v489_v47, %v11333_v15  ;;  %v10035_v55 = vpack.c.bf16 %v2147_v3, %v2146_v45  ;;  %v2155_v37 = vld [vmem:[%s11256_s21 + $0x1cd8] sm:$0xff] }
 0x1eb   : > { %9974 = vmatpush3.bf16.msra.mxu0 %v9973_v39  ;;  %v2095_v39 = vld [vmem:[%s11256_s21 + $0x1af8] sm:$0xff]  ;;  %v2130_v43 = vld [vmem:[%s11256_s21 + $0x1c10] sm:$0xff]  ;;  %vm422_vm10 = vcmp.lt.s32.totalorder %v308_v8, %v11339_v21  ;;  %v10051_v45 = vpack.c.bf16 %v2155_v37, %v2154_v60  ;;  %v2156_v8 = vld [vmem:[%s11256_s21 + $0x1ce0] sm:$0xff] }
 0x1ec   : > { %10006 = vmatpush3.bf16.msra.mxu1 %v10005_v12  ;;  %9976 = vmatprep.subr.bf16.mxu0 %v9975_v40  ;;  %v9995_v48 = vpack.c.bf16 %v2095_v39, %v2094_v24  ;;  %v12601_v10 = vrot.slane %v769_v56, %v11333_v15  ;;  %v2162_v18 = vld [vmem:[%s11256_s21 + $0x1d10] sm:$0xff]  ;;  %v784_v27 = vcombine.high %v12595_v5, %v12595_v5  ;;  %v2132_v24 = vld [vmem:[%s11256_s21 + $0x1c20] sm:$0xff]  ;;  %v2133_v39 = vld [vmem:[%s11256_s21 + $0x1c28] sm:$0xff] }
 0x1ed   : > { %10008 = vmatprep.subr.bf16.mxu1 %v10007_v44  ;;  %v2136_v56 = vld [vmem:[%s11256_s21 + $0x1c40] sm:$0xff]  ;;  %v2186_v0 = vld [vmem:[%s11256_s21 + $0x1dd0] sm:$0xff]  ;;  %v2225_v60 = vld [vmem:[%s11256_s21 + $0x1f08] sm:$0xff] }
 0x1ee   : > { %v2138_v3 = vld [vmem:[%s11256_s21 + $0x1c50] sm:$0xff] }
 0x1ef   : > { %9978 = vmatpush3.bf16.msra.mxu0 %v9977_v49  ;;  %v2078_v49 = vld [vmem:[%s11256_s21 + $0x1a70] sm:$0xff] }
 0x1f0   : > { %10010 = vmatpush3.bf16.msra.mxu1 %v10009_v50  ;;  %9980 = vmatprep.subr.bf16.mxu0 %v9979_v9  ;;  %v2079_v50 = vld [vmem:[%s11256_s21 + $0x1a78] sm:$0xff]  ;;  %v2110_v9 = vld [vmem:[%s11256_s21 + $0x1b70] sm:$0xff] }
 0x1f1   : > { %10012 = vmatprep.subr.bf16.mxu1 %v10011_v52  ;;  %v2144_v52 = vld [vmem:[%s11256_s21 + $0x1c80] sm:$0xff]  ;;  %v2210_v37 = vld [vmem:[%s11256_s21 + $0x1e90] sm:$0xff] }
 0x1f3   : > { %9982 = vmatpush3.bf16.msra.mxu0 %v9981_v32  ;;  %v9997_v32 = vpack.c.bf16 %v2079_v50, %v2078_v49  ;;  %v2166_v49 = vld [vmem:[%s11256_s21 + $0x1d30] sm:$0xff] }
 0x1f4   : > { %10014 = vmatpush3.bf16.msra.mxu1 %v10013_v41  ;;  %9984 = vmatprep.subr.bf16.mxu0 %v9983_v57  ;;  %v10029_v41 = vpack.c.bf16 %v2111_v51, %v2110_v9  ;;  %v10031_v57 = vpack.c.bf16 %v2145_v28, %v2144_v52  ;;  %v2167_v9 = vld [vmem:[%s11256_s21 + $0x1d38] sm:$0xff]  ;;  %v2184_v51 = vld [vmem:[%s11256_s21 + $0x1dc0] sm:$0xff]  ;;  %v2185_v52 = vld [vmem:[%s11256_s21 + $0x1dc8] sm:$0xff] }
 0x1f5   : > { %10016 = vmatprep.subr.bf16.mxu1 %v10015_v62  ;;  %v2160_v62 = vld [vmem:[%s11256_s21 + $0x1d00] sm:$0xff]  ;;  %v10077_v33 = vpack.c.bf16 %v2167_v9, %v2166_v49  ;;  %v2175_v49 = vld [vmem:[%s11256_s21 + $0x1d78] sm:$0xff]  ;;  %v2209_v9 = vld [vmem:[%s11256_s21 + $0x1e88] sm:$0xff] }
 0x1f7   : > { %9986 = vmatpush3.bf16.msra.mxu0 %v9985_v1  ;;  %v2178_v1 = vld [vmem:[%s11256_s21 + $0x1d90] sm:$0xff] }
 0x1f8   : > { %10018 = vmatpush3.bf16.msra.mxu1 %v10017_v2  ;;  %9988 = vmatprep.subr.bf16.mxu0 %v9987_v6  ;;  %v2179_v2 = vld [vmem:[%s11256_s21 + $0x1d98] sm:$0xff]  ;;  %v306_v6 = vadd.s32 7296, %v11325_v4 }
 0x1f9   : > { %v7627_v31 = vpop.f32.mrb[12].mxu0  ;;  %10020 = vmatprep.subr.bf16.mxu1 %v10019_v11  ;;  %v10065_v11 = vpack.c.bf16 %v2161_v54, %v2160_v62  ;;  %v10067_v20 = vpack.c.bf16 %v2179_v2, %v2178_v1  ;;  %v2187_v62 = vld [vmem:[%s11256_s21 + $0x1dd8] sm:$0xff]  ;;  %v2170_v2 = vld [vmem:[%s11256_s21 + $0x1d50] sm:$0xff] }
 0x1fa   : > { %v7628_v12 = vpop.f32.mrb[13].mxu0  ;;  %v7662_v40 = vpop.f32.mrb[12].mxu1  ;;  %vm420_vm9 = vcmp.lt.s32.totalorder %v306_v6, %v11339_v21  ;;  %v2139_v1 = vld [vmem:[%s11256_s21 + $0x1c58] sm:$0xff]  ;;  %v10083_v6 = vpack.c.bf16 %v2187_v62, %v2186_v0 }
 0x1fb   : > { %v7629_v17 = vadd.f32 %v7628_v12, %v7627_v31  ;;  %9990 = vmatpush3.bf16.msra.mxu0 %v9989_v22  ;;  %v7663_v44 = vpop.f32.mrb[13].mxu1  ;;  %v2163_v22 = vld [vmem:[%s11256_s21 + $0x1d18] sm:$0xff]  ;;  %v785_v31 = vcombine.high %v12601_v10, %v12601_v10  ;;  %v2164_v12 = vld [vmem:[%s11256_s21 + $0x1d20] sm:$0xff] }
 0x1fc   : > { %v7664_v16 = vadd.f32 %v7663_v44, %v7662_v40  ;;  %10022 = vmatpush3.bf16.msra.mxu1 %v10021_v25  ;;  %9992 = vmatprep.subr.bf16.mxu0 %v9991_v26  ;;  %v2148_v25 = vld [vmem:[%s11256_s21 + $0x1ca0] sm:$0xff]  ;;  %v2149_v26 = vld [vmem:[%s11256_s21 + $0x1ca8] sm:$0xff]  ;;  %v10071_v40 = vpack.c.bf16 %v2181_v30, %v2180_v29  ;;  %v2183_v44 = vld [vmem:[%s11256_s21 + $0x1db8] sm:$0xff]  ;;  %v10073_v47 = vpack.c.bf16 %v2165_v42, %v2164_v12 }
 0x1fd   : > { %v3931_v19 = vadd.f32 %v7629_v17, %v12488_v61  ;;  %10024 = vmatprep.subr.bf16.mxu1 %v10023_v35  ;;  %v301_v61 = vadd.s32 6656, %v11325_v4  ;;  %v10037_v35 = vpack.c.bf16 %v2131_v14, %v2130_v43  ;;  %v10039_v36 = vpack.c.bf16 %v2149_v26, %v2148_v25  ;;  %v2182_v17 = vld [vmem:[%s11256_s21 + $0x1db0] sm:$0xff]  ;;  %v2189_v43 = vld [vmem:[%s11256_s21 + $0x1de8] sm:$0xff]  ;;  %v2172_v26 = vld [vmem:[%s11256_s21 + $0x1d60] sm:$0xff] }
 0x1fe   : > { %v10075_v50 = vpack.c.bf16 %v2183_v44, %v2182_v17  ;;  %v10053_v14 = vpack.c.bf16 %v2139_v1, %v2138_v3  ;;  %v2141_v25 = vld [vmem:[%s11256_s21 + $0x1c68] sm:$0xff]  ;;  %v2211_v0 = vld [vmem:[%s11256_s21 + $0x1e98] sm:$0xff] }
 0x1ff   : > { %v12584_v59 = vadd.f32 %v7664_v16, %v3931_v19  ;;  %9994 = vmatpush3.bf16.msra.mxu0 %v9993_v46  ;;  %vm415_vm7 = vcmp.lt.s32.totalorder %v301_v61, %v11339_v21  ;;  %v10041_v46 = vpack.c.bf16 %v2133_v39, %v2132_v24  ;;  %v2152_v19 = vld [vmem:[%s11256_s21 + $0x1cc0] sm:$0xff]  ;;  %v2173_v30 = vld [vmem:[%s11256_s21 + $0x1d68] sm:$0xff]  ;;  %v2190_v24 = vld [vmem:[%s11256_s21 + $0x1df0] sm:$0xff] }
 0x200   : > { %10026 = vmatpush3.bf16.msra.mxu1 %v10025_v23  ;;  %9996 = vmatprep.subr.bf16.mxu0 %v9995_v48  ;;  %v2134_v23 = vld [vmem:[%s11256_s21 + $0x1c30] sm:$0xff]  ;;  %v2135_v48 = vld [vmem:[%s11256_s21 + $0x1c38] sm:$0xff]  ;;  %v2168_v61 = vld [vmem:[%s11256_s21 + $0x1d40] sm:$0xff]  ;;  %v10089_v17 = vpack.c.bf16 %v2173_v30, %v2172_v26 }
 0x201   : > { %10028 = vmatprep.subr.bf16.mxu1 %v10027_v38  ;;  %v2153_v38 = vld [vmem:[%s11256_s21 + $0x1cc8] sm:$0xff]  ;;  %v10045_v28 = vpack.c.bf16 %v2135_v48, %v2134_v23  ;;  %v2191_v39 = vld [vmem:[%s11256_s21 + $0x1df8] sm:$0xff] }
 0x202   : > { %v10047_v53 = vpack.c.bf16 %v2153_v38, %v2152_v19  ;;  %v10091_v48 = vpack.c.bf16 %v2191_v39, %v2190_v24  ;;  %v2240_v19 = vld [vmem:[%s11256_s21 + $0x1f80] sm:$0xff]  ;;  %v2241_v38 = vld [vmem:[%s11256_s21 + $0x1f88] sm:$0xff]  ;;  %v2214_v39 = vld [vmem:[%s11256_s21 + $0x1eb0] sm:$0xff] }
 0x203   : > { %9998 = vmatpush3.bf16.msra.mxu0 %v9997_v32  ;;  %v2137_v32 = vld [vmem:[%s11256_s21 + $0x1c48] sm:$0xff] }
 0x204   : > { %10030 = vmatpush3.bf16.msra.mxu1 %v10029_v41  ;;  %10032 = vmatprep.subr.bf16.mxu0 %v10031_v57  ;;  %v10079_v41 = vpack.c.bf16 %v2185_v52, %v2184_v51  ;;  %v2169_v57 = vld [vmem:[%s11256_s21 + $0x1d48] sm:$0xff] }
 0x205   : > { %10064 = vmatprep.subr.bf16.mxu1 %v10063_v63  ;;  %v10049_v63 = vpack.c.bf16 %v2137_v32, %v2136_v56  ;;  %v10081_v54 = vpack.c.bf16 %v2169_v57, %v2168_v61  ;;  %v2192_v56 = vld [vmem:[%s11256_s21 + $0x1e00] sm:$0xff]  ;;  %v2193_v32 = vld [vmem:[%s11256_s21 + $0x1e08] sm:$0xff]  ;;  %v307_v61 = vadd.s32 7424, %v11325_v4  ;;  %v10127_v57 = vpack.c.bf16 %v2241_v38, %v2240_v19 }
 0x206   : > { %7112 = vmatmul.mubr.msk.f32.vlgmr.msra.gmra.mrb[26].mxu0 %vm415_vm7, %v12499_v7  ;;  %v10069_v7 = vpack.c.bf16 %v2163_v22, %v2162_v18  ;;  %v2140_v22 = vld [vmem:[%s11256_s21 + $0x1c60] sm:$0xff]  ;;  %v10097_v1 = vpack.c.bf16 %v2193_v32, %v2192_v56  ;;  %v2245_v26 = vld [vmem:[%s11256_s21 + $0x1fa8] sm:$0xff]  ;;  %v2218_v56 = vld [vmem:[%s11256_s21 + $0x1ed0] sm:$0xff] }
 0x207   : > { %10034 = vmatpush3.bf16.msra.mxu0 %v10033_v58  ;;  %7114 = vmatmul.mubr.msk.f32.vlgmr.msra.gmra.mrb[26].mxu1 %vm417_vm8, %v12505_v13  ;;  %v2151_v13 = vld [vmem:[%s11256_s21 + $0x1cb8] sm:$0xff]  ;;  %v10057_v42 = vpack.c.bf16 %v2141_v25, %v2140_v22  ;;  %vm421_vm12 = vcmp.lt.s32.totalorder %v307_v61, %v11339_v21  ;;  %v2244_v25 = vld [vmem:[%s11256_s21 + $0x1fa0] sm:$0xff]  ;;  %v2229_v24 = vld [vmem:[%s11256_s21 + $0x1f28] sm:$0xff] }
 0x208   : > { %10066 = vmatpush3.bf16.msra.mxu1 %v10065_v11  ;;  %10036 = vmatprep.subr.bf16.mxu0 %v10035_v55  ;;  %v10043_v16 = vpack.c.bf16 %v2151_v13, %v2150_v34  ;;  %v2171_v58 = vld [vmem:[%s11256_s21 + $0x1d58] sm:$0xff]  ;;  %v2157_v11 = vld [vmem:[%s11256_s21 + $0x1ce8] sm:$0xff]  ;;  %v2188_v55 = vld [vmem:[%s11256_s21 + $0x1de0] sm:$0xff] }
 0x209   : > { %10068 = vmatprep.subr.bf16.mxu1 %v10067_v20  ;;  %7115 = vmatprep.mubr.msk.f32.mxu0 %vm420_vm9, %v784_v27  ;;  %v10085_v18 = vpack.c.bf16 %v2171_v58, %v2170_v2  ;;  %v10055_v20 = vpack.c.bf16 %v2157_v11, %v2156_v8  ;;  %v10087_v29 = vpack.c.bf16 %v2189_v43, %v2188_v55  ;;  %v490_v34 = vld [vmem:[%s11277_s28 + $0x78] sm:$0xff]  ;;  %v312_v2 = vadd.s32 8064, %v11325_v4 }
 0x20a   : > { %7117 = vmatprep.mubr.msk.f32.mxu1 %vm422_vm10, %v785_v31  ;;  %v2158_v31 = vld [vmem:[%s11256_s21 + $0x1cf0] sm:$0xff]  ;;  %v786_v51 = vcombine.high %v490_v34, %v490_v34  ;;  %v12691_v62 = vrot.slane %v490_v34, %v11333_v15  ;;  %v10099_v58 = vpack.c.bf16 %v2211_v0, %v2210_v37  ;;  %v2195_v11 = vld [vmem:[%s11256_s21 + $0x1e18] sm:$0xff] }
 0x20b   : > { %10038 = vmatpush3.bf16.msra.mxu0 %v10037_v35  ;;  %v2159_v35 = vld [vmem:[%s11256_s21 + $0x1cf8] sm:$0xff]  ;;  %v2194_v8 = vld [vmem:[%s11256_s21 + $0x1e10] sm:$0xff]  ;;  %vm426_vm14 = vcmp.lt.s32.totalorder %v312_v2, %v11339_v21  ;;  %v2220_v2 = vld [vmem:[%s11256_s21 + $0x1ee0] sm:$0xff] }
 0x20c   : > { %10070 = vmatpush3.bf16.msra.mxu1 %v10069_v7  ;;  %10040 = vmatprep.subr.bf16.mxu0 %v10039_v36  ;;  %v10059_v44 = vpack.c.bf16 %v2159_v35, %v2158_v31  ;;  %v12697_v3 = vrot.slane %v786_v51, %v11333_v15  ;;  %v2226_v55 = vld [vmem:[%s11256_s21 + $0x1f10] sm:$0xff]  ;;  %v801_v22 = vcombine.high %v12691_v62, %v12691_v62  ;;  %v2196_v31 = vld [vmem:[%s11256_s21 + $0x1e20] sm:$0xff]  ;;  %v2197_v35 = vld [vmem:[%s11256_s21 + $0x1e28] sm:$0xff] }
 0x20d   : > { %10072 = vmatprep.subr.bf16.mxu1 %v10071_v40  ;;  %v2200_v51 = vld [vmem:[%s11256_s21 + $0x1e40] sm:$0xff]  ;;  %v2219_v32 = vld [vmem:[%s11256_s21 + $0x1ed8] sm:$0xff]  ;;  %v2250_v61 = vld [vmem:[%s11256_s21 + $0x1fd0] sm:$0xff] }
 0x20e   : > { %v10115_v37 = vpack.c.bf16 %v2219_v32, %v2218_v56  ;;  %v2202_v0 = vld [vmem:[%s11256_s21 + $0x1e50] sm:$0xff]  ;;  %v2289_v56 = vld [vmem:[%s11256_s21 + $0x2108] sm:$0xff] }
 0x20f   : > { %10042 = vmatpush3.bf16.msra.mxu0 %v10041_v46  ;;  %v2142_v46 = vld [vmem:[%s11256_s21 + $0x1c70] sm:$0xff] }
 0x210   : > { %10074 = vmatpush3.bf16.msra.mxu1 %v10073_v47  ;;  %10044 = vmatprep.subr.bf16.mxu0 %v10043_v16  ;;  %v2143_v47 = vld [vmem:[%s11256_s21 + $0x1c78] sm:$0xff]  ;;  %v2174_v16 = vld [vmem:[%s11256_s21 + $0x1d70] sm:$0xff] }
 0x211   : > { %10076 = vmatprep.subr.bf16.mxu1 %v10075_v50  ;;  %v2208_v50 = vld [vmem:[%s11256_s21 + $0x1e80] sm:$0xff]  ;;  %v2274_v32 = vld [vmem:[%s11256_s21 + $0x2090] sm:$0xff] }
 0x213   : > { %10046 = vmatpush3.bf16.msra.mxu0 %v10045_v28  ;;  %v10061_v28 = vpack.c.bf16 %v2143_v47, %v2142_v46  ;;  %v2230_v46 = vld [vmem:[%s11256_s21 + $0x1f30] sm:$0xff] }
 0x214   : > { %10078 = vmatpush3.bf16.msra.mxu1 %v10077_v33  ;;  %10048 = vmatprep.subr.bf16.mxu0 %v10047_v53  ;;  %v10093_v33 = vpack.c.bf16 %v2175_v49, %v2174_v16  ;;  %v10095_v53 = vpack.c.bf16 %v2209_v9, %v2208_v50  ;;  %v2231_v16 = vld [vmem:[%s11256_s21 + $0x1f38] sm:$0xff]  ;;  %v2248_v49 = vld [vmem:[%s11256_s21 + $0x1fc0] sm:$0xff]  ;;  %v2249_v50 = vld [vmem:[%s11256_s21 + $0x1fc8] sm:$0xff] }
 0x215   : > { %10080 = vmatprep.subr.bf16.mxu1 %v10079_v41  ;;  %v2224_v41 = vld [vmem:[%s11256_s21 + $0x1f00] sm:$0xff]  ;;  %v10141_v19 = vpack.c.bf16 %v2231_v16, %v2230_v46  ;;  %v2239_v46 = vld [vmem:[%s11256_s21 + $0x1f78] sm:$0xff]  ;;  %v2273_v16 = vld [vmem:[%s11256_s21 + $0x2088] sm:$0xff] }
 0x217   : > { %10050 = vmatpush3.bf16.msra.mxu0 %v10049_v63  ;;  %v2242_v63 = vld [vmem:[%s11256_s21 + $0x1f90] sm:$0xff] }
 0x218   : > { %10082 = vmatpush3.bf16.msra.mxu1 %v10081_v54  ;;  %10052 = vmatprep.subr.bf16.mxu0 %v10051_v45  ;;  %v2243_v54 = vld [vmem:[%s11256_s21 + $0x1f98] sm:$0xff]  ;;  %v310_v45 = vadd.s32 7808, %v11325_v4 }
 0x219   : > { %v7697_v27 = vpop.f32.mrb[14].mxu0  ;;  %10084 = vmatprep.subr.bf16.mxu1 %v10083_v6  ;;  %v10129_v6 = vpack.c.bf16 %v2225_v60, %v2224_v41  ;;  %v10131_v43 = vpack.c.bf16 %v2243_v54, %v2242_v63  ;;  %v2251_v41 = vld [vmem:[%s11256_s21 + $0x1fd8] sm:$0xff]  ;;  %v2234_v54 = vld [vmem:[%s11256_s21 + $0x1f50] sm:$0xff] }
 0x21a   : > { %v7698_v7 = vpop.f32.mrb[15].mxu0  ;;  %v7732_v36 = vpop.f32.mrb[14].mxu1  ;;  %vm424_vm13 = vcmp.lt.s32.totalorder %v310_v45, %v11339_v21  ;;  %v2203_v63 = vld [vmem:[%s11256_s21 + $0x1e58] sm:$0xff]  ;;  %v10147_v45 = vpack.c.bf16 %v2251_v41, %v2250_v61 }
 0x21b   : > { %v7699_v12 = vadd.f32 %v7698_v7, %v7697_v27  ;;  %10054 = vmatpush3.bf16.msra.mxu0 %v10053_v14  ;;  %v7733_v40 = vpop.f32.mrb[15].mxu1  ;;  %v2227_v14 = vld [vmem:[%s11256_s21 + $0x1f18] sm:$0xff]  ;;  %v802_v27 = vcombine.high %v12697_v3, %v12697_v3  ;;  %v2228_v7 = vld [vmem:[%s11256_s21 + $0x1f20] sm:$0xff] }
 0x21c   : > { %v7734_v13 = vadd.f32 %v7733_v40, %v7732_v36  ;;  %10086 = vmatpush3.bf16.msra.mxu1 %v10085_v18  ;;  %10056 = vmatprep.subr.bf16.mxu0 %v10055_v20  ;;  %v2212_v18 = vld [vmem:[%s11256_s21 + $0x1ea0] sm:$0xff]  ;;  %v2213_v20 = vld [vmem:[%s11256_s21 + $0x1ea8] sm:$0xff]  ;;  %v10135_v36 = vpack.c.bf16 %v2245_v26, %v2244_v25  ;;  %v2247_v40 = vld [vmem:[%s11256_s21 + $0x1fb8] sm:$0xff]  ;;  %v10137_v34 = vpack.c.bf16 %v2229_v24, %v2228_v7 }
 0x21d   : > { %v4071_v23 = vadd.f32 %v7699_v12, %v12584_v59  ;;  %10088 = vmatprep.subr.bf16.mxu1 %v10087_v29  ;;  %v305_v59 = vadd.s32 7168, %v11325_v4  ;;  %v10101_v29 = vpack.c.bf16 %v2195_v11, %v2194_v8  ;;  %v10103_v30 = vpack.c.bf16 %v2213_v20, %v2212_v18  ;;  %v2246_v12 = vld [vmem:[%s11256_s21 + $0x1fb0] sm:$0xff]  ;;  %v2253_v8 = vld [vmem:[%s11256_s21 + $0x1fe8] sm:$0xff]  ;;  %v2236_v20 = vld [vmem:[%s11256_s21 + $0x1f60] sm:$0xff] }
 0x21e   : > { %v10139_v47 = vpack.c.bf16 %v2247_v40, %v2246_v12  ;;  %v10117_v11 = vpack.c.bf16 %v2203_v63, %v2202_v0  ;;  %v2205_v18 = vld [vmem:[%s11256_s21 + $0x1e68] sm:$0xff]  ;;  %v2275_v61 = vld [vmem:[%s11256_s21 + $0x2098] sm:$0xff] }
 0x21f   : > { %v12680_v52 = vadd.f32 %v7734_v13, %v4071_v23  ;;  %10058 = vmatpush3.bf16.msra.mxu0 %v10057_v42  ;;  %vm419_vm11 = vcmp.lt.s32.totalorder %v305_v59, %v11339_v21  ;;  %v10105_v42 = vpack.c.bf16 %v2197_v35, %v2196_v31  ;;  %v2216_v23 = vld [vmem:[%s11256_s21 + $0x1ec0] sm:$0xff]  ;;  %v2237_v26 = vld [vmem:[%s11256_s21 + $0x1f68] sm:$0xff]  ;;  %v2254_v31 = vld [vmem:[%s11256_s21 + $0x1ff0] sm:$0xff] }
 0x220   : > { %10090 = vmatpush3.bf16.msra.mxu1 %v10089_v17  ;;  %10060 = vmatprep.subr.bf16.mxu0 %v10059_v44  ;;  %v2198_v17 = vld [vmem:[%s11256_s21 + $0x1e30] sm:$0xff]  ;;  %v2199_v44 = vld [vmem:[%s11256_s21 + $0x1e38] sm:$0xff]  ;;  %v2232_v59 = vld [vmem:[%s11256_s21 + $0x1f40] sm:$0xff]  ;;  %v10153_v12 = vpack.c.bf16 %v2237_v26, %v2236_v20 }
 0x221   : > { %10092 = vmatprep.subr.bf16.mxu1 %v10091_v48  ;;  %v2217_v48 = vld [vmem:[%s11256_s21 + $0x1ec8] sm:$0xff]  ;;  %v10109_v9 = vpack.c.bf16 %v2199_v44, %v2198_v17  ;;  %v2255_v35 = vld [vmem:[%s11256_s21 + $0x1ff8] sm:$0xff] }
 0x222   : > { %v10111_v38 = vpack.c.bf16 %v2217_v48, %v2216_v23  ;;  %v10155_v44 = vpack.c.bf16 %v2255_v35, %v2254_v31  ;;  %v2304_v23 = vld [vmem:[%s11256_s21 + $0x2180] sm:$0xff]  ;;  %v2305_v48 = vld [vmem:[%s11256_s21 + $0x2188] sm:$0xff]  ;;  %v2278_v35 = vld [vmem:[%s11256_s21 + $0x20b0] sm:$0xff] }
 0x223   : > { %10062 = vmatpush3.bf16.msra.mxu0 %v10061_v28  ;;  %v2201_v28 = vld [vmem:[%s11256_s21 + $0x1e48] sm:$0xff] }
 0x224   : > { %10094 = vmatpush3.bf16.msra.mxu1 %v10093_v33  ;;  %10096 = vmatprep.subr.bf16.mxu0 %v10095_v53  ;;  %v10143_v33 = vpack.c.bf16 %v2249_v50, %v2248_v49  ;;  %v2233_v53 = vld [vmem:[%s11256_s21 + $0x1f48] sm:$0xff] }
 0x225   : > { %10128 = vmatprep.subr.bf16.mxu1 %v10127_v57  ;;  %v10113_v57 = vpack.c.bf16 %v2201_v28, %v2200_v51  ;;  %v10145_v60 = vpack.c.bf16 %v2233_v53, %v2232_v59  ;;  %v2256_v51 = vld [vmem:[%s11256_s21 + $0x2000] sm:$0xff]  ;;  %v2257_v28 = vld [vmem:[%s11256_s21 + $0x2008] sm:$0xff]  ;;  %v311_v59 = vadd.s32 7936, %v11325_v4  ;;  %v10191_v53 = vpack.c.bf16 %v2305_v48, %v2304_v23 }
 0x226   : > { %7116 = vmatmul.mubr.msk.f32.vlgmr.msra.gmra.mrb[28].mxu0 %vm419_vm11, %v12595_v5  ;;  %v10133_v5 = vpack.c.bf16 %v2227_v14, %v2226_v55  ;;  %v2204_v14 = vld [vmem:[%s11256_s21 + $0x1e60] sm:$0xff]  ;;  %v10161_v63 = vpack.c.bf16 %v2257_v28, %v2256_v51  ;;  %v2309_v20 = vld [vmem:[%s11256_s21 + $0x21a8] sm:$0xff]  ;;  %v2282_v51 = vld [vmem:[%s11256_s21 + $0x20d0] sm:$0xff] }
 0x227   : > { %10098 = vmatpush3.bf16.msra.mxu0 %v10097_v1  ;;  %7118 = vmatmul.mubr.msk.f32.vlgmr.msra.gmra.mrb[28].mxu1 %vm421_vm12, %v12601_v10  ;;  %v2215_v10 = vld [vmem:[%s11256_s21 + $0x1eb8] sm:$0xff]  ;;  %v10121_v24 = vpack.c.bf16 %v2205_v18, %v2204_v14  ;;  %vm425_vm0 = vcmp.lt.s32.totalorder %v311_v59, %v11339_v21  ;;  %v2308_v18 = vld [vmem:[%s11256_s21 + $0x21a0] sm:$0xff]  ;;  %v2293_v31 = vld [vmem:[%s11256_s21 + $0x2128] sm:$0xff] }
 0x228   : > { %10130 = vmatpush3.bf16.msra.mxu1 %v10129_v6  ;;  %10100 = vmatprep.subr.bf16.mxu0 %v10099_v58  ;;  %v10107_v13 = vpack.c.bf16 %v2215_v10, %v2214_v39  ;;  %v2235_v1 = vld [vmem:[%s11256_s21 + $0x1f58] sm:$0xff]  ;;  %v2221_v6 = vld [vmem:[%s11256_s21 + $0x1ee8] sm:$0xff]  ;;  %v2252_v58 = vld [vmem:[%s11256_s21 + $0x1fe0] sm:$0xff] }
 0x229   : > { %10132 = vmatprep.subr.bf16.mxu1 %v10131_v43  ;;  %7119 = vmatprep.mubr.msk.f32.mxu0 %vm424_vm13, %v801_v22  ;;  %v10149_v55 = vpack.c.bf16 %v2235_v1, %v2234_v54  ;;  %v10119_v43 = vpack.c.bf16 %v2221_v6, %v2220_v2  ;;  %v10151_v25 = vpack.c.bf16 %v2253_v8, %v2252_v58  ;;  %v491_v39 = vld [vmem:[%s11277_s28 + $0x80] sm:$0xff]  ;;  %v316_v54 = vadd.s32 8576, %v11325_v4  ;;  %v2258_v2 = vld [vmem:[%s11256_s21 + $0x2010] sm:$0xff] }
 0x22a   : > { %7121 = vmatprep.mubr.msk.f32.mxu1 %vm426_vm14, %v802_v27  ;;  %v2222_v27 = vld [vmem:[%s11256_s21 + $0x1ef0] sm:$0xff]  ;;  %v803_v49 = vcombine.high %v491_v39, %v491_v39  ;;  %v12787_v41 = vrot.slane %v491_v39, %v11333_v15  ;;  %v10163_v1 = vpack.c.bf16 %v2275_v61, %v2274_v32  ;;  %v2259_v6 = vld [vmem:[%s11256_s21 + $0x2018] sm:$0xff] }
 0x22b   : > { %10102 = vmatpush3.bf16.msra.mxu0 %v10101_v29  ;;  %v2223_v29 = vld [vmem:[%s11256_s21 + $0x1ef8] sm:$0xff]  ;;  %v2290_v58 = vld [vmem:[%s11256_s21 + $0x2110] sm:$0xff]  ;;  %vm430_vm2 = vcmp.lt.s32.totalorder %v316_v54, %v11339_v21  ;;  %v2284_v54 = vld [vmem:[%s11256_s21 + $0x20e0] sm:$0xff] }
 0x22c   : > { %10134 = vmatpush3.bf16.msra.mxu1 %v10133_v5  ;;  %10104 = vmatprep.subr.bf16.mxu0 %v10103_v30  ;;  %v10123_v40 = vpack.c.bf16 %v2223_v29, %v2222_v27  ;;  %v12793_v0 = vrot.slane %v803_v49, %v11333_v15  ;;  %v818_v14 = vcombine.high %v12787_v41, %v12787_v41  ;;  %v2260_v27 = vld [vmem:[%s11256_s21 + $0x2020] sm:$0xff]  ;;  %v2261_v29 = vld [vmem:[%s11256_s21 + $0x2028] sm:$0xff]  ;;  %v2283_v28 = vld [vmem:[%s11256_s21 + $0x20d8] sm:$0xff] }
 0x22d   : > { %10136 = vmatprep.subr.bf16.mxu1 %v10135_v36  ;;  %v2264_v49 = vld [vmem:[%s11256_s21 + $0x2040] sm:$0xff]  ;;  %v2314_v59 = vld [vmem:[%s11256_s21 + $0x21d0] sm:$0xff]  ;;  %v10179_v32 = vpack.c.bf16 %v2283_v28, %v2282_v51  ;;  %v2353_v51 = vld [vmem:[%s11256_s21 + $0x2308] sm:$0xff] }
 0x22e   : > { %v2266_v61 = vld [vmem:[%s11256_s21 + $0x2050] sm:$0xff] }
 0x22f   : > { %10106 = vmatpush3.bf16.msra.mxu0 %v10105_v42  ;;  %v2206_v42 = vld [vmem:[%s11256_s21 + $0x1e70] sm:$0xff] }
 0x230   : > { %10138 = vmatpush3.bf16.msra.mxu1 %v10137_v34  ;;  %10108 = vmatprep.subr.bf16.mxu0 %v10107_v13  ;;  %v2207_v34 = vld [vmem:[%s11256_s21 + $0x1e78] sm:$0xff]  ;;  %v2238_v13 = vld [vmem:[%s11256_s21 + $0x1f70] sm:$0xff] }
 0x231   : > { %10140 = vmatprep.subr.bf16.mxu1 %v10139_v47  ;;  %v2272_v47 = vld [vmem:[%s11256_s21 + $0x2080] sm:$0xff]  ;;  %v2338_v28 = vld [vmem:[%s11256_s21 + $0x2290] sm:$0xff] }
 0x233   : > { %10110 = vmatpush3.bf16.msra.mxu0 %v10109_v9  ;;  %v10125_v9 = vpack.c.bf16 %v2207_v34, %v2206_v42  ;;  %v2294_v42 = vld [vmem:[%s11256_s21 + $0x2130] sm:$0xff] }
 0x234   : > { %10142 = vmatpush3.bf16.msra.mxu1 %v10141_v19  ;;  %10112 = vmatprep.subr.bf16.mxu0 %v10111_v38  ;;  %v10157_v19 = vpack.c.bf16 %v2239_v46, %v2238_v13  ;;  %v10159_v38 = vpack.c.bf16 %v2273_v16, %v2272_v47  ;;  %v2295_v13 = vld [vmem:[%s11256_s21 + $0x2138] sm:$0xff]  ;;  %v2312_v46 = vld [vmem:[%s11256_s21 + $0x21c0] sm:$0xff]  ;;  %v2313_v47 = vld [vmem:[%s11256_s21 + $0x21c8] sm:$0xff] }
 0x235   : > { %10144 = vmatprep.subr.bf16.mxu1 %v10143_v33  ;;  %v2288_v33 = vld [vmem:[%s11256_s21 + $0x2100] sm:$0xff]  ;;  %v10205_v23 = vpack.c.bf16 %v2295_v13, %v2294_v42  ;;  %v2303_v42 = vld [vmem:[%s11256_s21 + $0x2178] sm:$0xff]  ;;  %v2337_v13 = vld [vmem:[%s11256_s21 + $0x2288] sm:$0xff] }
 0x237   : > { %10114 = vmatpush3.bf16.msra.mxu0 %v10113_v57  ;;  %v2306_v57 = vld [vmem:[%s11256_s21 + $0x2190] sm:$0xff] }
 0x238   : > { %10146 = vmatpush3.bf16.msra.mxu1 %v10145_v60  ;;  %10116 = vmatprep.subr.bf16.mxu0 %v10115_v37  ;;  %v2307_v60 = vld [vmem:[%s11256_s21 + $0x2198] sm:$0xff]  ;;  %v314_v37 = vadd.s32 8320, %v11325_v4 }
 0x239   : > { %v7767_v22 = vpop.f32.mrb[16].mxu0  ;;  %10148 = vmatprep.subr.bf16.mxu1 %v10147_v45  ;;  %v10193_v45 = vpack.c.bf16 %v2289_v56, %v2288_v33  ;;  %v10195_v8 = vpack.c.bf16 %v2307_v60, %v2306_v57  ;;  %v2315_v33 = vld [vmem:[%s11256_s21 + $0x21d8] sm:$0xff]  ;;  %v2298_v60 = vld [vmem:[%s11256_s21 + $0x2150] sm:$0xff] }
 0x23a   : > { %v7768_v5 = vpop.f32.mrb[17].mxu0  ;;  %v7802_v30 = vpop.f32.mrb[16].mxu1  ;;  %vm428_vm1 = vcmp.lt.s32.totalorder %v314_v37, %v11339_v21  ;;  %v2267_v57 = vld [vmem:[%s11256_s21 + $0x2058] sm:$0xff]  ;;  %v10211_v37 = vpack.c.bf16 %v2315_v33, %v2314_v59 }
 0x23b   : > { %v7769_v7 = vadd.f32 %v7768_v5, %v7767_v22  ;;  %10118 = vmatpush3.bf16.msra.mxu0 %v10117_v11  ;;  %v7803_v36 = vpop.f32.mrb[17].mxu1  ;;  %v2291_v11 = vld [vmem:[%s11256_s21 + $0x2118] sm:$0xff]  ;;  %v819_v22 = vcombine.high %v12793_v0, %v12793_v0  ;;  %v2292_v5 = vld [vmem:[%s11256_s21 + $0x2120] sm:$0xff] }
 0x23c   : > { %v7804_v10 = vadd.f32 %v7803_v36, %v7802_v30  ;;  %10150 = vmatpush3.bf16.msra.mxu1 %v10149_v55  ;;  %10120 = vmatprep.subr.bf16.mxu0 %v10119_v43  ;;  %v2276_v55 = vld [vmem:[%s11256_s21 + $0x20a0] sm:$0xff]  ;;  %v2277_v43 = vld [vmem:[%s11256_s21 + $0x20a8] sm:$0xff]  ;;  %v10199_v30 = vpack.c.bf16 %v2309_v20, %v2308_v18  ;;  %v2311_v36 = vld [vmem:[%s11256_s21 + $0x21b8] sm:$0xff]  ;;  %v10201_v39 = vpack.c.bf16 %v2293_v31, %v2292_v5 }
 0x23d   : > { %v4211_v17 = vadd.f32 %v7769_v7, %v12680_v52  ;;  %10152 = vmatprep.subr.bf16.mxu1 %v10151_v25  ;;  %v309_v52 = vadd.s32 7680, %v11325_v4  ;;  %v10165_v25 = vpack.c.bf16 %v2259_v6, %v2258_v2  ;;  %v10167_v26 = vpack.c.bf16 %v2277_v43, %v2276_v55  ;;  %v2310_v7 = vld [vmem:[%s11256_s21 + $0x21b0] sm:$0xff]  ;;  %v2317_v2 = vld [vmem:[%s11256_s21 + $0x21e8] sm:$0xff]  ;;  %v2300_v43 = vld [vmem:[%s11256_s21 + $0x2160] sm:$0xff] }
 0x23e   : > { %v10203_v34 = vpack.c.bf16 %v2311_v36, %v2310_v7  ;;  %v10181_v6 = vpack.c.bf16 %v2267_v57, %v2266_v61  ;;  %v2269_v55 = vld [vmem:[%s11256_s21 + $0x2068] sm:$0xff]  ;;  %v2339_v59 = vld [vmem:[%s11256_s21 + $0x2298] sm:$0xff] }
 0x23f   : > { %v12776_v50 = vadd.f32 %v7804_v10, %v4211_v17  ;;  %10122 = vmatpush3.bf16.msra.mxu0 %v10121_v24  ;;  %vm423_vm15 = vcmp.lt.s32.totalorder %v309_v52, %v11339_v21  ;;  %v10169_v24 = vpack.c.bf16 %v2261_v29, %v2260_v27  ;;  %v2280_v17 = vld [vmem:[%s11256_s21 + $0x20c0] sm:$0xff]  ;;  %v2301_v20 = vld [vmem:[%s11256_s21 + $0x2168] sm:$0xff]  ;;  %v2318_v27 = vld [vmem:[%s11256_s21 + $0x21f0] sm:$0xff] }
 0x240   : > { %10154 = vmatpush3.bf16.msra.mxu1 %v10153_v12  ;;  %10124 = vmatprep.subr.bf16.mxu0 %v10123_v40  ;;  %v2262_v12 = vld [vmem:[%s11256_s21 + $0x2030] sm:$0xff]  ;;  %v2263_v40 = vld [vmem:[%s11256_s21 + $0x2038] sm:$0xff]  ;;  %v2296_v52 = vld [vmem:[%s11256_s21 + $0x2140] sm:$0xff]  ;;  %v10217_v7 = vpack.c.bf16 %v2301_v20, %v2300_v43 }
 0x241   : > { %10156 = vmatprep.subr.bf16.mxu1 %v10155_v44  ;;  %v2281_v44 = vld [vmem:[%s11256_s21 + $0x20c8] sm:$0xff]  ;;  %v10173_v16 = vpack.c.bf16 %v2263_v40, %v2262_v12  ;;  %v2319_v29 = vld [vmem:[%s11256_s21 + $0x21f8] sm:$0xff] }
 0x242   : > { %v10175_v48 = vpack.c.bf16 %v2281_v44, %v2280_v17  ;;  %v10219_v40 = vpack.c.bf16 %v2319_v29, %v2318_v27  ;;  %v2368_v17 = vld [vmem:[%s11256_s21 + $0x2380] sm:$0xff]  ;;  %v2369_v44 = vld [vmem:[%s11256_s21 + $0x2388] sm:$0xff]  ;;  %v2342_v29 = vld [vmem:[%s11256_s21 + $0x22b0] sm:$0xff] }
 0x243   : > { %10126 = vmatpush3.bf16.msra.mxu0 %v10125_v9  ;;  %v2265_v9 = vld [vmem:[%s11256_s21 + $0x2048] sm:$0xff] }
 0x244   : > { %10158 = vmatpush3.bf16.msra.mxu1 %v10157_v19  ;;  %10160 = vmatprep.subr.bf16.mxu0 %v10159_v38  ;;  %v10207_v19 = vpack.c.bf16 %v2313_v47, %v2312_v46  ;;  %v2297_v38 = vld [vmem:[%s11256_s21 + $0x2148] sm:$0xff] }
 0x245   : > { %10192 = vmatprep.subr.bf16.mxu1 %v10191_v53  ;;  %v10177_v53 = vpack.c.bf16 %v2265_v9, %v2264_v49  ;;  %v10209_v56 = vpack.c.bf16 %v2297_v38, %v2296_v52  ;;  %v2320_v49 = vld [vmem:[%s11256_s21 + $0x2200] sm:$0xff]  ;;  %v2321_v9 = vld [vmem:[%s11256_s21 + $0x2208] sm:$0xff]  ;;  %v315_v52 = vadd.s32 8448, %v11325_v4  ;;  %v10255_v38 = vpack.c.bf16 %v2369_v44, %v2368_v17 }
 0x246   : > { %7120 = vmatmul.mubr.msk.f32.vlgmr.msra.gmra.mrb[30].mxu0 %vm423_vm15, %v12691_v62  ;;  %v10197_v62 = vpack.c.bf16 %v2291_v11, %v2290_v58  ;;  %v2268_v11 = vld [vmem:[%s11256_s21 + $0x2060] sm:$0xff]  ;;  %v10225_v57 = vpack.c.bf16 %v2321_v9, %v2320_v49  ;;  %v2373_v43 = vld [vmem:[%s11256_s21 + $0x23a8] sm:$0xff]  ;;  %v2346_v49 = vld [vmem:[%s11256_s21 + $0x22d0] sm:$0xff] }
 0x247   : > { %10162 = vmatpush3.bf16.msra.mxu0 %v10161_v63  ;;  %7122 = vmatmul.mubr.msk.f32.vlgmr.msra.gmra.mrb[30].mxu1 %vm425_vm0, %v12697_v3  ;;  %v2279_v3 = vld [vmem:[%s11256_s21 + $0x20b8] sm:$0xff]  ;;  %v10185_v31 = vpack.c.bf16 %v2269_v55, %v2268_v11  ;;  %vm429_vm4 = vcmp.lt.s32.totalorder %v315_v52, %v11339_v21  ;;  %v2372_v55 = vld [vmem:[%s11256_s21 + $0x23a0] sm:$0xff]  ;;  %v2357_v27 = vld [vmem:[%s11256_s21 + $0x2328] sm:$0xff] }
 0x248   : > { %10194 = vmatpush3.bf16.msra.mxu1 %v10193_v45  ;;  %10164 = vmatprep.subr.bf16.mxu0 %v10163_v1  ;;  %v10171_v10 = vpack.c.bf16 %v2279_v3, %v2278_v35  ;;  %v2299_v63 = vld [vmem:[%s11256_s21 + $0x2158] sm:$0xff]  ;;  %v2285_v45 = vld [vmem:[%s11256_s21 + $0x20e8] sm:$0xff]  ;;  %v2316_v1 = vld [vmem:[%s11256_s21 + $0x21e0] sm:$0xff] }
 0x249   : > { %10196 = vmatprep.subr.bf16.mxu1 %v10195_v8  ;;  %7123 = vmatprep.mubr.msk.f32.mxu0 %vm428_vm1, %v818_v14  ;;  %v10213_v58 = vpack.c.bf16 %v2299_v63, %v2298_v60  ;;  %v10183_v8 = vpack.c.bf16 %v2285_v45, %v2284_v54  ;;  %v10215_v18 = vpack.c.bf16 %v2317_v2, %v2316_v1  ;;  %v492_v35 = vld [vmem:[%s11277_s28 + $0x88] sm:$0xff]  ;;  %v320_v60 = vadd.s32 9088, %v11325_v4  ;;  %v2322_v54 = vld [vmem:[%s11256_s21 + $0x2210] sm:$0xff]  ;;  %v2323_v45 = vld [vmem:[%s11256_s21 + $0x2218] sm:$0xff] }
 0x24a   : > { %7125 = vmatprep.mubr.msk.f32.mxu1 %vm430_vm2, %v819_v22  ;;  %v2286_v22 = vld [vmem:[%s11256_s21 + $0x20f0] sm:$0xff]  ;;  %v820_v46 = vcombine.high %v492_v35, %v492_v35  ;;  %v12883_v33 = vrot.slane %v492_v35, %v11333_v15  ;;  %v10227_v63 = vpack.c.bf16 %v2339_v59, %v2338_v28  ;;  %v2347_v9 = vld [vmem:[%s11256_s21 + $0x22d8] sm:$0xff] }
 0x24b   : > { %10166 = vmatpush3.bf16.msra.mxu0 %v10165_v25  ;;  %v2287_v25 = vld [vmem:[%s11256_s21 + $0x20f8] sm:$0xff]  ;;  %v2354_v1 = vld [vmem:[%s11256_s21 + $0x2310] sm:$0xff]  ;;  %vm434_vm6 = vcmp.lt.s32.totalorder %v320_v60, %v11339_v21  ;;  %v10243_v28 = vpack.c.bf16 %v2347_v9, %v2346_v49  ;;  %v2348_v60 = vld [vmem:[%s11256_s21 + $0x22e0] sm:$0xff] }
 0x24c   : > { %10198 = vmatpush3.bf16.msra.mxu1 %v10197_v62  ;;  %10168 = vmatprep.subr.bf16.mxu0 %v10167_v26  ;;  %v10187_v36 = vpack.c.bf16 %v2287_v25, %v2286_v22  ;;  %v12889_v61 = vrot.slane %v820_v46, %v11333_v15  ;;  %v835_v11 = vcombine.high %v12883_v33, %v12883_v33  ;;  %v2324_v22 = vld [vmem:[%s11256_s21 + $0x2220] sm:$0xff]  ;;  %v2325_v25 = vld [vmem:[%s11256_s21 + $0x2228] sm:$0xff]  ;;  %v2378_v52 = vld [vmem:[%s11256_s21 + $0x23d0] sm:$0xff] }
 0x24d   : > { %10200 = vmatprep.subr.bf16.mxu1 %v10199_v30  ;;  %v2328_v46 = vld [vmem:[%s11256_s21 + $0x2240] sm:$0xff]  ;;  %v2330_v59 = vld [vmem:[%s11256_s21 + $0x2250] sm:$0xff]  ;;  %v2417_v49 = vld [vmem:[%s11256_s21 + $0x2508] sm:$0xff] }
 0x24e   : > { %v2402_v9 = vld [vmem:[%s11256_s21 + $0x2490] sm:$0xff] }
 0x24f   : > { %10170 = vmatpush3.bf16.msra.mxu0 %v10169_v24  ;;  %v2270_v24 = vld [vmem:[%s11256_s21 + $0x2070] sm:$0xff] }
 0x250   : > { %10202 = vmatpush3.bf16.msra.mxu1 %v10201_v39  ;;  %10172 = vmatprep.subr.bf16.mxu0 %v10171_v10  ;;  %v2271_v39 = vld [vmem:[%s11256_s21 + $0x2078] sm:$0xff]  ;;  %v2302_v10 = vld [vmem:[%s11256_s21 + $0x2170] sm:$0xff] }
 0x251   : > { %10204 = vmatprep.subr.bf16.mxu1 %v10203_v34  ;;  %v2336_v34 = vld [vmem:[%s11256_s21 + $0x2280] sm:$0xff] }
 0x253   : > { %10174 = vmatpush3.bf16.msra.mxu0 %v10173_v16  ;;  %v10189_v16 = vpack.c.bf16 %v2271_v39, %v2270_v24  ;;  %v2358_v24 = vld [vmem:[%s11256_s21 + $0x2330] sm:$0xff] }
 0x254   : > { %10206 = vmatpush3.bf16.msra.mxu1 %v10205_v23  ;;  %10176 = vmatprep.subr.bf16.mxu0 %v10175_v48  ;;  %v10221_v23 = vpack.c.bf16 %v2303_v42, %v2302_v10  ;;  %v10223_v48 = vpack.c.bf16 %v2337_v13, %v2336_v34  ;;  %v2359_v10 = vld [vmem:[%s11256_s21 + $0x2338] sm:$0xff]  ;;  %v2376_v42 = vld [vmem:[%s11256_s21 + $0x23c0] sm:$0xff]  ;;  %v2377_v34 = vld [vmem:[%s11256_s21 + $0x23c8] sm:$0xff] }
 0x255   : > { %10208 = vmatprep.subr.bf16.mxu1 %v10207_v19  ;;  %v2352_v19 = vld [vmem:[%s11256_s21 + $0x2300] sm:$0xff]  ;;  %v10269_v17 = vpack.c.bf16 %v2359_v10, %v2358_v24  ;;  %v2367_v24 = vld [vmem:[%s11256_s21 + $0x2378] sm:$0xff]  ;;  %v2401_v10 = vld [vmem:[%s11256_s21 + $0x2488] sm:$0xff] }
 0x257   : > { %10178 = vmatpush3.bf16.msra.mxu0 %v10177_v53  ;;  %v2370_v53 = vld [vmem:[%s11256_s21 + $0x2390] sm:$0xff] }
 0x258   : > { %10210 = vmatpush3.bf16.msra.mxu1 %v10209_v56  ;;  %10180 = vmatprep.subr.bf16.mxu0 %v10179_v32  ;;  %v2371_v56 = vld [vmem:[%s11256_s21 + $0x2398] sm:$0xff]  ;;  %v318_v32 = vadd.s32 8832, %v11325_v4 }
 0x259   : > { %v7837_v14 = vpop.f32.mrb[18].mxu0  ;;  %10212 = vmatprep.subr.bf16.mxu1 %v10211_v37  ;;  %v10257_v37 = vpack.c.bf16 %v2353_v51, %v2352_v19  ;;  %v10259_v2 = vpack.c.bf16 %v2371_v56, %v2370_v53  ;;  %v2379_v19 = vld [vmem:[%s11256_s21 + $0x23d8] sm:$0xff]  ;;  %v2362_v56 = vld [vmem:[%s11256_s21 + $0x2350] sm:$0xff] }
 0x25a   : > { %v7838_v62 = vpop.f32.mrb[19].mxu0  ;;  %v7872_v26 = vpop.f32.mrb[18].mxu1  ;;  %vm432_vm5 = vcmp.lt.s32.totalorder %v318_v32, %v11339_v21  ;;  %v2331_v53 = vld [vmem:[%s11256_s21 + $0x2258] sm:$0xff]  ;;  %v10275_v32 = vpack.c.bf16 %v2379_v19, %v2378_v52 }
 0x25b   : > { %v7839_v5 = vadd.f32 %v7838_v62, %v7837_v14  ;;  %10182 = vmatpush3.bf16.msra.mxu0 %v10181_v6  ;;  %v7873_v30 = vpop.f32.mrb[19].mxu1  ;;  %v2355_v6 = vld [vmem:[%s11256_s21 + $0x2318] sm:$0xff]  ;;  %v836_v14 = vcombine.high %v12889_v61, %v12889_v61  ;;  %v2356_v62 = vld [vmem:[%s11256_s21 + $0x2320] sm:$0xff] }
 0x25c   : > { %v7874_v3 = vadd.f32 %v7873_v30, %v7872_v26  ;;  %10214 = vmatpush3.bf16.msra.mxu1 %v10213_v58  ;;  %10184 = vmatprep.subr.bf16.mxu0 %v10183_v8  ;;  %v2340_v58 = vld [vmem:[%s11256_s21 + $0x22a0] sm:$0xff]  ;;  %v2341_v8 = vld [vmem:[%s11256_s21 + $0x22a8] sm:$0xff]  ;;  %v10263_v26 = vpack.c.bf16 %v2373_v43, %v2372_v55  ;;  %v2375_v30 = vld [vmem:[%s11256_s21 + $0x23b8] sm:$0xff]  ;;  %v10265_v35 = vpack.c.bf16 %v2357_v27, %v2356_v62 }
 0x25d   : > { %v4351_v12 = vadd.f32 %v7839_v5, %v12776_v50  ;;  %10216 = vmatprep.subr.bf16.mxu1 %v10215_v18  ;;  %v313_v50 = vadd.s32 8192, %v11325_v4  ;;  %v10229_v18 = vpack.c.bf16 %v2323_v45, %v2322_v54  ;;  %v10231_v20 = vpack.c.bf16 %v2341_v8, %v2340_v58  ;;  %v2374_v5 = vld [vmem:[%s11256_s21 + $0x23b0] sm:$0xff]  ;;  %v2381_v54 = vld [vmem:[%s11256_s21 + $0x23e8] sm:$0xff]  ;;  %v2364_v8 = vld [vmem:[%s11256_s21 + $0x2360] sm:$0xff] }
 0x25e   : > { %v10267_v39 = vpack.c.bf16 %v2375_v30, %v2374_v5  ;;  %v10245_v45 = vpack.c.bf16 %v2331_v53, %v2330_v59  ;;  %v2333_v58 = vld [vmem:[%s11256_s21 + $0x2268] sm:$0xff]  ;;  %v2403_v52 = vld [vmem:[%s11256_s21 + $0x2498] sm:$0xff] }
 0x25f   : > { %v12872_v47 = vadd.f32 %v7874_v3, %v4351_v12  ;;  %10186 = vmatpush3.bf16.msra.mxu0 %v10185_v31  ;;  %vm427_vm3 = vcmp.lt.s32.totalorder %v313_v50, %v11339_v21  ;;  %v10233_v31 = vpack.c.bf16 %v2325_v25, %v2324_v22  ;;  %v2344_v12 = vld [vmem:[%s11256_s21 + $0x22c0] sm:$0xff]  ;;  %v2365_v43 = vld [vmem:[%s11256_s21 + $0x2368] sm:$0xff]  ;;  %v2382_v22 = vld [vmem:[%s11256_s21 + $0x23f0] sm:$0xff] }
 0x260   : > { %10218 = vmatpush3.bf16.msra.mxu1 %v10217_v7  ;;  %10188 = vmatprep.subr.bf16.mxu0 %v10187_v36  ;;  %v2326_v7 = vld [vmem:[%s11256_s21 + $0x2230] sm:$0xff]  ;;  %v2327_v36 = vld [vmem:[%s11256_s21 + $0x2238] sm:$0xff]  ;;  %v2360_v50 = vld [vmem:[%s11256_s21 + $0x2340] sm:$0xff]  ;;  %v10281_v5 = vpack.c.bf16 %v2365_v43, %v2364_v8 }
 0x261   : > { %10220 = vmatprep.subr.bf16.mxu1 %v10219_v40  ;;  %v2345_v40 = vld [vmem:[%s11256_s21 + $0x22c8] sm:$0xff]  ;;  %v10237_v13 = vpack.c.bf16 %v2327_v36, %v2326_v7  ;;  %v2383_v25 = vld [vmem:[%s11256_s21 + $0x23f8] sm:$0xff] }
 0x262   : > { %v10239_v44 = vpack.c.bf16 %v2345_v40, %v2344_v12  ;;  %v10283_v36 = vpack.c.bf16 %v2383_v25, %v2382_v22  ;;  %v2432_v12 = vld [vmem:[%s11256_s21 + $0x2580] sm:$0xff]  ;;  %v2433_v40 = vld [vmem:[%s11256_s21 + $0x2588] sm:$0xff]  ;;  %v2406_v25 = vld [vmem:[%s11256_s21 + $0x24b0] sm:$0xff] }
 0x263   : > { %10190 = vmatpush3.bf16.msra.mxu0 %v10189_v16  ;;  %v2329_v16 = vld [vmem:[%s11256_s21 + $0x2248] sm:$0xff] }
 0x264   : > { %10222 = vmatpush3.bf16.msra.mxu1 %v10221_v23  ;;  %10224 = vmatprep.subr.bf16.mxu0 %v10223_v48  ;;  %v10271_v23 = vpack.c.bf16 %v2377_v34, %v2376_v42  ;;  %v2361_v48 = vld [vmem:[%s11256_s21 + $0x2348] sm:$0xff] }
 0x265   : > { %10256 = vmatprep.subr.bf16.mxu1 %v10255_v38  ;;  %v10241_v38 = vpack.c.bf16 %v2329_v16, %v2328_v46  ;;  %v10273_v51 = vpack.c.bf16 %v2361_v48, %v2360_v50  ;;  %v2384_v46 = vld [vmem:[%s11256_s21 + $0x2400] sm:$0xff]  ;;  %v2385_v16 = vld [vmem:[%s11256_s21 + $0x2408] sm:$0xff]  ;;  %v319_v50 = vadd.s32 8960, %v11325_v4  ;;  %v10319_v48 = vpack.c.bf16 %v2433_v40, %v2432_v12 }
 0x266   : > { %7124 = vmatmul.mubr.msk.f32.vlgmr.msra.gmra.mrb[32].mxu0 %vm427_vm3, %v12787_v41  ;;  %v10261_v41 = vpack.c.bf16 %v2355_v6, %v2354_v1  ;;  %v2332_v6 = vld [vmem:[%s11256_s21 + $0x2260] sm:$0xff]  ;;  %v10289_v53 = vpack.c.bf16 %v2385_v16, %v2384_v46  ;;  %v2437_v8 = vld [vmem:[%s11256_s21 + $0x25a8] sm:$0xff]  ;;  %v2410_v46 = vld [vmem:[%s11256_s21 + $0x24d0] sm:$0xff] }
 0x267   : > { %10226 = vmatpush3.bf16.msra.mxu0 %v10225_v57  ;;  %7126 = vmatmul.mubr.msk.f32.vlgmr.msra.gmra.mrb[32].mxu1 %vm429_vm4, %v12793_v0  ;;  %v2343_v0 = vld [vmem:[%s11256_s21 + $0x22b8] sm:$0xff]  ;;  %v10249_v27 = vpack.c.bf16 %v2333_v58, %v2332_v6  ;;  %vm433_vm8 = vcmp.lt.s32.totalorder %v319_v50, %v11339_v21  ;;  %v2436_v58 = vld [vmem:[%s11256_s21 + $0x25a0] sm:$0xff]  ;;  %v2421_v22 = vld [vmem:[%s11256_s21 + $0x2528] sm:$0xff] }
 0x268   : > { %10258 = vmatpush3.bf16.msra.mxu1 %v10257_v37  ;;  %10228 = vmatprep.subr.bf16.mxu0 %v10227_v63  ;;  %v10235_v3 = vpack.c.bf16 %v2343_v0, %v2342_v29  ;;  %v2363_v57 = vld [vmem:[%s11256_s21 + $0x2358] sm:$0xff]  ;;  %v2349_v37 = vld [vmem:[%s11256_s21 + $0x22e8] sm:$0xff]  ;;  %v2380_v63 = vld [vmem:[%s11256_s21 + $0x23e0] sm:$0xff] }
 0x269   : > { %10260 = vmatprep.subr.bf16.mxu1 %v10259_v2  ;;  %7127 = vmatprep.mubr.msk.f32.mxu0 %vm432_vm5, %v835_v11  ;;  %v10277_v1 = vpack.c.bf16 %v2363_v57, %v2362_v56  ;;  %v10247_v2 = vpack.c.bf16 %v2349_v37, %v2348_v60  ;;  %v10279_v55 = vpack.c.bf16 %v2381_v54, %v2380_v63  ;;  %v493_v29 = vld [vmem:[%s11277_s28 + $0x90] sm:$0xff]  ;;  %v324_v56 = vadd.s32 9600, %v11325_v4  ;;  %v2387_v37 = vld [vmem:[%s11256_s21 + $0x2418] sm:$0xff] }
 0x26a   : > { %7129 = vmatprep.mubr.msk.f32.mxu1 %vm434_vm6, %v836_v14  ;;  %v2350_v14 = vld [vmem:[%s11256_s21 + $0x22f0] sm:$0xff]  ;;  %v837_v42 = vcombine.high %v493_v29, %v493_v29  ;;  %v12979_v19 = vrot.slane %v493_v29, %v11333_v15  ;;  %v10291_v57 = vpack.c.bf16 %v2403_v52, %v2402_v9  ;;  %v2411_v16 = vld [vmem:[%s11256_s21 + $0x24d8] sm:$0xff] }
 0x26b   : > { %10230 = vmatpush3.bf16.msra.mxu0 %v10229_v18  ;;  %v2351_v18 = vld [vmem:[%s11256_s21 + $0x22f8] sm:$0xff]  ;;  %v2386_v60 = vld [vmem:[%s11256_s21 + $0x2410] sm:$0xff]  ;;  %vm438_vm10 = vcmp.lt.s32.totalorder %v324_v56, %v11339_v21  ;;  %v10307_v9 = vpack.c.bf16 %v2411_v16, %v2410_v46  ;;  %v2412_v56 = vld [vmem:[%s11256_s21 + $0x24e0] sm:$0xff] }
 0x26c   : > { %10262 = vmatpush3.bf16.msra.mxu1 %v10261_v41  ;;  %10232 = vmatprep.subr.bf16.mxu0 %v10231_v20  ;;  %v10251_v30 = vpack.c.bf16 %v2351_v18, %v2350_v14  ;;  %v12985_v59 = vrot.slane %v837_v42, %v11333_v15  ;;  %v2418_v63 = vld [vmem:[%s11256_s21 + $0x2510] sm:$0xff]  ;;  %v852_v6 = vcombine.high %v12979_v19, %v12979_v19  ;;  %v2388_v14 = vld [vmem:[%s11256_s21 + $0x2420] sm:$0xff]  ;;  %v2389_v18 = vld [vmem:[%s11256_s21 + $0x2428] sm:$0xff] }
 0x26d   : > { %10264 = vmatprep.subr.bf16.mxu1 %v10263_v26  ;;  %v2392_v42 = vld [vmem:[%s11256_s21 + $0x2440] sm:$0xff]  ;;  %v2442_v50 = vld [vmem:[%s11256_s21 + $0x25d0] sm:$0xff]  ;;  %v2481_v46 = vld [vmem:[%s11256_s21 + $0x2708] sm:$0xff] }
 0x26e   : > { %v2394_v52 = vld [vmem:[%s11256_s21 + $0x2450] sm:$0xff] }
 0x26f   : > { %10234 = vmatpush3.bf16.msra.mxu0 %v10233_v31  ;;  %v2334_v31 = vld [vmem:[%s11256_s21 + $0x2270] sm:$0xff] }
 0x270   : > { %10266 = vmatpush3.bf16.msra.mxu1 %v10265_v35  ;;  %10236 = vmatprep.subr.bf16.mxu0 %v10235_v3  ;;  %v2335_v35 = vld [vmem:[%s11256_s21 + $0x2278] sm:$0xff]  ;;  %v2366_v3 = vld [vmem:[%s11256_s21 + $0x2370] sm:$0xff] }
 0x271   : > { %10268 = vmatprep.subr.bf16.mxu1 %v10267_v39  ;;  %v2400_v39 = vld [vmem:[%s11256_s21 + $0x2480] sm:$0xff]  ;;  %v2466_v16 = vld [vmem:[%s11256_s21 + $0x2690] sm:$0xff] }
 0x273   : > { %10238 = vmatpush3.bf16.msra.mxu0 %v10237_v13  ;;  %v10253_v13 = vpack.c.bf16 %v2335_v35, %v2334_v31  ;;  %v2422_v31 = vld [vmem:[%s11256_s21 + $0x2530] sm:$0xff] }
 0x274   : > { %10270 = vmatpush3.bf16.msra.mxu1 %v10269_v17  ;;  %10240 = vmatprep.subr.bf16.mxu0 %v10239_v44  ;;  %v10285_v17 = vpack.c.bf16 %v2367_v24, %v2366_v3  ;;  %v10287_v44 = vpack.c.bf16 %v2401_v10, %v2400_v39  ;;  %v2423_v3 = vld [vmem:[%s11256_s21 + $0x2538] sm:$0xff]  ;;  %v2440_v24 = vld [vmem:[%s11256_s21 + $0x25c0] sm:$0xff]  ;;  %v2441_v39 = vld [vmem:[%s11256_s21 + $0x25c8] sm:$0xff] }
 0x275   : > { %10272 = vmatprep.subr.bf16.mxu1 %v10271_v23  ;;  %v2416_v23 = vld [vmem:[%s11256_s21 + $0x2500] sm:$0xff]  ;;  %v10333_v12 = vpack.c.bf16 %v2423_v3, %v2422_v31  ;;  %v2431_v31 = vld [vmem:[%s11256_s21 + $0x2578] sm:$0xff]  ;;  %v2465_v3 = vld [vmem:[%s11256_s21 + $0x2688] sm:$0xff] }
 0x277   : > { %10242 = vmatpush3.bf16.msra.mxu0 %v10241_v38  ;;  %v2434_v38 = vld [vmem:[%s11256_s21 + $0x2590] sm:$0xff] }
 0x278   : > { %10274 = vmatpush3.bf16.msra.mxu1 %v10273_v51  ;;  %10244 = vmatprep.subr.bf16.mxu0 %v10243_v28  ;;  %v2435_v51 = vld [vmem:[%s11256_s21 + $0x2598] sm:$0xff]  ;;  %v322_v28 = vadd.s32 9344, %v11325_v4 }
 0x279   : > { %v7907_v11 = vpop.f32.mrb[20].mxu0  ;;  %10276 = vmatprep.subr.bf16.mxu1 %v10275_v32  ;;  %v10321_v32 = vpack.c.bf16 %v2417_v49, %v2416_v23  ;;  %v10323_v54 = vpack.c.bf16 %v2435_v51, %v2434_v38  ;;  %v2443_v23 = vld [vmem:[%s11256_s21 + $0x25d8] sm:$0xff]  ;;  %v2426_v51 = vld [vmem:[%s11256_s21 + $0x2550] sm:$0xff] }
 0x27a   : > { %v7908_v41 = vpop.f32.mrb[21].mxu0  ;;  %v7942_v20 = vpop.f32.mrb[20].mxu1  ;;  %vm436_vm9 = vcmp.lt.s32.totalorder %v322_v28, %v11339_v21  ;;  %v2395_v38 = vld [vmem:[%s11256_s21 + $0x2458] sm:$0xff]  ;;  %v10339_v28 = vpack.c.bf16 %v2443_v23, %v2442_v50 }
 0x27b   : > { %v7909_v62 = vadd.f32 %v7908_v41, %v7907_v11  ;;  %10246 = vmatpush3.bf16.msra.mxu0 %v10245_v45  ;;  %v7943_v26 = vpop.f32.mrb[21].mxu1  ;;  %v2419_v45 = vld [vmem:[%s11256_s21 + $0x2518] sm:$0xff]  ;;  %v853_v11 = vcombine.high %v12985_v59, %v12985_v59  ;;  %v2420_v41 = vld [vmem:[%s11256_s21 + $0x2520] sm:$0xff] }
 0x27c   : > { %v7944_v0 = vadd.f32 %v7943_v26, %v7942_v20  ;;  %10278 = vmatpush3.bf16.msra.mxu1 %v10277_v1  ;;  %10248 = vmatprep.subr.bf16.mxu0 %v10247_v2  ;;  %v2404_v1 = vld [vmem:[%s11256_s21 + $0x24a0] sm:$0xff]  ;;  %v2405_v2 = vld [vmem:[%s11256_s21 + $0x24a8] sm:$0xff]  ;;  %v10327_v20 = vpack.c.bf16 %v2437_v8, %v2436_v58  ;;  %v2439_v26 = vld [vmem:[%s11256_s21 + $0x25b8] sm:$0xff]  ;;  %v10329_v29 = vpack.c.bf16 %v2421_v22, %v2420_v41 }
 0x27d   : > { %v4491_v7 = vadd.f32 %v7909_v62, %v12872_v47  ;;  %10280 = vmatprep.subr.bf16.mxu1 %v10279_v55  ;;  %v317_v47 = vadd.s32 8704, %v11325_v4  ;;  %v10293_v55 = vpack.c.bf16 %v2387_v37, %v2386_v60  ;;  %v10295_v43 = vpack.c.bf16 %v2405_v2, %v2404_v1  ;;  %v2438_v62 = vld [vmem:[%s11256_s21 + $0x25b0] sm:$0xff]  ;;  %v2445_v60 = vld [vmem:[%s11256_s21 + $0x25e8] sm:$0xff]  ;;  %v2428_v2 = vld [vmem:[%s11256_s21 + $0x2560] sm:$0xff] }
 0x27e   : > { %v10331_v35 = vpack.c.bf16 %v2439_v26, %v2438_v62  ;;  %v10309_v37 = vpack.c.bf16 %v2395_v38, %v2394_v52  ;;  %v2397_v1 = vld [vmem:[%s11256_s21 + $0x2468] sm:$0xff]  ;;  %v2467_v50 = vld [vmem:[%s11256_s21 + $0x2698] sm:$0xff] }
 0x27f   : > { %v12968_v34 = vadd.f32 %v7944_v0, %v4491_v7  ;;  %10250 = vmatpush3.bf16.msra.mxu0 %v10249_v27  ;;  %vm431_vm7 = vcmp.lt.s32.totalorder %v317_v47, %v11339_v21  ;;  %v10297_v27 = vpack.c.bf16 %v2389_v18, %v2388_v14  ;;  %v2408_v7 = vld [vmem:[%s11256_s21 + $0x24c0] sm:$0xff]  ;;  %v2429_v8 = vld [vmem:[%s11256_s21 + $0x2568] sm:$0xff]  ;;  %v2446_v14 = vld [vmem:[%s11256_s21 + $0x25f0] sm:$0xff] }
 0x280   : > { %10282 = vmatpush3.bf16.msra.mxu1 %v10281_v5  ;;  %10252 = vmatprep.subr.bf16.mxu0 %v10251_v30  ;;  %v2390_v5 = vld [vmem:[%s11256_s21 + $0x2430] sm:$0xff]  ;;  %v2391_v30 = vld [vmem:[%s11256_s21 + $0x2438] sm:$0xff]  ;;  %v2424_v47 = vld [vmem:[%s11256_s21 + $0x2540] sm:$0xff]  ;;  %v10345_v62 = vpack.c.bf16 %v2429_v8, %v2428_v2 }
 0x281   : > { %10284 = vmatprep.subr.bf16.mxu1 %v10283_v36  ;;  %v2409_v36 = vld [vmem:[%s11256_s21 + $0x24c8] sm:$0xff]  ;;  %v10301_v10 = vpack.c.bf16 %v2391_v30, %v2390_v5  ;;  %v2447_v18 = vld [vmem:[%s11256_s21 + $0x25f8] sm:$0xff] }
 0x282   : > { %v10303_v40 = vpack.c.bf16 %v2409_v36, %v2408_v7  ;;  %v10347_v30 = vpack.c.bf16 %v2447_v18, %v2446_v14  ;;  %v2496_v7 = vld [vmem:[%s11256_s21 + $0x2780] sm:$0xff]  ;;  %v2497_v36 = vld [vmem:[%s11256_s21 + $0x2788] sm:$0xff]  ;;  %v2470_v18 = vld [vmem:[%s11256_s21 + $0x26b0] sm:$0xff] }
 0x283   : > { %10254 = vmatpush3.bf16.msra.mxu0 %v10253_v13  ;;  %v2393_v13 = vld [vmem:[%s11256_s21 + $0x2448] sm:$0xff] }
 0x284   : > { %10286 = vmatpush3.bf16.msra.mxu1 %v10285_v17  ;;  %10288 = vmatprep.subr.bf16.mxu0 %v10287_v44  ;;  %v10335_v17 = vpack.c.bf16 %v2441_v39, %v2440_v24  ;;  %v2425_v44 = vld [vmem:[%s11256_s21 + $0x2548] sm:$0xff] }
 0x285   : > { %10320 = vmatprep.subr.bf16.mxu1 %v10319_v48  ;;  %v10305_v48 = vpack.c.bf16 %v2393_v13, %v2392_v42  ;;  %v10337_v49 = vpack.c.bf16 %v2425_v44, %v2424_v47  ;;  %v2448_v42 = vld [vmem:[%s11256_s21 + $0x2600] sm:$0xff]  ;;  %v2449_v13 = vld [vmem:[%s11256_s21 + $0x2608] sm:$0xff]  ;;  %v323_v47 = vadd.s32 9472, %v11325_v4  ;;  %v10383_v44 = vpack.c.bf16 %v2497_v36, %v2496_v7 }
 0x286   : > { %7128 = vmatmul.mubr.msk.f32.vlgmr.msra.gmra.mrb[34].mxu0 %vm431_vm7, %v12883_v33  ;;  %v10325_v33 = vpack.c.bf16 %v2419_v45, %v2418_v63  ;;  %v2396_v45 = vld [vmem:[%s11256_s21 + $0x2460] sm:$0xff]  ;;  %v10353_v38 = vpack.c.bf16 %v2449_v13, %v2448_v42  ;;  %v2501_v2 = vld [vmem:[%s11256_s21 + $0x27a8] sm:$0xff]  ;;  %v2474_v42 = vld [vmem:[%s11256_s21 + $0x26d0] sm:$0xff] }
 0x287   : > { %10290 = vmatpush3.bf16.msra.mxu0 %v10289_v53  ;;  %7130 = vmatmul.mubr.msk.f32.vlgmr.msra.gmra.mrb[34].mxu1 %vm433_vm8, %v12889_v61  ;;  %v2407_v61 = vld [vmem:[%s11256_s21 + $0x24b8] sm:$0xff]  ;;  %v10313_v22 = vpack.c.bf16 %v2397_v1, %v2396_v45  ;;  %vm437_vm12 = vcmp.lt.s32.totalorder %v323_v47, %v11339_v21  ;;  %v2500_v1 = vld [vmem:[%s11256_s21 + $0x27a0] sm:$0xff]  ;;  %v2485_v14 = vld [vmem:[%s11256_s21 + $0x2728] sm:$0xff] }
 0x288   : > { %10322 = vmatpush3.bf16.msra.mxu1 %v10321_v32  ;;  %10292 = vmatprep.subr.bf16.mxu0 %v10291_v57  ;;  %v10299_v0 = vpack.c.bf16 %v2407_v61, %v2406_v25  ;;  %v2427_v53 = vld [vmem:[%s11256_s21 + $0x2558] sm:$0xff]  ;;  %v2413_v32 = vld [vmem:[%s11256_s21 + $0x24e8] sm:$0xff]  ;;  %v2444_v57 = vld [vmem:[%s11256_s21 + $0x25e0] sm:$0xff] }
 0x289   : > { %10324 = vmatprep.subr.bf16.mxu1 %v10323_v54  ;;  %7131 = vmatprep.mubr.msk.f32.mxu0 %vm436_vm9, %v852_v6  ;;  %v10341_v63 = vpack.c.bf16 %v2427_v53, %v2426_v51  ;;  %v10311_v54 = vpack.c.bf16 %v2413_v32, %v2412_v56  ;;  %v10343_v58 = vpack.c.bf16 %v2445_v60, %v2444_v57  ;;  %v494_v25 = vld [vmem:[%s11277_s28 + $0x98] sm:$0xff]  ;;  %v328_v51 = vadd.s32 10112, %v11325_v4 }
 0x28a   : > { %7133 = vmatprep.mubr.msk.f32.mxu1 %vm438_vm10, %v853_v11  ;;  %v2414_v11 = vld [vmem:[%s11256_s21 + $0x24f0] sm:$0xff]  ;;  %v854_v24 = vcombine.high %v494_v25, %v494_v25  ;;  %v13075_v23 = vrot.slane %v494_v25, %v11333_v15  ;;  %v10355_v53 = vpack.c.bf16 %v2467_v50, %v2466_v16  ;;  %v2451_v32 = vld [vmem:[%s11256_s21 + $0x2618] sm:$0xff] }
 0x28b   : > { %10294 = vmatpush3.bf16.msra.mxu0 %v10293_v55  ;;  %v2415_v55 = vld [vmem:[%s11256_s21 + $0x24f8] sm:$0xff]  ;;  %v2450_v56 = vld [vmem:[%s11256_s21 + $0x2610] sm:$0xff]  ;;  %vm442_vm14 = vcmp.lt.s32.totalorder %v328_v51, %v11339_v21  ;;  %v2476_v51 = vld [vmem:[%s11256_s21 + $0x26e0] sm:$0xff] }
 0x28c   : > { %10326 = vmatpush3.bf16.msra.mxu1 %v10325_v33  ;;  %10296 = vmatprep.subr.bf16.mxu0 %v10295_v43  ;;  %v10315_v26 = vpack.c.bf16 %v2415_v55, %v2414_v11  ;;  %v13081_v52 = vrot.slane %v854_v24, %v11333_v15  ;;  %v2482_v57 = vld [vmem:[%s11256_s21 + $0x2710] sm:$0xff]  ;;  %v869_v45 = vcombine.high %v13075_v23, %v13075_v23  ;;  %v2452_v11 = vld [vmem:[%s11256_s21 + $0x2620] sm:$0xff]  ;;  %v2453_v55 = vld [vmem:[%s11256_s21 + $0x2628] sm:$0xff] }
 0x28d   : > { %10328 = vmatprep.subr.bf16.mxu1 %v10327_v20  ;;  %v2456_v24 = vld [vmem:[%s11256_s21 + $0x2640] sm:$0xff]  ;;  %v2475_v13 = vld [vmem:[%s11256_s21 + $0x26d8] sm:$0xff]  ;;  %v2506_v47 = vld [vmem:[%s11256_s21 + $0x27d0] sm:$0xff] }
 0x28e   : > { %v10371_v16 = vpack.c.bf16 %v2475_v13, %v2474_v42  ;;  %v2458_v50 = vld [vmem:[%s11256_s21 + $0x2650] sm:$0xff]  ;;  %v2545_v42 = vld [vmem:[%s11256_s21 + $0x2908] sm:$0xff] }
 0x28f   : > { %10298 = vmatpush3.bf16.msra.mxu0 %v10297_v27  ;;  %v2398_v27 = vld [vmem:[%s11256_s21 + $0x2470] sm:$0xff] }
 0x290   : > { %10330 = vmatpush3.bf16.msra.mxu1 %v10329_v29  ;;  %10300 = vmatprep.subr.bf16.mxu0 %v10299_v0  ;;  %v2399_v29 = vld [vmem:[%s11256_s21 + $0x2478] sm:$0xff]  ;;  %v2430_v0 = vld [vmem:[%s11256_s21 + $0x2570] sm:$0xff] }
 0x291   : > { %10332 = vmatprep.subr.bf16.mxu1 %v10331_v35  ;;  %v2464_v35 = vld [vmem:[%s11256_s21 + $0x2680] sm:$0xff]  ;;  %v2530_v13 = vld [vmem:[%s11256_s21 + $0x2890] sm:$0xff] }
 0x293   : > { %10302 = vmatpush3.bf16.msra.mxu0 %v10301_v10  ;;  %v10317_v10 = vpack.c.bf16 %v2399_v29, %v2398_v27  ;;  %v2486_v27 = vld [vmem:[%s11256_s21 + $0x2730] sm:$0xff] }
 0x294   : > { %10334 = vmatpush3.bf16.msra.mxu1 %v10333_v12  ;;  %10304 = vmatprep.subr.bf16.mxu0 %v10303_v40  ;;  %v10349_v12 = vpack.c.bf16 %v2431_v31, %v2430_v0  ;;  %v10351_v40 = vpack.c.bf16 %v2465_v3, %v2464_v35  ;;  %v2487_v0 = vld [vmem:[%s11256_s21 + $0x2738] sm:$0xff]  ;;  %v2504_v31 = vld [vmem:[%s11256_s21 + $0x27c0] sm:$0xff]  ;;  %v2505_v35 = vld [vmem:[%s11256_s21 + $0x27c8] sm:$0xff] }
 0x295   : > { %10336 = vmatprep.subr.bf16.mxu1 %v10335_v17  ;;  %v2480_v17 = vld [vmem:[%s11256_s21 + $0x2700] sm:$0xff]  ;;  %v10397_v7 = vpack.c.bf16 %v2487_v0, %v2486_v27  ;;  %v2495_v27 = vld [vmem:[%s11256_s21 + $0x2778] sm:$0xff]  ;;  %v2529_v0 = vld [vmem:[%s11256_s21 + $0x2888] sm:$0xff] }
 0x297   : > { %10306 = vmatpush3.bf16.msra.mxu0 %v10305_v48  ;;  %v2498_v48 = vld [vmem:[%s11256_s21 + $0x2790] sm:$0xff] }
 0x298   : > { %10338 = vmatpush3.bf16.msra.mxu1 %v10337_v49  ;;  %10308 = vmatprep.subr.bf16.mxu0 %v10307_v9  ;;  %v2499_v49 = vld [vmem:[%s11256_s21 + $0x2798] sm:$0xff]  ;;  %v326_v9 = vadd.s32 9856, %v11325_v4 }
 0x299   : > { %v7977_v6 = vpop.f32.mrb[22].mxu0  ;;  %10340 = vmatprep.subr.bf16.mxu1 %v10339_v28  ;;  %v10385_v28 = vpack.c.bf16 %v2481_v46, %v2480_v17  ;;  %v10387_v60 = vpack.c.bf16 %v2499_v49, %v2498_v48  ;;  %v2507_v17 = vld [vmem:[%s11256_s21 + $0x27d8] sm:$0xff]  ;;  %v2490_v49 = vld [vmem:[%s11256_s21 + $0x2750] sm:$0xff] }
 0x29a   : > { %v7978_v33 = vpop.f32.mrb[23].mxu0  ;;  %v8012_v43 = vpop.f32.mrb[22].mxu1  ;;  %vm440_vm13 = vcmp.lt.s32.totalorder %v326_v9, %v11339_v21  ;;  %v2459_v48 = vld [vmem:[%s11256_s21 + $0x2658] sm:$0xff]  ;;  %v10403_v9 = vpack.c.bf16 %v2507_v17, %v2506_v47 }
 0x29b   : > { %v7979_v41 = vadd.f32 %v7978_v33, %v7977_v6  ;;  %10310 = vmatpush3.bf16.msra.mxu0 %v10309_v37  ;;  %v8013_v20 = vpop.f32.mrb[23].mxu1  ;;  %v2483_v37 = vld [vmem:[%s11256_s21 + $0x2718] sm:$0xff]  ;;  %v870_v6 = vcombine.high %v13081_v52, %v13081_v52  ;;  %v2484_v33 = vld [vmem:[%s11256_s21 + $0x2720] sm:$0xff] }
 0x29c   : > { %v8014_v61 = vadd.f32 %v8013_v20, %v8012_v43  ;;  %10342 = vmatpush3.bf16.msra.mxu1 %v10341_v63  ;;  %10312 = vmatprep.subr.bf16.mxu0 %v10311_v54  ;;  %v2468_v63 = vld [vmem:[%s11256_s21 + $0x26a0] sm:$0xff]  ;;  %v2469_v54 = vld [vmem:[%s11256_s21 + $0x26a8] sm:$0xff]  ;;  %v10391_v43 = vpack.c.bf16 %v2501_v2, %v2500_v1  ;;  %v2503_v20 = vld [vmem:[%s11256_s21 + $0x27b8] sm:$0xff]  ;;  %v10393_v25 = vpack.c.bf16 %v2485_v14, %v2484_v33 }
 0x29d   : > { %v4631_v5 = vadd.f32 %v7979_v41, %v12968_v34  ;;  %10344 = vmatprep.subr.bf16.mxu1 %v10343_v58  ;;  %v321_v34 = vadd.s32 9216, %v11325_v4  ;;  %v10357_v58 = vpack.c.bf16 %v2451_v32, %v2450_v56  ;;  %v10359_v8 = vpack.c.bf16 %v2469_v54, %v2468_v63  ;;  %v2502_v41 = vld [vmem:[%s11256_s21 + $0x27b0] sm:$0xff]  ;;  %v2509_v56 = vld [vmem:[%s11256_s21 + $0x27e8] sm:$0xff]  ;;  %v2492_v54 = vld [vmem:[%s11256_s21 + $0x2760] sm:$0xff] }
 0x29e   : > { %v10395_v29 = vpack.c.bf16 %v2503_v20, %v2502_v41  ;;  %v10373_v32 = vpack.c.bf16 %v2459_v48, %v2458_v50  ;;  %v2461_v63 = vld [vmem:[%s11256_s21 + $0x2668] sm:$0xff]  ;;  %v2531_v47 = vld [vmem:[%s11256_s21 + $0x2898] sm:$0xff] }
 0x29f   : > { %v13064_v39 = vadd.f32 %v8014_v61, %v4631_v5  ;;  %10314 = vmatpush3.bf16.msra.mxu0 %v10313_v22  ;;  %vm435_vm11 = vcmp.lt.s32.totalorder %v321_v34, %v11339_v21  ;;  %v10361_v22 = vpack.c.bf16 %v2453_v55, %v2452_v11  ;;  %v2472_v5 = vld [vmem:[%s11256_s21 + $0x26c0] sm:$0xff]  ;;  %v2493_v2 = vld [vmem:[%s11256_s21 + $0x2768] sm:$0xff]  ;;  %v2510_v11 = vld [vmem:[%s11256_s21 + $0x27f0] sm:$0xff] }
 0x2a0   : > { %10346 = vmatpush3.bf16.msra.mxu1 %v10345_v62  ;;  %10316 = vmatprep.subr.bf16.mxu0 %v10315_v26  ;;  %v2454_v62 = vld [vmem:[%s11256_s21 + $0x2630] sm:$0xff]  ;;  %v2455_v26 = vld [vmem:[%s11256_s21 + $0x2638] sm:$0xff]  ;;  %v2488_v34 = vld [vmem:[%s11256_s21 + $0x2740] sm:$0xff]  ;;  %v10409_v41 = vpack.c.bf16 %v2493_v2, %v2492_v54 }
 0x2a1   : > { %10348 = vmatprep.subr.bf16.mxu1 %v10347_v30  ;;  %v2473_v30 = vld [vmem:[%s11256_s21 + $0x26c8] sm:$0xff]  ;;  %v10365_v3 = vpack.c.bf16 %v2455_v26, %v2454_v62  ;;  %v2511_v55 = vld [vmem:[%s11256_s21 + $0x27f8] sm:$0xff] }
 0x2a2   : > { %v10367_v36 = vpack.c.bf16 %v2473_v30, %v2472_v5  ;;  %v10411_v26 = vpack.c.bf16 %v2511_v55, %v2510_v11  ;;  %v2560_v5 = vld [vmem:[%s11256_s21 + $0x2980] sm:$0xff]  ;;  %v2561_v30 = vld [vmem:[%s11256_s21 + $0x2988] sm:$0xff]  ;;  %v2534_v55 = vld [vmem:[%s11256_s21 + $0x28b0] sm:$0xff] }
 0x2a3   : > { %10318 = vmatpush3.bf16.msra.mxu0 %v10317_v10  ;;  %v2457_v10 = vld [vmem:[%s11256_s21 + $0x2648] sm:$0xff] }
 0x2a4   : > { %10350 = vmatpush3.bf16.msra.mxu1 %v10349_v12  ;;  %10352 = vmatprep.subr.bf16.mxu0 %v10351_v40  ;;  %v10399_v12 = vpack.c.bf16 %v2505_v35, %v2504_v31  ;;  %v2489_v40 = vld [vmem:[%s11256_s21 + $0x2748] sm:$0xff] }
 0x2a5   : > { %10384 = vmatprep.subr.bf16.mxu1 %v10383_v44  ;;  %v10369_v44 = vpack.c.bf16 %v2457_v10, %v2456_v24  ;;  %v10401_v46 = vpack.c.bf16 %v2489_v40, %v2488_v34  ;;  %v2512_v24 = vld [vmem:[%s11256_s21 + $0x2800] sm:$0xff]  ;;  %v2513_v10 = vld [vmem:[%s11256_s21 + $0x2808] sm:$0xff]  ;;  %v327_v34 = vadd.s32 9984, %v11325_v4  ;;  %v10447_v40 = vpack.c.bf16 %v2561_v30, %v2560_v5 }
 0x2a6   : > { %7132 = vmatmul.mubr.msk.f32.vlgmr.msra.gmra.mrb[36].mxu0 %vm435_vm11, %v12979_v19  ;;  %v10389_v19 = vpack.c.bf16 %v2483_v37, %v2482_v57  ;;  %v2460_v37 = vld [vmem:[%s11256_s21 + $0x2660] sm:$0xff]  ;;  %v10417_v48 = vpack.c.bf16 %v2513_v10, %v2512_v24  ;;  %v2565_v54 = vld [vmem:[%s11256_s21 + $0x29a8] sm:$0xff]  ;;  %v2538_v24 = vld [vmem:[%s11256_s21 + $0x28d0] sm:$0xff] }
 0x2a7   : > { %10354 = vmatpush3.bf16.msra.mxu0 %v10353_v38  ;;  %7134 = vmatmul.mubr.msk.f32.vlgmr.msra.gmra.mrb[36].mxu1 %vm437_vm12, %v12985_v59  ;;  %v2471_v59 = vld [vmem:[%s11256_s21 + $0x26b8] sm:$0xff]  ;;  %v10377_v14 = vpack.c.bf16 %v2461_v63, %v2460_v37  ;;  %vm441_vm0 = vcmp.lt.s32.totalorder %v327_v34, %v11339_v21  ;;  %v2564_v63 = vld [vmem:[%s11256_s21 + $0x29a0] sm:$0xff]  ;;  %v2549_v11 = vld [vmem:[%s11256_s21 + $0x2928] sm:$0xff] }
 0x2a8   : > { %10386 = vmatpush3.bf16.msra.mxu1 %v10385_v28  ;;  %10356 = vmatprep.subr.bf16.mxu0 %v10355_v53  ;;  %v10363_v61 = vpack.c.bf16 %v2471_v59, %v2470_v18  ;;  %v2491_v38 = vld [vmem:[%s11256_s21 + $0x2758] sm:$0xff]  ;;  %v2477_v28 = vld [vmem:[%s11256_s21 + $0x26e8] sm:$0xff]  ;;  %v2508_v53 = vld [vmem:[%s11256_s21 + $0x27e0] sm:$0xff] }
 0x2a9   : > { %10388 = vmatprep.subr.bf16.mxu1 %v10387_v60  ;;  %7135 = vmatprep.mubr.msk.f32.mxu0 %vm440_vm13, %v869_v45  ;;  %v10405_v57 = vpack.c.bf16 %v2491_v38, %v2490_v49  ;;  %v10375_v60 = vpack.c.bf16 %v2477_v28, %v2476_v51  ;;  %v10407_v1 = vpack.c.bf16 %v2509_v56, %v2508_v53  ;;  %v495_v18 = vld [vmem:[%s11277_s28 + $0xa0] sm:$0xff]  ;;  %v332_v49 = vadd.s32 10624, %v11325_v4  ;;  %v2514_v51 = vld [vmem:[%s11256_s21 + $0x2810] sm:$0xff] }
 0x2aa   : > { %7137 = vmatprep.mubr.msk.f32.mxu1 %vm442_vm14, %v870_v6  ;;  %v2478_v6 = vld [vmem:[%s11256_s21 + $0x26f0] sm:$0xff]  ;;  %v871_v31 = vcombine.high %v495_v18, %v495_v18  ;;  %v13171_v17 = vrot.slane %v495_v18, %v11333_v15  ;;  %v10419_v38 = vpack.c.bf16 %v2531_v47, %v2530_v13  ;;  %v2515_v28 = vld [vmem:[%s11256_s21 + $0x2818] sm:$0xff] }
 0x2ab   : > { %10358 = vmatpush3.bf16.msra.mxu0 %v10357_v58  ;;  %v2479_v58 = vld [vmem:[%s11256_s21 + $0x26f8] sm:$0xff]  ;;  %v2546_v53 = vld [vmem:[%s11256_s21 + $0x2910] sm:$0xff]  ;;  %vm446_vm2 = vcmp.lt.s32.totalorder %v332_v49, %v11339_v21  ;;  %v2540_v49 = vld [vmem:[%s11256_s21 + $0x28e0] sm:$0xff] }
 0x2ac   : > { %10390 = vmatpush3.bf16.msra.mxu1 %v10389_v19  ;;  %10360 = vmatprep.subr.bf16.mxu0 %v10359_v8  ;;  %v10379_v20 = vpack.c.bf16 %v2479_v58, %v2478_v6  ;;  %v13177_v50 = vrot.slane %v871_v31, %v11333_v15  ;;  %v886_v37 = vcombine.high %v13171_v17, %v13171_v17  ;;  %v2516_v6 = vld [vmem:[%s11256_s21 + $0x2820] sm:$0xff]  ;;  %v2517_v58 = vld [vmem:[%s11256_s21 + $0x2828] sm:$0xff]  ;;  %v2539_v10 = vld [vmem:[%s11256_s21 + $0x28d8] sm:$0xff] }
 0x2ad   : > { %10392 = vmatprep.subr.bf16.mxu1 %v10391_v43  ;;  %v2520_v31 = vld [vmem:[%s11256_s21 + $0x2840] sm:$0xff]  ;;  %v2570_v34 = vld [vmem:[%s11256_s21 + $0x29d0] sm:$0xff]  ;;  %v10435_v13 = vpack.c.bf16 %v2539_v10, %v2538_v24  ;;  %v2609_v24 = vld [vmem:[%s11256_s21 + $0x2b08] sm:$0xff] }
 0x2ae   : > { %v2522_v47 = vld [vmem:[%s11256_s21 + $0x2850] sm:$0xff] }
 0x2af   : > { %10362 = vmatpush3.bf16.msra.mxu0 %v10361_v22  ;;  %v2462_v22 = vld [vmem:[%s11256_s21 + $0x2670] sm:$0xff] }
 0x2b0   : > { %10394 = vmatpush3.bf16.msra.mxu1 %v10393_v25  ;;  %10364 = vmatprep.subr.bf16.mxu0 %v10363_v61  ;;  %v2463_v25 = vld [vmem:[%s11256_s21 + $0x2678] sm:$0xff]  ;;  %v2494_v61 = vld [vmem:[%s11256_s21 + $0x2770] sm:$0xff] }
 0x2b1   : > { %10396 = vmatprep.subr.bf16.mxu1 %v10395_v29  ;;  %v2528_v29 = vld [vmem:[%s11256_s21 + $0x2880] sm:$0xff]  ;;  %v2594_v10 = vld [vmem:[%s11256_s21 + $0x2a90] sm:$0xff] }
 0x2b3   : > { %10366 = vmatpush3.bf16.msra.mxu0 %v10365_v3  ;;  %v10381_v3 = vpack.c.bf16 %v2463_v25, %v2462_v22  ;;  %v2550_v22 = vld [vmem:[%s11256_s21 + $0x2930] sm:$0xff] }
 0x2b4   : > { %10398 = vmatpush3.bf16.msra.mxu1 %v10397_v7  ;;  %10368 = vmatprep.subr.bf16.mxu0 %v10367_v36  ;;  %v10413_v7 = vpack.c.bf16 %v2495_v27, %v2494_v61  ;;  %v10415_v36 = vpack.c.bf16 %v2529_v0, %v2528_v29  ;;  %v2551_v61 = vld [vmem:[%s11256_s21 + $0x2938] sm:$0xff]  ;;  %v2568_v27 = vld [vmem:[%s11256_s21 + $0x29c0] sm:$0xff]  ;;  %v2569_v29 = vld [vmem:[%s11256_s21 + $0x29c8] sm:$0xff] }
 0x2b5   : > { %10400 = vmatprep.subr.bf16.mxu1 %v10399_v12  ;;  %v2544_v12 = vld [vmem:[%s11256_s21 + $0x2900] sm:$0xff]  ;;  %v10461_v5 = vpack.c.bf16 %v2551_v61, %v2550_v22  ;;  %v2559_v22 = vld [vmem:[%s11256_s21 + $0x2978] sm:$0xff]  ;;  %v2593_v61 = vld [vmem:[%s11256_s21 + $0x2a88] sm:$0xff] }
 0x2b7   : > { %10370 = vmatpush3.bf16.msra.mxu0 %v10369_v44  ;;  %v2562_v44 = vld [vmem:[%s11256_s21 + $0x2990] sm:$0xff] }
 0x2b8   : > { %10402 = vmatpush3.bf16.msra.mxu1 %v10401_v46  ;;  %10372 = vmatprep.subr.bf16.mxu0 %v10371_v16  ;;  %v2563_v46 = vld [vmem:[%s11256_s21 + $0x2998] sm:$0xff]  ;;  %v330_v16 = vadd.s32 10368, %v11325_v4 }
 0x2b9   : > { %v8047_v45 = vpop.f32.mrb[24].mxu0  ;;  %10404 = vmatprep.subr.bf16.mxu1 %v10403_v9  ;;  %v10449_v9 = vpack.c.bf16 %v2545_v42, %v2544_v12  ;;  %v10451_v56 = vpack.c.bf16 %v2563_v46, %v2562_v44  ;;  %v2571_v12 = vld [vmem:[%s11256_s21 + $0x29d8] sm:$0xff]  ;;  %v2554_v46 = vld [vmem:[%s11256_s21 + $0x2950] sm:$0xff] }
 0x2ba   : > { %v8048_v19 = vpop.f32.mrb[25].mxu0  ;;  %v8082_v8 = vpop.f32.mrb[24].mxu1  ;;  %vm444_vm1 = vcmp.lt.s32.totalorder %v330_v16, %v11339_v21  ;;  %v2523_v44 = vld [vmem:[%s11256_s21 + $0x2858] sm:$0xff]  ;;  %v10467_v16 = vpack.c.bf16 %v2571_v12, %v2570_v34 }
 0x2bb   : > { %v8049_v33 = vadd.f32 %v8048_v19, %v8047_v45  ;;  %10374 = vmatpush3.bf16.msra.mxu0 %v10373_v32  ;;  %v8083_v43 = vpop.f32.mrb[25].mxu1  ;;  %v2547_v32 = vld [vmem:[%s11256_s21 + $0x2918] sm:$0xff]  ;;  %v887_v45 = vcombine.high %v13177_v50, %v13177_v50  ;;  %v2548_v19 = vld [vmem:[%s11256_s21 + $0x2920] sm:$0xff] }
 0x2bc   : > { %v8084_v59 = vadd.f32 %v8083_v43, %v8082_v8  ;;  %10406 = vmatpush3.bf16.msra.mxu1 %v10405_v57  ;;  %10376 = vmatprep.subr.bf16.mxu0 %v10375_v60  ;;  %v2532_v57 = vld [vmem:[%s11256_s21 + $0x28a0] sm:$0xff]  ;;  %v2533_v60 = vld [vmem:[%s11256_s21 + $0x28a8] sm:$0xff]  ;;  %v10455_v8 = vpack.c.bf16 %v2565_v54, %v2564_v63  ;;  %v2567_v43 = vld [vmem:[%s11256_s21 + $0x29b8] sm:$0xff]  ;;  %v10457_v18 = vpack.c.bf16 %v2549_v11, %v2548_v19 }
 0x2bd   : > { %v4771_v62 = vadd.f32 %v8049_v33, %v13064_v39  ;;  %10408 = vmatprep.subr.bf16.mxu1 %v10407_v1  ;;  %v325_v39 = vadd.s32 9728, %v11325_v4  ;;  %v10421_v1 = vpack.c.bf16 %v2515_v28, %v2514_v51  ;;  %v10423_v2 = vpack.c.bf16 %v2533_v60, %v2532_v57  ;;  %v2566_v33 = vld [vmem:[%s11256_s21 + $0x29b0] sm:$0xff]  ;;  %v2573_v51 = vld [vmem:[%s11256_s21 + $0x29e8] sm:$0xff]  ;;  %v2556_v60 = vld [vmem:[%s11256_s21 + $0x2960] sm:$0xff] }
 0x2be   : > { %v10459_v25 = vpack.c.bf16 %v2567_v43, %v2566_v33  ;;  %v10437_v28 = vpack.c.bf16 %v2523_v44, %v2522_v47  ;;  %v2525_v57 = vld [vmem:[%s11256_s21 + $0x2868] sm:$0xff]  ;;  %v2595_v34 = vld [vmem:[%s11256_s21 + $0x2a98] sm:$0xff] }
 0x2bf   : > { %v13160_v35 = vadd.f32 %v8084_v59, %v4771_v62  ;;  %10378 = vmatpush3.bf16.msra.mxu0 %v10377_v14  ;;  %vm439_vm15 = vcmp.lt.s32.totalorder %v325_v39, %v11339_v21  ;;  %v10425_v14 = vpack.c.bf16 %v2517_v58, %v2516_v6  ;;  %v2536_v62 = vld [vmem:[%s11256_s21 + $0x28c0] sm:$0xff]  ;;  %v2557_v54 = vld [vmem:[%s11256_s21 + $0x2968] sm:$0xff]  ;;  %v2574_v6 = vld [vmem:[%s11256_s21 + $0x29f0] sm:$0xff] }
 0x2c0   : > { %10410 = vmatpush3.bf16.msra.mxu1 %v10409_v41  ;;  %10380 = vmatprep.subr.bf16.mxu0 %v10379_v20  ;;  %v2518_v41 = vld [vmem:[%s11256_s21 + $0x2830] sm:$0xff]  ;;  %v2519_v20 = vld [vmem:[%s11256_s21 + $0x2838] sm:$0xff]  ;;  %v2552_v39 = vld [vmem:[%s11256_s21 + $0x2940] sm:$0xff]  ;;  %v10473_v33 = vpack.c.bf16 %v2557_v54, %v2556_v60 }
 0x2c1   : > { %10412 = vmatprep.subr.bf16.mxu1 %v10411_v26  ;;  %v2537_v26 = vld [vmem:[%s11256_s21 + $0x28c8] sm:$0xff]  ;;  %v10429_v0 = vpack.c.bf16 %v2519_v20, %v2518_v41  ;;  %v2575_v58 = vld [vmem:[%s11256_s21 + $0x29f8] sm:$0xff] }
 0x2c2   : > { %v10431_v30 = vpack.c.bf16 %v2537_v26, %v2536_v62  ;;  %v10475_v20 = vpack.c.bf16 %v2575_v58, %v2574_v6  ;;  %v2624_v62 = vld [vmem:[%s11256_s21 + $0x2b80] sm:$0xff]  ;;  %v2625_v26 = vld [vmem:[%s11256_s21 + $0x2b88] sm:$0xff]  ;;  %v2598_v58 = vld [vmem:[%s11256_s21 + $0x2ab0] sm:$0xff] }
 0x2c3   : > { %10382 = vmatpush3.bf16.msra.mxu0 %v10381_v3  ;;  %v2521_v3 = vld [vmem:[%s11256_s21 + $0x2848] sm:$0xff] }
 0x2c4   : > { %10414 = vmatpush3.bf16.msra.mxu1 %v10413_v7  ;;  %10416 = vmatprep.subr.bf16.mxu0 %v10415_v36  ;;  %v10463_v7 = vpack.c.bf16 %v2569_v29, %v2568_v27  ;;  %v2553_v36 = vld [vmem:[%s11256_s21 + $0x2948] sm:$0xff] }
 0x2c5   : > { %10448 = vmatprep.subr.bf16.mxu1 %v10447_v40  ;;  %v10433_v40 = vpack.c.bf16 %v2521_v3, %v2520_v31  ;;  %v10465_v42 = vpack.c.bf16 %v2553_v36, %v2552_v39  ;;  %v2576_v31 = vld [vmem:[%s11256_s21 + $0x2a00] sm:$0xff]  ;;  %v2577_v3 = vld [vmem:[%s11256_s21 + $0x2a08] sm:$0xff]  ;;  %v331_v39 = vadd.s32 10496, %v11325_v4  ;;  %v10511_v36 = vpack.c.bf16 %v2625_v26, %v2624_v62 }
 0x2c6   : > { %7136 = vmatmul.mubr.msk.f32.vlgmr.msra.gmra.mrb[38].mxu0 %vm439_vm15, %v13075_v23  ;;  %v10453_v23 = vpack.c.bf16 %v2547_v32, %v2546_v53  ;;  %v2524_v32 = vld [vmem:[%s11256_s21 + $0x2860] sm:$0xff]  ;;  %v10481_v44 = vpack.c.bf16 %v2577_v3, %v2576_v31  ;;  %v2629_v60 = vld [vmem:[%s11256_s21 + $0x2ba8] sm:$0xff]  ;;  %v2602_v31 = vld [vmem:[%s11256_s21 + $0x2ad0] sm:$0xff] }
 0x2c7   : > { %10418 = vmatpush3.bf16.msra.mxu0 %v10417_v48  ;;  %7138 = vmatmul.mubr.msk.f32.vlgmr.msra.gmra.mrb[38].mxu1 %vm441_vm0, %v13081_v52  ;;  %v2535_v52 = vld [vmem:[%s11256_s21 + $0x28b8] sm:$0xff]  ;;  %v10441_v11 = vpack.c.bf16 %v2525_v57, %v2524_v32  ;;  %vm445_vm4 = vcmp.lt.s32.totalorder %v331_v39, %v11339_v21  ;;  %v2628_v57 = vld [vmem:[%s11256_s21 + $0x2ba0] sm:$0xff]  ;;  %v2613_v6 = vld [vmem:[%s11256_s21 + $0x2b28] sm:$0xff] }
 0x2c8   : > { %10450 = vmatpush3.bf16.msra.mxu1 %v10449_v9  ;;  %10420 = vmatprep.subr.bf16.mxu0 %v10419_v38  ;;  %v10427_v59 = vpack.c.bf16 %v2535_v52, %v2534_v55  ;;  %v2555_v48 = vld [vmem:[%s11256_s21 + $0x2958] sm:$0xff]  ;;  %v2541_v9 = vld [vmem:[%s11256_s21 + $0x28e8] sm:$0xff]  ;;  %v2572_v38 = vld [vmem:[%s11256_s21 + $0x29e0] sm:$0xff] }
 0x2c9   : > { %10452 = vmatprep.subr.bf16.mxu1 %v10451_v56  ;;  %7139 = vmatprep.mubr.msk.f32.mxu0 %vm444_vm1, %v886_v37  ;;  %v10469_v53 = vpack.c.bf16 %v2555_v48, %v2554_v46  ;;  %v10439_v56 = vpack.c.bf16 %v2541_v9, %v2540_v49  ;;  %v10471_v63 = vpack.c.bf16 %v2573_v51, %v2572_v38  ;;  %v496_v55 = vld [vmem:[%s11277_s28 + $0xa8] sm:$0xff]  ;;  %v336_v46 = vadd.s32 11136, %v11325_v4  ;;  %v2578_v49 = vld [vmem:[%s11256_s21 + $0x2a10] sm:$0xff]  ;;  %v2579_v9 = vld [vmem:[%s11256_s21 + $0x2a18] sm:$0xff] }
 0x2ca   : > { %7141 = vmatprep.mubr.msk.f32.mxu1 %vm446_vm2, %v887_v45  ;;  %v2542_v45 = vld [vmem:[%s11256_s21 + $0x28f0] sm:$0xff]  ;;  %v888_v27 = vcombine.high %v496_v55, %v496_v55  ;;  %v13267_v12 = vrot.slane %v496_v55, %v11333_v15  ;;  %v10483_v48 = vpack.c.bf16 %v2595_v34, %v2594_v10  ;;  %v2603_v3 = vld [vmem:[%s11256_s21 + $0x2ad8] sm:$0xff] }
 0x2cb   : > { %10422 = vmatpush3.bf16.msra.mxu0 %v10421_v1  ;;  %v2543_v1 = vld [vmem:[%s11256_s21 + $0x28f8] sm:$0xff]  ;;  %v2610_v38 = vld [vmem:[%s11256_s21 + $0x2b10] sm:$0xff]  ;;  %vm450_vm6 = vcmp.lt.s32.totalorder %v336_v46, %v11339_v21  ;;  %v10499_v10 = vpack.c.bf16 %v2603_v3, %v2602_v31  ;;  %v2604_v46 = vld [vmem:[%s11256_s21 + $0x2ae0] sm:$0xff] }
 0x2cc   : > { %10454 = vmatpush3.bf16.msra.mxu1 %v10453_v23  ;;  %10424 = vmatprep.subr.bf16.mxu0 %v10423_v2  ;;  %v10443_v43 = vpack.c.bf16 %v2543_v1, %v2542_v45  ;;  %v13273_v47 = vrot.slane %v888_v27, %v11333_v15  ;;  %v903_v32 = vcombine.high %v13267_v12, %v13267_v12  ;;  %v2580_v45 = vld [vmem:[%s11256_s21 + $0x2a20] sm:$0xff]  ;;  %v2581_v1 = vld [vmem:[%s11256_s21 + $0x2a28] sm:$0xff]  ;;  %v2634_v39 = vld [vmem:[%s11256_s21 + $0x2bd0] sm:$0xff] }
 0x2cd   : > { %10456 = vmatprep.subr.bf16.mxu1 %v10455_v8  ;;  %v2584_v27 = vld [vmem:[%s11256_s21 + $0x2a40] sm:$0xff]  ;;  %v2586_v34 = vld [vmem:[%s11256_s21 + $0x2a50] sm:$0xff]  ;;  %v2673_v31 = vld [vmem:[%s11256_s21 + $0x2d08] sm:$0xff] }
 0x2ce   : > { %v2658_v3 = vld [vmem:[%s11256_s21 + $0x2c90] sm:$0xff] }
 0x2cf   : > { %10426 = vmatpush3.bf16.msra.mxu0 %v10425_v14  ;;  %v2526_v14 = vld [vmem:[%s11256_s21 + $0x2870] sm:$0xff] }
 0x2d0   : > { %10458 = vmatpush3.bf16.msra.mxu1 %v10457_v18  ;;  %10428 = vmatprep.subr.bf16.mxu0 %v10427_v59  ;;  %v2527_v18 = vld [vmem:[%s11256_s21 + $0x2878] sm:$0xff]  ;;  %v2558_v59 = vld [vmem:[%s11256_s21 + $0x2970] sm:$0xff] }
 0x2d1   : > { %10460 = vmatprep.subr.bf16.mxu1 %v10459_v25  ;;  %v2592_v25 = vld [vmem:[%s11256_s21 + $0x2a80] sm:$0xff] }
 0x2d3   : > { %10430 = vmatpush3.bf16.msra.mxu0 %v10429_v0  ;;  %v10445_v0 = vpack.c.bf16 %v2527_v18, %v2526_v14  ;;  %v2614_v14 = vld [vmem:[%s11256_s21 + $0x2b30] sm:$0xff] }
 0x2d4   : > { %10462 = vmatpush3.bf16.msra.mxu1 %v10461_v5  ;;  %10432 = vmatprep.subr.bf16.mxu0 %v10431_v30  ;;  %v10477_v5 = vpack.c.bf16 %v2559_v22, %v2558_v59  ;;  %v10479_v30 = vpack.c.bf16 %v2593_v61, %v2592_v25  ;;  %v2615_v59 = vld [vmem:[%s11256_s21 + $0x2b38] sm:$0xff]  ;;  %v2632_v22 = vld [vmem:[%s11256_s21 + $0x2bc0] sm:$0xff]  ;;  %v2633_v25 = vld [vmem:[%s11256_s21 + $0x2bc8] sm:$0xff] }
 0x2d5   : > { %10464 = vmatprep.subr.bf16.mxu1 %v10463_v7  ;;  %v2608_v7 = vld [vmem:[%s11256_s21 + $0x2b00] sm:$0xff]  ;;  %v10525_v62 = vpack.c.bf16 %v2615_v59, %v2614_v14  ;;  %v2623_v14 = vld [vmem:[%s11256_s21 + $0x2b78] sm:$0xff]  ;;  %v2657_v59 = vld [vmem:[%s11256_s21 + $0x2c88] sm:$0xff] }
 0x2d7   : > { %10434 = vmatpush3.bf16.msra.mxu0 %v10433_v40  ;;  %v2626_v40 = vld [vmem:[%s11256_s21 + $0x2b90] sm:$0xff] }
 0x2d8   : > { %10466 = vmatpush3.bf16.msra.mxu1 %v10465_v42  ;;  %10436 = vmatprep.subr.bf16.mxu0 %v10435_v13  ;;  %v2627_v42 = vld [vmem:[%s11256_s21 + $0x2b98] sm:$0xff]  ;;  %v334_v13 = vadd.s32 10880, %v11325_v4 }
 0x2d9   : > { %v8117_v37 = vpop.f32.mrb[26].mxu0  ;;  %10468 = vmatprep.subr.bf16.mxu1 %v10467_v16  ;;  %v10513_v16 = vpack.c.bf16 %v2609_v24, %v2608_v7  ;;  %v10515_v51 = vpack.c.bf16 %v2627_v42, %v2626_v40  ;;  %v2635_v7 = vld [vmem:[%s11256_s21 + $0x2bd8] sm:$0xff]  ;;  %v2618_v42 = vld [vmem:[%s11256_s21 + $0x2b50] sm:$0xff] }
 0x2da   : > { %v8118_v23 = vpop.f32.mrb[27].mxu0  ;;  %v8152_v2 = vpop.f32.mrb[26].mxu1  ;;  %vm448_vm5 = vcmp.lt.s32.totalorder %v334_v13, %v11339_v21  ;;  %v2587_v40 = vld [vmem:[%s11256_s21 + $0x2a58] sm:$0xff]  ;;  %v10531_v13 = vpack.c.bf16 %v2635_v7, %v2634_v39 }
 0x2db   : > { %v8119_v19 = vadd.f32 %v8118_v23, %v8117_v37  ;;  %10438 = vmatpush3.bf16.msra.mxu0 %v10437_v28  ;;  %v8153_v8 = vpop.f32.mrb[27].mxu1  ;;  %v2611_v28 = vld [vmem:[%s11256_s21 + $0x2b18] sm:$0xff]  ;;  %v904_v37 = vcombine.high %v13273_v47, %v13273_v47  ;;  %v2612_v23 = vld [vmem:[%s11256_s21 + $0x2b20] sm:$0xff] }
 0x2dc   : > { %v8154_v52 = vadd.f32 %v8153_v8, %v8152_v2  ;;  %10470 = vmatpush3.bf16.msra.mxu1 %v10469_v53  ;;  %10440 = vmatprep.subr.bf16.mxu0 %v10439_v56  ;;  %v2596_v53 = vld [vmem:[%s11256_s21 + $0x2aa0] sm:$0xff]  ;;  %v2597_v56 = vld [vmem:[%s11256_s21 + $0x2aa8] sm:$0xff]  ;;  %v10519_v2 = vpack.c.bf16 %v2629_v60, %v2628_v57  ;;  %v2631_v8 = vld [vmem:[%s11256_s21 + $0x2bb8] sm:$0xff]  ;;  %v10521_v55 = vpack.c.bf16 %v2613_v6, %v2612_v23 }
 0x2dd   : > { %v4911_v41 = vadd.f32 %v8119_v19, %v13160_v35  ;;  %10472 = vmatprep.subr.bf16.mxu1 %v10471_v63  ;;  %v329_v35 = vadd.s32 10240, %v11325_v4  ;;  %v10485_v63 = vpack.c.bf16 %v2579_v9, %v2578_v49  ;;  %v10487_v54 = vpack.c.bf16 %v2597_v56, %v2596_v53  ;;  %v2630_v19 = vld [vmem:[%s11256_s21 + $0x2bb0] sm:$0xff]  ;;  %v2637_v49 = vld [vmem:[%s11256_s21 + $0x2be8] sm:$0xff]  ;;  %v2620_v56 = vld [vmem:[%s11256_s21 + $0x2b60] sm:$0xff] }
 0x2de   : > { %v10523_v18 = vpack.c.bf16 %v2631_v8, %v2630_v19  ;;  %v10501_v9 = vpack.c.bf16 %v2587_v40, %v2586_v34  ;;  %v2589_v53 = vld [vmem:[%s11256_s21 + $0x2a68] sm:$0xff]  ;;  %v2659_v39 = vld [vmem:[%s11256_s21 + $0x2c98] sm:$0xff] }
 0x2df   : > { %v13256_v29 = vadd.f32 %v8154_v52, %v4911_v41  ;;  %10442 = vmatpush3.bf16.msra.mxu0 %v10441_v11  ;;  %vm443_vm3 = vcmp.lt.s32.totalorder %v329_v35, %v11339_v21  ;;  %v10489_v11 = vpack.c.bf16 %v2581_v1, %v2580_v45  ;;  %v2600_v41 = vld [vmem:[%s11256_s21 + $0x2ac0] sm:$0xff]  ;;  %v2621_v60 = vld [vmem:[%s11256_s21 + $0x2b68] sm:$0xff]  ;;  %v2638_v45 = vld [vmem:[%s11256_s21 + $0x2bf0] sm:$0xff] }
 0x2e0   : > { %10474 = vmatpush3.bf16.msra.mxu1 %v10473_v33  ;;  %10444 = vmatprep.subr.bf16.mxu0 %v10443_v43  ;;  %v2582_v33 = vld [vmem:[%s11256_s21 + $0x2a30] sm:$0xff]  ;;  %v2583_v43 = vld [vmem:[%s11256_s21 + $0x2a38] sm:$0xff]  ;;  %v2616_v35 = vld [vmem:[%s11256_s21 + $0x2b40] sm:$0xff]  ;;  %v10537_v19 = vpack.c.bf16 %v2621_v60, %v2620_v56 }
 0x2e1   : > { %10476 = vmatprep.subr.bf16.mxu1 %v10475_v20  ;;  %v2601_v20 = vld [vmem:[%s11256_s21 + $0x2ac8] sm:$0xff]  ;;  %v10493_v61 = vpack.c.bf16 %v2583_v43, %v2582_v33  ;;  %v2639_v1 = vld [vmem:[%s11256_s21 + $0x2bf8] sm:$0xff] }
 0x2e2   : > { %v10495_v26 = vpack.c.bf16 %v2601_v20, %v2600_v41  ;;  %v10539_v43 = vpack.c.bf16 %v2639_v1, %v2638_v45  ;;  %v2688_v41 = vld [vmem:[%s11256_s21 + $0x2d80] sm:$0xff]  ;;  %v2689_v20 = vld [vmem:[%s11256_s21 + $0x2d88] sm:$0xff]  ;;  %v2662_v1 = vld [vmem:[%s11256_s21 + $0x2cb0] sm:$0xff] }
 0x2e3   : > { %10446 = vmatpush3.bf16.msra.mxu0 %v10445_v0  ;;  %v2585_v0 = vld [vmem:[%s11256_s21 + $0x2a48] sm:$0xff] }
 0x2e4   : > { %10478 = vmatpush3.bf16.msra.mxu1 %v10477_v5  ;;  %10480 = vmatprep.subr.bf16.mxu0 %v10479_v30  ;;  %v10527_v5 = vpack.c.bf16 %v2633_v25, %v2632_v22  ;;  %v2617_v30 = vld [vmem:[%s11256_s21 + $0x2b48] sm:$0xff] }
 0x2e5   : > { %10512 = vmatprep.subr.bf16.mxu1 %v10511_v36  ;;  %v10497_v36 = vpack.c.bf16 %v2585_v0, %v2584_v27  ;;  %v10529_v24 = vpack.c.bf16 %v2617_v30, %v2616_v35  ;;  %v2640_v27 = vld [vmem:[%s11256_s21 + $0x2c00] sm:$0xff]  ;;  %v2641_v0 = vld [vmem:[%s11256_s21 + $0x2c08] sm:$0xff]  ;;  %v335_v35 = vadd.s32 11008, %v11325_v4  ;;  %v10575_v30 = vpack.c.bf16 %v2689_v20, %v2688_v41 }
 0x2e6   : > { %7140 = vmatmul.mubr.msk.f32.vlgmr.msra.gmra.mrb[40].mxu0 %vm443_vm3, %v13171_v17  ;;  %v10517_v17 = vpack.c.bf16 %v2611_v28, %v2610_v38  ;;  %v2588_v28 = vld [vmem:[%s11256_s21 + $0x2a60] sm:$0xff]  ;;  %v10545_v40 = vpack.c.bf16 %v2641_v0, %v2640_v27  ;;  %v2693_v56 = vld [vmem:[%s11256_s21 + $0x2da8] sm:$0xff]  ;;  %v2666_v27 = vld [vmem:[%s11256_s21 + $0x2cd0] sm:$0xff] }
 0x2e7   : > { %10482 = vmatpush3.bf16.msra.mxu0 %v10481_v44  ;;  %7142 = vmatmul.mubr.msk.f32.vlgmr.msra.gmra.mrb[40].mxu1 %vm445_vm4, %v13177_v50  ;;  %v2599_v50 = vld [vmem:[%s11256_s21 + $0x2ab8] sm:$0xff]  ;;  %v10505_v6 = vpack.c.bf16 %v2589_v53, %v2588_v28  ;;  %vm449_vm8 = vcmp.lt.s32.totalorder %v335_v35, %v11339_v21  ;;  %v2692_v53 = vld [vmem:[%s11256_s21 + $0x2da0] sm:$0xff]  ;;  %v2677_v45 = vld [vmem:[%s11256_s21 + $0x2d28] sm:$0xff] }
 0x2e8   : > { %10514 = vmatpush3.bf16.msra.mxu1 %v10513_v16  ;;  %10484 = vmatprep.subr.bf16.mxu0 %v10483_v48  ;;  %v10491_v52 = vpack.c.bf16 %v2599_v50, %v2598_v58  ;;  %v2619_v44 = vld [vmem:[%s11256_s21 + $0x2b58] sm:$0xff]  ;;  %v2605_v16 = vld [vmem:[%s11256_s21 + $0x2ae8] sm:$0xff]  ;;  %v2636_v48 = vld [vmem:[%s11256_s21 + $0x2be0] sm:$0xff] }
 0x2e9   : > { %10516 = vmatprep.subr.bf16.mxu1 %v10515_v51  ;;  %7143 = vmatprep.mubr.msk.f32.mxu0 %vm448_vm5, %v903_v32  ;;  %v10533_v38 = vpack.c.bf16 %v2619_v44, %v2618_v42  ;;  %v10503_v51 = vpack.c.bf16 %v2605_v16, %v2604_v46  ;;  %v10535_v57 = vpack.c.bf16 %v2637_v49, %v2636_v48  ;;  %v497_v58 = vld [vmem:[%s11277_s28 + $0xb0] sm:$0xff]  ;;  %v340_v42 = vadd.s32 11648, %v11325_v4  ;;  %v2643_v16 = vld [vmem:[%s11256_s21 + $0x2c18] sm:$0xff] }
 0x2ea   : > { %7145 = vmatprep.mubr.msk.f32.mxu1 %vm450_vm6, %v904_v37  ;;  %v2606_v37 = vld [vmem:[%s11256_s21 + $0x2af0] sm:$0xff]  ;;  %v905_v22 = vcombine.high %v497_v58, %v497_v58  ;;  %v13363_v7 = vrot.slane %v497_v58, %v11333_v15  ;;  %v10547_v44 = vpack.c.bf16 %v2659_v39, %v2658_v3  ;;  %v2667_v0 = vld [vmem:[%s11256_s21 + $0x2cd8] sm:$0xff] }
 0x2eb   : > { %10486 = vmatpush3.bf16.msra.mxu0 %v10485_v63  ;;  %v2607_v63 = vld [vmem:[%s11256_s21 + $0x2af8] sm:$0xff]  ;;  %v2642_v46 = vld [vmem:[%s11256_s21 + $0x2c10] sm:$0xff]  ;;  %vm454_vm10 = vcmp.lt.s32.totalorder %v340_v42, %v11339_v21  ;;  %v10563_v3 = vpack.c.bf16 %v2667_v0, %v2666_v27  ;;  %v2668_v42 = vld [vmem:[%s11256_s21 + $0x2ce0] sm:$0xff] }
 0x2ec   : > { %10518 = vmatpush3.bf16.msra.mxu1 %v10517_v17  ;;  %10488 = vmatprep.subr.bf16.mxu0 %v10487_v54  ;;  %v10507_v8 = vpack.c.bf16 %v2607_v63, %v2606_v37  ;;  %v13369_v34 = vrot.slane %v905_v22, %v11333_v15  ;;  %v2674_v48 = vld [vmem:[%s11256_s21 + $0x2d10] sm:$0xff]  ;;  %v920_v28 = vcombine.high %v13363_v7, %v13363_v7  ;;  %v2644_v37 = vld [vmem:[%s11256_s21 + $0x2c20] sm:$0xff]  ;;  %v2645_v63 = vld [vmem:[%s11256_s21 + $0x2c28] sm:$0xff] }
 0x2ed   : > { %10520 = vmatprep.subr.bf16.mxu1 %v10519_v2  ;;  %v2648_v22 = vld [vmem:[%s11256_s21 + $0x2c40] sm:$0xff]  ;;  %v2698_v35 = vld [vmem:[%s11256_s21 + $0x2dd0] sm:$0xff]  ;;  %v2737_v27 = vld [vmem:[%s11256_s21 + $0x2f08] sm:$0xff] }
 0x2ee   : > { %v2650_v39 = vld [vmem:[%s11256_s21 + $0x2c50] sm:$0xff] }
 0x2ef   : > { %10490 = vmatpush3.bf16.msra.mxu0 %v10489_v11  ;;  %v2590_v11 = vld [vmem:[%s11256_s21 + $0x2a70] sm:$0xff] }
 0x2f0   : > { %10522 = vmatpush3.bf16.msra.mxu1 %v10521_v55  ;;  %10492 = vmatprep.subr.bf16.mxu0 %v10491_v52  ;;  %v2591_v55 = vld [vmem:[%s11256_s21 + $0x2a78] sm:$0xff]  ;;  %v2622_v52 = vld [vmem:[%s11256_s21 + $0x2b70] sm:$0xff] }
 0x2f1   : > { %10524 = vmatprep.subr.bf16.mxu1 %v10523_v18  ;;  %v2656_v18 = vld [vmem:[%s11256_s21 + $0x2c80] sm:$0xff]  ;;  %v2722_v0 = vld [vmem:[%s11256_s21 + $0x2e90] sm:$0xff] }
 0x2f3   : > { %10494 = vmatpush3.bf16.msra.mxu0 %v10493_v61  ;;  %v10509_v61 = vpack.c.bf16 %v2591_v55, %v2590_v11  ;;  %v2678_v11 = vld [vmem:[%s11256_s21 + $0x2d30] sm:$0xff] }
 0x2f4   : > { %10526 = vmatpush3.bf16.msra.mxu1 %v10525_v62  ;;  %10496 = vmatprep.subr.bf16.mxu0 %v10495_v26  ;;  %v10541_v62 = vpack.c.bf16 %v2623_v14, %v2622_v52  ;;  %v10543_v26 = vpack.c.bf16 %v2657_v59, %v2656_v18  ;;  %v2679_v52 = vld [vmem:[%s11256_s21 + $0x2d38] sm:$0xff]  ;;  %v2696_v14 = vld [vmem:[%s11256_s21 + $0x2dc0] sm:$0xff]  ;;  %v2697_v18 = vld [vmem:[%s11256_s21 + $0x2dc8] sm:$0xff] }
 0x2f5   : > { %10528 = vmatprep.subr.bf16.mxu1 %v10527_v5  ;;  %v2672_v5 = vld [vmem:[%s11256_s21 + $0x2d00] sm:$0xff]  ;;  %v10589_v41 = vpack.c.bf16 %v2679_v52, %v2678_v11  ;;  %v2687_v11 = vld [vmem:[%s11256_s21 + $0x2d78] sm:$0xff]  ;;  %v2721_v52 = vld [vmem:[%s11256_s21 + $0x2e88] sm:$0xff] }
 0x2f7   : > { %10498 = vmatpush3.bf16.msra.mxu0 %v10497_v36  ;;  %v2690_v36 = vld [vmem:[%s11256_s21 + $0x2d90] sm:$0xff] }
 0x2f8   : > { %10530 = vmatpush3.bf16.msra.mxu1 %v10529_v24  ;;  %10500 = vmatprep.subr.bf16.mxu0 %v10499_v10  ;;  %v2691_v24 = vld [vmem:[%s11256_s21 + $0x2d98] sm:$0xff]  ;;  %v338_v10 = vadd.s32 11392, %v11325_v4 }
 0x2f9   : > { %v8187_v32 = vpop.f32.mrb[28].mxu0  ;;  %10532 = vmatprep.subr.bf16.mxu1 %v10531_v13  ;;  %v10577_v13 = vpack.c.bf16 %v2673_v31, %v2672_v5  ;;  %v10579_v49 = vpack.c.bf16 %v2691_v24, %v2690_v36  ;;  %v2699_v5 = vld [vmem:[%s11256_s21 + $0x2dd8] sm:$0xff]  ;;  %v2682_v24 = vld [vmem:[%s11256_s21 + $0x2d50] sm:$0xff] }
 0x2fa   : > { %v8188_v17 = vpop.f32.mrb[29].mxu0  ;;  %v8222_v54 = vpop.f32.mrb[28].mxu1  ;;  %vm452_vm9 = vcmp.lt.s32.totalorder %v338_v10, %v11339_v21  ;;  %v2651_v36 = vld [vmem:[%s11256_s21 + $0x2c58] sm:$0xff]  ;;  %v10595_v10 = vpack.c.bf16 %v2699_v5, %v2698_v35 }
 0x2fb   : > { %v8189_v23 = vadd.f32 %v8188_v17, %v8187_v32  ;;  %10502 = vmatpush3.bf16.msra.mxu0 %v10501_v9  ;;  %v8223_v2 = vpop.f32.mrb[29].mxu1  ;;  %v2675_v9 = vld [vmem:[%s11256_s21 + $0x2d18] sm:$0xff]  ;;  %v921_v32 = vcombine.high %v13369_v34, %v13369_v34  ;;  %v2676_v17 = vld [vmem:[%s11256_s21 + $0x2d20] sm:$0xff] }
 0x2fc   : > { %v8224_v50 = vadd.f32 %v8223_v2, %v8222_v54  ;;  %10534 = vmatpush3.bf16.msra.mxu1 %v10533_v38  ;;  %10504 = vmatprep.subr.bf16.mxu0 %v10503_v51  ;;  %v2660_v38 = vld [vmem:[%s11256_s21 + $0x2ca0] sm:$0xff]  ;;  %v2661_v51 = vld [vmem:[%s11256_s21 + $0x2ca8] sm:$0xff]  ;;  %v10583_v54 = vpack.c.bf16 %v2693_v56, %v2692_v53  ;;  %v2695_v2 = vld [vmem:[%s11256_s21 + $0x2db8] sm:$0xff]  ;;  %v10585_v58 = vpack.c.bf16 %v2677_v45, %v2676_v17 }
 0x2fd   : > { %v5051_v33 = vadd.f32 %v8189_v23, %v13256_v29  ;;  %10536 = vmatprep.subr.bf16.mxu1 %v10535_v57  ;;  %v333_v29 = vadd.s32 10752, %v11325_v4  ;;  %v10549_v57 = vpack.c.bf16 %v2643_v16, %v2642_v46  ;;  %v10551_v60 = vpack.c.bf16 %v2661_v51, %v2660_v38  ;;  %v2694_v23 = vld [vmem:[%s11256_s21 + $0x2db0] sm:$0xff]  ;;  %v2701_v46 = vld [vmem:[%s11256_s21 + $0x2de8] sm:$0xff]  ;;  %v2684_v51 = vld [vmem:[%s11256_s21 + $0x2d60] sm:$0xff] }
 0x2fe   : > { %v10587_v55 = vpack.c.bf16 %v2695_v2, %v2694_v23  ;;  %v10565_v16 = vpack.c.bf16 %v2651_v36, %v2650_v39  ;;  %v2653_v38 = vld [vmem:[%s11256_s21 + $0x2c68] sm:$0xff]  ;;  %v2723_v35 = vld [vmem:[%s11256_s21 + $0x2e98] sm:$0xff] }
 0x2ff   : > { %v13352_v25 = vadd.f32 %v8224_v50, %v5051_v33  ;;  %10506 = vmatpush3.bf16.msra.mxu0 %v10505_v6  ;;  %vm447_vm7 = vcmp.lt.s32.totalorder %v333_v29, %v11339_v21  ;;  %v10553_v6 = vpack.c.bf16 %v2645_v63, %v2644_v37  ;;  %v2664_v33 = vld [vmem:[%s11256_s21 + $0x2cc0] sm:$0xff]  ;;  %v2685_v56 = vld [vmem:[%s11256_s21 + $0x2d68] sm:$0xff]  ;;  %v2702_v37 = vld [vmem:[%s11256_s21 + $0x2df0] sm:$0xff] }
 0x300   : > { %10538 = vmatpush3.bf16.msra.mxu1 %v10537_v19  ;;  %10508 = vmatprep.subr.bf16.mxu0 %v10507_v8  ;;  %v2646_v19 = vld [vmem:[%s11256_s21 + $0x2c30] sm:$0xff]  ;;  %v2647_v8 = vld [vmem:[%s11256_s21 + $0x2c38] sm:$0xff]  ;;  %v2680_v29 = vld [vmem:[%s11256_s21 + $0x2d40] sm:$0xff]  ;;  %v10601_v23 = vpack.c.bf16 %v2685_v56, %v2684_v51 }
 0x301   : > { %10540 = vmatprep.subr.bf16.mxu1 %v10539_v43  ;;  %v2665_v43 = vld [vmem:[%s11256_s21 + $0x2cc8] sm:$0xff]  ;;  %v10557_v59 = vpack.c.bf16 %v2647_v8, %v2646_v19  ;;  %v2703_v63 = vld [vmem:[%s11256_s21 + $0x2df8] sm:$0xff] }
 0x302   : > { %v10559_v20 = vpack.c.bf16 %v2665_v43, %v2664_v33  ;;  %v10603_v8 = vpack.c.bf16 %v2703_v63, %v2702_v37  ;;  %v2752_v33 = vld [vmem:[%s11256_s21 + $0x2f80] sm:$0xff]  ;;  %v2753_v43 = vld [vmem:[%s11256_s21 + $0x2f88] sm:$0xff]  ;;  %v2726_v63 = vld [vmem:[%s11256_s21 + $0x2eb0] sm:$0xff] }
 0x303   : > { %10510 = vmatpush3.bf16.msra.mxu0 %v10509_v61  ;;  %v2649_v61 = vld [vmem:[%s11256_s21 + $0x2c48] sm:$0xff] }
 0x304   : > { %10542 = vmatpush3.bf16.msra.mxu1 %v10541_v62  ;;  %10544 = vmatprep.subr.bf16.mxu0 %v10543_v26  ;;  %v10591_v62 = vpack.c.bf16 %v2697_v18, %v2696_v14  ;;  %v2681_v26 = vld [vmem:[%s11256_s21 + $0x2d48] sm:$0xff] }
 0x305   : > { %10576 = vmatprep.subr.bf16.mxu1 %v10575_v30  ;;  %v10561_v30 = vpack.c.bf16 %v2649_v61, %v2648_v22  ;;  %v10593_v31 = vpack.c.bf16 %v2681_v26, %v2680_v29  ;;  %v2704_v22 = vld [vmem:[%s11256_s21 + $0x2e00] sm:$0xff]  ;;  %v2705_v61 = vld [vmem:[%s11256_s21 + $0x2e08] sm:$0xff]  ;;  %v339_v29 = vadd.s32 11520, %v11325_v4  ;;  %v10639_v26 = vpack.c.bf16 %v2753_v43, %v2752_v33 }
 0x306   : > { %7144 = vmatmul.mubr.msk.f32.vlgmr.msra.gmra.mrb[42].mxu0 %vm447_vm7, %v13267_v12  ;;  %v10581_v12 = vpack.c.bf16 %v2675_v9, %v2674_v48  ;;  %v2652_v9 = vld [vmem:[%s11256_s21 + $0x2c60] sm:$0xff]  ;;  %v10609_v36 = vpack.c.bf16 %v2705_v61, %v2704_v22  ;;  %v2757_v51 = vld [vmem:[%s11256_s21 + $0x2fa8] sm:$0xff]  ;;  %v2730_v22 = vld [vmem:[%s11256_s21 + $0x2ed0] sm:$0xff] }
 0x307   : > { %10546 = vmatpush3.bf16.msra.mxu0 %v10545_v40  ;;  %7146 = vmatmul.mubr.msk.f32.vlgmr.msra.gmra.mrb[42].mxu1 %vm449_vm8, %v13273_v47  ;;  %v2663_v47 = vld [vmem:[%s11256_s21 + $0x2cb8] sm:$0xff]  ;;  %v10569_v45 = vpack.c.bf16 %v2653_v38, %v2652_v9  ;;  %vm453_vm12 = vcmp.lt.s32.totalorder %v339_v29, %v11339_v21  ;;  %v2756_v38 = vld [vmem:[%s11256_s21 + $0x2fa0] sm:$0xff]  ;;  %v2741_v37 = vld [vmem:[%s11256_s21 + $0x2f28] sm:$0xff] }
 0x308   : > { %10578 = vmatpush3.bf16.msra.mxu1 %v10577_v13  ;;  %10548 = vmatprep.subr.bf16.mxu0 %v10547_v44  ;;  %v10555_v50 = vpack.c.bf16 %v2663_v47, %v2662_v1  ;;  %v2683_v40 = vld [vmem:[%s11256_s21 + $0x2d58] sm:$0xff]  ;;  %v2669_v13 = vld [vmem:[%s11256_s21 + $0x2ce8] sm:$0xff]  ;;  %v2700_v44 = vld [vmem:[%s11256_s21 + $0x2de0] sm:$0xff] }
 0x309   : > { %10580 = vmatprep.subr.bf16.mxu1 %v10579_v49  ;;  %7147 = vmatprep.mubr.msk.f32.mxu0 %vm452_vm9, %v920_v28  ;;  %v10597_v48 = vpack.c.bf16 %v2683_v40, %v2682_v24  ;;  %v10567_v49 = vpack.c.bf16 %v2669_v13, %v2668_v42  ;;  %v10599_v53 = vpack.c.bf16 %v2701_v46, %v2700_v44  ;;  %v498_v1 = vld [vmem:[%s11277_s28 + $0xb8] sm:$0xff]  ;;  %v344_v24 = vadd.s32 12160, %v11325_v4 }
 0x30a   : > { %7149 = vmatprep.mubr.msk.f32.mxu1 %vm454_vm10, %v921_v32  ;;  %v2670_v32 = vld [vmem:[%s11256_s21 + $0x2cf0] sm:$0xff]  ;;  %v922_v14 = vcombine.high %v498_v1, %v498_v1  ;;  %v13459_v5 = vrot.slane %v498_v1, %v11333_v15  ;;  %v10611_v40 = vpack.c.bf16 %v2723_v35, %v2722_v0  ;;  %v2707_v13 = vld [vmem:[%s11256_s21 + $0x2e18] sm:$0xff] }
 0x30b   : > { %10550 = vmatpush3.bf16.msra.mxu0 %v10549_v57  ;;  %v2671_v57 = vld [vmem:[%s11256_s21 + $0x2cf8] sm:$0xff]  ;;  %v2706_v42 = vld [vmem:[%s11256_s21 + $0x2e10] sm:$0xff]  ;;  %vm458_vm14 = vcmp.lt.s32.totalorder %v344_v24, %v11339_v21  ;;  %v2732_v24 = vld [vmem:[%s11256_s21 + $0x2ee0] sm:$0xff] }
 0x30c   : > { %10582 = vmatpush3.bf16.msra.mxu1 %v10581_v12  ;;  %10552 = vmatprep.subr.bf16.mxu0 %v10551_v60  ;;  %v10571_v2 = vpack.c.bf16 %v2671_v57, %v2670_v32  ;;  %v13465_v39 = vrot.slane %v922_v14, %v11333_v15  ;;  %v2738_v44 = vld [vmem:[%s11256_s21 + $0x2f10] sm:$0xff]  ;;  %v937_v9 = vcombine.high %v13459_v5, %v13459_v5  ;;  %v2708_v32 = vld [vmem:[%s11256_s21 + $0x2e20] sm:$0xff]  ;;  %v2709_v57 = vld [vmem:[%s11256_s21 + $0x2e28] sm:$0xff] }
 0x30d   : > { %10584 = vmatprep.subr.bf16.mxu1 %v10583_v54  ;;  %v2712_v14 = vld [vmem:[%s11256_s21 + $0x2e40] sm:$0xff]  ;;  %v2731_v61 = vld [vmem:[%s11256_s21 + $0x2ed8] sm:$0xff]  ;;  %v2762_v29 = vld [vmem:[%s11256_s21 + $0x2fd0] sm:$0xff] }
 0x30e   : > { %v10627_v0 = vpack.c.bf16 %v2731_v61, %v2730_v22  ;;  %v2714_v35 = vld [vmem:[%s11256_s21 + $0x2e50] sm:$0xff]  ;;  %v2801_v22 = vld [vmem:[%s11256_s21 + $0x3108] sm:$0xff] }
 0x30f   : > { %10554 = vmatpush3.bf16.msra.mxu0 %v10553_v6  ;;  %v2654_v6 = vld [vmem:[%s11256_s21 + $0x2c70] sm:$0xff] }
 0x310   : > { %10586 = vmatpush3.bf16.msra.mxu1 %v10585_v58  ;;  %10556 = vmatprep.subr.bf16.mxu0 %v10555_v50  ;;  %v2655_v58 = vld [vmem:[%s11256_s21 + $0x2c78] sm:$0xff]  ;;  %v2686_v50 = vld [vmem:[%s11256_s21 + $0x2d70] sm:$0xff] }
 0x311   : > { %10588 = vmatprep.subr.bf16.mxu1 %v10587_v55  ;;  %v2720_v55 = vld [vmem:[%s11256_s21 + $0x2e80] sm:$0xff]  ;;  %v2786_v61 = vld [vmem:[%s11256_s21 + $0x3090] sm:$0xff] }
 0x313   : > { %10558 = vmatpush3.bf16.msra.mxu0 %v10557_v59  ;;  %v10573_v59 = vpack.c.bf16 %v2655_v58, %v2654_v6  ;;  %v2742_v6 = vld [vmem:[%s11256_s21 + $0x2f30] sm:$0xff] }
 0x314   : > { %10590 = vmatpush3.bf16.msra.mxu1 %v10589_v41  ;;  %10560 = vmatprep.subr.bf16.mxu0 %v10559_v20  ;;  %v10605_v41 = vpack.c.bf16 %v2687_v11, %v2686_v50  ;;  %v10607_v20 = vpack.c.bf16 %v2721_v52, %v2720_v55  ;;  %v2743_v50 = vld [vmem:[%s11256_s21 + $0x2f38] sm:$0xff]  ;;  %v2760_v11 = vld [vmem:[%s11256_s21 + $0x2fc0] sm:$0xff]  ;;  %v2761_v55 = vld [vmem:[%s11256_s21 + $0x2fc8] sm:$0xff] }
 0x315   : > { %10592 = vmatprep.subr.bf16.mxu1 %v10591_v62  ;;  %v2736_v62 = vld [vmem:[%s11256_s21 + $0x2f00] sm:$0xff]  ;;  %v10653_v33 = vpack.c.bf16 %v2743_v50, %v2742_v6  ;;  %v2751_v6 = vld [vmem:[%s11256_s21 + $0x2f78] sm:$0xff]  ;;  %v2785_v50 = vld [vmem:[%s11256_s21 + $0x3088] sm:$0xff] }
 0x317   : > { %10562 = vmatpush3.bf16.msra.mxu0 %v10561_v30  ;;  %v2754_v30 = vld [vmem:[%s11256_s21 + $0x2f90] sm:$0xff] }
 0x318   : > { %10594 = vmatpush3.bf16.msra.mxu1 %v10593_v31  ;;  %10564 = vmatprep.subr.bf16.mxu0 %v10563_v3  ;;  %v2755_v31 = vld [vmem:[%s11256_s21 + $0x2f98] sm:$0xff]  ;;  %v342_v3 = vadd.s32 11904, %v11325_v4 }
 0x319   : > { %v8257_v28 = vpop.f32.mrb[30].mxu0  ;;  %10596 = vmatprep.subr.bf16.mxu1 %v10595_v10  ;;  %v10641_v10 = vpack.c.bf16 %v2737_v27, %v2736_v62  ;;  %v10643_v46 = vpack.c.bf16 %v2755_v31, %v2754_v30  ;;  %v2763_v62 = vld [vmem:[%s11256_s21 + $0x2fd8] sm:$0xff]  ;;  %v2746_v31 = vld [vmem:[%s11256_s21 + $0x2f50] sm:$0xff] }
 0x31a   : > { %v8258_v12 = vpop.f32.mrb[31].mxu0  ;;  %v8292_v60 = vpop.f32.mrb[30].mxu1  ;;  %vm456_vm13 = vcmp.lt.s32.totalorder %v342_v3, %v11339_v21  ;;  %v2715_v30 = vld [vmem:[%s11256_s21 + $0x2e58] sm:$0xff]  ;;  %v10659_v3 = vpack.c.bf16 %v2763_v62, %v2762_v29 }
 0x31b   : > { %v8259_v17 = vadd.f32 %v8258_v12, %v8257_v28  ;;  %10566 = vmatpush3.bf16.msra.mxu0 %v10565_v16  ;;  %v8293_v54 = vpop.f32.mrb[31].mxu1  ;;  %v2739_v16 = vld [vmem:[%s11256_s21 + $0x2f18] sm:$0xff]  ;;  %v938_v28 = vcombine.high %v13465_v39, %v13465_v39  ;;  %v2740_v12 = vld [vmem:[%s11256_s21 + $0x2f20] sm:$0xff] }
 0x31c   : > { %v8294_v47 = vadd.f32 %v8293_v54, %v8292_v60  ;;  %10598 = vmatpush3.bf16.msra.mxu1 %v10597_v48  ;;  %10568 = vmatprep.subr.bf16.mxu0 %v10567_v49  ;;  %v2724_v48 = vld [vmem:[%s11256_s21 + $0x2ea0] sm:$0xff]  ;;  %v2725_v49 = vld [vmem:[%s11256_s21 + $0x2ea8] sm:$0xff]  ;;  %v10647_v60 = vpack.c.bf16 %v2757_v51, %v2756_v38  ;;  %v2759_v54 = vld [vmem:[%s11256_s21 + $0x2fb8] sm:$0xff]  ;;  %v10649_v1 = vpack.c.bf16 %v2741_v37, %v2740_v12 }
 0x31d   : > { %v5191_v19 = vadd.f32 %v8259_v17, %v13352_v25  ;;  %10600 = vmatprep.subr.bf16.mxu1 %v10599_v53  ;;  %v337_v25 = vadd.s32 11264, %v11325_v4  ;;  %v10613_v53 = vpack.c.bf16 %v2707_v13, %v2706_v42  ;;  %v10615_v56 = vpack.c.bf16 %v2725_v49, %v2724_v48  ;;  %v2758_v17 = vld [vmem:[%s11256_s21 + $0x2fb0] sm:$0xff]  ;;  %v2765_v42 = vld [vmem:[%s11256_s21 + $0x2fe8] sm:$0xff]  ;;  %v2748_v49 = vld [vmem:[%s11256_s21 + $0x2f60] sm:$0xff] }
 0x31e   : > { %v10651_v58 = vpack.c.bf16 %v2759_v54, %v2758_v17  ;;  %v10629_v13 = vpack.c.bf16 %v2715_v30, %v2714_v35  ;;  %v2717_v48 = vld [vmem:[%s11256_s21 + $0x2e68] sm:$0xff]  ;;  %v2787_v29 = vld [vmem:[%s11256_s21 + $0x3098] sm:$0xff] }
 0x31f   : > { %v13448_v18 = vadd.f32 %v8294_v47, %v5191_v19  ;;  %10570 = vmatpush3.bf16.msra.mxu0 %v10569_v45  ;;  %vm451_vm11 = vcmp.lt.s32.totalorder %v337_v25, %v11339_v21  ;;  %v10617_v45 = vpack.c.bf16 %v2709_v57, %v2708_v32  ;;  %v2728_v19 = vld [vmem:[%s11256_s21 + $0x2ec0] sm:$0xff]  ;;  %v2749_v51 = vld [vmem:[%s11256_s21 + $0x2f68] sm:$0xff]  ;;  %v2766_v32 = vld [vmem:[%s11256_s21 + $0x2ff0] sm:$0xff] }
 0x320   : > { %10602 = vmatpush3.bf16.msra.mxu1 %v10601_v23  ;;  %10572 = vmatprep.subr.bf16.mxu0 %v10571_v2  ;;  %v2710_v23 = vld [vmem:[%s11256_s21 + $0x2e30] sm:$0xff]  ;;  %v2711_v2 = vld [vmem:[%s11256_s21 + $0x2e38] sm:$0xff]  ;;  %v2744_v25 = vld [vmem:[%s11256_s21 + $0x2f40] sm:$0xff]  ;;  %v10665_v17 = vpack.c.bf16 %v2749_v51, %v2748_v49 }
 0x321   : > { %10604 = vmatprep.subr.bf16.mxu1 %v10603_v8  ;;  %v2729_v8 = vld [vmem:[%s11256_s21 + $0x2ec8] sm:$0xff]  ;;  %v10621_v52 = vpack.c.bf16 %v2711_v2, %v2710_v23  ;;  %v2767_v57 = vld [vmem:[%s11256_s21 + $0x2ff8] sm:$0xff] }
 0x322   : > { %v10623_v43 = vpack.c.bf16 %v2729_v8, %v2728_v19  ;;  %v10667_v2 = vpack.c.bf16 %v2767_v57, %v2766_v32  ;;  %v2816_v19 = vld [vmem:[%s11256_s21 + $0x3180] sm:$0xff]  ;;  %v2817_v8 = vld [vmem:[%s11256_s21 + $0x3188] sm:$0xff]  ;;  %v2790_v57 = vld [vmem:[%s11256_s21 + $0x30b0] sm:$0xff] }
 0x323   : > { %10574 = vmatpush3.bf16.msra.mxu0 %v10573_v59  ;;  %v2713_v59 = vld [vmem:[%s11256_s21 + $0x2e48] sm:$0xff] }
 0x324   : > { %10606 = vmatpush3.bf16.msra.mxu1 %v10605_v41  ;;  %10608 = vmatprep.subr.bf16.mxu0 %v10607_v20  ;;  %v10655_v41 = vpack.c.bf16 %v2761_v55, %v2760_v11  ;;  %v2745_v20 = vld [vmem:[%s11256_s21 + $0x2f48] sm:$0xff] }
 0x325   : > { %10640 = vmatprep.subr.bf16.mxu1 %v10639_v26  ;;  %v10625_v26 = vpack.c.bf16 %v2713_v59, %v2712_v14  ;;  %v10657_v27 = vpack.c.bf16 %v2745_v20, %v2744_v25  ;;  %v2768_v14 = vld [vmem:[%s11256_s21 + $0x3000] sm:$0xff]  ;;  %v2769_v59 = vld [vmem:[%s11256_s21 + $0x3008] sm:$0xff]  ;;  %v343_v25 = vadd.s32 12032, %v11325_v4  ;;  %v10703_v20 = vpack.c.bf16 %v2817_v8, %v2816_v19 }
 0x326   : > { %7148 = vmatmul.mubr.msk.f32.vlgmr.msra.gmra.mrb[44].mxu0 %vm451_vm11, %v13363_v7  ;;  %v10645_v7 = vpack.c.bf16 %v2739_v16, %v2738_v44  ;;  %v2716_v16 = vld [vmem:[%s11256_s21 + $0x2e60] sm:$0xff]  ;;  %v10673_v30 = vpack.c.bf16 %v2769_v59, %v2768_v14  ;;  %v2821_v49 = vld [vmem:[%s11256_s21 + $0x31a8] sm:$0xff]  ;;  %v2794_v14 = vld [vmem:[%s11256_s21 + $0x30d0] sm:$0xff] }
 0x327   : > { %10610 = vmatpush3.bf16.msra.mxu0 %v10609_v36  ;;  %7150 = vmatmul.mubr.msk.f32.vlgmr.msra.gmra.mrb[44].mxu1 %vm453_vm12, %v13369_v34  ;;  %v2727_v34 = vld [vmem:[%s11256_s21 + $0x2eb8] sm:$0xff]  ;;  %v10633_v37 = vpack.c.bf16 %v2717_v48, %v2716_v16  ;;  %vm457_vm0 = vcmp.lt.s32.totalorder %v343_v25, %v11339_v21  ;;  %v2820_v48 = vld [vmem:[%s11256_s21 + $0x31a0] sm:$0xff]  ;;  %v2805_v32 = vld [vmem:[%s11256_s21 + $0x3128] sm:$0xff] }
 0x328   : > { %10642 = vmatpush3.bf16.msra.mxu1 %v10641_v10  ;;  %10612 = vmatprep.subr.bf16.mxu0 %v10611_v40  ;;  %v10619_v47 = vpack.c.bf16 %v2727_v34, %v2726_v63  ;;  %v2747_v36 = vld [vmem:[%s11256_s21 + $0x2f58] sm:$0xff]  ;;  %v2733_v10 = vld [vmem:[%s11256_s21 + $0x2ee8] sm:$0xff]  ;;  %v2764_v40 = vld [vmem:[%s11256_s21 + $0x2fe0] sm:$0xff] }
 0x329   : > { %10644 = vmatprep.subr.bf16.mxu1 %v10643_v46  ;;  %7151 = vmatprep.mubr.msk.f32.mxu0 %vm456_vm13, %v937_v9  ;;  %v10661_v44 = vpack.c.bf16 %v2747_v36, %v2746_v31  ;;  %v10631_v46 = vpack.c.bf16 %v2733_v10, %v2732_v24  ;;  %v10663_v38 = vpack.c.bf16 %v2765_v42, %v2764_v40  ;;  %v499_v63 = vld [vmem:[%s11277_s28 + $0xc0] sm:$0xff]  ;;  %v348_v31 = vadd.s32 12672, %v11325_v4  ;;  %v2770_v24 = vld [vmem:[%s11256_s21 + $0x3010] sm:$0xff] }
 0x32a   : > { %7153 = vmatprep.mubr.msk.f32.mxu1 %vm458_vm14, %v938_v28  ;;  %v2734_v28 = vld [vmem:[%s11256_s21 + $0x2ef0] sm:$0xff]  ;;  %v939_v11 = vcombine.high %v499_v63, %v499_v63  ;;  %v13555_v62 = vrot.slane %v499_v63, %v11333_v15  ;;  %v10675_v36 = vpack.c.bf16 %v2787_v29, %v2786_v61  ;;  %v2771_v10 = vld [vmem:[%s11256_s21 + $0x3018] sm:$0xff] }
 0x32b   : > { %10614 = vmatpush3.bf16.msra.mxu0 %v10613_v53  ;;  %v2735_v53 = vld [vmem:[%s11256_s21 + $0x2ef8] sm:$0xff]  ;;  %v2802_v40 = vld [vmem:[%s11256_s21 + $0x3110] sm:$0xff]  ;;  %vm462_vm2 = vcmp.lt.s32.totalorder %v348_v31, %v11339_v21  ;;  %v2796_v31 = vld [vmem:[%s11256_s21 + $0x30e0] sm:$0xff] }
 0x32c   : > { %10646 = vmatpush3.bf16.msra.mxu1 %v10645_v7  ;;  %10616 = vmatprep.subr.bf16.mxu0 %v10615_v56  ;;  %v10635_v54 = vpack.c.bf16 %v2735_v53, %v2734_v28  ;;  %v13561_v35 = vrot.slane %v939_v11, %v11333_v15  ;;  %v954_v16 = vcombine.high %v13555_v62, %v13555_v62  ;;  %v2772_v28 = vld [vmem:[%s11256_s21 + $0x3020] sm:$0xff]  ;;  %v2773_v53 = vld [vmem:[%s11256_s21 + $0x3028] sm:$0xff]  ;;  %v2795_v59 = vld [vmem:[%s11256_s21 + $0x30d8] sm:$0xff] }
 0x32d   : > { %10648 = vmatprep.subr.bf16.mxu1 %v10647_v60  ;;  %v2776_v11 = vld [vmem:[%s11256_s21 + $0x3040] sm:$0xff]  ;;  %v2826_v25 = vld [vmem:[%s11256_s21 + $0x31d0] sm:$0xff]  ;;  %v10691_v61 = vpack.c.bf16 %v2795_v59, %v2794_v14  ;;  %v2865_v14 = vld [vmem:[%s11256_s21 + $0x3308] sm:$0xff] }
 0x32e   : > { %v2778_v29 = vld [vmem:[%s11256_s21 + $0x3050] sm:$0xff] }
 0x32f   : > { %10618 = vmatpush3.bf16.msra.mxu0 %v10617_v45  ;;  %v2718_v45 = vld [vmem:[%s11256_s21 + $0x2e70] sm:$0xff] }
 0x330   : > { %10650 = vmatpush3.bf16.msra.mxu1 %v10649_v1  ;;  %10620 = vmatprep.subr.bf16.mxu0 %v10619_v47  ;;  %v2719_v1 = vld [vmem:[%s11256_s21 + $0x2e78] sm:$0xff]  ;;  %v2750_v47 = vld [vmem:[%s11256_s21 + $0x2f70] sm:$0xff] }
 0x331   : > { %10652 = vmatprep.subr.bf16.mxu1 %v10651_v58  ;;  %v2784_v58 = vld [vmem:[%s11256_s21 + $0x3080] sm:$0xff]  ;;  %v2850_v59 = vld [vmem:[%s11256_s21 + $0x3290] sm:$0xff] }
 0x333   : > { %10622 = vmatpush3.bf16.msra.mxu0 %v10621_v52  ;;  %v10637_v52 = vpack.c.bf16 %v2719_v1, %v2718_v45  ;;  %v2806_v45 = vld [vmem:[%s11256_s21 + $0x3130] sm:$0xff] }
 0x334   : > { %10654 = vmatpush3.bf16.msra.mxu1 %v10653_v33  ;;  %10624 = vmatprep.subr.bf16.mxu0 %v10623_v43  ;;  %v10669_v33 = vpack.c.bf16 %v2751_v6, %v2750_v47  ;;  %v10671_v43 = vpack.c.bf16 %v2785_v50, %v2784_v58  ;;  %v2807_v47 = vld [vmem:[%s11256_s21 + $0x3138] sm:$0xff]  ;;  %v2824_v6 = vld [vmem:[%s11256_s21 + $0x31c0] sm:$0xff]  ;;  %v2825_v58 = vld [vmem:[%s11256_s21 + $0x31c8] sm:$0xff] }
 0x335   : > { %10656 = vmatprep.subr.bf16.mxu1 %v10655_v41  ;;  %v2800_v41 = vld [vmem:[%s11256_s21 + $0x3100] sm:$0xff]  ;;  %v10717_v19 = vpack.c.bf16 %v2807_v47, %v2806_v45  ;;  %v2815_v45 = vld [vmem:[%s11256_s21 + $0x3178] sm:$0xff]  ;;  %v2849_v47 = vld [vmem:[%s11256_s21 + $0x3288] sm:$0xff] }
 0x337   : > { %10626 = vmatpush3.bf16.msra.mxu0 %v10625_v26  ;;  %v2818_v26 = vld [vmem:[%s11256_s21 + $0x3190] sm:$0xff] }
 0x338   : > { %10658 = vmatpush3.bf16.msra.mxu1 %v10657_v27  ;;  %10628 = vmatprep.subr.bf16.mxu0 %v10627_v0  ;;  %v2819_v27 = vld [vmem:[%s11256_s21 + $0x3198] sm:$0xff]  ;;  %v346_v0 = vadd.s32 12416, %v11325_v4 }
 0x339   : > { %v8327_v9 = vpop.f32.mrb[32].mxu0  ;;  %10660 = vmatprep.subr.bf16.mxu1 %v10659_v3  ;;  %v10705_v3 = vpack.c.bf16 %v2801_v22, %v2800_v41  ;;  %v10707_v42 = vpack.c.bf16 %v2819_v27, %v2818_v26  ;;  %v2827_v41 = vld [vmem:[%s11256_s21 + $0x31d8] sm:$0xff]  ;;  %v2810_v27 = vld [vmem:[%s11256_s21 + $0x3150] sm:$0xff] }
 0x33a   : > { %v8328_v7 = vpop.f32.mrb[33].mxu0  ;;  %v8362_v56 = vpop.f32.mrb[32].mxu1  ;;  %vm460_vm1 = vcmp.lt.s32.totalorder %v346_v0, %v11339_v21  ;;  %v2779_v26 = vld [vmem:[%s11256_s21 + $0x3058] sm:$0xff]  ;;  %v10723_v0 = vpack.c.bf16 %v2827_v41, %v2826_v25 }
 0x33b   : > { %v8329_v12 = vadd.f32 %v8328_v7, %v8327_v9  ;;  %10630 = vmatpush3.bf16.msra.mxu0 %v10629_v13  ;;  %v8363_v60 = vpop.f32.mrb[33].mxu1  ;;  %v2803_v13 = vld [vmem:[%s11256_s21 + $0x3118] sm:$0xff]  ;;  %v955_v9 = vcombine.high %v13561_v35, %v13561_v35  ;;  %v2804_v7 = vld [vmem:[%s11256_s21 + $0x3120] sm:$0xff] }
 0x33c   : > { %v8364_v34 = vadd.f32 %v8363_v60, %v8362_v56  ;;  %10662 = vmatpush3.bf16.msra.mxu1 %v10661_v44  ;;  %10632 = vmatprep.subr.bf16.mxu0 %v10631_v46  ;;  %v2788_v44 = vld [vmem:[%s11256_s21 + $0x30a0] sm:$0xff]  ;;  %v2789_v46 = vld [vmem:[%s11256_s21 + $0x30a8] sm:$0xff]  ;;  %v10711_v56 = vpack.c.bf16 %v2821_v49, %v2820_v48  ;;  %v2823_v60 = vld [vmem:[%s11256_s21 + $0x31b8] sm:$0xff]  ;;  %v10713_v63 = vpack.c.bf16 %v2805_v32, %v2804_v7 }
 0x33d   : > { %v5331_v23 = vadd.f32 %v8329_v12, %v13448_v18  ;;  %10664 = vmatprep.subr.bf16.mxu1 %v10663_v38  ;;  %v341_v18 = vadd.s32 11776, %v11325_v4  ;;  %v10677_v38 = vpack.c.bf16 %v2771_v10, %v2770_v24  ;;  %v10679_v51 = vpack.c.bf16 %v2789_v46, %v2788_v44  ;;  %v2822_v12 = vld [vmem:[%s11256_s21 + $0x31b0] sm:$0xff]  ;;  %v2829_v24 = vld [vmem:[%s11256_s21 + $0x31e8] sm:$0xff]  ;;  %v2812_v46 = vld [vmem:[%s11256_s21 + $0x3160] sm:$0xff] }
 0x33e   : > { %v10715_v1 = vpack.c.bf16 %v2823_v60, %v2822_v12  ;;  %v10693_v10 = vpack.c.bf16 %v2779_v26, %v2778_v29  ;;  %v2781_v44 = vld [vmem:[%s11256_s21 + $0x3068] sm:$0xff]  ;;  %v2851_v25 = vld [vmem:[%s11256_s21 + $0x3298] sm:$0xff] }
 0x33f   : > { %v13544_v55 = vadd.f32 %v8364_v34, %v5331_v23  ;;  %10634 = vmatpush3.bf16.msra.mxu0 %v10633_v37  ;;  %vm455_vm15 = vcmp.lt.s32.totalorder %v341_v18, %v11339_v21  ;;  %v10681_v37 = vpack.c.bf16 %v2773_v53, %v2772_v28  ;;  %v2792_v23 = vld [vmem:[%s11256_s21 + $0x30c0] sm:$0xff]  ;;  %v2813_v49 = vld [vmem:[%s11256_s21 + $0x3168] sm:$0xff]  ;;  %v2830_v28 = vld [vmem:[%s11256_s21 + $0x31f0] sm:$0xff] }
 0x340   : > { %10666 = vmatpush3.bf16.msra.mxu1 %v10665_v17  ;;  %10636 = vmatprep.subr.bf16.mxu0 %v10635_v54  ;;  %v2774_v17 = vld [vmem:[%s11256_s21 + $0x3030] sm:$0xff]  ;;  %v2775_v54 = vld [vmem:[%s11256_s21 + $0x3038] sm:$0xff]  ;;  %v2808_v18 = vld [vmem:[%s11256_s21 + $0x3140] sm:$0xff]  ;;  %v10729_v12 = vpack.c.bf16 %v2813_v49, %v2812_v46 }
 0x341   : > { %10668 = vmatprep.subr.bf16.mxu1 %v10667_v2  ;;  %v2793_v2 = vld [vmem:[%s11256_s21 + $0x30c8] sm:$0xff]  ;;  %v10685_v50 = vpack.c.bf16 %v2775_v54, %v2774_v17  ;;  %v2831_v53 = vld [vmem:[%s11256_s21 + $0x31f8] sm:$0xff] }
 0x342   : > { %v10687_v8 = vpack.c.bf16 %v2793_v2, %v2792_v23  ;;  %v10731_v54 = vpack.c.bf16 %v2831_v53, %v2830_v28  ;;  %v2880_v23 = vld [vmem:[%s11256_s21 + $0x3380] sm:$0xff]  ;;  %v2881_v2 = vld [vmem:[%s11256_s21 + $0x3388] sm:$0xff]  ;;  %v2854_v53 = vld [vmem:[%s11256_s21 + $0x32b0] sm:$0xff] }
 0x343   : > { %10638 = vmatpush3.bf16.msra.mxu0 %v10637_v52  ;;  %v2777_v52 = vld [vmem:[%s11256_s21 + $0x3048] sm:$0xff] }
 0x344   : > { %10670 = vmatpush3.bf16.msra.mxu1 %v10669_v33  ;;  %10672 = vmatprep.subr.bf16.mxu0 %v10671_v43  ;;  %v10719_v33 = vpack.c.bf16 %v2825_v58, %v2824_v6  ;;  %v2809_v43 = vld [vmem:[%s11256_s21 + $0x3148] sm:$0xff] }
 0x345   : > { %10704 = vmatprep.subr.bf16.mxu1 %v10703_v20  ;;  %v10689_v20 = vpack.c.bf16 %v2777_v52, %v2776_v11  ;;  %v10721_v22 = vpack.c.bf16 %v2809_v43, %v2808_v18  ;;  %v2832_v11 = vld [vmem:[%s11256_s21 + $0x3200] sm:$0xff]  ;;  %v2833_v52 = vld [vmem:[%s11256_s21 + $0x3208] sm:$0xff]  ;;  %v347_v18 = vadd.s32 12544, %v11325_v4  ;;  %v10767_v43 = vpack.c.bf16 %v2881_v2, %v2880_v23 }
 0x346   : > { %7152 = vmatmul.mubr.msk.f32.vlgmr.msra.gmra.mrb[46].mxu0 %vm455_vm15, %v13459_v5  ;;  %v10709_v5 = vpack.c.bf16 %v2803_v13, %v2802_v40  ;;  %v2780_v13 = vld [vmem:[%s11256_s21 + $0x3060] sm:$0xff]  ;;  %v10737_v26 = vpack.c.bf16 %v2833_v52, %v2832_v11  ;;  %v2885_v46 = vld [vmem:[%s11256_s21 + $0x33a8] sm:$0xff]  ;;  %v2858_v11 = vld [vmem:[%s11256_s21 + $0x32d0] sm:$0xff] }
 0x347   : > { %10674 = vmatpush3.bf16.msra.mxu0 %v10673_v30  ;;  %7154 = vmatmul.mubr.msk.f32.vlgmr.msra.gmra.mrb[46].mxu1 %vm457_vm0, %v13465_v39  ;;  %v2791_v39 = vld [vmem:[%s11256_s21 + $0x30b8] sm:$0xff]  ;;  %v10697_v32 = vpack.c.bf16 %v2781_v44, %v2780_v13  ;;  %vm461_vm4 = vcmp.lt.s32.totalorder %v347_v18, %v11339_v21  ;;  %v2884_v44 = vld [vmem:[%s11256_s21 + $0x33a0] sm:$0xff]  ;;  %v2869_v28 = vld [vmem:[%s11256_s21 + $0x3328] sm:$0xff] }
 0x348   : > { %10706 = vmatpush3.bf16.msra.mxu1 %v10705_v3  ;;  %10676 = vmatprep.subr.bf16.mxu0 %v10675_v36  ;;  %v10683_v34 = vpack.c.bf16 %v2791_v39, %v2790_v57  ;;  %v2811_v30 = vld [vmem:[%s11256_s21 + $0x3158] sm:$0xff]  ;;  %v2797_v3 = vld [vmem:[%s11256_s21 + $0x30e8] sm:$0xff]  ;;  %v2828_v36 = vld [vmem:[%s11256_s21 + $0x31e0] sm:$0xff] }
 0x349   : > { %10708 = vmatprep.subr.bf16.mxu1 %v10707_v42  ;;  %7155 = vmatprep.mubr.msk.f32.mxu0 %vm460_vm1, %v954_v16  ;;  %v10725_v40 = vpack.c.bf16 %v2811_v30, %v2810_v27  ;;  %v10695_v42 = vpack.c.bf16 %v2797_v3, %v2796_v31  ;;  %v10727_v48 = vpack.c.bf16 %v2829_v24, %v2828_v36  ;;  %v500_v57 = vld [vmem:[%s11277_s28 + $0xc8] sm:$0xff]  ;;  %v352_v27 = vadd.s32 13184, %v11325_v4  ;;  %v2834_v31 = vld [vmem:[%s11256_s21 + $0x3210] sm:$0xff]  ;;  %v2835_v3 = vld [vmem:[%s11256_s21 + $0x3218] sm:$0xff] }
 0x34a   : > { %7157 = vmatprep.mubr.msk.f32.mxu1 %vm462_vm2, %v955_v9  ;;  %v2798_v9 = vld [vmem:[%s11256_s21 + $0x30f0] sm:$0xff]  ;;  %v956_v6 = vcombine.high %v500_v57, %v500_v57  ;;  %v13651_v41 = vrot.slane %v500_v57, %v11333_v15  ;;  %v10739_v30 = vpack.c.bf16 %v2851_v25, %v2850_v59  ;;  %v2859_v52 = vld [vmem:[%s11256_s21 + $0x32d8] sm:$0xff]  ;;  %vm6945_vm1 = vcmask 812032  }
 0x34b   : > { %10678 = vmatpush3.bf16.msra.mxu0 %v10677_v38  ;;  %v2799_v38 = vld [vmem:[%s11256_s21 + $0x30f8] sm:$0xff]  ;;  %v2866_v36 = vld [vmem:[%s11256_s21 + $0x3310] sm:$0xff]  ;;  %vm466_vm6 = vcmp.lt.s32.totalorder %v352_v27, %v11339_v21  ;;  %v10755_v59 = vpack.c.bf16 %v2859_v52, %v2858_v11  ;;  %v2860_v27 = vld [vmem:[%s11256_s21 + $0x32e0] sm:$0xff] }
 0x34c   : > { %10710 = vmatpush3.bf16.msra.mxu1 %v10709_v5  ;;  %10680 = vmatprep.subr.bf16.mxu0 %v10679_v51  ;;  %v10699_v60 = vpack.c.bf16 %v2799_v38, %v2798_v9  ;;  %v13657_v29 = vrot.slane %v956_v6, %v11333_v15  ;;  %v971_v13 = vcombine.high %v13651_v41, %v13651_v41  ;;  %v2836_v9 = vld [vmem:[%s11256_s21 + $0x3220] sm:$0xff]  ;;  %v2837_v38 = vld [vmem:[%s11256_s21 + $0x3228] sm:$0xff]  ;;  %v2890_v18 = vld [vmem:[%s11256_s21 + $0x33d0] sm:$0xff] }
 0x34d   : > { %10712 = vmatprep.subr.bf16.mxu1 %v10711_v56  ;;  %v2840_v6 = vld [vmem:[%s11256_s21 + $0x3240] sm:$0xff]  ;;  %v2842_v25 = vld [vmem:[%s11256_s21 + $0x3250] sm:$0xff]  ;;  %v2929_v11 = vld [vmem:[%s11256_s21 + $0x3508] sm:$0xff] }
 0x34e   : > { %v2914_v52 = vld [vmem:[%s11256_s21 + $0x3490] sm:$0xff] }
 0x34f   : > { %10682 = vmatpush3.bf16.msra.mxu0 %v10681_v37  ;;  %v2782_v37 = vld [vmem:[%s11256_s21 + $0x3070] sm:$0xff] }
 0x350   : > { %10714 = vmatpush3.bf16.msra.mxu1 %v10713_v63  ;;  %10684 = vmatprep.subr.bf16.mxu0 %v10683_v34  ;;  %v2783_v63 = vld [vmem:[%s11256_s21 + $0x3078] sm:$0xff]  ;;  %v2814_v34 = vld [vmem:[%s11256_s21 + $0x3170] sm:$0xff] }
 0x351   : > { %10716 = vmatprep.subr.bf16.mxu1 %v10715_v1  ;;  %v2848_v1 = vld [vmem:[%s11256_s21 + $0x3280] sm:$0xff] }
 0x353   : > { %10686 = vmatpush3.bf16.msra.mxu0 %v10685_v50  ;;  %v10701_v50 = vpack.c.bf16 %v2783_v63, %v2782_v37  ;;  %v2870_v37 = vld [vmem:[%s11256_s21 + $0x3330] sm:$0xff] }
 0x354   : > { %10718 = vmatpush3.bf16.msra.mxu1 %v10717_v19  ;;  %10688 = vmatprep.subr.bf16.mxu0 %v10687_v8  ;;  %v10733_v19 = vpack.c.bf16 %v2815_v45, %v2814_v34  ;;  %v10735_v8 = vpack.c.bf16 %v2849_v47, %v2848_v1  ;;  %v2871_v34 = vld [vmem:[%s11256_s21 + $0x3338] sm:$0xff]  ;;  %v2888_v45 = vld [vmem:[%s11256_s21 + $0x33c0] sm:$0xff]  ;;  %v2889_v1 = vld [vmem:[%s11256_s21 + $0x33c8] sm:$0xff] }
 0x355   : > { %10720 = vmatprep.subr.bf16.mxu1 %v10719_v33  ;;  %v2864_v33 = vld [vmem:[%s11256_s21 + $0x3300] sm:$0xff]  ;;  %v10781_v23 = vpack.c.bf16 %v2871_v34, %v2870_v37  ;;  %v2879_v37 = vld [vmem:[%s11256_s21 + $0x3378] sm:$0xff]  ;;  %v2913_v34 = vld [vmem:[%s11256_s21 + $0x3488] sm:$0xff] }
 0x357   : > { %10690 = vmatpush3.bf16.msra.mxu0 %v10689_v20  ;;  %v2882_v20 = vld [vmem:[%s11256_s21 + $0x3390] sm:$0xff] }
 0x358   : > { %10722 = vmatpush3.bf16.msra.mxu1 %v10721_v22  ;;  %10692 = vmatprep.subr.bf16.mxu0 %v10691_v61  ;;  %v2883_v22 = vld [vmem:[%s11256_s21 + $0x3398] sm:$0xff]  ;;  %v350_v61 = vadd.s32 12928, %v11325_v4 }
 0x359   : > { %v8397_v16 = vpop.f32.mrb[34].mxu0  ;;  %10724 = vmatprep.subr.bf16.mxu1 %v10723_v0  ;;  %v10769_v0 = vpack.c.bf16 %v2865_v14, %v2864_v33  ;;  %v10771_v24 = vpack.c.bf16 %v2883_v22, %v2882_v20  ;;  %v2891_v33 = vld [vmem:[%s11256_s21 + $0x33d8] sm:$0xff]  ;;  %v2874_v22 = vld [vmem:[%s11256_s21 + $0x3350] sm:$0xff] }
 0x35a   : > { %v8398_v5 = vpop.f32.mrb[35].mxu0  ;;  %v8432_v51 = vpop.f32.mrb[34].mxu1  ;;  %vm464_vm5 = vcmp.lt.s32.totalorder %v350_v61, %v11339_v21  ;;  %v2843_v20 = vld [vmem:[%s11256_s21 + $0x3258] sm:$0xff]  ;;  %v10787_v61 = vpack.c.bf16 %v2891_v33, %v2890_v18 }
 0x35b   : > { %v8399_v7 = vadd.f32 %v8398_v5, %v8397_v16  ;;  %10694 = vmatpush3.bf16.msra.mxu0 %v10693_v10  ;;  %v8433_v56 = vpop.f32.mrb[35].mxu1  ;;  %v2867_v10 = vld [vmem:[%s11256_s21 + $0x3318] sm:$0xff]  ;;  %v972_v16 = vcombine.high %v13657_v29, %v13657_v29  ;;  %v2868_v5 = vld [vmem:[%s11256_s21 + $0x3320] sm:$0xff] }
 0x35c   : > { %v8434_v39 = vadd.f32 %v8433_v56, %v8432_v51  ;;  %10726 = vmatpush3.bf16.msra.mxu1 %v10725_v40  ;;  %10696 = vmatprep.subr.bf16.mxu0 %v10695_v42  ;;  %v2852_v40 = vld [vmem:[%s11256_s21 + $0x32a0] sm:$0xff]  ;;  %v2853_v42 = vld [vmem:[%s11256_s21 + $0x32a8] sm:$0xff]  ;;  %v10775_v51 = vpack.c.bf16 %v2885_v46, %v2884_v44  ;;  %v2887_v56 = vld [vmem:[%s11256_s21 + $0x33b8] sm:$0xff]  ;;  %v10777_v57 = vpack.c.bf16 %v2869_v28, %v2868_v5 }
 0x35d   : > { %v5471_v17 = vadd.f32 %v8399_v7, %v13544_v55  ;;  %10728 = vmatprep.subr.bf16.mxu1 %v10727_v48  ;;  %v345_v55 = vadd.s32 12288, %v11325_v4  ;;  %v10741_v48 = vpack.c.bf16 %v2835_v3, %v2834_v31  ;;  %v10743_v49 = vpack.c.bf16 %v2853_v42, %v2852_v40  ;;  %v2886_v7 = vld [vmem:[%s11256_s21 + $0x33b0] sm:$0xff]  ;;  %v2893_v31 = vld [vmem:[%s11256_s21 + $0x33e8] sm:$0xff]  ;;  %v2876_v42 = vld [vmem:[%s11256_s21 + $0x3360] sm:$0xff] }
 0x35e   : > { %v10779_v63 = vpack.c.bf16 %v2887_v56, %v2886_v7  ;;  %v10757_v3 = vpack.c.bf16 %v2843_v20, %v2842_v25  ;;  %v2845_v40 = vld [vmem:[%s11256_s21 + $0x3268] sm:$0xff]  ;;  %v2915_v18 = vld [vmem:[%s11256_s21 + $0x3498] sm:$0xff] }
 0x35f   : > { %v13640_v58 = vadd.f32 %v8434_v39, %v5471_v17  ;;  %10698 = vmatpush3.bf16.msra.mxu0 %v10697_v32  ;;  %vm459_vm3 = vcmp.lt.s32.totalorder %v345_v55, %v11339_v21  ;;  %v10745_v32 = vpack.c.bf16 %v2837_v38, %v2836_v9  ;;  %v2856_v17 = vld [vmem:[%s11256_s21 + $0x32c0] sm:$0xff]  ;;  %v2877_v46 = vld [vmem:[%s11256_s21 + $0x3368] sm:$0xff]  ;;  %v2894_v9 = vld [vmem:[%s11256_s21 + $0x33f0] sm:$0xff] }
 0x360   : > { %10730 = vmatpush3.bf16.msra.mxu1 %v10729_v12  ;;  %10700 = vmatprep.subr.bf16.mxu0 %v10699_v60  ;;  %v2838_v12 = vld [vmem:[%s11256_s21 + $0x3230] sm:$0xff]  ;;  %v2839_v60 = vld [vmem:[%s11256_s21 + $0x3238] sm:$0xff]  ;;  %v2872_v55 = vld [vmem:[%s11256_s21 + $0x3340] sm:$0xff]  ;;  %v10793_v7 = vpack.c.bf16 %v2877_v46, %v2876_v42 }
 0x361   : > { %10732 = vmatprep.subr.bf16.mxu1 %v10731_v54  ;;  %v2857_v54 = vld [vmem:[%s11256_s21 + $0x32c8] sm:$0xff]  ;;  %v10749_v47 = vpack.c.bf16 %v2839_v60, %v2838_v12  ;;  %v2895_v38 = vld [vmem:[%s11256_s21 + $0x33f8] sm:$0xff] }
 0x362   : > { %v10751_v2 = vpack.c.bf16 %v2857_v54, %v2856_v17  ;;  %v10795_v60 = vpack.c.bf16 %v2895_v38, %v2894_v9  ;;  %v2944_v17 = vld [vmem:[%s11256_s21 + $0x3580] sm:$0xff]  ;;  %v2945_v54 = vld [vmem:[%s11256_s21 + $0x3588] sm:$0xff]  ;;  %v2918_v38 = vld [vmem:[%s11256_s21 + $0x34b0] sm:$0xff] }
 0x363   : > { %10702 = vmatpush3.bf16.msra.mxu0 %v10701_v50  ;;  %v2841_v50 = vld [vmem:[%s11256_s21 + $0x3248] sm:$0xff] }
 0x364   : > { %10734 = vmatpush3.bf16.msra.mxu1 %v10733_v19  ;;  %10736 = vmatprep.subr.bf16.mxu0 %v10735_v8  ;;  %v10783_v19 = vpack.c.bf16 %v2889_v1, %v2888_v45  ;;  %v2873_v8 = vld [vmem:[%s11256_s21 + $0x3348] sm:$0xff] }
 0x365   : > { %10768 = vmatprep.subr.bf16.mxu1 %v10767_v43  ;;  %v10753_v43 = vpack.c.bf16 %v2841_v50, %v2840_v6  ;;  %v10785_v14 = vpack.c.bf16 %v2873_v8, %v2872_v55  ;;  %v2896_v6 = vld [vmem:[%s11256_s21 + $0x3400] sm:$0xff]  ;;  %v2897_v50 = vld [vmem:[%s11256_s21 + $0x3408] sm:$0xff]  ;;  %v351_v55 = vadd.s32 13056, %v11325_v4  ;;  %v10831_v8 = vpack.c.bf16 %v2945_v54, %v2944_v17 }
 0x366   : > { %7156 = vmatmul.mubr.msk.f32.vlgmr.msra.gmra.mrb[48].mxu0 %vm459_vm3, %v13555_v62  ;;  %v10773_v62 = vpack.c.bf16 %v2867_v10, %v2866_v36  ;;  %v2844_v10 = vld [vmem:[%s11256_s21 + $0x3260] sm:$0xff]  ;;  %v10801_v20 = vpack.c.bf16 %v2897_v50, %v2896_v6  ;;  %v2949_v42 = vld [vmem:[%s11256_s21 + $0x35a8] sm:$0xff]  ;;  %v2922_v6 = vld [vmem:[%s11256_s21 + $0x34d0] sm:$0xff] }
 0x367   : > { %10738 = vmatpush3.bf16.msra.mxu0 %v10737_v26  ;;  %7158 = vmatmul.mubr.msk.f32.vlgmr.msra.gmra.mrb[48].mxu1 %vm461_vm4, %v13561_v35  ;;  %v2855_v35 = vld [vmem:[%s11256_s21 + $0x32b8] sm:$0xff]  ;;  %v10761_v28 = vpack.c.bf16 %v2845_v40, %v2844_v10  ;;  %vm465_vm8 = vcmp.lt.s32.totalorder %v351_v55, %v11339_v21  ;;  %v2948_v40 = vld [vmem:[%s11256_s21 + $0x35a0] sm:$0xff]  ;;  %v2933_v9 = vld [vmem:[%s11256_s21 + $0x3528] sm:$0xff] }
 0x368   : > { %10770 = vmatpush3.bf16.msra.mxu1 %v10769_v0  ;;  %10740 = vmatprep.subr.bf16.mxu0 %v10739_v30  ;;  %v10747_v39 = vpack.c.bf16 %v2855_v35, %v2854_v53  ;;  %v2875_v26 = vld [vmem:[%s11256_s21 + $0x3358] sm:$0xff]  ;;  %v2861_v0 = vld [vmem:[%s11256_s21 + $0x32e8] sm:$0xff]  ;;  %v2892_v30 = vld [vmem:[%s11256_s21 + $0x33e0] sm:$0xff] }
 0x369   : > { %10772 = vmatprep.subr.bf16.mxu1 %v10771_v24  ;;  %7159 = vmatprep.mubr.msk.f32.mxu0 %vm464_vm5, %v971_v13  ;;  %v10789_v36 = vpack.c.bf16 %v2875_v26, %v2874_v22  ;;  %v10759_v24 = vpack.c.bf16 %v2861_v0, %v2860_v27  ;;  %v10791_v44 = vpack.c.bf16 %v2893_v31, %v2892_v30  ;;  %v501_v53 = vld [vmem:[%s11277_s28 + $0xd0] sm:$0xff]  ;;  %v356_v22 = vadd.s32 13696, %v11325_v4  ;;  %v2899_v0 = vld [vmem:[%s11256_s21 + $0x3418] sm:$0xff] }
 0x36a   : > { %7161 = vmatprep.mubr.msk.f32.mxu1 %vm466_vm6, %v972_v16  ;;  %v2862_v16 = vld [vmem:[%s11256_s21 + $0x32f0] sm:$0xff]  ;;  %v973_v45 = vcombine.high %v501_v53, %v501_v53  ;;  %v13747_v33 = vrot.slane %v501_v53, %v11333_v15  ;;  %v10803_v26 = vpack.c.bf16 %v2915_v18, %v2914_v52  ;;  %v2923_v50 = vld [vmem:[%s11256_s21 + $0x34d8] sm:$0xff] }
 0x36b   : > { %10742 = vmatpush3.bf16.msra.mxu0 %v10741_v48  ;;  %v2863_v48 = vld [vmem:[%s11256_s21 + $0x32f8] sm:$0xff]  ;;  %v2898_v27 = vld [vmem:[%s11256_s21 + $0x3410] sm:$0xff]  ;;  %vm470_vm10 = vcmp.lt.s32.totalorder %v356_v22, %v11339_v21  ;;  %v10819_v52 = vpack.c.bf16 %v2923_v50, %v2922_v6  ;;  %v2924_v22 = vld [vmem:[%s11256_s21 + $0x34e0] sm:$0xff] }
 0x36c   : > { %10774 = vmatpush3.bf16.msra.mxu1 %v10773_v62  ;;  %10744 = vmatprep.subr.bf16.mxu0 %v10743_v49  ;;  %v10763_v56 = vpack.c.bf16 %v2863_v48, %v2862_v16  ;;  %v13753_v25 = vrot.slane %v973_v45, %v11333_v15  ;;  %v2930_v30 = vld [vmem:[%s11256_s21 + $0x3510] sm:$0xff]  ;;  %v988_v10 = vcombine.high %v13747_v33, %v13747_v33  ;;  %v2900_v16 = vld [vmem:[%s11256_s21 + $0x3420] sm:$0xff]  ;;  %v2901_v48 = vld [vmem:[%s11256_s21 + $0x3428] sm:$0xff] }
 0x36d   : > { %10776 = vmatprep.subr.bf16.mxu1 %v10775_v51  ;;  %v2904_v45 = vld [vmem:[%s11256_s21 + $0x3440] sm:$0xff]  ;;  %v2954_v55 = vld [vmem:[%s11256_s21 + $0x35d0] sm:$0xff]  ;;  %v2993_v6 = vld [vmem:[%s11256_s21 + $0x3708] sm:$0xff] }
 0x36e   : > { %v2906_v18 = vld [vmem:[%s11256_s21 + $0x3450] sm:$0xff] }
 0x36f   : > { %10746 = vmatpush3.bf16.msra.mxu0 %v10745_v32  ;;  %v2846_v32 = vld [vmem:[%s11256_s21 + $0x3270] sm:$0xff] }
 0x370   : > { %10778 = vmatpush3.bf16.msra.mxu1 %v10777_v57  ;;  %10748 = vmatprep.subr.bf16.mxu0 %v10747_v39  ;;  %v2847_v57 = vld [vmem:[%s11256_s21 + $0x3278] sm:$0xff]  ;;  %v2878_v39 = vld [vmem:[%s11256_s21 + $0x3370] sm:$0xff] }
 0x371   : > { %10780 = vmatprep.subr.bf16.mxu1 %v10779_v63  ;;  %v2912_v63 = vld [vmem:[%s11256_s21 + $0x3480] sm:$0xff]  ;;  %v2978_v50 = vld [vmem:[%s11256_s21 + $0x3690] sm:$0xff] }
 0x373   : > { %10750 = vmatpush3.bf16.msra.mxu0 %v10749_v47  ;;  %v10765_v47 = vpack.c.bf16 %v2847_v57, %v2846_v32  ;;  %v2934_v32 = vld [vmem:[%s11256_s21 + $0x3530] sm:$0xff] }
 0x374   : > { %10782 = vmatpush3.bf16.msra.mxu1 %v10781_v23  ;;  %10752 = vmatprep.subr.bf16.mxu0 %v10751_v2  ;;  %v10797_v23 = vpack.c.bf16 %v2879_v37, %v2878_v39  ;;  %v10799_v2 = vpack.c.bf16 %v2913_v34, %v2912_v63  ;;  %v2935_v39 = vld [vmem:[%s11256_s21 + $0x3538] sm:$0xff]  ;;  %v2952_v37 = vld [vmem:[%s11256_s21 + $0x35c0] sm:$0xff]  ;;  %v2953_v63 = vld [vmem:[%s11256_s21 + $0x35c8] sm:$0xff] }
 0x375   : > { %10784 = vmatprep.subr.bf16.mxu1 %v10783_v19  ;;  %v2928_v19 = vld [vmem:[%s11256_s21 + $0x3500] sm:$0xff]  ;;  %v10845_v17 = vpack.c.bf16 %v2935_v39, %v2934_v32  ;;  %v2943_v32 = vld [vmem:[%s11256_s21 + $0x3578] sm:$0xff]  ;;  %v2977_v39 = vld [vmem:[%s11256_s21 + $0x3688] sm:$0xff] }
 0x377   : > { %10754 = vmatpush3.bf16.msra.mxu0 %v10753_v43  ;;  %v2946_v43 = vld [vmem:[%s11256_s21 + $0x3590] sm:$0xff] }
 0x378   : > { %10786 = vmatpush3.bf16.msra.mxu1 %v10785_v14  ;;  %10756 = vmatprep.subr.bf16.mxu0 %v10755_v59  ;;  %v2947_v14 = vld [vmem:[%s11256_s21 + $0x3598] sm:$0xff]  ;;  %v354_v59 = vadd.s32 13440, %v11325_v4 }
 0x379   : > { %v8467_v13 = vpop.f32.mrb[36].mxu0  ;;  %10788 = vmatprep.subr.bf16.mxu1 %v10787_v61  ;;  %v10833_v61 = vpack.c.bf16 %v2929_v11, %v2928_v19  ;;  %v10835_v31 = vpack.c.bf16 %v2947_v14, %v2946_v43  ;;  %v2955_v19 = vld [vmem:[%s11256_s21 + $0x35d8] sm:$0xff]  ;;  %v2938_v14 = vld [vmem:[%s11256_s21 + $0x3550] sm:$0xff] }
 0x37a   : > { %v8468_v62 = vpop.f32.mrb[37].mxu0  ;;  %v8502_v49 = vpop.f32.mrb[36].mxu1  ;;  %vm468_vm9 = vcmp.lt.s32.totalorder %v354_v59, %v11339_v21  ;;  %v2907_v43 = vld [vmem:[%s11256_s21 + $0x3458] sm:$0xff]  ;;  %v10851_v59 = vpack.c.bf16 %v2955_v19, %v2954_v55 }
 0x37b   : > { %v8469_v5 = vadd.f32 %v8468_v62, %v8467_v13  ;;  %10758 = vmatpush3.bf16.msra.mxu0 %v10757_v3  ;;  %v8503_v51 = vpop.f32.mrb[37].mxu1  ;;  %v2931_v3 = vld [vmem:[%s11256_s21 + $0x3518] sm:$0xff]  ;;  %v989_v13 = vcombine.high %v13753_v25, %v13753_v25  ;;  %v2932_v62 = vld [vmem:[%s11256_s21 + $0x3520] sm:$0xff] }
 0x37c   : > { %v8504_v35 = vadd.f32 %v8503_v51, %v8502_v49  ;;  %10790 = vmatpush3.bf16.msra.mxu1 %v10789_v36  ;;  %10760 = vmatprep.subr.bf16.mxu0 %v10759_v24  ;;  %v2916_v36 = vld [vmem:[%s11256_s21 + $0x34a0] sm:$0xff]  ;;  %v2917_v24 = vld [vmem:[%s11256_s21 + $0x34a8] sm:$0xff]  ;;  %v10839_v49 = vpack.c.bf16 %v2949_v42, %v2948_v40  ;;  %v2951_v51 = vld [vmem:[%s11256_s21 + $0x35b8] sm:$0xff]  ;;  %v10841_v53 = vpack.c.bf16 %v2933_v9, %v2932_v62 }
 0x37d   : > { %v5611_v12 = vadd.f32 %v8469_v5, %v13640_v58  ;;  %10792 = vmatprep.subr.bf16.mxu1 %v10791_v44  ;;  %v349_v58 = vadd.s32 12800, %v11325_v4  ;;  %v10805_v44 = vpack.c.bf16 %v2899_v0, %v2898_v27  ;;  %v10807_v46 = vpack.c.bf16 %v2917_v24, %v2916_v36  ;;  %v2950_v5 = vld [vmem:[%s11256_s21 + $0x35b0] sm:$0xff]  ;;  %v2957_v27 = vld [vmem:[%s11256_s21 + $0x35e8] sm:$0xff]  ;;  %v2940_v24 = vld [vmem:[%s11256_s21 + $0x3560] sm:$0xff] }
 0x37e   : > { %v10843_v57 = vpack.c.bf16 %v2951_v51, %v2950_v5  ;;  %v10821_v0 = vpack.c.bf16 %v2907_v43, %v2906_v18  ;;  %v2909_v36 = vld [vmem:[%s11256_s21 + $0x3468] sm:$0xff]  ;;  %v2979_v55 = vld [vmem:[%s11256_s21 + $0x3698] sm:$0xff] }
 0x37f   : > { %v13736_v1 = vadd.f32 %v8504_v35, %v5611_v12  ;;  %10762 = vmatpush3.bf16.msra.mxu0 %v10761_v28  ;;  %vm463_vm7 = vcmp.lt.s32.totalorder %v349_v58, %v11339_v21  ;;  %v10809_v28 = vpack.c.bf16 %v2901_v48, %v2900_v16  ;;  %v2920_v12 = vld [vmem:[%s11256_s21 + $0x34c0] sm:$0xff]  ;;  %v2941_v42 = vld [vmem:[%s11256_s21 + $0x3568] sm:$0xff]  ;;  %v2958_v16 = vld [vmem:[%s11256_s21 + $0x35f0] sm:$0xff] }
 0x380   : > { %10794 = vmatpush3.bf16.msra.mxu1 %v10793_v7  ;;  %10764 = vmatprep.subr.bf16.mxu0 %v10763_v56  ;;  %v2902_v7 = vld [vmem:[%s11256_s21 + $0x3430] sm:$0xff]  ;;  %v2903_v56 = vld [vmem:[%s11256_s21 + $0x3438] sm:$0xff]  ;;  %v2936_v58 = vld [vmem:[%s11256_s21 + $0x3540] sm:$0xff]  ;;  %v10857_v5 = vpack.c.bf16 %v2941_v42, %v2940_v24 }
 0x381   : > { %10796 = vmatprep.subr.bf16.mxu1 %v10795_v60  ;;  %v2921_v60 = vld [vmem:[%s11256_s21 + $0x34c8] sm:$0xff]  ;;  %v10813_v34 = vpack.c.bf16 %v2903_v56, %v2902_v7  ;;  %v2959_v48 = vld [vmem:[%s11256_s21 + $0x35f8] sm:$0xff]  ;;  %v2964_v42 = vld [vmem:[%s11256_s21 + $0x3620] sm:$0xff] }
 0x382   : > { %v10815_v54 = vpack.c.bf16 %v2921_v60, %v2920_v12  ;;  %v10859_v56 = vpack.c.bf16 %v2959_v48, %v2958_v16  ;;  %v3008_v12 = vld [vmem:[%s11256_s21 + $0x3780] sm:$0xff]  ;;  %v3009_v60 = vld [vmem:[%s11256_s21 + $0x3788] sm:$0xff]  ;;  %v2982_v16 = vld [vmem:[%s11256_s21 + $0x36b0] sm:$0xff] }
 0x383   : > { %10766 = vmatpush3.bf16.msra.mxu0 %v10765_v47  ;;  %v2905_v47 = vld [vmem:[%s11256_s21 + $0x3448] sm:$0xff]  ;;  %v3014_v48 = vld [vmem:[%s11256_s21 + $0x37b0] sm:$0xff] }
 0x384   : > { %10798 = vmatpush3.bf16.msra.mxu1 %v10797_v23  ;;  %10800 = vmatprep.subr.bf16.mxu0 %v10799_v2  ;;  %v10847_v23 = vpack.c.bf16 %v2953_v63, %v2952_v37  ;;  %v2937_v2 = vld [vmem:[%s11256_s21 + $0x3548] sm:$0xff] }
 0x385   : > { %10832 = vmatprep.subr.bf16.mxu1 %v10831_v8  ;;  %v10817_v8 = vpack.c.bf16 %v2905_v47, %v2904_v45  ;;  %v10849_v11 = vpack.c.bf16 %v2937_v2, %v2936_v58  ;;  %v2960_v45 = vld [vmem:[%s11256_s21 + $0x3600] sm:$0xff]  ;;  %v2961_v47 = vld [vmem:[%s11256_s21 + $0x3608] sm:$0xff]  ;;  %v355_v58 = vadd.s32 13568, %v11325_v4  ;;  %v10895_v2 = vpack.c.bf16 %v3009_v60, %v3008_v12 }
 0x386   : > { %7160 = vmatmul.mubr.msk.f32.vlgmr.msra.gmra.mrb[50].mxu0 %vm463_vm7, %v13651_v41  ;;  %v10837_v41 = vpack.c.bf16 %v2931_v3, %v2930_v30  ;;  %v2908_v3 = vld [vmem:[%s11256_s21 + $0x3460] sm:$0xff]  ;;  %v10865_v43 = vpack.c.bf16 %v2961_v47, %v2960_v45  ;;  %v2987_v45 = vld [vmem:[%s11256_s21 + $0x36d8] sm:$0xff]  ;;  %v3018_v47 = vld [vmem:[%s11256_s21 + $0x37d0] sm:$0xff] }
 0x387   : > { %10802 = vmatpush3.bf16.msra.mxu0 %v10801_v20  ;;  %7162 = vmatmul.mubr.msk.f32.vlgmr.msra.gmra.mrb[50].mxu1 %vm465_vm8, %v13657_v29  ;;  %v2919_v29 = vld [vmem:[%s11256_s21 + $0x34b8] sm:$0xff]  ;;  %v10825_v9 = vpack.c.bf16 %v2909_v36, %v2908_v3  ;;  %vm469_vm12 = vcmp.lt.s32.totalorder %v355_v58, %v11339_v21  ;;  %v3012_v3 = vld [vmem:[%s11256_s21 + $0x37a0] sm:$0xff]  ;;  %v3013_v36 = vld [vmem:[%s11256_s21 + $0x37a8] sm:$0xff] }
 0x388   : > { %10834 = vmatpush3.bf16.msra.mxu1 %v10833_v61  ;;  %10804 = vmatprep.subr.bf16.mxu0 %v10803_v26  ;;  %v10811_v35 = vpack.c.bf16 %v2919_v29, %v2918_v38  ;;  %v2939_v20 = vld [vmem:[%s11256_s21 + $0x3558] sm:$0xff]  ;;  %v2925_v61 = vld [vmem:[%s11256_s21 + $0x34e8] sm:$0xff]  ;;  %v2956_v26 = vld [vmem:[%s11256_s21 + $0x35e0] sm:$0xff] }
 0x389   : > { %10836 = vmatprep.subr.bf16.mxu1 %v10835_v31  ;;  %7163 = vmatprep.mubr.msk.f32.mxu0 %vm468_vm9, %v988_v10  ;;  %v10853_v30 = vpack.c.bf16 %v2939_v20, %v2938_v14  ;;  %v10823_v31 = vpack.c.bf16 %v2925_v61, %v2924_v22  ;;  %v10855_v40 = vpack.c.bf16 %v2957_v27, %v2956_v26  ;;  %v502_v38 = vld [vmem:[%s11277_s28 + $0xd8] sm:$0xff]  ;;  %v360_v14 = vadd.s32 14208, %v11325_v4  ;;  %v2968_v60 = vld [vmem:[%s11256_s21 + $0x3640] sm:$0xff] }
 0x38a   : > { %7165 = vmatprep.mubr.msk.f32.mxu1 %vm470_vm10, %v989_v13  ;;  %v2926_v13 = vld [vmem:[%s11256_s21 + $0x34f0] sm:$0xff]  ;;  %v990_v37 = vcombine.high %v502_v38, %v502_v38  ;;  %v13843_v19 = vrot.slane %v502_v38, %v11333_v15  ;;  %v10867_v20 = vpack.c.bf16 %v2979_v55, %v2978_v50  ;;  %v2963_v61 = vld [vmem:[%s11256_s21 + $0x3618] sm:$0xff] }
 0x38b   : > { %10806 = vmatpush3.bf16.msra.mxu0 %v10805_v44  ;;  %v2927_v44 = vld [vmem:[%s11256_s21 + $0x34f8] sm:$0xff]  ;;  %v2962_v22 = vld [vmem:[%s11256_s21 + $0x3610] sm:$0xff]  ;;  %vm474_vm14 = vcmp.lt.s32.totalorder %v360_v14, %v11339_v21  ;;  %v2989_v14 = vld [vmem:[%s11256_s21 + $0x36e8] sm:$0xff] }
 0x38c   : > { %10838 = vmatpush3.bf16.msra.mxu1 %v10837_v41  ;;  %10808 = vmatprep.subr.bf16.mxu0 %v10807_v46  ;;  %v10827_v51 = vpack.c.bf16 %v2927_v44, %v2926_v13  ;;  %v13849_v18 = vrot.slane %v990_v37, %v11333_v15  ;;  %v2994_v15 = vld [vmem:[%s11256_s21 + $0x3710] sm:$0xff]  ;;  %v2995_v27 = vld [vmem:[%s11256_s21 + $0x3718] sm:$0xff]  ;;  %v2965_v13 = vld [vmem:[%s11256_s21 + $0x3628] sm:$0xff] }
 0x38d   : > { %10840 = vmatprep.subr.bf16.mxu1 %v10839_v49  ;;  %v2996_v44 = vld [vmem:[%s11256_s21 + $0x3720] sm:$0xff]  ;;  %v2969_v37 = vld [vmem:[%s11256_s21 + $0x3648] sm:$0xff]  ;;  %v3019_v58 = vld [vmem:[%s11256_s21 + $0x37d8] sm:$0xff] }
 0x38e   : > { %v1006_v24 = vcombine.high %v13849_v18, %v13849_v18  ;;  %v2970_v50 = vld [vmem:[%s11256_s21 + $0x3650] sm:$0xff]  ;;  %v2971_v55 = vld [vmem:[%s11256_s21 + $0x3658] sm:$0xff] }
 0x38f   : > { %10810 = vmatpush3.bf16.msra.mxu0 %v10809_v28  ;;  %v2910_v28 = vld [vmem:[%s11256_s21 + $0x3470] sm:$0xff] }
 0x390   : > { %10842 = vmatpush3.bf16.msra.mxu1 %v10841_v53  ;;  %10812 = vmatprep.subr.bf16.mxu0 %v10811_v35  ;;  %v2911_v53 = vld [vmem:[%s11256_s21 + $0x3478] sm:$0xff]  ;;  %v2942_v35 = vld [vmem:[%s11256_s21 + $0x3570] sm:$0xff] }
 0x391   : > { %10844 = vmatprep.subr.bf16.mxu1 %v10843_v57  ;;  %v2976_v57 = vld [vmem:[%s11256_s21 + $0x3680] sm:$0xff] }
 0x393   : > { %10814 = vmatpush3.bf16.msra.mxu0 %v10813_v34  ;;  %v10829_v34 = vpack.c.bf16 %v2911_v53, %v2910_v28  ;;  %v2999_v53 = vld [vmem:[%s11256_s21 + $0x3738] sm:$0xff] }
 0x394   : > { %10846 = vmatpush3.bf16.msra.mxu1 %v10845_v17  ;;  %10816 = vmatprep.subr.bf16.mxu0 %v10815_v54  ;;  %v10861_v17 = vpack.c.bf16 %v2943_v32, %v2942_v35  ;;  %v10863_v54 = vpack.c.bf16 %v2977_v39, %v2976_v57  ;;  %v2984_v35 = vld [vmem:[%s11256_s21 + $0x36c0] sm:$0xff]  ;;  %v3017_v32 = vld [vmem:[%s11256_s21 + $0x37c8] sm:$0xff] }
 0x395   : > { %10848 = vmatprep.subr.bf16.mxu1 %v10847_v23  ;;  %v2992_v23 = vld [vmem:[%s11256_s21 + $0x3700] sm:$0xff] }
 0x397   : > { %10818 = vmatpush3.bf16.msra.mxu0 %v10817_v8  ;;  %v3010_v8 = vld [vmem:[%s11256_s21 + $0x3790] sm:$0xff] }
 0x398   : > { %10850 = vmatpush3.bf16.msra.mxu1 %v10849_v11  ;;  %10820 = vmatprep.subr.bf16.mxu0 %v10819_v52  ;;  %v3011_v11 = vld [vmem:[%s11256_s21 + $0x3798] sm:$0xff]  ;;  %v358_v52 = vadd.s32 13952, %v11325_v4 }
 0x399   : > { %v8537_v10 = vpop.f32.mrb[38].mxu0  ;;  %10852 = vmatprep.subr.bf16.mxu1 %v10851_v59  ;;  %v10897_v59 = vpack.c.bf16 %v2993_v6, %v2992_v23  ;;  %v10899_v26 = vpack.c.bf16 %v3011_v11, %v3010_v8  ;;  %v10881_v23 = vpack.c.bf16 %v2969_v37, %v2968_v60  ;;  %v3002_v8 = vld [vmem:[%s11256_s21 + $0x3750] sm:$0xff]  ;;  %v10915_v11 = vpack.c.bf16 %v3019_v58, %v3018_v47 }
 0x39a   : > { %v8538_v41 = vpop.f32.mrb[39].mxu0  ;;  %v8572_v46 = vpop.f32.mrb[38].mxu1  ;;  %vm472_vm13 = vcmp.lt.s32.totalorder %v358_v52, %v11339_v21  ;;  %v3003_v52 = vld [vmem:[%s11256_s21 + $0x3758] sm:$0xff] }
 0x39b   : > { %v8539_v62 = vadd.f32 %v8538_v41, %v8537_v10  ;;  %10822 = vmatpush3.bf16.msra.mxu0 %v10821_v0  ;;  %v8573_v49 = vpop.f32.mrb[39].mxu1  ;;  %v2980_v0 = vld [vmem:[%s11256_s21 + $0x36a0] sm:$0xff]  ;;  %v10869_v10 = vpack.c.bf16 %v2963_v61, %v2962_v22  ;;  %v10903_v41 = vpack.c.bf16 %v3013_v36, %v3012_v3  ;;  %v10885_v22 = vpack.c.bf16 %v2971_v55, %v2970_v50  ;;  %v3005_v3 = vld [vmem:[%s11256_s21 + $0x3768] sm:$0xff]  ;;  %v2990_v36 = vld [vmem:[%s11256_s21 + $0x36f0] sm:$0xff] }
 0x39c   : > { %v8574_v29 = vadd.f32 %v8573_v49, %v8572_v46  ;;  %10854 = vmatpush3.bf16.msra.mxu1 %v10853_v30  ;;  %10824 = vmatprep.subr.bf16.mxu0 %v10823_v31  ;;  %v2981_v30 = vld [vmem:[%s11256_s21 + $0x36a8] sm:$0xff]  ;;  %v1005_v31 = vcombine.high %v13843_v19, %v13843_v19  ;;  %v10873_v49 = vpack.c.bf16 %v2965_v13, %v2964_v42  ;;  %v3023_v42 = vld [vmem:[%s11256_s21 + $0x37f8] sm:$0xff] }
 0x39d   : > { %v5751_v7 = vadd.f32 %v8539_v62, %v13736_v1  ;;  %10856 = vmatprep.subr.bf16.mxu1 %v10855_v40  ;;  %v353_v1 = vadd.s32 13312, %v11325_v4  ;;  %v10871_v40 = vpack.c.bf16 %v2981_v30, %v2980_v0  ;;  %v2997_v46 = vld [vmem:[%s11256_s21 + $0x3728] sm:$0xff]  ;;  %v3015_v62 = vld [vmem:[%s11256_s21 + $0x37b8] sm:$0xff]  ;;  %v10917_v61 = vpack.c.bf16 %v3003_v52, %v3002_v8  ;;  %v3004_v0 = vld [vmem:[%s11256_s21 + $0x3760] sm:$0xff] }
 0x39e   : > { %v10907_v28 = vpack.c.bf16 %v3015_v62, %v3014_v48  ;;  %v2974_v48 = vld [vmem:[%s11256_s21 + $0x3670] sm:$0xff]  ;;  %v2975_v62 = vld [vmem:[%s11256_s21 + $0x3678] sm:$0xff] }
 0x39f   : > { %v13832_v63 = vadd.f32 %v8574_v29, %v5751_v7  ;;  %10826 = vmatpush3.bf16.msra.mxu0 %v10825_v9  ;;  %vm467_vm11 = vcmp.lt.s32.totalorder %v353_v1, %v11339_v21  ;;  %v10905_v9 = vpack.c.bf16 %v2997_v46, %v2996_v44  ;;  %v2966_v29 = vld [vmem:[%s11256_s21 + $0x3630] sm:$0xff]  ;;  %v2985_v7 = vld [vmem:[%s11256_s21 + $0x36c8] sm:$0xff] }
 0x3a0   : > { %10858 = vmatpush3.bf16.msra.mxu1 %v10857_v5  ;;  %10828 = vmatprep.subr.bf16.mxu0 %v10827_v51  ;;  %v2967_v5 = vld [vmem:[%s11256_s21 + $0x3638] sm:$0xff]  ;;  %v2998_v51 = vld [vmem:[%s11256_s21 + $0x3730] sm:$0xff]  ;;  %v10879_v12 = vpack.c.bf16 %v2985_v7, %v2984_v35  ;;  %v359_v35 = vadd.s32 14080, %v11325_v4 }
 0x3a1   : > { %10860 = vmatprep.subr.bf16.mxu1 %v10859_v56  ;;  %v3016_v56 = vld [vmem:[%s11256_s21 + $0x37c0] sm:$0xff]  ;;  %v10877_v57 = vpack.c.bf16 %v2967_v5, %v2966_v29  ;;  %v10909_v39 = vpack.c.bf16 %v2999_v53, %v2998_v51  ;;  %v3007_v29 = vld [vmem:[%s11256_s21 + $0x3778] sm:$0xff]  ;;  %v10893_v51 = vpack.c.bf16 %v2975_v62, %v2974_v48 }
 0x3a2   : > { %v10911_v1 = vpack.c.bf16 %v3017_v32, %v3016_v56  ;;  %vm473_vm0 = vcmp.lt.s32.totalorder %v359_v35, %v11339_v21 }
 0x3a3   : > { %10830 = vmatpush3.bf16.msra.mxu0 %v10829_v34  ;;  %v3000_v34 = vld [vmem:[%s11256_s21 + $0x3740] sm:$0xff] }
 0x3a4   : > { %10862 = vmatpush3.bf16.msra.mxu1 %v10861_v17  ;;  %10864 = vmatprep.subr.bf16.mxu0 %v10863_v54  ;;  %v3001_v17 = vld [vmem:[%s11256_s21 + $0x3748] sm:$0xff]  ;;  %v2986_v54 = vld [vmem:[%s11256_s21 + $0x36d0] sm:$0xff] }
 0x3a5   : > { %10896 = vmatprep.subr.bf16.mxu1 %v10895_v2  ;;  %v10913_v2 = vpack.c.bf16 %v3001_v17, %v3000_v34  ;;  %v10883_v6 = vpack.c.bf16 %v2987_v45, %v2986_v54 }
 0x3a6   : > { %7164 = vmatmul.mubr.msk.f32.vlgmr.msra.gmra.mrb[52].mxu0 %vm467_vm11, %v13747_v33  ;;  %v10901_v33 = vpack.c.bf16 %v2995_v27, %v2994_v15  ;;  %v2973_v27 = vld [vmem:[%s11256_s21 + $0x3668] sm:$0xff] }
 0x3a7   : > { %10866 = vmatpush3.bf16.msra.mxu0 %v10865_v43  ;;  %7166 = vmatmul.mubr.msk.f32.vlgmr.msra.gmra.mrb[52].mxu1 %vm469_vm12, %v13753_v25  ;;  %v2983_v25 = vld [vmem:[%s11256_s21 + $0x36b8] sm:$0xff]  ;;  %v2988_v43 = vld [vmem:[%s11256_s21 + $0x36e0] sm:$0xff] }
 0x3a8   : > { %10898 = vmatpush3.bf16.msra.mxu1 %v10897_v59  ;;  %10868 = vmatprep.subr.bf16.mxu0 %v10867_v20  ;;  %v10875_v38 = vpack.c.bf16 %v2983_v25, %v2982_v16  ;;  %v3020_v59 = vld [vmem:[%s11256_s21 + $0x37e0] sm:$0xff]  ;;  %v3021_v20 = vld [vmem:[%s11256_s21 + $0x37e8] sm:$0xff]  ;;  %v10887_v15 = vpack.c.bf16 %v2989_v14, %v2988_v43  ;;  %v10921_v16 = vpack.c.bf16 %v3005_v3, %v3004_v0 }
 0x3a9   : > { %10900 = vmatprep.subr.bf16.mxu1 %v10899_v26  ;;  %7167 = vmatprep.mubr.msk.f32.mxu0 %vm472_vm13, %v1005_v31  ;;  %v2972_v26 = vld [vmem:[%s11256_s21 + $0x3660] sm:$0xff]  ;;  %v10919_v31 = vpack.c.bf16 %v3021_v20, %v3020_v59 }
 0x3aa   : > { %7169 = vmatprep.mubr.msk.f32.mxu1 %vm474_vm14, %v1006_v24  ;;  %v2991_v24 = vld [vmem:[%s11256_s21 + $0x36f8] sm:$0xff] }
 0x3ab   : > { %10870 = vmatpush3.bf16.msra.mxu0 %v10869_v10  ;;  %v10891_v25 = vpack.c.bf16 %v2991_v24, %v2990_v36 }
 0x3ac   : > { %10902 = vmatpush3.bf16.msra.mxu1 %v10901_v33  ;;  %10872 = vmatprep.subr.bf16.mxu0 %v10871_v40  ;;  %v3022_v40 = vld [vmem:[%s11256_s21 + $0x37f0] sm:$0xff] }
 0x3ad   : > { %10904 = vmatprep.subr.bf16.mxu1 %v10903_v41  ;;  %v10889_v41 = vpack.c.bf16 %v2973_v27, %v2972_v26 }
 0x3af   : > { %10874 = vmatpush3.bf16.msra.mxu0 %v10873_v49 }
 0x3b0   : > { %10906 = vmatpush3.bf16.msra.mxu1 %v10905_v9  ;;  %10876 = vmatprep.subr.bf16.mxu0 %v10875_v38  ;;  %v10923_v9 = vpack.c.bf16 %v3023_v42, %v3022_v40  ;;  %v3006_v38 = vld [vmem:[%s11256_s21 + $0x3770] sm:$0xff] }
 0x3b1   : > { %10908 = vmatprep.subr.bf16.mxu1 %v10907_v28  ;;  %v357_v28 = vadd.s32 13824, %v11325_v4  ;;  %v10925_v53 = vpack.c.bf16 %v3007_v29, %v3006_v38 }
 0x3b3   : > { %10878 = vmatpush3.bf16.msra.mxu0 %v10877_v57  ;;  %vm471_vm15 = vcmp.lt.s32.totalorder %v357_v28, %v11339_v21 }
 0x3b4   : > { %10910 = vmatpush3.bf16.msra.mxu1 %v10909_v39  ;;  %10880 = vmatprep.subr.bf16.mxu0 %v10879_v12 }
 0x3b5   : > { %10912 = vmatprep.subr.bf16.mxu1 %v10911_v1 }
 0x3b7   : > { %10882 = vmatpush3.bf16.msra.mxu0 %v10881_v23 }
 0x3b8   : > { %10914 = vmatpush3.bf16.msra.mxu1 %v10913_v2  ;;  %10884 = vmatprep.subr.bf16.mxu0 %v10883_v6 }
 0x3b9   : > { %v8607_v30 = vpop.f32.mrb[40].mxu0  ;;  %10916 = vmatprep.subr.bf16.mxu1 %v10915_v11 }
 0x3ba   : > { %v8608_v10 = vpop.f32.mrb[41].mxu0  ;;  %v8642_v33 = vpop.f32.mrb[40].mxu1 }
 0x3bb   : > { %v8609_v13 = vadd.f32 %v8608_v10, %v8607_v30  ;;  %10886 = vmatpush3.bf16.msra.mxu0 %v10885_v22  ;;  %v8643_v44 = vpop.f32.mrb[41].mxu1 }
 0x3bc   : > { %v8644_v46 = vadd.f32 %v8643_v44, %v8642_v33  ;;  %10918 = vmatpush3.bf16.msra.mxu1 %v10917_v61  ;;  %10888 = vmatprep.subr.bf16.mxu0 %v10887_v15 }
 0x3bd   : > { %v5891_v49 = vadd.f32 %v8609_v13, %v13832_v63  ;;  %10920 = vmatprep.subr.bf16.mxu1 %v10919_v31 }
 0x3bf   : > { %v5961_v5 = vadd.f32 %v8644_v46, %v5891_v49  ;;  %10890 = vmatpush3.bf16.msra.mxu0 %v10889_v41  ;;  %v1231_v49 = vld [vmem:[#allocation2] sm:$0x3] }
 0x3c0   : > { %10922 = vmatpush3.bf16.msra.mxu1 %v10921_v16  ;;  %10892 = vmatprep.subr.bf16.mxu0 %v10891_v25 }
 0x3c1   : > { %10924 = vmatprep.subr.bf16.mxu1 %v10923_v9 }
 0x3c3   : > { %10894 = vmatpush3.bf16.msra.mxu0 %v10893_v51 }
 0x3c4   : > { %10926 = vmatpush3.bf16.msra.mxu1 %v10925_v53 }
 0x3c6   : > { %7168 = vmatmul.mubr.msk.f32.vlgmr.msra.gmra.mrb[54].mxu0 %vm471_vm15, %v13843_v19 }
 0x3c7   : > { %7170 = vmatmul.mubr.msk.f32.vlgmr.msra.gmra.mrb[54].mxu1 %vm473_vm0, %v13849_v18 }
 0x3d9   : > { %v8677_v63 = vpop.f32.mrb[42].mxu0 }
 0x3da   : > { %v8678_v7 = vpop.f32.mrb[43].mxu0  ;;  %v8712_v56 = vpop.f32.mrb[42].mxu1 }
 0x3db   : > { %v8679_v32 = vadd.f32 %v8678_v7, %v8677_v63  ;;  %v8713_v57 = vpop.f32.mrb[43].mxu1 }
 0x3dc   : > { %v8714_v39 = vadd.f32 %v8713_v57, %v8712_v56 }
 0x3dd   : > { %v6031_v12 = vadd.f32 %v8679_v32, %v5961_v5 }
 0x3df   : > { %v6101_v60 = vadd.f32 %v8714_v39, %v6031_v12 }
 0x3f9   : > { %v8747_v4 = vpop.f32.mrb[44].mxu0 }
 0x3fa   : > { %v8748_v37 = vpop.f32.mrb[45].mxu0  ;;  %v8782_v34 = vpop.f32.mrb[44].mxu1 }
 0x3fb   : > { %v8749_v1 = vadd.f32 %v8748_v37, %v8747_v4  ;;  %v8783_v17 = vpop.f32.mrb[45].mxu1 }
 0x3fc   : > { %v8784_v54 = vadd.f32 %v8783_v17, %v8782_v34 }
 0x3fd   : > { %v6171_v45 = vadd.f32 %v8749_v1, %v6101_v60 }
 0x3ff   : > { %v6241_v21 = vadd.f32 %v8784_v54, %v6171_v45 }
 0x419   : > { %v8817_v47 = vpop.f32.mrb[46].mxu0 }
 0x41a   : > { %v8818_v19 = vpop.f32.mrb[47].mxu0  ;;  %v8852_v58 = vpop.f32.mrb[46].mxu1 }
 0x41b   : > { %v8819_v18 = vadd.f32 %v8818_v19, %v8817_v47  ;;  %v8853_v23 = vpop.f32.mrb[47].mxu1 }
 0x41c   : > { %v8854_v2 = vadd.f32 %v8853_v23, %v8852_v58 }
 0x41d   : > { %v6311_v6 = vadd.f32 %v8819_v18, %v6241_v21 }
 0x41f   : > { %v6381_v50 = vadd.f32 %v8854_v2, %v6311_v6 }
 0x439   : > { %v8887_v55 = vpop.f32.mrb[48].mxu0 }
 0x43a   : > { %v8888_v8 = vpop.f32.mrb[49].mxu0  ;;  %v8922_v11 = vpop.f32.mrb[48].mxu1 }
 0x43b   : > { %v8889_v52 = vadd.f32 %v8888_v8, %v8887_v55  ;;  %v8923_v43 = vpop.f32.mrb[49].mxu1 }
 0x43c   : > { %v8924_v14 = vadd.f32 %v8923_v43, %v8922_v11 }
 0x43d   : > { %v6451_v59 = vadd.f32 %v8889_v52, %v6381_v50 }
 0x43f   : > { %v6521_v20 = vadd.f32 %v8924_v14, %v6451_v59 }
 0x459   : > { %v8957_v22 = vpop.f32.mrb[50].mxu0 }
 0x45a   : > { %v8958_v61 = vpop.f32.mrb[51].mxu0  ;;  %v8992_v15 = vpop.f32.mrb[50].mxu1 }
 0x45b   : > { %v8959_v26 = vadd.f32 %v8958_v61, %v8957_v22  ;;  %v8993_v27 = vpop.f32.mrb[51].mxu1 }
 0x45c   : > { %v8994_v0 = vadd.f32 %v8993_v27, %v8992_v15 }
 0x45d   : > { %v6591_v30 = vadd.f32 %v8959_v26, %v6521_v20 }
 0x45f   : > { %v6661_v31 = vadd.f32 %v8994_v0, %v6591_v30 }
 0x479   : > { %v9027_v3 = vpop.f32.mrb[52].mxu0 }
 0x47a   : > { %v9028_v36 = vpop.f32.mrb[53].mxu0  ;;  %v9062_v24 = vpop.f32.mrb[52].mxu1 }
 0x47b   : > { %v9029_v10 = vadd.f32 %v9028_v36, %v9027_v3  ;;  %v9063_v33 = vpop.f32.mrb[53].mxu1 }
 0x47c   : > { %v9064_v40 = vadd.f32 %v9063_v33, %v9062_v24 }
 0x47d   : > { %v6731_v42 = vadd.f32 %v9029_v10, %v6661_v31 }
 0x47f   : > { %v6801_v13 = vadd.f32 %v9064_v40, %v6731_v42 }
 0x499   : > { %v9097_v44 = vpop.f32.mrb[54].mxu0 }
 0x49a   : > { %v9098_v41 = vpop.f32.mrb[55].mxu0  ;;  %v9132_v46 = vpop.f32.mrb[54].mxu1 }
 0x49b   : > { %v9099_v16 = vadd.f32 %v9098_v41, %v9097_v44  ;;  %v9133_v25 = vpop.f32.mrb[55].mxu1 }
 0x49c   : > { %v9134_v48 = vadd.f32 %v9133_v25, %v9132_v46 }
 0x49d   : > { %v6871_v62 = vadd.f32 %v9099_v16, %v6801_v13  ;;  %6950 = sbr.rel (%p7171_p6) target bundleno = 1196 (0x4ac), region = 40 }
 0x49f   : > { %v6941_v9 = vadd.f32 %v9134_v48, %v6871_v62 }
 0x4a1   : > { %v6944_v38 = vadd.f32 %v6941_v9, %v1231_v49 }
 0x4a3   : > { %6946 = vst.msk [vmem:[#allocation2] sm:$0x3] %vm6945_vm1, %v6944_v38 }
 0x4aa   : > { %v6951_v29 = vld [vmem:[#allocation2] sm:$0x3] }
 0x4ab   : > { %6952 = vst.msk [vmem:[%s11272_s25] sm:$0x3] %vm6945_vm1, %v6951_v29 }
 0x4ac PF: > { %s15_s16 = sadd.s32 1, %s11128_s16   ;;  %s13960_s9 = smov %s11104_s10 }
 0x4ad   : > { %p12_p8 = scmp.ge.s32.totalorder %s15_s16, 10   ;;  %s13961_s10 = smov %s11108_s11 }
 0x4ae   : > { %s13962_s11 = smov %s11216_s30  ;;  %s13963_s12 = smov %s11120_s14 }
 0x4af   : > { %s13964_s13 = smov %s11124_s15  ;;  %s13965_s14 = smov %s13968_s18 }
 0x4b0   : > { %s13966_s15 = smov %s13972_s19  ;;  %14 = sbr.rel (!%p12_p8) target bundleno = 5 (0x5), region = 79 }
 0x4b7   :  { %6972 = vsyncpa [#allocation4], 1 }
 0x4b8   :  { %6974 = vsyncpa [#allocation4 + $0x1], 1 }

</bundles_post_ra>
